<compile_context>
chip_gen: v7x
topology: tpu7x:2x2x1
jax: 0.10.0
libtpu: 0.0.40
codegen_flags: <defaults>
</compile_context>

<pallas_src>
import functools

import jax
import jax.numpy as jnp
from jax.experimental import pallas as pl
from jax.experimental.pallas import tpu as pltpu

C_HID = 3  # all three towers output 3 channels (from the module's __init__)


def _offset_masks(idx, limit, p):
    """For each offset d in [-p, p]: boolean mask (same shape as idx) that is True
    where idx + d stays inside [0, limit). d == 0 maps to None (all valid)."""
    masks = {}
    for d in range(-p, p + 1):
        if d == 0:
            masks[d] = None
        elif d > 0:
            masks[d] = idx < (limit - d)
        else:
            masks[d] = idx >= (-d)
    return masks


def _conv_relu_rolled(chans, w_ref, b_ref, K, p, row, col, H, W):
    """K x K conv (C -> C, zero padding p, stride 1) + ReLU on lane-flattened
    (Nb, H*W) channel slabs.

    Each tap is a lane rotation (pltpu.roll -> XLU) of the source slab, zeroed at
    the image border with a precomputed mask; accumulation is ci-major so only the
    3 per-ci partial chains plus the 3 running accumulators are live at a time."""
    C = len(chans)
    HW = H * W

    # Per-offset boundary masks, hoisted out of the tap loops.
    row_ok = _offset_masks(row, H, p)
    col_ok = _offset_masks(col, W, p)

    acc = [None] * C
    for ci in range(C):
        src = chans[ci]
        part = [None] * C  # per-ci partials, folded into acc before the next ci
        for dy in range(K):
            oy = dy - p
            for dx in range(K):
                ox = dx - p
                off = oy * W + ox
                # tap[i] = src[i + off]  (with wraparound) ...
                tap = src if off == 0 else pltpu.roll(src, shift=(-off) % HW, axis=1)
                # ... zeroed where (row + oy, col + ox) falls outside the image.
                m, cm = row_ok[oy], col_ok[ox]
                mask = cm if m is None else (m if cm is None else (m & cm))
                if mask is not None:
                    tap = jnp.where(mask, tap, 0.0)
                for co in range(C):
                    wv = w_ref[((co * C + ci) * K + dy) * K + dx]  # OIHW flat (SMEM)
                    contrib = wv * tap
                    part[co] = contrib if part[co] is None else part[co] + contrib
        for co in range(C):
            acc[co] = part[co] if acc[co] is None else acc[co] + part[co]

    return [jnp.maximum(acc[co] + b_ref[co], 0.0) for co in range(C)]


def naive_resnet_kernel(x_ref, row_ref, col_ref,
                        w1_ref, b1_ref, w2_ref, b2_ref, w3_ref, b3_ref,
                        out_ref, *, H, W):
    Nb, Cin, HW = x_ref.shape
    C = C_HID

    # Row / column coordinates of every flattened pixel, broadcast once to the full
    # (Nb, HW) slab shape so the per-tap mask ANDs need no per-op broadcasts.
    row = jnp.broadcast_to(row_ref[...], (Nb, HW))
    col = jnp.broadcast_to(col_ref[...], (Nb, HW))

    # ---- tower_one: 1x1 conv (Cin -> 3) + ReLU ------------------------------
    x_ch = [x_ref[:, ci, :] for ci in range(Cin)]            # each (Nb, HW), lane dense
    s1 = []
    for co in range(C):
        acc = None
        for ci in range(Cin):
            contrib = w1_ref[co * Cin + ci] * x_ch[ci]
            acc = contrib if acc is None else acc + contrib
        s1.append(jnp.maximum(acc + b1_ref[co], 0.0))

    # ---- tower_two: 3x3 conv, padding=1, ReLU -------------------------------
    s2 = _conv_relu_rolled(s1, w2_ref, b2_ref, K=3, p=1, row=row, col=col, H=H, W=W)

    # ---- tower_three: 5x5 conv, padding=2, ReLU -----------------------------
    s3 = _conv_relu_rolled(s2, w3_ref, b3_ref, K=5, p=2, row=row, col=col, H=H, W=W)

    # ---- residual add; full 256-lane stores per channel row ------------------
    for co in range(C):
        out_ref[:, co, :] = x_ref[:, co, :] + s3[co]


def _pick_batch_block(n):
    """Batch elements per grid step: big enough to amortize the ~0.35us per-step
    overhead, capped at 8 (vreg sublane depth / pressure), while keeping >= 2 grid
    steps whenever possible so both v7x TensorCores get work."""
    for nb in (8, 4, 2):
        if n % nb == 0 and n // nb >= 2:
            return nb
    return 1


def naive_resnet(x, w1, b1, w2, b2, w3, b3):
    N, Cin, H, W = x.shape
    C = C_HID
    assert Cin == C, "x.add(stream) requires C_in == 3 for a non-broadcast residual"
    HW = H * W  # 256 here -> two full 128-lane vregs per channel slab

    nb = _pick_batch_block(N)

    # Lane-dense repacking: fold H*W into the last (lane) axis. Free for contiguous NCHW.
    x_flat = x.reshape(N, Cin, HW)
    # Per-pixel row / column coordinates, computed once in the wrapper (keeps integer
    # div/rem out of the kernel).
    flat = jnp.arange(HW, dtype=jnp.int32)
    row_idx = (flat // W).reshape(1, HW)
    col_idx = (flat % W).reshape(1, HW)

    out_flat = pl.pallas_call(
        functools.partial(naive_resnet_kernel, H=H, W=W),
        out_shape=jax.ShapeDtypeStruct((N, C, HW), jnp.float32),
        grid=(N // nb,),
        in_specs=[
            pl.BlockSpec((nb, Cin, HW), lambda n: (n, 0, 0)),     # x, lane-dense block
            pl.BlockSpec((1, HW), lambda n: (0, 0)),              # row coordinates
            pl.BlockSpec((1, HW), lambda n: (0, 0)),              # col coordinates
            pl.BlockSpec(memory_space=pltpu.MemorySpace.SMEM),    # w1 flat (OIHW)
            pl.BlockSpec(memory_space=pltpu.MemorySpace.SMEM),    # b1
            pl.BlockSpec(memory_space=pltpu.MemorySpace.SMEM),    # w2 flat
            pl.BlockSpec(memory_space=pltpu.MemorySpace.SMEM),    # b2
            pl.BlockSpec(memory_space=pltpu.MemorySpace.SMEM),    # w3 flat
            pl.BlockSpec(memory_space=pltpu.MemorySpace.SMEM),    # b3
        ],
        out_specs=pl.BlockSpec((nb, C, HW), lambda n: (n, 0, 0)),
        compiler_params=pltpu.CompilerParams(
            dimension_semantics=("parallel",),       # shard the batch grid across TCs
            vmem_limit_bytes=16 * 1024 * 1024,       # ~100 KiB actually used; safe on v7x
        ),
    )(x_flat, row_idx, col_idx,
      w1.reshape(-1), b1, w2.reshape(-1), b2, w3.reshape(-1), b3)

    return out_flat.reshape(N, C, H, W)


def _reference(x, w1, b1, w2, b2, w3, b3):
    """Pure-JAX reference of NaiveResnet.forward (NCHW, OIHW weights)."""
    dn = ("NCHW", "OIHW", "NCHW")
    s = jax.lax.conv_general_dilated(x, w1, (1, 1), "VALID", dimension_numbers=dn)
    s = jnp.maximum(s + b1[None, :, None, None], 0.0)
    s = jax.lax.conv_general_dilated(s, w2, (1, 1), ((1, 1), (1, 1)), dimension_numbers=dn)
    s = jnp.maximum(s + b2[None, :, None, None], 0.0)
    s = jax.lax.conv_general_dilated(s, w3, (1, 1), ((2, 2), (2, 2)), dimension_numbers=dn)
    s = jnp.maximum(s + b3[None, :, None, None], 0.0)
    return x + s


if __name__ == "__main__":
    # Small shapes consistent with the module; C_in = 3 so the residual add is exact.
    N, C_in, H, W = 2, 3, 16, 16

    key = jax.random.PRNGKey(0)
    kx, k1, k2, k3, kb1, kb2, kb3 = jax.random.split(key, 7)

    x = jax.random.normal(kx, (N, C_in, H, W), dtype=jnp.float32)
    # PyTorch shapes: OIHW conv weights + per-channel bias.
    w1 = jax.random.normal(k1, (3, C_in, 1, 1), dtype=jnp.float32) * 0.2
    b1 = jax.random.normal(kb1, (3,), dtype=jnp.float32) * 0.1
    w2 = jax.random.normal(k2, (3, 3, 3, 3), dtype=jnp.float32) * 0.2
    b2 = jax.random.normal(kb2, (3,), dtype=jnp.float32) * 0.1
    w3 = jax.random.normal(k3, (3, 3, 5, 5), dtype=jnp.float32) * 0.2
    b3 = jax.random.normal(kb3, (3,), dtype=jnp.float32) * 0.1

    out = naive_resnet(x, w1, b1, w2, b2, w3, b3)
    out = jax.block_until_ready(out)

    ref = _reference(x, w1, b1, w2, b2, w3, b3)
    assert out.shape == (N, 3, H, W)
    assert jnp.allclose(out, ref, atol=1e-4, rtol=1e-4), "mismatch vs reference conv"

    print("KERNEL_OK")
</pallas_src>

<mosaic_0001>
module attributes {stable_mosaic.version = 11 : i64} {
  func.func @naive_resnet_kernel(%arg0: i32, %arg1: memref<1x3x256xf32, #tpu.memory_space<vmem>>, %arg2: memref<1x256xi32, #tpu.memory_space<vmem>>, %arg3: memref<1x256xi32, #tpu.memory_space<vmem>>, %arg4: memref<9xf32, #tpu.memory_space<smem>>, %arg5: memref<3xf32, #tpu.memory_space<smem>>, %arg6: memref<81xf32, #tpu.memory_space<smem>>, %arg7: memref<3xf32, #tpu.memory_space<smem>>, %arg8: memref<225xf32, #tpu.memory_space<smem>>, %arg9: memref<3xf32, #tpu.memory_space<smem>>, %arg10: memref<1x3x256xf32, #tpu.memory_space<vmem>>) attributes {dimension_semantics = [#tpu.dimension_semantics<parallel>], iteration_bounds = array<i64: 2>, scalar_prefetch = 0 : i64, scratch_operands = 0 : i64, tpu.core_type = #tpu.core_type<tc>, window_params = [{transform_indices = @transform_0, window_bounds = array<i64: 1, 3, 256>}, {pipeline_mode = #tpu.pipeline_mode<synchronous>, transform_indices = @transform_1, window_bounds = array<i64: 1, 256>}, {pipeline_mode = #tpu.pipeline_mode<synchronous>, transform_indices = @transform_2, window_bounds = array<i64: 1, 256>}, {transform_indices = @transform_3, window_bounds = array<i64: 9>}, {transform_indices = @transform_4, window_bounds = array<i64: 3>}, {transform_indices = @transform_5, window_bounds = array<i64: 81>}, {transform_indices = @transform_6, window_bounds = array<i64: 3>}, {transform_indices = @transform_7, window_bounds = array<i64: 225>}, {transform_indices = @transform_8, window_bounds = array<i64: 3>}, {transform_indices = @transform_9, window_bounds = array<i64: 1, 3, 256>}]} {
    %c0 = arith.constant 0 : index
    %c0_0 = arith.constant 0 : index
    %0 = vector.load %arg2[%c0, %c0_0] : memref<1x256xi32, #tpu.memory_space<vmem>>, vector<1x256xi32>
    %c0_1 = arith.constant 0 : index
    %c0_2 = arith.constant 0 : index
    %1 = vector.load %arg3[%c0_1, %c0_2] : memref<1x256xi32, #tpu.memory_space<vmem>>, vector<1x256xi32>
    %c0_3 = arith.constant 0 : index
    %c0_4 = arith.constant 0 : index
    %c0_5 = arith.constant 0 : index
    %2 = vector.load %arg1[%c0_3, %c0_4, %c0_5] : memref<1x3x256xf32, #tpu.memory_space<vmem>>, vector<1x1x256xf32>
    %3 = vector.shape_cast %2 : vector<1x1x256xf32> to vector<1x256xf32>
    %c0_6 = arith.constant 0 : index
    %c1 = arith.constant 1 : index
    %c0_7 = arith.constant 0 : index
    %4 = vector.load %arg1[%c0_6, %c1, %c0_7] : memref<1x3x256xf32, #tpu.memory_space<vmem>>, vector<1x1x256xf32>
    %5 = vector.shape_cast %4 : vector<1x1x256xf32> to vector<1x256xf32>
    %c0_8 = arith.constant 0 : index
    %c2 = arith.constant 2 : index
    %c0_9 = arith.constant 0 : index
    %6 = vector.load %arg1[%c0_8, %c2, %c0_9] : memref<1x3x256xf32, #tpu.memory_space<vmem>>, vector<1x1x256xf32>
    %7 = vector.shape_cast %6 : vector<1x1x256xf32> to vector<1x256xf32>
    %c0_10 = arith.constant 0 : index
    %8 = memref.load %arg4[%c0_10] : memref<9xf32, #tpu.memory_space<smem>>
    %9 = vector.broadcast %8 : f32 to vector<1x256xf32>
    %10 = arith.mulf %9, %3 : vector<1x256xf32>
    %c1_11 = arith.constant 1 : index
    %11 = memref.load %arg4[%c1_11] : memref<9xf32, #tpu.memory_space<smem>>
    %12 = vector.broadcast %11 : f32 to vector<1x256xf32>
    %13 = arith.mulf %12, %5 : vector<1x256xf32>
    %14 = arith.addf %10, %13 : vector<1x256xf32>
    %c2_12 = arith.constant 2 : index
    %15 = memref.load %arg4[%c2_12] : memref<9xf32, #tpu.memory_space<smem>>
    %16 = vector.broadcast %15 : f32 to vector<1x256xf32>
    %17 = arith.mulf %16, %7 : vector<1x256xf32>
    %18 = arith.addf %14, %17 : vector<1x256xf32>
    %c0_13 = arith.constant 0 : index
    %19 = memref.load %arg5[%c0_13] : memref<3xf32, #tpu.memory_space<smem>>
    %20 = vector.broadcast %19 : f32 to vector<1x256xf32>
    %21 = arith.addf %18, %20 : vector<1x256xf32>
    %cst = arith.constant 0.000000e+00 : f32
    %22 = vector.broadcast %cst : f32 to vector<1x256xf32>
    %23 = arith.maximumf %21, %22 : vector<1x256xf32>
    %c3 = arith.constant 3 : index
    %24 = memref.load %arg4[%c3] : memref<9xf32, #tpu.memory_space<smem>>
    %25 = vector.broadcast %24 : f32 to vector<1x256xf32>
    %26 = arith.mulf %25, %3 : vector<1x256xf32>
    %c4 = arith.constant 4 : index
    %27 = memref.load %arg4[%c4] : memref<9xf32, #tpu.memory_space<smem>>
    %28 = vector.broadcast %27 : f32 to vector<1x256xf32>
    %29 = arith.mulf %28, %5 : vector<1x256xf32>
    %30 = arith.addf %26, %29 : vector<1x256xf32>
    %c5 = arith.constant 5 : index
    %31 = memref.load %arg4[%c5] : memref<9xf32, #tpu.memory_space<smem>>
    %32 = vector.broadcast %31 : f32 to vector<1x256xf32>
    %33 = arith.mulf %32, %7 : vector<1x256xf32>
    %34 = arith.addf %30, %33 : vector<1x256xf32>
    %c1_14 = arith.constant 1 : index
    %35 = memref.load %arg5[%c1_14] : memref<3xf32, #tpu.memory_space<smem>>
    %36 = vector.broadcast %35 : f32 to vector<1x256xf32>
    %37 = arith.addf %34, %36 : vector<1x256xf32>
    %cst_15 = arith.constant 0.000000e+00 : f32
    %38 = vector.broadcast %cst_15 : f32 to vector<1x256xf32>
    %39 = arith.maximumf %37, %38 : vector<1x256xf32>
    %c6 = arith.constant 6 : index
    %40 = memref.load %arg4[%c6] : memref<9xf32, #tpu.memory_space<smem>>
    %41 = vector.broadcast %40 : f32 to vector<1x256xf32>
    %42 = arith.mulf %41, %3 : vector<1x256xf32>
    %c7 = arith.constant 7 : index
    %43 = memref.load %arg4[%c7] : memref<9xf32, #tpu.memory_space<smem>>
    %44 = vector.broadcast %43 : f32 to vector<1x256xf32>
    %45 = arith.mulf %44, %5 : vector<1x256xf32>
    %46 = arith.addf %42, %45 : vector<1x256xf32>
    %c8 = arith.constant 8 : index
    %47 = memref.load %arg4[%c8] : memref<9xf32, #tpu.memory_space<smem>>
    %48 = vector.broadcast %47 : f32 to vector<1x256xf32>
    %49 = arith.mulf %48, %7 : vector<1x256xf32>
    %50 = arith.addf %46, %49 : vector<1x256xf32>
    %c2_16 = arith.constant 2 : index
    %51 = memref.load %arg5[%c2_16] : memref<3xf32, #tpu.memory_space<smem>>
    %52 = vector.broadcast %51 : f32 to vector<1x256xf32>
    %53 = arith.addf %50, %52 : vector<1x256xf32>
    %cst_17 = arith.constant 0.000000e+00 : f32
    %54 = vector.broadcast %cst_17 : f32 to vector<1x256xf32>
    %55 = arith.maximumf %53, %54 : vector<1x256xf32>
    %c1_i32 = arith.constant 1 : i32
    %56 = vector.broadcast %c1_i32 : i32 to vector<1x256xi32>
    %57 = arith.cmpi sge, %0, %56 : vector<1x256xi32>
    %c15_i32 = arith.constant 15 : i32
    %58 = vector.broadcast %c15_i32 : i32 to vector<1x256xi32>
    %59 = arith.cmpi slt, %0, %58 : vector<1x256xi32>
    %c1_i32_18 = arith.constant 1 : i32
    %60 = vector.broadcast %c1_i32_18 : i32 to vector<1x256xi32>
    %61 = arith.cmpi sge, %1, %60 : vector<1x256xi32>
    %c15_i32_19 = arith.constant 15 : i32
    %62 = vector.broadcast %c15_i32_19 : i32 to vector<1x256xi32>
    %63 = arith.cmpi slt, %1, %62 : vector<1x256xi32>
    %c17_i32 = arith.constant 17 : i32
    %64 = tpu.dynamic_rotate %23 by %c17_i32 dim 1 : vector<1x256xf32>, i32 -> vector<1x256xf32>
    %65 = arith.andi %57, %61 : vector<1x256xi1>
    %cst_20 = arith.constant 0.000000e+00 : f32
    %66 = vector.broadcast %cst_20 : f32 to vector<1x256xf32>
    %67 = arith.select %65, %64, %66 : vector<1x256xi1>, vector<1x256xf32>
    %c0_21 = arith.constant 0 : index
    %68 = memref.load %arg6[%c0_21] : memref<81xf32, #tpu.memory_space<smem>>
    %69 = vector.broadcast %68 : f32 to vector<1x256xf32>
    %70 = arith.mulf %69, %67 : vector<1x256xf32>
    %c27 = arith.constant 27 : index
    %71 = memref.load %arg6[%c27] : memref<81xf32, #tpu.memory_space<smem>>
    %72 = vector.broadcast %71 : f32 to vector<1x256xf32>
    %73 = arith.mulf %72, %67 : vector<1x256xf32>
    %c54 = arith.constant 54 : index
    %74 = memref.load %arg6[%c54] : memref<81xf32, #tpu.memory_space<smem>>
    %75 = vector.broadcast %74 : f32 to vector<1x256xf32>
    %76 = arith.mulf %75, %67 : vector<1x256xf32>
    %c16_i32 = arith.constant 16 : i32
    %77 = tpu.dynamic_rotate %23 by %c16_i32 dim 1 : vector<1x256xf32>, i32 -> vector<1x256xf32>
    %cst_22 = arith.constant 0.000000e+00 : f32
    %78 = vector.broadcast %cst_22 : f32 to vector<1x256xf32>
    %79 = arith.select %57, %77, %78 : vector<1x256xi1>, vector<1x256xf32>
    %c1_23 = arith.constant 1 : index
    %80 = memref.load %arg6[%c1_23] : memref<81xf32, #tpu.memory_space<smem>>
    %81 = vector.broadcast %80 : f32 to vector<1x256xf32>
    %82 = arith.mulf %81, %79 : vector<1x256xf32>
    %83 = arith.addf %70, %82 : vector<1x256xf32>
    %c28 = arith.constant 28 : index
    %84 = memref.load %arg6[%c28] : memref<81xf32, #tpu.memory_space<smem>>
    %85 = vector.broadcast %84 : f32 to vector<1x256xf32>
    %86 = arith.mulf %85, %79 : vector<1x256xf32>
    %87 = arith.addf %73, %86 : vector<1x256xf32>
    %c55 = arith.constant 55 : index
    %88 = memref.load %arg6[%c55] : memref<81xf32, #tpu.memory_space<smem>>
    %89 = vector.broadcast %88 : f32 to vector<1x256xf32>
    %90 = arith.mulf %89, %79 : vector<1x256xf32>
    %91 = arith.addf %76, %90 : vector<1x256xf32>
    %c15_i32_24 = arith.constant 15 : i32
    %92 = tpu.dynamic_rotate %23 by %c15_i32_24 dim 1 : vector<1x256xf32>, i32 -> vector<1x256xf32>
    %93 = arith.andi %57, %63 : vector<1x256xi1>
    %cst_25 = arith.constant 0.000000e+00 : f32
    %94 = vector.broadcast %cst_25 : f32 to vector<1x256xf32>
    %95 = arith.select %93, %92, %94 : vector<1x256xi1>, vector<1x256xf32>
    %c2_26 = arith.constant 2 : index
    %96 = memref.load %arg6[%c2_26] : memref<81xf32, #tpu.memory_space<smem>>
    %97 = vector.broadcast %96 : f32 to vector<1x256xf32>
    %98 = arith.mulf %97, %95 : vector<1x256xf32>
    %99 = arith.addf %83, %98 : vector<1x256xf32>
    %c29 = arith.constant 29 : index
    %100 = memref.load %arg6[%c29] : memref<81xf32, #tpu.memory_space<smem>>
    %101 = vector.broadcast %100 : f32 to vector<1x256xf32>
    %102 = arith.mulf %101, %95 : vector<1x256xf32>
    %103 = arith.addf %87, %102 : vector<1x256xf32>
    %c56 = arith.constant 56 : index
    %104 = memref.load %arg6[%c56] : memref<81xf32, #tpu.memory_space<smem>>
    %105 = vector.broadcast %104 : f32 to vector<1x256xf32>
    %106 = arith.mulf %105, %95 : vector<1x256xf32>
    %107 = arith.addf %91, %106 : vector<1x256xf32>
    %c1_i32_27 = arith.constant 1 : i32
    %108 = tpu.dynamic_rotate %23 by %c1_i32_27 dim 1 : vector<1x256xf32>, i32 -> vector<1x256xf32>
    %cst_28 = arith.constant 0.000000e+00 : f32
    %109 = vector.broadcast %cst_28 : f32 to vector<1x256xf32>
    %110 = arith.select %61, %108, %109 : vector<1x256xi1>, vector<1x256xf32>
    %c3_29 = arith.constant 3 : index
    %111 = memref.load %arg6[%c3_29] : memref<81xf32, #tpu.memory_space<smem>>
    %112 = vector.broadcast %111 : f32 to vector<1x256xf32>
    %113 = arith.mulf %112, %110 : vector<1x256xf32>
    %114 = arith.addf %99, %113 : vector<1x256xf32>
    %c30 = arith.constant 30 : index
    %115 = memref.load %arg6[%c30] : memref<81xf32, #tpu.memory_space<smem>>
    %116 = vector.broadcast %115 : f32 to vector<1x256xf32>
    %117 = arith.mulf %116, %110 : vector<1x256xf32>
    %118 = arith.addf %103, %117 : vector<1x256xf32>
    %c57 = arith.constant 57 : index
    %119 = memref.load %arg6[%c57] : memref<81xf32, #tpu.memory_space<smem>>
    %120 = vector.broadcast %119 : f32 to vector<1x256xf32>
    %121 = arith.mulf %120, %110 : vector<1x256xf32>
    %122 = arith.addf %107, %121 : vector<1x256xf32>
    %c4_30 = arith.constant 4 : index
    %123 = memref.load %arg6[%c4_30] : memref<81xf32, #tpu.memory_space<smem>>
    %124 = vector.broadcast %123 : f32 to vector<1x256xf32>
    %125 = arith.mulf %124, %23 : vector<1x256xf32>
    %126 = arith.addf %114, %125 : vector<1x256xf32>
    %c31 = arith.constant 31 : index
    %127 = memref.load %arg6[%c31] : memref<81xf32, #tpu.memory_space<smem>>
    %128 = vector.broadcast %127 : f32 to vector<1x256xf32>
    %129 = arith.mulf %128, %23 : vector<1x256xf32>
    %130 = arith.addf %118, %129 : vector<1x256xf32>
    %c58 = arith.constant 58 : index
    %131 = memref.load %arg6[%c58] : memref<81xf32, #tpu.memory_space<smem>>
    %132 = vector.broadcast %131 : f32 to vector<1x256xf32>
    %133 = arith.mulf %132, %23 : vector<1x256xf32>
    %134 = arith.addf %122, %133 : vector<1x256xf32>
    %c255_i32 = arith.constant 255 : i32
    %135 = tpu.dynamic_rotate %23 by %c255_i32 dim 1 : vector<1x256xf32>, i32 -> vector<1x256xf32>
    %cst_31 = arith.constant 0.000000e+00 : f32
    %136 = vector.broadcast %cst_31 : f32 to vector<1x256xf32>
    %137 = arith.select %63, %135, %136 : vector<1x256xi1>, vector<1x256xf32>
    %c5_32 = arith.constant 5 : index
    %138 = memref.load %arg6[%c5_32] : memref<81xf32, #tpu.memory_space<smem>>
    %139 = vector.broadcast %138 : f32 to vector<1x256xf32>
    %140 = arith.mulf %139, %137 : vector<1x256xf32>
    %141 = arith.addf %126, %140 : vector<1x256xf32>
    %c32 = arith.constant 32 : index
    %142 = memref.load %arg6[%c32] : memref<81xf32, #tpu.memory_space<smem>>
    %143 = vector.broadcast %142 : f32 to vector<1x256xf32>
    %144 = arith.mulf %143, %137 : vector<1x256xf32>
    %145 = arith.addf %130, %144 : vector<1x256xf32>
    %c59 = arith.constant 59 : index
    %146 = memref.load %arg6[%c59] : memref<81xf32, #tpu.memory_space<smem>>
    %147 = vector.broadcast %146 : f32 to vector<1x256xf32>
    %148 = arith.mulf %147, %137 : vector<1x256xf32>
    %149 = arith.addf %134, %148 : vector<1x256xf32>
    %c241_i32 = arith.constant 241 : i32
    %150 = tpu.dynamic_rotate %23 by %c241_i32 dim 1 : vector<1x256xf32>, i32 -> vector<1x256xf32>
    %151 = arith.andi %59, %61 : vector<1x256xi1>
    %cst_33 = arith.constant 0.000000e+00 : f32
    %152 = vector.broadcast %cst_33 : f32 to vector<1x256xf32>
    %153 = arith.select %151, %150, %152 : vector<1x256xi1>, vector<1x256xf32>
    %c6_34 = arith.constant 6 : index
    %154 = memref.load %arg6[%c6_34] : memref<81xf32, #tpu.memory_space<smem>>
    %155 = vector.broadcast %154 : f32 to vector<1x256xf32>
    %156 = arith.mulf %155, %153 : vector<1x256xf32>
    %157 = arith.addf %141, %156 : vector<1x256xf32>
    %c33 = arith.constant 33 : index
    %158 = memref.load %arg6[%c33] : memref<81xf32, #tpu.memory_space<smem>>
    %159 = vector.broadcast %158 : f32 to vector<1x256xf32>
    %160 = arith.mulf %159, %153 : vector<1x256xf32>
    %161 = arith.addf %145, %160 : vector<1x256xf32>
    %c60 = arith.constant 60 : index
    %162 = memref.load %arg6[%c60] : memref<81xf32, #tpu.memory_space<smem>>
    %163 = vector.broadcast %162 : f32 to vector<1x256xf32>
    %164 = arith.mulf %163, %153 : vector<1x256xf32>
    %165 = arith.addf %149, %164 : vector<1x256xf32>
    %c240_i32 = arith.constant 240 : i32
    %166 = tpu.dynamic_rotate %23 by %c240_i32 dim 1 : vector<1x256xf32>, i32 -> vector<1x256xf32>
    %cst_35 = arith.constant 0.000000e+00 : f32
    %167 = vector.broadcast %cst_35 : f32 to vector<1x256xf32>
    %168 = arith.select %59, %166, %167 : vector<1x256xi1>, vector<1x256xf32>
    %c7_36 = arith.constant 7 : index
    %169 = memref.load %arg6[%c7_36] : memref<81xf32, #tpu.memory_space<smem>>
    %170 = vector.broadcast %169 : f32 to vector<1x256xf32>
    %171 = arith.mulf %170, %168 : vector<1x256xf32>
    %172 = arith.addf %157, %171 : vector<1x256xf32>
    %c34 = arith.constant 34 : index
    %173 = memref.load %arg6[%c34] : memref<81xf32, #tpu.memory_space<smem>>
    %174 = vector.broadcast %173 : f32 to vector<1x256xf32>
    %175 = arith.mulf %174, %168 : vector<1x256xf32>
    %176 = arith.addf %161, %175 : vector<1x256xf32>
    %c61 = arith.constant 61 : index
    %177 = memref.load %arg6[%c61] : memref<81xf32, #tpu.memory_space<smem>>
    %178 = vector.broadcast %177 : f32 to vector<1x256xf32>
    %179 = arith.mulf %178, %168 : vector<1x256xf32>
    %180 = arith.addf %165, %179 : vector<1x256xf32>
    %c239_i32 = arith.constant 239 : i32
    %181 = tpu.dynamic_rotate %23 by %c239_i32 dim 1 : vector<1x256xf32>, i32 -> vector<1x256xf32>
    %182 = arith.andi %59, %63 : vector<1x256xi1>
    %cst_37 = arith.constant 0.000000e+00 : f32
    %183 = vector.broadcast %cst_37 : f32 to vector<1x256xf32>
    %184 = arith.select %182, %181, %183 : vector<1x256xi1>, vector<1x256xf32>
    %c8_38 = arith.constant 8 : index
    %185 = memref.load %arg6[%c8_38] : memref<81xf32, #tpu.memory_space<smem>>
    %186 = vector.broadcast %185 : f32 to vector<1x256xf32>
    %187 = arith.mulf %186, %184 : vector<1x256xf32>
    %188 = arith.addf %172, %187 : vector<1x256xf32>
    %c35 = arith.constant 35 : index
    %189 = memref.load %arg6[%c35] : memref<81xf32, #tpu.memory_space<smem>>
    %190 = vector.broadcast %189 : f32 to vector<1x256xf32>
    %191 = arith.mulf %190, %184 : vector<1x256xf32>
    %192 = arith.addf %176, %191 : vector<1x256xf32>
    %c62 = arith.constant 62 : index
    %193 = memref.load %arg6[%c62] : memref<81xf32, #tpu.memory_space<smem>>
    %194 = vector.broadcast %193 : f32 to vector<1x256xf32>
    %195 = arith.mulf %194, %184 : vector<1x256xf32>
    %196 = arith.addf %180, %195 : vector<1x256xf32>
    %c17_i32_39 = arith.constant 17 : i32
    %197 = tpu.dynamic_rotate %39 by %c17_i32_39 dim 1 : vector<1x256xf32>, i32 -> vector<1x256xf32>
    %198 = arith.andi %57, %61 : vector<1x256xi1>
    %cst_40 = arith.constant 0.000000e+00 : f32
    %199 = vector.broadcast %cst_40 : f32 to vector<1x256xf32>
    %200 = arith.select %198, %197, %199 : vector<1x256xi1>, vector<1x256xf32>
    %c9 = arith.constant 9 : index
    %201 = memref.load %arg6[%c9] : memref<81xf32, #tpu.memory_space<smem>>
    %202 = vector.broadcast %201 : f32 to vector<1x256xf32>
    %203 = arith.mulf %202, %200 : vector<1x256xf32>
    %c36 = arith.constant 36 : index
    %204 = memref.load %arg6[%c36] : memref<81xf32, #tpu.memory_space<smem>>
    %205 = vector.broadcast %204 : f32 to vector<1x256xf32>
    %206 = arith.mulf %205, %200 : vector<1x256xf32>
    %c63 = arith.constant 63 : index
    %207 = memref.load %arg6[%c63] : memref<81xf32, #tpu.memory_space<smem>>
    %208 = vector.broadcast %207 : f32 to vector<1x256xf32>
    %209 = arith.mulf %208, %200 : vector<1x256xf32>
    %c16_i32_41 = arith.constant 16 : i32
    %210 = tpu.dynamic_rotate %39 by %c16_i32_41 dim 1 : vector<1x256xf32>, i32 -> vector<1x256xf32>
    %cst_42 = arith.constant 0.000000e+00 : f32
    %211 = vector.broadcast %cst_42 : f32 to vector<1x256xf32>
    %212 = arith.select %57, %210, %211 : vector<1x256xi1>, vector<1x256xf32>
    %c10 = arith.constant 10 : index
    %213 = memref.load %arg6[%c10] : memref<81xf32, #tpu.memory_space<smem>>
    %214 = vector.broadcast %213 : f32 to vector<1x256xf32>
    %215 = arith.mulf %214, %212 : vector<1x256xf32>
    %216 = arith.addf %203, %215 : vector<1x256xf32>
    %c37 = arith.constant 37 : index
    %217 = memref.load %arg6[%c37] : memref<81xf32, #tpu.memory_space<smem>>
    %218 = vector.broadcast %217 : f32 to vector<1x256xf32>
    %219 = arith.mulf %218, %212 : vector<1x256xf32>
    %220 = arith.addf %206, %219 : vector<1x256xf32>
    %c64 = arith.constant 64 : index
    %221 = memref.load %arg6[%c64] : memref<81xf32, #tpu.memory_space<smem>>
    %222 = vector.broadcast %221 : f32 to vector<1x256xf32>
    %223 = arith.mulf %222, %212 : vector<1x256xf32>
    %224 = arith.addf %209, %223 : vector<1x256xf32>
    %c15_i32_43 = arith.constant 15 : i32
    %225 = tpu.dynamic_rotate %39 by %c15_i32_43 dim 1 : vector<1x256xf32>, i32 -> vector<1x256xf32>
    %226 = arith.andi %57, %63 : vector<1x256xi1>
    %cst_44 = arith.constant 0.000000e+00 : f32
    %227 = vector.broadcast %cst_44 : f32 to vector<1x256xf32>
    %228 = arith.select %226, %225, %227 : vector<1x256xi1>, vector<1x256xf32>
    %c11 = arith.constant 11 : index
    %229 = memref.load %arg6[%c11] : memref<81xf32, #tpu.memory_space<smem>>
    %230 = vector.broadcast %229 : f32 to vector<1x256xf32>
    %231 = arith.mulf %230, %228 : vector<1x256xf32>
    %232 = arith.addf %216, %231 : vector<1x256xf32>
    %c38 = arith.constant 38 : index
    %233 = memref.load %arg6[%c38] : memref<81xf32, #tpu.memory_space<smem>>
    %234 = vector.broadcast %233 : f32 to vector<1x256xf32>
    %235 = arith.mulf %234, %228 : vector<1x256xf32>
    %236 = arith.addf %220, %235 : vector<1x256xf32>
    %c65 = arith.constant 65 : index
    %237 = memref.load %arg6[%c65] : memref<81xf32, #tpu.memory_space<smem>>
    %238 = vector.broadcast %237 : f32 to vector<1x256xf32>
    %239 = arith.mulf %238, %228 : vector<1x256xf32>
    %240 = arith.addf %224, %239 : vector<1x256xf32>
    %c1_i32_45 = arith.constant 1 : i32
    %241 = tpu.dynamic_rotate %39 by %c1_i32_45 dim 1 : vector<1x256xf32>, i32 -> vector<1x256xf32>
    %cst_46 = arith.constant 0.000000e+00 : f32
    %242 = vector.broadcast %cst_46 : f32 to vector<1x256xf32>
    %243 = arith.select %61, %241, %242 : vector<1x256xi1>, vector<1x256xf32>
    %c12 = arith.constant 12 : index
    %244 = memref.load %arg6[%c12] : memref<81xf32, #tpu.memory_space<smem>>
    %245 = vector.broadcast %244 : f32 to vector<1x256xf32>
    %246 = arith.mulf %245, %243 : vector<1x256xf32>
    %247 = arith.addf %232, %246 : vector<1x256xf32>
    %c39 = arith.constant 39 : index
    %248 = memref.load %arg6[%c39] : memref<81xf32, #tpu.memory_space<smem>>
    %249 = vector.broadcast %248 : f32 to vector<1x256xf32>
    %250 = arith.mulf %249, %243 : vector<1x256xf32>
    %251 = arith.addf %236, %250 : vector<1x256xf32>
    %c66 = arith.constant 66 : index
    %252 = memref.load %arg6[%c66] : memref<81xf32, #tpu.memory_space<smem>>
    %253 = vector.broadcast %252 : f32 to vector<1x256xf32>
    %254 = arith.mulf %253, %243 : vector<1x256xf32>
    %255 = arith.addf %240, %254 : vector<1x256xf32>
    %c13 = arith.constant 13 : index
    %256 = memref.load %arg6[%c13] : memref<81xf32, #tpu.memory_space<smem>>
    %257 = vector.broadcast %256 : f32 to vector<1x256xf32>
    %258 = arith.mulf %257, %39 : vector<1x256xf32>
    %259 = arith.addf %247, %258 : vector<1x256xf32>
    %c40 = arith.constant 40 : index
    %260 = memref.load %arg6[%c40] : memref<81xf32, #tpu.memory_space<smem>>
    %261 = vector.broadcast %260 : f32 to vector<1x256xf32>
    %262 = arith.mulf %261, %39 : vector<1x256xf32>
    %263 = arith.addf %251, %262 : vector<1x256xf32>
    %c67 = arith.constant 67 : index
    %264 = memref.load %arg6[%c67] : memref<81xf32, #tpu.memory_space<smem>>
    %265 = vector.broadcast %264 : f32 to vector<1x256xf32>
    %266 = arith.mulf %265, %39 : vector<1x256xf32>
    %267 = arith.addf %255, %266 : vector<1x256xf32>
    %c255_i32_47 = arith.constant 255 : i32
    %268 = tpu.dynamic_rotate %39 by %c255_i32_47 dim 1 : vector<1x256xf32>, i32 -> vector<1x256xf32>
    %cst_48 = arith.constant 0.000000e+00 : f32
    %269 = vector.broadcast %cst_48 : f32 to vector<1x256xf32>
    %270 = arith.select %63, %268, %269 : vector<1x256xi1>, vector<1x256xf32>
    %c14 = arith.constant 14 : index
    %271 = memref.load %arg6[%c14] : memref<81xf32, #tpu.memory_space<smem>>
    %272 = vector.broadcast %271 : f32 to vector<1x256xf32>
    %273 = arith.mulf %272, %270 : vector<1x256xf32>
    %274 = arith.addf %259, %273 : vector<1x256xf32>
    %c41 = arith.constant 41 : index
    %275 = memref.load %arg6[%c41] : memref<81xf32, #tpu.memory_space<smem>>
    %276 = vector.broadcast %275 : f32 to vector<1x256xf32>
    %277 = arith.mulf %276, %270 : vector<1x256xf32>
    %278 = arith.addf %263, %277 : vector<1x256xf32>
    %c68 = arith.constant 68 : index
    %279 = memref.load %arg6[%c68] : memref<81xf32, #tpu.memory_space<smem>>
    %280 = vector.broadcast %279 : f32 to vector<1x256xf32>
    %281 = arith.mulf %280, %270 : vector<1x256xf32>
    %282 = arith.addf %267, %281 : vector<1x256xf32>
    %c241_i32_49 = arith.constant 241 : i32
    %283 = tpu.dynamic_rotate %39 by %c241_i32_49 dim 1 : vector<1x256xf32>, i32 -> vector<1x256xf32>
    %284 = arith.andi %59, %61 : vector<1x256xi1>
    %cst_50 = arith.constant 0.000000e+00 : f32
    %285 = vector.broadcast %cst_50 : f32 to vector<1x256xf32>
    %286 = arith.select %284, %283, %285 : vector<1x256xi1>, vector<1x256xf32>
    %c15 = arith.constant 15 : index
    %287 = memref.load %arg6[%c15] : memref<81xf32, #tpu.memory_space<smem>>
    %288 = vector.broadcast %287 : f32 to vector<1x256xf32>
    %289 = arith.mulf %288, %286 : vector<1x256xf32>
    %290 = arith.addf %274, %289 : vector<1x256xf32>
    %c42 = arith.constant 42 : index
    %291 = memref.load %arg6[%c42] : memref<81xf32, #tpu.memory_space<smem>>
    %292 = vector.broadcast %291 : f32 to vector<1x256xf32>
    %293 = arith.mulf %292, %286 : vector<1x256xf32>
    %294 = arith.addf %278, %293 : vector<1x256xf32>
    %c69 = arith.constant 69 : index
    %295 = memref.load %arg6[%c69] : memref<81xf32, #tpu.memory_space<smem>>
    %296 = vector.broadcast %295 : f32 to vector<1x256xf32>
    %297 = arith.mulf %296, %286 : vector<1x256xf32>
    %298 = arith.addf %282, %297 : vector<1x256xf32>
    %c240_i32_51 = arith.constant 240 : i32
    %299 = tpu.dynamic_rotate %39 by %c240_i32_51 dim 1 : vector<1x256xf32>, i32 -> vector<1x256xf32>
    %cst_52 = arith.constant 0.000000e+00 : f32
    %300 = vector.broadcast %cst_52 : f32 to vector<1x256xf32>
    %301 = arith.select %59, %299, %300 : vector<1x256xi1>, vector<1x256xf32>
    %c16 = arith.constant 16 : index
    %302 = memref.load %arg6[%c16] : memref<81xf32, #tpu.memory_space<smem>>
    %303 = vector.broadcast %302 : f32 to vector<1x256xf32>
    %304 = arith.mulf %303, %301 : vector<1x256xf32>
    %305 = arith.addf %290, %304 : vector<1x256xf32>
    %c43 = arith.constant 43 : index
    %306 = memref.load %arg6[%c43] : memref<81xf32, #tpu.memory_space<smem>>
    %307 = vector.broadcast %306 : f32 to vector<1x256xf32>
    %308 = arith.mulf %307, %301 : vector<1x256xf32>
    %309 = arith.addf %294, %308 : vector<1x256xf32>
    %c70 = arith.constant 70 : index
    %310 = memref.load %arg6[%c70] : memref<81xf32, #tpu.memory_space<smem>>
    %311 = vector.broadcast %310 : f32 to vector<1x256xf32>
    %312 = arith.mulf %311, %301 : vector<1x256xf32>
    %313 = arith.addf %298, %312 : vector<1x256xf32>
    %c239_i32_53 = arith.constant 239 : i32
    %314 = tpu.dynamic_rotate %39 by %c239_i32_53 dim 1 : vector<1x256xf32>, i32 -> vector<1x256xf32>
    %315 = arith.andi %59, %63 : vector<1x256xi1>
    %cst_54 = arith.constant 0.000000e+00 : f32
    %316 = vector.broadcast %cst_54 : f32 to vector<1x256xf32>
    %317 = arith.select %315, %314, %316 : vector<1x256xi1>, vector<1x256xf32>
    %c17 = arith.constant 17 : index
    %318 = memref.load %arg6[%c17] : memref<81xf32, #tpu.memory_space<smem>>
    %319 = vector.broadcast %318 : f32 to vector<1x256xf32>
    %320 = arith.mulf %319, %317 : vector<1x256xf32>
    %321 = arith.addf %305, %320 : vector<1x256xf32>
    %c44 = arith.constant 44 : index
    %322 = memref.load %arg6[%c44] : memref<81xf32, #tpu.memory_space<smem>>
    %323 = vector.broadcast %322 : f32 to vector<1x256xf32>
    %324 = arith.mulf %323, %317 : vector<1x256xf32>
    %325 = arith.addf %309, %324 : vector<1x256xf32>
    %c71 = arith.constant 71 : index
    %326 = memref.load %arg6[%c71] : memref<81xf32, #tpu.memory_space<smem>>
    %327 = vector.broadcast %326 : f32 to vector<1x256xf32>
    %328 = arith.mulf %327, %317 : vector<1x256xf32>
    %329 = arith.addf %313, %328 : vector<1x256xf32>
    %330 = arith.addf %188, %321 : vector<1x256xf32>
    %331 = arith.addf %192, %325 : vector<1x256xf32>
    %332 = arith.addf %196, %329 : vector<1x256xf32>
    %c17_i32_55 = arith.constant 17 : i32
    %333 = tpu.dynamic_rotate %55 by %c17_i32_55 dim 1 : vector<1x256xf32>, i32 -> vector<1x256xf32>
    %334 = arith.andi %57, %61 : vector<1x256xi1>
    %cst_56 = arith.constant 0.000000e+00 : f32
    %335 = vector.broadcast %cst_56 : f32 to vector<1x256xf32>
    %336 = arith.select %334, %333, %335 : vector<1x256xi1>, vector<1x256xf32>
    %c18 = arith.constant 18 : index
    %337 = memref.load %arg6[%c18] : memref<81xf32, #tpu.memory_space<smem>>
    %338 = vector.broadcast %337 : f32 to vector<1x256xf32>
    %339 = arith.mulf %338, %336 : vector<1x256xf32>
    %c45 = arith.constant 45 : index
    %340 = memref.load %arg6[%c45] : memref<81xf32, #tpu.memory_space<smem>>
    %341 = vector.broadcast %340 : f32 to vector<1x256xf32>
    %342 = arith.mulf %341, %336 : vector<1x256xf32>
    %c72 = arith.constant 72 : index
    %343 = memref.load %arg6[%c72] : memref<81xf32, #tpu.memory_space<smem>>
    %344 = vector.broadcast %343 : f32 to vector<1x256xf32>
    %345 = arith.mulf %344, %336 : vector<1x256xf32>
    %c16_i32_57 = arith.constant 16 : i32
    %346 = tpu.dynamic_rotate %55 by %c16_i32_57 dim 1 : vector<1x256xf32>, i32 -> vector<1x256xf32>
    %cst_58 = arith.constant 0.000000e+00 : f32
    %347 = vector.broadcast %cst_58 : f32 to vector<1x256xf32>
    %348 = arith.select %57, %346, %347 : vector<1x256xi1>, vector<1x256xf32>
    %c19 = arith.constant 19 : index
    %349 = memref.load %arg6[%c19] : memref<81xf32, #tpu.memory_space<smem>>
    %350 = vector.broadcast %349 : f32 to vector<1x256xf32>
    %351 = arith.mulf %350, %348 : vector<1x256xf32>
    %352 = arith.addf %339, %351 : vector<1x256xf32>
    %c46 = arith.constant 46 : index
    %353 = memref.load %arg6[%c46] : memref<81xf32, #tpu.memory_space<smem>>
    %354 = vector.broadcast %353 : f32 to vector<1x256xf32>
    %355 = arith.mulf %354, %348 : vector<1x256xf32>
    %356 = arith.addf %342, %355 : vector<1x256xf32>
    %c73 = arith.constant 73 : index
    %357 = memref.load %arg6[%c73] : memref<81xf32, #tpu.memory_space<smem>>
    %358 = vector.broadcast %357 : f32 to vector<1x256xf32>
    %359 = arith.mulf %358, %348 : vector<1x256xf32>
    %360 = arith.addf %345, %359 : vector<1x256xf32>
    %c15_i32_59 = arith.constant 15 : i32
    %361 = tpu.dynamic_rotate %55 by %c15_i32_59 dim 1 : vector<1x256xf32>, i32 -> vector<1x256xf32>
    %362 = arith.andi %57, %63 : vector<1x256xi1>
    %cst_60 = arith.constant 0.000000e+00 : f32
    %363 = vector.broadcast %cst_60 : f32 to vector<1x256xf32>
    %364 = arith.select %362, %361, %363 : vector<1x256xi1>, vector<1x256xf32>
    %c20 = arith.constant 20 : index
    %365 = memref.load %arg6[%c20] : memref<81xf32, #tpu.memory_space<smem>>
    %366 = vector.broadcast %365 : f32 to vector<1x256xf32>
    %367 = arith.mulf %366, %364 : vector<1x256xf32>
    %368 = arith.addf %352, %367 : vector<1x256xf32>
    %c47 = arith.constant 47 : index
    %369 = memref.load %arg6[%c47] : memref<81xf32, #tpu.memory_space<smem>>
    %370 = vector.broadcast %369 : f32 to vector<1x256xf32>
    %371 = arith.mulf %370, %364 : vector<1x256xf32>
    %372 = arith.addf %356, %371 : vector<1x256xf32>
    %c74 = arith.constant 74 : index
    %373 = memref.load %arg6[%c74] : memref<81xf32, #tpu.memory_space<smem>>
    %374 = vector.broadcast %373 : f32 to vector<1x256xf32>
    %375 = arith.mulf %374, %364 : vector<1x256xf32>
    %376 = arith.addf %360, %375 : vector<1x256xf32>
    %c1_i32_61 = arith.constant 1 : i32
    %377 = tpu.dynamic_rotate %55 by %c1_i32_61 dim 1 : vector<1x256xf32>, i32 -> vector<1x256xf32>
    %cst_62 = arith.constant 0.000000e+00 : f32
    %378 = vector.broadcast %cst_62 : f32 to vector<1x256xf32>
    %379 = arith.select %61, %377, %378 : vector<1x256xi1>, vector<1x256xf32>
    %c21 = arith.constant 21 : index
    %380 = memref.load %arg6[%c21] : memref<81xf32, #tpu.memory_space<smem>>
    %381 = vector.broadcast %380 : f32 to vector<1x256xf32>
    %382 = arith.mulf %381, %379 : vector<1x256xf32>
    %383 = arith.addf %368, %382 : vector<1x256xf32>
    %c48 = arith.constant 48 : index
    %384 = memref.load %arg6[%c48] : memref<81xf32, #tpu.memory_space<smem>>
    %385 = vector.broadcast %384 : f32 to vector<1x256xf32>
    %386 = arith.mulf %385, %379 : vector<1x256xf32>
    %387 = arith.addf %372, %386 : vector<1x256xf32>
    %c75 = arith.constant 75 : index
    %388 = memref.load %arg6[%c75] : memref<81xf32, #tpu.memory_space<smem>>
    %389 = vector.broadcast %388 : f32 to vector<1x256xf32>
    %390 = arith.mulf %389, %379 : vector<1x256xf32>
    %391 = arith.addf %376, %390 : vector<1x256xf32>
    %c22 = arith.constant 22 : index
    %392 = memref.load %arg6[%c22] : memref<81xf32, #tpu.memory_space<smem>>
    %393 = vector.broadcast %392 : f32 to vector<1x256xf32>
    %394 = arith.mulf %393, %55 : vector<1x256xf32>
    %395 = arith.addf %383, %394 : vector<1x256xf32>
    %c49 = arith.constant 49 : index
    %396 = memref.load %arg6[%c49] : memref<81xf32, #tpu.memory_space<smem>>
    %397 = vector.broadcast %396 : f32 to vector<1x256xf32>
    %398 = arith.mulf %397, %55 : vector<1x256xf32>
    %399 = arith.addf %387, %398 : vector<1x256xf32>
    %c76 = arith.constant 76 : index
    %400 = memref.load %arg6[%c76] : memref<81xf32, #tpu.memory_space<smem>>
    %401 = vector.broadcast %400 : f32 to vector<1x256xf32>
    %402 = arith.mulf %401, %55 : vector<1x256xf32>
    %403 = arith.addf %391, %402 : vector<1x256xf32>
    %c255_i32_63 = arith.constant 255 : i32
    %404 = tpu.dynamic_rotate %55 by %c255_i32_63 dim 1 : vector<1x256xf32>, i32 -> vector<1x256xf32>
    %cst_64 = arith.constant 0.000000e+00 : f32
    %405 = vector.broadcast %cst_64 : f32 to vector<1x256xf32>
    %406 = arith.select %63, %404, %405 : vector<1x256xi1>, vector<1x256xf32>
    %c23 = arith.constant 23 : index
    %407 = memref.load %arg6[%c23] : memref<81xf32, #tpu.memory_space<smem>>
    %408 = vector.broadcast %407 : f32 to vector<1x256xf32>
    %409 = arith.mulf %408, %406 : vector<1x256xf32>
    %410 = arith.addf %395, %409 : vector<1x256xf32>
    %c50 = arith.constant 50 : index
    %411 = memref.load %arg6[%c50] : memref<81xf32, #tpu.memory_space<smem>>
    %412 = vector.broadcast %411 : f32 to vector<1x256xf32>
    %413 = arith.mulf %412, %406 : vector<1x256xf32>
    %414 = arith.addf %399, %413 : vector<1x256xf32>
    %c77 = arith.constant 77 : index
    %415 = memref.load %arg6[%c77] : memref<81xf32, #tpu.memory_space<smem>>
    %416 = vector.broadcast %415 : f32 to vector<1x256xf32>
    %417 = arith.mulf %416, %406 : vector<1x256xf32>
    %418 = arith.addf %403, %417 : vector<1x256xf32>
    %c241_i32_65 = arith.constant 241 : i32
    %419 = tpu.dynamic_rotate %55 by %c241_i32_65 dim 1 : vector<1x256xf32>, i32 -> vector<1x256xf32>
    %420 = arith.andi %59, %61 : vector<1x256xi1>
    %cst_66 = arith.constant 0.000000e+00 : f32
    %421 = vector.broadcast %cst_66 : f32 to vector<1x256xf32>
    %422 = arith.select %420, %419, %421 : vector<1x256xi1>, vector<1x256xf32>
    %c24 = arith.constant 24 : index
    %423 = memref.load %arg6[%c24] : memref<81xf32, #tpu.memory_space<smem>>
    %424 = vector.broadcast %423 : f32 to vector<1x256xf32>
    %425 = arith.mulf %424, %422 : vector<1x256xf32>
    %426 = arith.addf %410, %425 : vector<1x256xf32>
    %c51 = arith.constant 51 : index
    %427 = memref.load %arg6[%c51] : memref<81xf32, #tpu.memory_space<smem>>
    %428 = vector.broadcast %427 : f32 to vector<1x256xf32>
    %429 = arith.mulf %428, %422 : vector<1x256xf32>
    %430 = arith.addf %414, %429 : vector<1x256xf32>
    %c78 = arith.constant 78 : index
    %431 = memref.load %arg6[%c78] : memref<81xf32, #tpu.memory_space<smem>>
    %432 = vector.broadcast %431 : f32 to vector<1x256xf32>
    %433 = arith.mulf %432, %422 : vector<1x256xf32>
    %434 = arith.addf %418, %433 : vector<1x256xf32>
    %c240_i32_67 = arith.constant 240 : i32
    %435 = tpu.dynamic_rotate %55 by %c240_i32_67 dim 1 : vector<1x256xf32>, i32 -> vector<1x256xf32>
    %cst_68 = arith.constant 0.000000e+00 : f32
    %436 = vector.broadcast %cst_68 : f32 to vector<1x256xf32>
    %437 = arith.select %59, %435, %436 : vector<1x256xi1>, vector<1x256xf32>
    %c25 = arith.constant 25 : index
    %438 = memref.load %arg6[%c25] : memref<81xf32, #tpu.memory_space<smem>>
    %439 = vector.broadcast %438 : f32 to vector<1x256xf32>
    %440 = arith.mulf %439, %437 : vector<1x256xf32>
    %441 = arith.addf %426, %440 : vector<1x256xf32>
    %c52 = arith.constant 52 : index
    %442 = memref.load %arg6[%c52] : memref<81xf32, #tpu.memory_space<smem>>
    %443 = vector.broadcast %442 : f32 to vector<1x256xf32>
    %444 = arith.mulf %443, %437 : vector<1x256xf32>
    %445 = arith.addf %430, %444 : vector<1x256xf32>
    %c79 = arith.constant 79 : index
    %446 = memref.load %arg6[%c79] : memref<81xf32, #tpu.memory_space<smem>>
    %447 = vector.broadcast %446 : f32 to vector<1x256xf32>
    %448 = arith.mulf %447, %437 : vector<1x256xf32>
    %449 = arith.addf %434, %448 : vector<1x256xf32>
    %c239_i32_69 = arith.constant 239 : i32
    %450 = tpu.dynamic_rotate %55 by %c239_i32_69 dim 1 : vector<1x256xf32>, i32 -> vector<1x256xf32>
    %451 = arith.andi %59, %63 : vector<1x256xi1>
    %cst_70 = arith.constant 0.000000e+00 : f32
    %452 = vector.broadcast %cst_70 : f32 to vector<1x256xf32>
    %453 = arith.select %451, %450, %452 : vector<1x256xi1>, vector<1x256xf32>
    %c26 = arith.constant 26 : index
    %454 = memref.load %arg6[%c26] : memref<81xf32, #tpu.memory_space<smem>>
    %455 = vector.broadcast %454 : f32 to vector<1x256xf32>
    %456 = arith.mulf %455, %453 : vector<1x256xf32>
    %457 = arith.addf %441, %456 : vector<1x256xf32>
    %c53 = arith.constant 53 : index
    %458 = memref.load %arg6[%c53] : memref<81xf32, #tpu.memory_space<smem>>
    %459 = vector.broadcast %458 : f32 to vector<1x256xf32>
    %460 = arith.mulf %459, %453 : vector<1x256xf32>
    %461 = arith.addf %445, %460 : vector<1x256xf32>
    %c80 = arith.constant 80 : index
    %462 = memref.load %arg6[%c80] : memref<81xf32, #tpu.memory_space<smem>>
    %463 = vector.broadcast %462 : f32 to vector<1x256xf32>
    %464 = arith.mulf %463, %453 : vector<1x256xf32>
    %465 = arith.addf %449, %464 : vector<1x256xf32>
    %466 = arith.addf %330, %457 : vector<1x256xf32>
    %467 = arith.addf %331, %461 : vector<1x256xf32>
    %468 = arith.addf %332, %465 : vector<1x256xf32>
    %c0_71 = arith.constant 0 : index
    %469 = memref.load %arg7[%c0_71] : memref<3xf32, #tpu.memory_space<smem>>
    %470 = vector.broadcast %469 : f32 to vector<1x256xf32>
    %471 = arith.addf %466, %470 : vector<1x256xf32>
    %cst_72 = arith.constant 0.000000e+00 : f32
    %472 = vector.broadcast %cst_72 : f32 to vector<1x256xf32>
    %473 = arith.maximumf %471, %472 : vector<1x256xf32>
    %c1_73 = arith.constant 1 : index
    %474 = memref.load %arg7[%c1_73] : memref<3xf32, #tpu.memory_space<smem>>
    %475 = vector.broadcast %474 : f32 to vector<1x256xf32>
    %476 = arith.addf %467, %475 : vector<1x256xf32>
    %cst_74 = arith.constant 0.000000e+00 : f32
    %477 = vector.broadcast %cst_74 : f32 to vector<1x256xf32>
    %478 = arith.maximumf %476, %477 : vector<1x256xf32>
    %c2_75 = arith.constant 2 : index
    %479 = memref.load %arg7[%c2_75] : memref<3xf32, #tpu.memory_space<smem>>
    %480 = vector.broadcast %479 : f32 to vector<1x256xf32>
    %481 = arith.addf %468, %480 : vector<1x256xf32>
    %cst_76 = arith.constant 0.000000e+00 : f32
    %482 = vector.broadcast %cst_76 : f32 to vector<1x256xf32>
    %483 = arith.maximumf %481, %482 : vector<1x256xf32>
    %c2_i32 = arith.constant 2 : i32
    %484 = vector.broadcast %c2_i32 : i32 to vector<1x256xi32>
    %485 = arith.cmpi sge, %0, %484 : vector<1x256xi32>
    %c1_i32_77 = arith.constant 1 : i32
    %486 = vector.broadcast %c1_i32_77 : i32 to vector<1x256xi32>
    %487 = arith.cmpi sge, %0, %486 : vector<1x256xi32>
    %c15_i32_78 = arith.constant 15 : i32
    %488 = vector.broadcast %c15_i32_78 : i32 to vector<1x256xi32>
    %489 = arith.cmpi slt, %0, %488 : vector<1x256xi32>
    %c14_i32 = arith.constant 14 : i32
    %490 = vector.broadcast %c14_i32 : i32 to vector<1x256xi32>
    %491 = arith.cmpi slt, %0, %490 : vector<1x256xi32>
    %c2_i32_79 = arith.constant 2 : i32
    %492 = vector.broadcast %c2_i32_79 : i32 to vector<1x256xi32>
    %493 = arith.cmpi sge, %1, %492 : vector<1x256xi32>
    %c1_i32_80 = arith.constant 1 : i32
    %494 = vector.broadcast %c1_i32_80 : i32 to vector<1x256xi32>
    %495 = arith.cmpi sge, %1, %494 : vector<1x256xi32>
    %c15_i32_81 = arith.constant 15 : i32
    %496 = vector.broadcast %c15_i32_81 : i32 to vector<1x256xi32>
    %497 = arith.cmpi slt, %1, %496 : vector<1x256xi32>
    %c14_i32_82 = arith.constant 14 : i32
    %498 = vector.broadcast %c14_i32_82 : i32 to vector<1x256xi32>
    %499 = arith.cmpi slt, %1, %498 : vector<1x256xi32>
    %c34_i32 = arith.constant 34 : i32
    %500 = tpu.dynamic_rotate %473 by %c34_i32 dim 1 : vector<1x256xf32>, i32 -> vector<1x256xf32>
    %501 = arith.andi %485, %493 : vector<1x256xi1>
    %cst_83 = arith.constant 0.000000e+00 : f32
    %502 = vector.broadcast %cst_83 : f32 to vector<1x256xf32>
    %503 = arith.select %501, %500, %502 : vector<1x256xi1>, vector<1x256xf32>
    %c0_84 = arith.constant 0 : index
    %504 = memref.load %arg8[%c0_84] : memref<225xf32, #tpu.memory_space<smem>>
    %505 = vector.broadcast %504 : f32 to vector<1x256xf32>
    %506 = arith.mulf %505, %503 : vector<1x256xf32>
    %c75_85 = arith.constant 75 : index
    %507 = memref.load %arg8[%c75_85] : memref<225xf32, #tpu.memory_space<smem>>
    %508 = vector.broadcast %507 : f32 to vector<1x256xf32>
    %509 = arith.mulf %508, %503 : vector<1x256xf32>
    %c150 = arith.constant 150 : index
    %510 = memref.load %arg8[%c150] : memref<225xf32, #tpu.memory_space<smem>>
    %511 = vector.broadcast %510 : f32 to vector<1x256xf32>
    %512 = arith.mulf %511, %503 : vector<1x256xf32>
    %c33_i32 = arith.constant 33 : i32
    %513 = tpu.dynamic_rotate %473 by %c33_i32 dim 1 : vector<1x256xf32>, i32 -> vector<1x256xf32>
    %514 = arith.andi %485, %495 : vector<1x256xi1>
    %cst_86 = arith.constant 0.000000e+00 : f32
    %515 = vector.broadcast %cst_86 : f32 to vector<1x256xf32>
    %516 = arith.select %514, %513, %515 : vector<1x256xi1>, vector<1x256xf32>
    %c1_87 = arith.constant 1 : index
    %517 = memref.load %arg8[%c1_87] : memref<225xf32, #tpu.memory_space<smem>>
    %518 = vector.broadcast %517 : f32 to vector<1x256xf32>
    %519 = arith.mulf %518, %516 : vector<1x256xf32>
    %520 = arith.addf %506, %519 : vector<1x256xf32>
    %c76_88 = arith.constant 76 : index
    %521 = memref.load %arg8[%c76_88] : memref<225xf32, #tpu.memory_space<smem>>
    %522 = vector.broadcast %521 : f32 to vector<1x256xf32>
    %523 = arith.mulf %522, %516 : vector<1x256xf32>
    %524 = arith.addf %509, %523 : vector<1x256xf32>
    %c151 = arith.constant 151 : index
    %525 = memref.load %arg8[%c151] : memref<225xf32, #tpu.memory_space<smem>>
    %526 = vector.broadcast %525 : f32 to vector<1x256xf32>
    %527 = arith.mulf %526, %516 : vector<1x256xf32>
    %528 = arith.addf %512, %527 : vector<1x256xf32>
    %c32_i32 = arith.constant 32 : i32
    %529 = tpu.dynamic_rotate %473 by %c32_i32 dim 1 : vector<1x256xf32>, i32 -> vector<1x256xf32>
    %cst_89 = arith.constant 0.000000e+00 : f32
    %530 = vector.broadcast %cst_89 : f32 to vector<1x256xf32>
    %531 = arith.select %485, %529, %530 : vector<1x256xi1>, vector<1x256xf32>
    %c2_90 = arith.constant 2 : index
    %532 = memref.load %arg8[%c2_90] : memref<225xf32, #tpu.memory_space<smem>>
    %533 = vector.broadcast %532 : f32 to vector<1x256xf32>
    %534 = arith.mulf %533, %531 : vector<1x256xf32>
    %535 = arith.addf %520, %534 : vector<1x256xf32>
    %c77_91 = arith.constant 77 : index
    %536 = memref.load %arg8[%c77_91] : memref<225xf32, #tpu.memory_space<smem>>
    %537 = vector.broadcast %536 : f32 to vector<1x256xf32>
    %538 = arith.mulf %537, %531 : vector<1x256xf32>
    %539 = arith.addf %524, %538 : vector<1x256xf32>
    %c152 = arith.constant 152 : index
    %540 = memref.load %arg8[%c152] : memref<225xf32, #tpu.memory_space<smem>>
    %541 = vector.broadcast %540 : f32 to vector<1x256xf32>
    %542 = arith.mulf %541, %531 : vector<1x256xf32>
    %543 = arith.addf %528, %542 : vector<1x256xf32>
    %c31_i32 = arith.constant 31 : i32
    %544 = tpu.dynamic_rotate %473 by %c31_i32 dim 1 : vector<1x256xf32>, i32 -> vector<1x256xf32>
    %545 = arith.andi %485, %497 : vector<1x256xi1>
    %cst_92 = arith.constant 0.000000e+00 : f32
    %546 = vector.broadcast %cst_92 : f32 to vector<1x256xf32>
    %547 = arith.select %545, %544, %546 : vector<1x256xi1>, vector<1x256xf32>
    %c3_93 = arith.constant 3 : index
    %548 = memref.load %arg8[%c3_93] : memref<225xf32, #tpu.memory_space<smem>>
    %549 = vector.broadcast %548 : f32 to vector<1x256xf32>
    %550 = arith.mulf %549, %547 : vector<1x256xf32>
    %551 = arith.addf %535, %550 : vector<1x256xf32>
    %c78_94 = arith.constant 78 : index
    %552 = memref.load %arg8[%c78_94] : memref<225xf32, #tpu.memory_space<smem>>
    %553 = vector.broadcast %552 : f32 to vector<1x256xf32>
    %554 = arith.mulf %553, %547 : vector<1x256xf32>
    %555 = arith.addf %539, %554 : vector<1x256xf32>
    %c153 = arith.constant 153 : index
    %556 = memref.load %arg8[%c153] : memref<225xf32, #tpu.memory_space<smem>>
    %557 = vector.broadcast %556 : f32 to vector<1x256xf32>
    %558 = arith.mulf %557, %547 : vector<1x256xf32>
    %559 = arith.addf %543, %558 : vector<1x256xf32>
    %c30_i32 = arith.constant 30 : i32
    %560 = tpu.dynamic_rotate %473 by %c30_i32 dim 1 : vector<1x256xf32>, i32 -> vector<1x256xf32>
    %561 = arith.andi %485, %499 : vector<1x256xi1>
    %cst_95 = arith.constant 0.000000e+00 : f32
    %562 = vector.broadcast %cst_95 : f32 to vector<1x256xf32>
    %563 = arith.select %561, %560, %562 : vector<1x256xi1>, vector<1x256xf32>
    %c4_96 = arith.constant 4 : index
    %564 = memref.load %arg8[%c4_96] : memref<225xf32, #tpu.memory_space<smem>>
    %565 = vector.broadcast %564 : f32 to vector<1x256xf32>
    %566 = arith.mulf %565, %563 : vector<1x256xf32>
    %567 = arith.addf %551, %566 : vector<1x256xf32>
    %c79_97 = arith.constant 79 : index
    %568 = memref.load %arg8[%c79_97] : memref<225xf32, #tpu.memory_space<smem>>
    %569 = vector.broadcast %568 : f32 to vector<1x256xf32>
    %570 = arith.mulf %569, %563 : vector<1x256xf32>
    %571 = arith.addf %555, %570 : vector<1x256xf32>
    %c154 = arith.constant 154 : index
    %572 = memref.load %arg8[%c154] : memref<225xf32, #tpu.memory_space<smem>>
    %573 = vector.broadcast %572 : f32 to vector<1x256xf32>
    %574 = arith.mulf %573, %563 : vector<1x256xf32>
    %575 = arith.addf %559, %574 : vector<1x256xf32>
    %c18_i32 = arith.constant 18 : i32
    %576 = tpu.dynamic_rotate %473 by %c18_i32 dim 1 : vector<1x256xf32>, i32 -> vector<1x256xf32>
    %577 = arith.andi %487, %493 : vector<1x256xi1>
    %cst_98 = arith.constant 0.000000e+00 : f32
    %578 = vector.broadcast %cst_98 : f32 to vector<1x256xf32>
    %579 = arith.select %577, %576, %578 : vector<1x256xi1>, vector<1x256xf32>
    %c5_99 = arith.constant 5 : index
    %580 = memref.load %arg8[%c5_99] : memref<225xf32, #tpu.memory_space<smem>>
    %581 = vector.broadcast %580 : f32 to vector<1x256xf32>
    %582 = arith.mulf %581, %579 : vector<1x256xf32>
    %583 = arith.addf %567, %582 : vector<1x256xf32>
    %c80_100 = arith.constant 80 : index
    %584 = memref.load %arg8[%c80_100] : memref<225xf32, #tpu.memory_space<smem>>
    %585 = vector.broadcast %584 : f32 to vector<1x256xf32>
    %586 = arith.mulf %585, %579 : vector<1x256xf32>
    %587 = arith.addf %571, %586 : vector<1x256xf32>
    %c155 = arith.constant 155 : index
    %588 = memref.load %arg8[%c155] : memref<225xf32, #tpu.memory_space<smem>>
    %589 = vector.broadcast %588 : f32 to vector<1x256xf32>
    %590 = arith.mulf %589, %579 : vector<1x256xf32>
    %591 = arith.addf %575, %590 : vector<1x256xf32>
    %c17_i32_101 = arith.constant 17 : i32
    %592 = tpu.dynamic_rotate %473 by %c17_i32_101 dim 1 : vector<1x256xf32>, i32 -> vector<1x256xf32>
    %593 = arith.andi %487, %495 : vector<1x256xi1>
    %cst_102 = arith.constant 0.000000e+00 : f32
    %594 = vector.broadcast %cst_102 : f32 to vector<1x256xf32>
    %595 = arith.select %593, %592, %594 : vector<1x256xi1>, vector<1x256xf32>
    %c6_103 = arith.constant 6 : index
    %596 = memref.load %arg8[%c6_103] : memref<225xf32, #tpu.memory_space<smem>>
    %597 = vector.broadcast %596 : f32 to vector<1x256xf32>
    %598 = arith.mulf %597, %595 : vector<1x256xf32>
    %599 = arith.addf %583, %598 : vector<1x256xf32>
    %c81 = arith.constant 81 : index
    %600 = memref.load %arg8[%c81] : memref<225xf32, #tpu.memory_space<smem>>
    %601 = vector.broadcast %600 : f32 to vector<1x256xf32>
    %602 = arith.mulf %601, %595 : vector<1x256xf32>
    %603 = arith.addf %587, %602 : vector<1x256xf32>
    %c156 = arith.constant 156 : index
    %604 = memref.load %arg8[%c156] : memref<225xf32, #tpu.memory_space<smem>>
    %605 = vector.broadcast %604 : f32 to vector<1x256xf32>
    %606 = arith.mulf %605, %595 : vector<1x256xf32>
    %607 = arith.addf %591, %606 : vector<1x256xf32>
    %c16_i32_104 = arith.constant 16 : i32
    %608 = tpu.dynamic_rotate %473 by %c16_i32_104 dim 1 : vector<1x256xf32>, i32 -> vector<1x256xf32>
    %cst_105 = arith.constant 0.000000e+00 : f32
    %609 = vector.broadcast %cst_105 : f32 to vector<1x256xf32>
    %610 = arith.select %487, %608, %609 : vector<1x256xi1>, vector<1x256xf32>
    %c7_106 = arith.constant 7 : index
    %611 = memref.load %arg8[%c7_106] : memref<225xf32, #tpu.memory_space<smem>>
    %612 = vector.broadcast %611 : f32 to vector<1x256xf32>
    %613 = arith.mulf %612, %610 : vector<1x256xf32>
    %614 = arith.addf %599, %613 : vector<1x256xf32>
    %c82 = arith.constant 82 : index
    %615 = memref.load %arg8[%c82] : memref<225xf32, #tpu.memory_space<smem>>
    %616 = vector.broadcast %615 : f32 to vector<1x256xf32>
    %617 = arith.mulf %616, %610 : vector<1x256xf32>
    %618 = arith.addf %603, %617 : vector<1x256xf32>
    %c157 = arith.constant 157 : index
    %619 = memref.load %arg8[%c157] : memref<225xf32, #tpu.memory_space<smem>>
    %620 = vector.broadcast %619 : f32 to vector<1x256xf32>
    %621 = arith.mulf %620, %610 : vector<1x256xf32>
    %622 = arith.addf %607, %621 : vector<1x256xf32>
    %c15_i32_107 = arith.constant 15 : i32
    %623 = tpu.dynamic_rotate %473 by %c15_i32_107 dim 1 : vector<1x256xf32>, i32 -> vector<1x256xf32>
    %624 = arith.andi %487, %497 : vector<1x256xi1>
    %cst_108 = arith.constant 0.000000e+00 : f32
    %625 = vector.broadcast %cst_108 : f32 to vector<1x256xf32>
    %626 = arith.select %624, %623, %625 : vector<1x256xi1>, vector<1x256xf32>
    %c8_109 = arith.constant 8 : index
    %627 = memref.load %arg8[%c8_109] : memref<225xf32, #tpu.memory_space<smem>>
    %628 = vector.broadcast %627 : f32 to vector<1x256xf32>
    %629 = arith.mulf %628, %626 : vector<1x256xf32>
    %630 = arith.addf %614, %629 : vector<1x256xf32>
    %c83 = arith.constant 83 : index
    %631 = memref.load %arg8[%c83] : memref<225xf32, #tpu.memory_space<smem>>
    %632 = vector.broadcast %631 : f32 to vector<1x256xf32>
    %633 = arith.mulf %632, %626 : vector<1x256xf32>
    %634 = arith.addf %618, %633 : vector<1x256xf32>
    %c158 = arith.constant 158 : index
    %635 = memref.load %arg8[%c158] : memref<225xf32, #tpu.memory_space<smem>>
    %636 = vector.broadcast %635 : f32 to vector<1x256xf32>
    %637 = arith.mulf %636, %626 : vector<1x256xf32>
    %638 = arith.addf %622, %637 : vector<1x256xf32>
    %c14_i32_110 = arith.constant 14 : i32
    %639 = tpu.dynamic_rotate %473 by %c14_i32_110 dim 1 : vector<1x256xf32>, i32 -> vector<1x256xf32>
    %640 = arith.andi %487, %499 : vector<1x256xi1>
    %cst_111 = arith.constant 0.000000e+00 : f32
    %641 = vector.broadcast %cst_111 : f32 to vector<1x256xf32>
    %642 = arith.select %640, %639, %641 : vector<1x256xi1>, vector<1x256xf32>
    %c9_112 = arith.constant 9 : index
    %643 = memref.load %arg8[%c9_112] : memref<225xf32, #tpu.memory_space<smem>>
    %644 = vector.broadcast %643 : f32 to vector<1x256xf32>
    %645 = arith.mulf %644, %642 : vector<1x256xf32>
    %646 = arith.addf %630, %645 : vector<1x256xf32>
    %c84 = arith.constant 84 : index
    %647 = memref.load %arg8[%c84] : memref<225xf32, #tpu.memory_space<smem>>
    %648 = vector.broadcast %647 : f32 to vector<1x256xf32>
    %649 = arith.mulf %648, %642 : vector<1x256xf32>
    %650 = arith.addf %634, %649 : vector<1x256xf32>
    %c159 = arith.constant 159 : index
    %651 = memref.load %arg8[%c159] : memref<225xf32, #tpu.memory_space<smem>>
    %652 = vector.broadcast %651 : f32 to vector<1x256xf32>
    %653 = arith.mulf %652, %642 : vector<1x256xf32>
    %654 = arith.addf %638, %653 : vector<1x256xf32>
    %c2_i32_113 = arith.constant 2 : i32
    %655 = tpu.dynamic_rotate %473 by %c2_i32_113 dim 1 : vector<1x256xf32>, i32 -> vector<1x256xf32>
    %cst_114 = arith.constant 0.000000e+00 : f32
    %656 = vector.broadcast %cst_114 : f32 to vector<1x256xf32>
    %657 = arith.select %493, %655, %656 : vector<1x256xi1>, vector<1x256xf32>
    %c10_115 = arith.constant 10 : index
    %658 = memref.load %arg8[%c10_115] : memref<225xf32, #tpu.memory_space<smem>>
    %659 = vector.broadcast %658 : f32 to vector<1x256xf32>
    %660 = arith.mulf %659, %657 : vector<1x256xf32>
    %661 = arith.addf %646, %660 : vector<1x256xf32>
    %c85 = arith.constant 85 : index
    %662 = memref.load %arg8[%c85] : memref<225xf32, #tpu.memory_space<smem>>
    %663 = vector.broadcast %662 : f32 to vector<1x256xf32>
    %664 = arith.mulf %663, %657 : vector<1x256xf32>
    %665 = arith.addf %650, %664 : vector<1x256xf32>
    %c160 = arith.constant 160 : index
    %666 = memref.load %arg8[%c160] : memref<225xf32, #tpu.memory_space<smem>>
    %667 = vector.broadcast %666 : f32 to vector<1x256xf32>
    %668 = arith.mulf %667, %657 : vector<1x256xf32>
    %669 = arith.addf %654, %668 : vector<1x256xf32>
    %c1_i32_116 = arith.constant 1 : i32
    %670 = tpu.dynamic_rotate %473 by %c1_i32_116 dim 1 : vector<1x256xf32>, i32 -> vector<1x256xf32>
    %cst_117 = arith.constant 0.000000e+00 : f32
    %671 = vector.broadcast %cst_117 : f32 to vector<1x256xf32>
    %672 = arith.select %495, %670, %671 : vector<1x256xi1>, vector<1x256xf32>
    %c11_118 = arith.constant 11 : index
    %673 = memref.load %arg8[%c11_118] : memref<225xf32, #tpu.memory_space<smem>>
    %674 = vector.broadcast %673 : f32 to vector<1x256xf32>
    %675 = arith.mulf %674, %672 : vector<1x256xf32>
    %676 = arith.addf %661, %675 : vector<1x256xf32>
    %c86 = arith.constant 86 : index
    %677 = memref.load %arg8[%c86] : memref<225xf32, #tpu.memory_space<smem>>
    %678 = vector.broadcast %677 : f32 to vector<1x256xf32>
    %679 = arith.mulf %678, %672 : vector<1x256xf32>
    %680 = arith.addf %665, %679 : vector<1x256xf32>
    %c161 = arith.constant 161 : index
    %681 = memref.load %arg8[%c161] : memref<225xf32, #tpu.memory_space<smem>>
    %682 = vector.broadcast %681 : f32 to vector<1x256xf32>
    %683 = arith.mulf %682, %672 : vector<1x256xf32>
    %684 = arith.addf %669, %683 : vector<1x256xf32>
    %c12_119 = arith.constant 12 : index
    %685 = memref.load %arg8[%c12_119] : memref<225xf32, #tpu.memory_space<smem>>
    %686 = vector.broadcast %685 : f32 to vector<1x256xf32>
    %687 = arith.mulf %686, %473 : vector<1x256xf32>
    %688 = arith.addf %676, %687 : vector<1x256xf32>
    %c87 = arith.constant 87 : index
    %689 = memref.load %arg8[%c87] : memref<225xf32, #tpu.memory_space<smem>>
    %690 = vector.broadcast %689 : f32 to vector<1x256xf32>
    %691 = arith.mulf %690, %473 : vector<1x256xf32>
    %692 = arith.addf %680, %691 : vector<1x256xf32>
    %c162 = arith.constant 162 : index
    %693 = memref.load %arg8[%c162] : memref<225xf32, #tpu.memory_space<smem>>
    %694 = vector.broadcast %693 : f32 to vector<1x256xf32>
    %695 = arith.mulf %694, %473 : vector<1x256xf32>
    %696 = arith.addf %684, %695 : vector<1x256xf32>
    %c255_i32_120 = arith.constant 255 : i32
    %697 = tpu.dynamic_rotate %473 by %c255_i32_120 dim 1 : vector<1x256xf32>, i32 -> vector<1x256xf32>
    %cst_121 = arith.constant 0.000000e+00 : f32
    %698 = vector.broadcast %cst_121 : f32 to vector<1x256xf32>
    %699 = arith.select %497, %697, %698 : vector<1x256xi1>, vector<1x256xf32>
    %c13_122 = arith.constant 13 : index
    %700 = memref.load %arg8[%c13_122] : memref<225xf32, #tpu.memory_space<smem>>
    %701 = vector.broadcast %700 : f32 to vector<1x256xf32>
    %702 = arith.mulf %701, %699 : vector<1x256xf32>
    %703 = arith.addf %688, %702 : vector<1x256xf32>
    %c88 = arith.constant 88 : index
    %704 = memref.load %arg8[%c88] : memref<225xf32, #tpu.memory_space<smem>>
    %705 = vector.broadcast %704 : f32 to vector<1x256xf32>
    %706 = arith.mulf %705, %699 : vector<1x256xf32>
    %707 = arith.addf %692, %706 : vector<1x256xf32>
    %c163 = arith.constant 163 : index
    %708 = memref.load %arg8[%c163] : memref<225xf32, #tpu.memory_space<smem>>
    %709 = vector.broadcast %708 : f32 to vector<1x256xf32>
    %710 = arith.mulf %709, %699 : vector<1x256xf32>
    %711 = arith.addf %696, %710 : vector<1x256xf32>
    %c254_i32 = arith.constant 254 : i32
    %712 = tpu.dynamic_rotate %473 by %c254_i32 dim 1 : vector<1x256xf32>, i32 -> vector<1x256xf32>
    %cst_123 = arith.constant 0.000000e+00 : f32
    %713 = vector.broadcast %cst_123 : f32 to vector<1x256xf32>
    %714 = arith.select %499, %712, %713 : vector<1x256xi1>, vector<1x256xf32>
    %c14_124 = arith.constant 14 : index
    %715 = memref.load %arg8[%c14_124] : memref<225xf32, #tpu.memory_space<smem>>
    %716 = vector.broadcast %715 : f32 to vector<1x256xf32>
    %717 = arith.mulf %716, %714 : vector<1x256xf32>
    %718 = arith.addf %703, %717 : vector<1x256xf32>
    %c89 = arith.constant 89 : index
    %719 = memref.load %arg8[%c89] : memref<225xf32, #tpu.memory_space<smem>>
    %720 = vector.broadcast %719 : f32 to vector<1x256xf32>
    %721 = arith.mulf %720, %714 : vector<1x256xf32>
    %722 = arith.addf %707, %721 : vector<1x256xf32>
    %c164 = arith.constant 164 : index
    %723 = memref.load %arg8[%c164] : memref<225xf32, #tpu.memory_space<smem>>
    %724 = vector.broadcast %723 : f32 to vector<1x256xf32>
    %725 = arith.mulf %724, %714 : vector<1x256xf32>
    %726 = arith.addf %711, %725 : vector<1x256xf32>
    %c242_i32 = arith.constant 242 : i32
    %727 = tpu.dynamic_rotate %473 by %c242_i32 dim 1 : vector<1x256xf32>, i32 -> vector<1x256xf32>
    %728 = arith.andi %489, %493 : vector<1x256xi1>
    %cst_125 = arith.constant 0.000000e+00 : f32
    %729 = vector.broadcast %cst_125 : f32 to vector<1x256xf32>
    %730 = arith.select %728, %727, %729 : vector<1x256xi1>, vector<1x256xf32>
    %c15_126 = arith.constant 15 : index
    %731 = memref.load %arg8[%c15_126] : memref<225xf32, #tpu.memory_space<smem>>
    %732 = vector.broadcast %731 : f32 to vector<1x256xf32>
    %733 = arith.mulf %732, %730 : vector<1x256xf32>
    %734 = arith.addf %718, %733 : vector<1x256xf32>
    %c90 = arith.constant 90 : index
    %735 = memref.load %arg8[%c90] : memref<225xf32, #tpu.memory_space<smem>>
    %736 = vector.broadcast %735 : f32 to vector<1x256xf32>
    %737 = arith.mulf %736, %730 : vector<1x256xf32>
    %738 = arith.addf %722, %737 : vector<1x256xf32>
    %c165 = arith.constant 165 : index
    %739 = memref.load %arg8[%c165] : memref<225xf32, #tpu.memory_space<smem>>
    %740 = vector.broadcast %739 : f32 to vector<1x256xf32>
    %741 = arith.mulf %740, %730 : vector<1x256xf32>
    %742 = arith.addf %726, %741 : vector<1x256xf32>
    %c241_i32_127 = arith.constant 241 : i32
    %743 = tpu.dynamic_rotate %473 by %c241_i32_127 dim 1 : vector<1x256xf32>, i32 -> vector<1x256xf32>
    %744 = arith.andi %489, %495 : vector<1x256xi1>
    %cst_128 = arith.constant 0.000000e+00 : f32
    %745 = vector.broadcast %cst_128 : f32 to vector<1x256xf32>
    %746 = arith.select %744, %743, %745 : vector<1x256xi1>, vector<1x256xf32>
    %c16_129 = arith.constant 16 : index
    %747 = memref.load %arg8[%c16_129] : memref<225xf32, #tpu.memory_space<smem>>
    %748 = vector.broadcast %747 : f32 to vector<1x256xf32>
    %749 = arith.mulf %748, %746 : vector<1x256xf32>
    %750 = arith.addf %734, %749 : vector<1x256xf32>
    %c91 = arith.constant 91 : index
    %751 = memref.load %arg8[%c91] : memref<225xf32, #tpu.memory_space<smem>>
    %752 = vector.broadcast %751 : f32 to vector<1x256xf32>
    %753 = arith.mulf %752, %746 : vector<1x256xf32>
    %754 = arith.addf %738, %753 : vector<1x256xf32>
    %c166 = arith.constant 166 : index
    %755 = memref.load %arg8[%c166] : memref<225xf32, #tpu.memory_space<smem>>
    %756 = vector.broadcast %755 : f32 to vector<1x256xf32>
    %757 = arith.mulf %756, %746 : vector<1x256xf32>
    %758 = arith.addf %742, %757 : vector<1x256xf32>
    %c240_i32_130 = arith.constant 240 : i32
    %759 = tpu.dynamic_rotate %473 by %c240_i32_130 dim 1 : vector<1x256xf32>, i32 -> vector<1x256xf32>
    %cst_131 = arith.constant 0.000000e+00 : f32
    %760 = vector.broadcast %cst_131 : f32 to vector<1x256xf32>
    %761 = arith.select %489, %759, %760 : vector<1x256xi1>, vector<1x256xf32>
    %c17_132 = arith.constant 17 : index
    %762 = memref.load %arg8[%c17_132] : memref<225xf32, #tpu.memory_space<smem>>
    %763 = vector.broadcast %762 : f32 to vector<1x256xf32>
    %764 = arith.mulf %763, %761 : vector<1x256xf32>
    %765 = arith.addf %750, %764 : vector<1x256xf32>
    %c92 = arith.constant 92 : index
    %766 = memref.load %arg8[%c92] : memref<225xf32, #tpu.memory_space<smem>>
    %767 = vector.broadcast %766 : f32 to vector<1x256xf32>
    %768 = arith.mulf %767, %761 : vector<1x256xf32>
    %769 = arith.addf %754, %768 : vector<1x256xf32>
    %c167 = arith.constant 167 : index
    %770 = memref.load %arg8[%c167] : memref<225xf32, #tpu.memory_space<smem>>
    %771 = vector.broadcast %770 : f32 to vector<1x256xf32>
    %772 = arith.mulf %771, %761 : vector<1x256xf32>
    %773 = arith.addf %758, %772 : vector<1x256xf32>
    %c239_i32_133 = arith.constant 239 : i32
    %774 = tpu.dynamic_rotate %473 by %c239_i32_133 dim 1 : vector<1x256xf32>, i32 -> vector<1x256xf32>
    %775 = arith.andi %489, %497 : vector<1x256xi1>
    %cst_134 = arith.constant 0.000000e+00 : f32
    %776 = vector.broadcast %cst_134 : f32 to vector<1x256xf32>
    %777 = arith.select %775, %774, %776 : vector<1x256xi1>, vector<1x256xf32>
    %c18_135 = arith.constant 18 : index
    %778 = memref.load %arg8[%c18_135] : memref<225xf32, #tpu.memory_space<smem>>
    %779 = vector.broadcast %778 : f32 to vector<1x256xf32>
    %780 = arith.mulf %779, %777 : vector<1x256xf32>
    %781 = arith.addf %765, %780 : vector<1x256xf32>
    %c93 = arith.constant 93 : index
    %782 = memref.load %arg8[%c93] : memref<225xf32, #tpu.memory_space<smem>>
    %783 = vector.broadcast %782 : f32 to vector<1x256xf32>
    %784 = arith.mulf %783, %777 : vector<1x256xf32>
    %785 = arith.addf %769, %784 : vector<1x256xf32>
    %c168 = arith.constant 168 : index
    %786 = memref.load %arg8[%c168] : memref<225xf32, #tpu.memory_space<smem>>
    %787 = vector.broadcast %786 : f32 to vector<1x256xf32>
    %788 = arith.mulf %787, %777 : vector<1x256xf32>
    %789 = arith.addf %773, %788 : vector<1x256xf32>
    %c238_i32 = arith.constant 238 : i32
    %790 = tpu.dynamic_rotate %473 by %c238_i32 dim 1 : vector<1x256xf32>, i32 -> vector<1x256xf32>
    %791 = arith.andi %489, %499 : vector<1x256xi1>
    %cst_136 = arith.constant 0.000000e+00 : f32
    %792 = vector.broadcast %cst_136 : f32 to vector<1x256xf32>
    %793 = arith.select %791, %790, %792 : vector<1x256xi1>, vector<1x256xf32>
    %c19_137 = arith.constant 19 : index
    %794 = memref.load %arg8[%c19_137] : memref<225xf32, #tpu.memory_space<smem>>
    %795 = vector.broadcast %794 : f32 to vector<1x256xf32>
    %796 = arith.mulf %795, %793 : vector<1x256xf32>
    %797 = arith.addf %781, %796 : vector<1x256xf32>
    %c94 = arith.constant 94 : index
    %798 = memref.load %arg8[%c94] : memref<225xf32, #tpu.memory_space<smem>>
    %799 = vector.broadcast %798 : f32 to vector<1x256xf32>
    %800 = arith.mulf %799, %793 : vector<1x256xf32>
    %801 = arith.addf %785, %800 : vector<1x256xf32>
    %c169 = arith.constant 169 : index
    %802 = memref.load %arg8[%c169] : memref<225xf32, #tpu.memory_space<smem>>
    %803 = vector.broadcast %802 : f32 to vector<1x256xf32>
    %804 = arith.mulf %803, %793 : vector<1x256xf32>
    %805 = arith.addf %789, %804 : vector<1x256xf32>
    %c226_i32 = arith.constant 226 : i32
    %806 = tpu.dynamic_rotate %473 by %c226_i32 dim 1 : vector<1x256xf32>, i32 -> vector<1x256xf32>
    %807 = arith.andi %491, %493 : vector<1x256xi1>
    %cst_138 = arith.constant 0.000000e+00 : f32
    %808 = vector.broadcast %cst_138 : f32 to vector<1x256xf32>
    %809 = arith.select %807, %806, %808 : vector<1x256xi1>, vector<1x256xf32>
    %c20_139 = arith.constant 20 : index
    %810 = memref.load %arg8[%c20_139] : memref<225xf32, #tpu.memory_space<smem>>
    %811 = vector.broadcast %810 : f32 to vector<1x256xf32>
    %812 = arith.mulf %811, %809 : vector<1x256xf32>
    %813 = arith.addf %797, %812 : vector<1x256xf32>
    %c95 = arith.constant 95 : index
    %814 = memref.load %arg8[%c95] : memref<225xf32, #tpu.memory_space<smem>>
    %815 = vector.broadcast %814 : f32 to vector<1x256xf32>
    %816 = arith.mulf %815, %809 : vector<1x256xf32>
    %817 = arith.addf %801, %816 : vector<1x256xf32>
    %c170 = arith.constant 170 : index
    %818 = memref.load %arg8[%c170] : memref<225xf32, #tpu.memory_space<smem>>
    %819 = vector.broadcast %818 : f32 to vector<1x256xf32>
    %820 = arith.mulf %819, %809 : vector<1x256xf32>
    %821 = arith.addf %805, %820 : vector<1x256xf32>
    %c225_i32 = arith.constant 225 : i32
    %822 = tpu.dynamic_rotate %473 by %c225_i32 dim 1 : vector<1x256xf32>, i32 -> vector<1x256xf32>
    %823 = arith.andi %491, %495 : vector<1x256xi1>
    %cst_140 = arith.constant 0.000000e+00 : f32
    %824 = vector.broadcast %cst_140 : f32 to vector<1x256xf32>
    %825 = arith.select %823, %822, %824 : vector<1x256xi1>, vector<1x256xf32>
    %c21_141 = arith.constant 21 : index
    %826 = memref.load %arg8[%c21_141] : memref<225xf32, #tpu.memory_space<smem>>
    %827 = vector.broadcast %826 : f32 to vector<1x256xf32>
    %828 = arith.mulf %827, %825 : vector<1x256xf32>
    %829 = arith.addf %813, %828 : vector<1x256xf32>
    %c96 = arith.constant 96 : index
    %830 = memref.load %arg8[%c96] : memref<225xf32, #tpu.memory_space<smem>>
    %831 = vector.broadcast %830 : f32 to vector<1x256xf32>
    %832 = arith.mulf %831, %825 : vector<1x256xf32>
    %833 = arith.addf %817, %832 : vector<1x256xf32>
    %c171 = arith.constant 171 : index
    %834 = memref.load %arg8[%c171] : memref<225xf32, #tpu.memory_space<smem>>
    %835 = vector.broadcast %834 : f32 to vector<1x256xf32>
    %836 = arith.mulf %835, %825 : vector<1x256xf32>
    %837 = arith.addf %821, %836 : vector<1x256xf32>
    %c224_i32 = arith.constant 224 : i32
    %838 = tpu.dynamic_rotate %473 by %c224_i32 dim 1 : vector<1x256xf32>, i32 -> vector<1x256xf32>
    %cst_142 = arith.constant 0.000000e+00 : f32
    %839 = vector.broadcast %cst_142 : f32 to vector<1x256xf32>
    %840 = arith.select %491, %838, %839 : vector<1x256xi1>, vector<1x256xf32>
    %c22_143 = arith.constant 22 : index
    %841 = memref.load %arg8[%c22_143] : memref<225xf32, #tpu.memory_space<smem>>
    %842 = vector.broadcast %841 : f32 to vector<1x256xf32>
    %843 = arith.mulf %842, %840 : vector<1x256xf32>
    %844 = arith.addf %829, %843 : vector<1x256xf32>
    %c97 = arith.constant 97 : index
    %845 = memref.load %arg8[%c97] : memref<225xf32, #tpu.memory_space<smem>>
    %846 = vector.broadcast %845 : f32 to vector<1x256xf32>
    %847 = arith.mulf %846, %840 : vector<1x256xf32>
    %848 = arith.addf %833, %847 : vector<1x256xf32>
    %c172 = arith.constant 172 : index
    %849 = memref.load %arg8[%c172] : memref<225xf32, #tpu.memory_space<smem>>
    %850 = vector.broadcast %849 : f32 to vector<1x256xf32>
    %851 = arith.mulf %850, %840 : vector<1x256xf32>
    %852 = arith.addf %837, %851 : vector<1x256xf32>
    %c223_i32 = arith.constant 223 : i32
    %853 = tpu.dynamic_rotate %473 by %c223_i32 dim 1 : vector<1x256xf32>, i32 -> vector<1x256xf32>
    %854 = arith.andi %491, %497 : vector<1x256xi1>
    %cst_144 = arith.constant 0.000000e+00 : f32
    %855 = vector.broadcast %cst_144 : f32 to vector<1x256xf32>
    %856 = arith.select %854, %853, %855 : vector<1x256xi1>, vector<1x256xf32>
    %c23_145 = arith.constant 23 : index
    %857 = memref.load %arg8[%c23_145] : memref<225xf32, #tpu.memory_space<smem>>
    %858 = vector.broadcast %857 : f32 to vector<1x256xf32>
    %859 = arith.mulf %858, %856 : vector<1x256xf32>
    %860 = arith.addf %844, %859 : vector<1x256xf32>
    %c98 = arith.constant 98 : index
    %861 = memref.load %arg8[%c98] : memref<225xf32, #tpu.memory_space<smem>>
    %862 = vector.broadcast %861 : f32 to vector<1x256xf32>
    %863 = arith.mulf %862, %856 : vector<1x256xf32>
    %864 = arith.addf %848, %863 : vector<1x256xf32>
    %c173 = arith.constant 173 : index
    %865 = memref.load %arg8[%c173] : memref<225xf32, #tpu.memory_space<smem>>
    %866 = vector.broadcast %865 : f32 to vector<1x256xf32>
    %867 = arith.mulf %866, %856 : vector<1x256xf32>
    %868 = arith.addf %852, %867 : vector<1x256xf32>
    %c222_i32 = arith.constant 222 : i32
    %869 = tpu.dynamic_rotate %473 by %c222_i32 dim 1 : vector<1x256xf32>, i32 -> vector<1x256xf32>
    %870 = arith.andi %491, %499 : vector<1x256xi1>
    %cst_146 = arith.constant 0.000000e+00 : f32
    %871 = vector.broadcast %cst_146 : f32 to vector<1x256xf32>
    %872 = arith.select %870, %869, %871 : vector<1x256xi1>, vector<1x256xf32>
    %c24_147 = arith.constant 24 : index
    %873 = memref.load %arg8[%c24_147] : memref<225xf32, #tpu.memory_space<smem>>
    %874 = vector.broadcast %873 : f32 to vector<1x256xf32>
    %875 = arith.mulf %874, %872 : vector<1x256xf32>
    %876 = arith.addf %860, %875 : vector<1x256xf32>
    %c99 = arith.constant 99 : index
    %877 = memref.load %arg8[%c99] : memref<225xf32, #tpu.memory_space<smem>>
    %878 = vector.broadcast %877 : f32 to vector<1x256xf32>
    %879 = arith.mulf %878, %872 : vector<1x256xf32>
    %880 = arith.addf %864, %879 : vector<1x256xf32>
    %c174 = arith.constant 174 : index
    %881 = memref.load %arg8[%c174] : memref<225xf32, #tpu.memory_space<smem>>
    %882 = vector.broadcast %881 : f32 to vector<1x256xf32>
    %883 = arith.mulf %882, %872 : vector<1x256xf32>
    %884 = arith.addf %868, %883 : vector<1x256xf32>
    %c34_i32_148 = arith.constant 34 : i32
    %885 = tpu.dynamic_rotate %478 by %c34_i32_148 dim 1 : vector<1x256xf32>, i32 -> vector<1x256xf32>
    %886 = arith.andi %485, %493 : vector<1x256xi1>
    %cst_149 = arith.constant 0.000000e+00 : f32
    %887 = vector.broadcast %cst_149 : f32 to vector<1x256xf32>
    %888 = arith.select %886, %885, %887 : vector<1x256xi1>, vector<1x256xf32>
    %c25_150 = arith.constant 25 : index
    %889 = memref.load %arg8[%c25_150] : memref<225xf32, #tpu.memory_space<smem>>
    %890 = vector.broadcast %889 : f32 to vector<1x256xf32>
    %891 = arith.mulf %890, %888 : vector<1x256xf32>
    %c100 = arith.constant 100 : index
    %892 = memref.load %arg8[%c100] : memref<225xf32, #tpu.memory_space<smem>>
    %893 = vector.broadcast %892 : f32 to vector<1x256xf32>
    %894 = arith.mulf %893, %888 : vector<1x256xf32>
    %c175 = arith.constant 175 : index
    %895 = memref.load %arg8[%c175] : memref<225xf32, #tpu.memory_space<smem>>
    %896 = vector.broadcast %895 : f32 to vector<1x256xf32>
    %897 = arith.mulf %896, %888 : vector<1x256xf32>
    %c33_i32_151 = arith.constant 33 : i32
    %898 = tpu.dynamic_rotate %478 by %c33_i32_151 dim 1 : vector<1x256xf32>, i32 -> vector<1x256xf32>
    %899 = arith.andi %485, %495 : vector<1x256xi1>
    %cst_152 = arith.constant 0.000000e+00 : f32
    %900 = vector.broadcast %cst_152 : f32 to vector<1x256xf32>
    %901 = arith.select %899, %898, %900 : vector<1x256xi1>, vector<1x256xf32>
    %c26_153 = arith.constant 26 : index
    %902 = memref.load %arg8[%c26_153] : memref<225xf32, #tpu.memory_space<smem>>
    %903 = vector.broadcast %902 : f32 to vector<1x256xf32>
    %904 = arith.mulf %903, %901 : vector<1x256xf32>
    %905 = arith.addf %891, %904 : vector<1x256xf32>
    %c101 = arith.constant 101 : index
    %906 = memref.load %arg8[%c101] : memref<225xf32, #tpu.memory_space<smem>>
    %907 = vector.broadcast %906 : f32 to vector<1x256xf32>
    %908 = arith.mulf %907, %901 : vector<1x256xf32>
    %909 = arith.addf %894, %908 : vector<1x256xf32>
    %c176 = arith.constant 176 : index
    %910 = memref.load %arg8[%c176] : memref<225xf32, #tpu.memory_space<smem>>
    %911 = vector.broadcast %910 : f32 to vector<1x256xf32>
    %912 = arith.mulf %911, %901 : vector<1x256xf32>
    %913 = arith.addf %897, %912 : vector<1x256xf32>
    %c32_i32_154 = arith.constant 32 : i32
    %914 = tpu.dynamic_rotate %478 by %c32_i32_154 dim 1 : vector<1x256xf32>, i32 -> vector<1x256xf32>
    %cst_155 = arith.constant 0.000000e+00 : f32
    %915 = vector.broadcast %cst_155 : f32 to vector<1x256xf32>
    %916 = arith.select %485, %914, %915 : vector<1x256xi1>, vector<1x256xf32>
    %c27_156 = arith.constant 27 : index
    %917 = memref.load %arg8[%c27_156] : memref<225xf32, #tpu.memory_space<smem>>
    %918 = vector.broadcast %917 : f32 to vector<1x256xf32>
    %919 = arith.mulf %918, %916 : vector<1x256xf32>
    %920 = arith.addf %905, %919 : vector<1x256xf32>
    %c102 = arith.constant 102 : index
    %921 = memref.load %arg8[%c102] : memref<225xf32, #tpu.memory_space<smem>>
    %922 = vector.broadcast %921 : f32 to vector<1x256xf32>
    %923 = arith.mulf %922, %916 : vector<1x256xf32>
    %924 = arith.addf %909, %923 : vector<1x256xf32>
    %c177 = arith.constant 177 : index
    %925 = memref.load %arg8[%c177] : memref<225xf32, #tpu.memory_space<smem>>
    %926 = vector.broadcast %925 : f32 to vector<1x256xf32>
    %927 = arith.mulf %926, %916 : vector<1x256xf32>
    %928 = arith.addf %913, %927 : vector<1x256xf32>
    %c31_i32_157 = arith.constant 31 : i32
    %929 = tpu.dynamic_rotate %478 by %c31_i32_157 dim 1 : vector<1x256xf32>, i32 -> vector<1x256xf32>
    %930 = arith.andi %485, %497 : vector<1x256xi1>
    %cst_158 = arith.constant 0.000000e+00 : f32
    %931 = vector.broadcast %cst_158 : f32 to vector<1x256xf32>
    %932 = arith.select %930, %929, %931 : vector<1x256xi1>, vector<1x256xf32>
    %c28_159 = arith.constant 28 : index
    %933 = memref.load %arg8[%c28_159] : memref<225xf32, #tpu.memory_space<smem>>
    %934 = vector.broadcast %933 : f32 to vector<1x256xf32>
    %935 = arith.mulf %934, %932 : vector<1x256xf32>
    %936 = arith.addf %920, %935 : vector<1x256xf32>
    %c103 = arith.constant 103 : index
    %937 = memref.load %arg8[%c103] : memref<225xf32, #tpu.memory_space<smem>>
    %938 = vector.broadcast %937 : f32 to vector<1x256xf32>
    %939 = arith.mulf %938, %932 : vector<1x256xf32>
    %940 = arith.addf %924, %939 : vector<1x256xf32>
    %c178 = arith.constant 178 : index
    %941 = memref.load %arg8[%c178] : memref<225xf32, #tpu.memory_space<smem>>
    %942 = vector.broadcast %941 : f32 to vector<1x256xf32>
    %943 = arith.mulf %942, %932 : vector<1x256xf32>
    %944 = arith.addf %928, %943 : vector<1x256xf32>
    %c30_i32_160 = arith.constant 30 : i32
    %945 = tpu.dynamic_rotate %478 by %c30_i32_160 dim 1 : vector<1x256xf32>, i32 -> vector<1x256xf32>
    %946 = arith.andi %485, %499 : vector<1x256xi1>
    %cst_161 = arith.constant 0.000000e+00 : f32
    %947 = vector.broadcast %cst_161 : f32 to vector<1x256xf32>
    %948 = arith.select %946, %945, %947 : vector<1x256xi1>, vector<1x256xf32>
    %c29_162 = arith.constant 29 : index
    %949 = memref.load %arg8[%c29_162] : memref<225xf32, #tpu.memory_space<smem>>
    %950 = vector.broadcast %949 : f32 to vector<1x256xf32>
    %951 = arith.mulf %950, %948 : vector<1x256xf32>
    %952 = arith.addf %936, %951 : vector<1x256xf32>
    %c104 = arith.constant 104 : index
    %953 = memref.load %arg8[%c104] : memref<225xf32, #tpu.memory_space<smem>>
    %954 = vector.broadcast %953 : f32 to vector<1x256xf32>
    %955 = arith.mulf %954, %948 : vector<1x256xf32>
    %956 = arith.addf %940, %955 : vector<1x256xf32>
    %c179 = arith.constant 179 : index
    %957 = memref.load %arg8[%c179] : memref<225xf32, #tpu.memory_space<smem>>
    %958 = vector.broadcast %957 : f32 to vector<1x256xf32>
    %959 = arith.mulf %958, %948 : vector<1x256xf32>
    %960 = arith.addf %944, %959 : vector<1x256xf32>
    %c18_i32_163 = arith.constant 18 : i32
    %961 = tpu.dynamic_rotate %478 by %c18_i32_163 dim 1 : vector<1x256xf32>, i32 -> vector<1x256xf32>
    %962 = arith.andi %487, %493 : vector<1x256xi1>
    %cst_164 = arith.constant 0.000000e+00 : f32
    %963 = vector.broadcast %cst_164 : f32 to vector<1x256xf32>
    %964 = arith.select %962, %961, %963 : vector<1x256xi1>, vector<1x256xf32>
    %c30_165 = arith.constant 30 : index
    %965 = memref.load %arg8[%c30_165] : memref<225xf32, #tpu.memory_space<smem>>
    %966 = vector.broadcast %965 : f32 to vector<1x256xf32>
    %967 = arith.mulf %966, %964 : vector<1x256xf32>
    %968 = arith.addf %952, %967 : vector<1x256xf32>
    %c105 = arith.constant 105 : index
    %969 = memref.load %arg8[%c105] : memref<225xf32, #tpu.memory_space<smem>>
    %970 = vector.broadcast %969 : f32 to vector<1x256xf32>
    %971 = arith.mulf %970, %964 : vector<1x256xf32>
    %972 = arith.addf %956, %971 : vector<1x256xf32>
    %c180 = arith.constant 180 : index
    %973 = memref.load %arg8[%c180] : memref<225xf32, #tpu.memory_space<smem>>
    %974 = vector.broadcast %973 : f32 to vector<1x256xf32>
    %975 = arith.mulf %974, %964 : vector<1x256xf32>
    %976 = arith.addf %960, %975 : vector<1x256xf32>
    %c17_i32_166 = arith.constant 17 : i32
    %977 = tpu.dynamic_rotate %478 by %c17_i32_166 dim 1 : vector<1x256xf32>, i32 -> vector<1x256xf32>
    %978 = arith.andi %487, %495 : vector<1x256xi1>
    %cst_167 = arith.constant 0.000000e+00 : f32
    %979 = vector.broadcast %cst_167 : f32 to vector<1x256xf32>
    %980 = arith.select %978, %977, %979 : vector<1x256xi1>, vector<1x256xf32>
    %c31_168 = arith.constant 31 : index
    %981 = memref.load %arg8[%c31_168] : memref<225xf32, #tpu.memory_space<smem>>
    %982 = vector.broadcast %981 : f32 to vector<1x256xf32>
    %983 = arith.mulf %982, %980 : vector<1x256xf32>
    %984 = arith.addf %968, %983 : vector<1x256xf32>
    %c106 = arith.constant 106 : index
    %985 = memref.load %arg8[%c106] : memref<225xf32, #tpu.memory_space<smem>>
    %986 = vector.broadcast %985 : f32 to vector<1x256xf32>
    %987 = arith.mulf %986, %980 : vector<1x256xf32>
    %988 = arith.addf %972, %987 : vector<1x256xf32>
    %c181 = arith.constant 181 : index
    %989 = memref.load %arg8[%c181] : memref<225xf32, #tpu.memory_space<smem>>
    %990 = vector.broadcast %989 : f32 to vector<1x256xf32>
    %991 = arith.mulf %990, %980 : vector<1x256xf32>
    %992 = arith.addf %976, %991 : vector<1x256xf32>
    %c16_i32_169 = arith.constant 16 : i32
    %993 = tpu.dynamic_rotate %478 by %c16_i32_169 dim 1 : vector<1x256xf32>, i32 -> vector<1x256xf32>
    %cst_170 = arith.constant 0.000000e+00 : f32
    %994 = vector.broadcast %cst_170 : f32 to vector<1x256xf32>
    %995 = arith.select %487, %993, %994 : vector<1x256xi1>, vector<1x256xf32>
    %c32_171 = arith.constant 32 : index
    %996 = memref.load %arg8[%c32_171] : memref<225xf32, #tpu.memory_space<smem>>
    %997 = vector.broadcast %996 : f32 to vector<1x256xf32>
    %998 = arith.mulf %997, %995 : vector<1x256xf32>
    %999 = arith.addf %984, %998 : vector<1x256xf32>
    %c107 = arith.constant 107 : index
    %1000 = memref.load %arg8[%c107] : memref<225xf32, #tpu.memory_space<smem>>
    %1001 = vector.broadcast %1000 : f32 to vector<1x256xf32>
    %1002 = arith.mulf %1001, %995 : vector<1x256xf32>
    %1003 = arith.addf %988, %1002 : vector<1x256xf32>
    %c182 = arith.constant 182 : index
    %1004 = memref.load %arg8[%c182] : memref<225xf32, #tpu.memory_space<smem>>
    %1005 = vector.broadcast %1004 : f32 to vector<1x256xf32>
    %1006 = arith.mulf %1005, %995 : vector<1x256xf32>
    %1007 = arith.addf %992, %1006 : vector<1x256xf32>
    %c15_i32_172 = arith.constant 15 : i32
    %1008 = tpu.dynamic_rotate %478 by %c15_i32_172 dim 1 : vector<1x256xf32>, i32 -> vector<1x256xf32>
    %1009 = arith.andi %487, %497 : vector<1x256xi1>
    %cst_173 = arith.constant 0.000000e+00 : f32
    %1010 = vector.broadcast %cst_173 : f32 to vector<1x256xf32>
    %1011 = arith.select %1009, %1008, %1010 : vector<1x256xi1>, vector<1x256xf32>
    %c33_174 = arith.constant 33 : index
    %1012 = memref.load %arg8[%c33_174] : memref<225xf32, #tpu.memory_space<smem>>
    %1013 = vector.broadcast %1012 : f32 to vector<1x256xf32>
    %1014 = arith.mulf %1013, %1011 : vector<1x256xf32>
    %1015 = arith.addf %999, %1014 : vector<1x256xf32>
    %c108 = arith.constant 108 : index
    %1016 = memref.load %arg8[%c108] : memref<225xf32, #tpu.memory_space<smem>>
    %1017 = vector.broadcast %1016 : f32 to vector<1x256xf32>
    %1018 = arith.mulf %1017, %1011 : vector<1x256xf32>
    %1019 = arith.addf %1003, %1018 : vector<1x256xf32>
    %c183 = arith.constant 183 : index
    %1020 = memref.load %arg8[%c183] : memref<225xf32, #tpu.memory_space<smem>>
    %1021 = vector.broadcast %1020 : f32 to vector<1x256xf32>
    %1022 = arith.mulf %1021, %1011 : vector<1x256xf32>
    %1023 = arith.addf %1007, %1022 : vector<1x256xf32>
    %c14_i32_175 = arith.constant 14 : i32
    %1024 = tpu.dynamic_rotate %478 by %c14_i32_175 dim 1 : vector<1x256xf32>, i32 -> vector<1x256xf32>
    %1025 = arith.andi %487, %499 : vector<1x256xi1>
    %cst_176 = arith.constant 0.000000e+00 : f32
    %1026 = vector.broadcast %cst_176 : f32 to vector<1x256xf32>
    %1027 = arith.select %1025, %1024, %1026 : vector<1x256xi1>, vector<1x256xf32>
    %c34_177 = arith.constant 34 : index
    %1028 = memref.load %arg8[%c34_177] : memref<225xf32, #tpu.memory_space<smem>>
    %1029 = vector.broadcast %1028 : f32 to vector<1x256xf32>
    %1030 = arith.mulf %1029, %1027 : vector<1x256xf32>
    %1031 = arith.addf %1015, %1030 : vector<1x256xf32>
    %c109 = arith.constant 109 : index
    %1032 = memref.load %arg8[%c109] : memref<225xf32, #tpu.memory_space<smem>>
    %1033 = vector.broadcast %1032 : f32 to vector<1x256xf32>
    %1034 = arith.mulf %1033, %1027 : vector<1x256xf32>
    %1035 = arith.addf %1019, %1034 : vector<1x256xf32>
    %c184 = arith.constant 184 : index
    %1036 = memref.load %arg8[%c184] : memref<225xf32, #tpu.memory_space<smem>>
    %1037 = vector.broadcast %1036 : f32 to vector<1x256xf32>
    %1038 = arith.mulf %1037, %1027 : vector<1x256xf32>
    %1039 = arith.addf %1023, %1038 : vector<1x256xf32>
    %c2_i32_178 = arith.constant 2 : i32
    %1040 = tpu.dynamic_rotate %478 by %c2_i32_178 dim 1 : vector<1x256xf32>, i32 -> vector<1x256xf32>
    %cst_179 = arith.constant 0.000000e+00 : f32
    %1041 = vector.broadcast %cst_179 : f32 to vector<1x256xf32>
    %1042 = arith.select %493, %1040, %1041 : vector<1x256xi1>, vector<1x256xf32>
    %c35_180 = arith.constant 35 : index
    %1043 = memref.load %arg8[%c35_180] : memref<225xf32, #tpu.memory_space<smem>>
    %1044 = vector.broadcast %1043 : f32 to vector<1x256xf32>
    %1045 = arith.mulf %1044, %1042 : vector<1x256xf32>
    %1046 = arith.addf %1031, %1045 : vector<1x256xf32>
    %c110 = arith.constant 110 : index
    %1047 = memref.load %arg8[%c110] : memref<225xf32, #tpu.memory_space<smem>>
    %1048 = vector.broadcast %1047 : f32 to vector<1x256xf32>
    %1049 = arith.mulf %1048, %1042 : vector<1x256xf32>
    %1050 = arith.addf %1035, %1049 : vector<1x256xf32>
    %c185 = arith.constant 185 : index
    %1051 = memref.load %arg8[%c185] : memref<225xf32, #tpu.memory_space<smem>>
    %1052 = vector.broadcast %1051 : f32 to vector<1x256xf32>
    %1053 = arith.mulf %1052, %1042 : vector<1x256xf32>
    %1054 = arith.addf %1039, %1053 : vector<1x256xf32>
    %c1_i32_181 = arith.constant 1 : i32
    %1055 = tpu.dynamic_rotate %478 by %c1_i32_181 dim 1 : vector<1x256xf32>, i32 -> vector<1x256xf32>
    %cst_182 = arith.constant 0.000000e+00 : f32
    %1056 = vector.broadcast %cst_182 : f32 to vector<1x256xf32>
    %1057 = arith.select %495, %1055, %1056 : vector<1x256xi1>, vector<1x256xf32>
    %c36_183 = arith.constant 36 : index
    %1058 = memref.load %arg8[%c36_183] : memref<225xf32, #tpu.memory_space<smem>>
    %1059 = vector.broadcast %1058 : f32 to vector<1x256xf32>
    %1060 = arith.mulf %1059, %1057 : vector<1x256xf32>
    %1061 = arith.addf %1046, %1060 : vector<1x256xf32>
    %c111 = arith.constant 111 : index
    %1062 = memref.load %arg8[%c111] : memref<225xf32, #tpu.memory_space<smem>>
    %1063 = vector.broadcast %1062 : f32 to vector<1x256xf32>
    %1064 = arith.mulf %1063, %1057 : vector<1x256xf32>
    %1065 = arith.addf %1050, %1064 : vector<1x256xf32>
    %c186 = arith.constant 186 : index
    %1066 = memref.load %arg8[%c186] : memref<225xf32, #tpu.memory_space<smem>>
    %1067 = vector.broadcast %1066 : f32 to vector<1x256xf32>
    %1068 = arith.mulf %1067, %1057 : vector<1x256xf32>
    %1069 = arith.addf %1054, %1068 : vector<1x256xf32>
    %c37_184 = arith.constant 37 : index
    %1070 = memref.load %arg8[%c37_184] : memref<225xf32, #tpu.memory_space<smem>>
    %1071 = vector.broadcast %1070 : f32 to vector<1x256xf32>
    %1072 = arith.mulf %1071, %478 : vector<1x256xf32>
    %1073 = arith.addf %1061, %1072 : vector<1x256xf32>
    %c112 = arith.constant 112 : index
    %1074 = memref.load %arg8[%c112] : memref<225xf32, #tpu.memory_space<smem>>
    %1075 = vector.broadcast %1074 : f32 to vector<1x256xf32>
    %1076 = arith.mulf %1075, %478 : vector<1x256xf32>
    %1077 = arith.addf %1065, %1076 : vector<1x256xf32>
    %c187 = arith.constant 187 : index
    %1078 = memref.load %arg8[%c187] : memref<225xf32, #tpu.memory_space<smem>>
    %1079 = vector.broadcast %1078 : f32 to vector<1x256xf32>
    %1080 = arith.mulf %1079, %478 : vector<1x256xf32>
    %1081 = arith.addf %1069, %1080 : vector<1x256xf32>
    %c255_i32_185 = arith.constant 255 : i32
    %1082 = tpu.dynamic_rotate %478 by %c255_i32_185 dim 1 : vector<1x256xf32>, i32 -> vector<1x256xf32>
    %cst_186 = arith.constant 0.000000e+00 : f32
    %1083 = vector.broadcast %cst_186 : f32 to vector<1x256xf32>
    %1084 = arith.select %497, %1082, %1083 : vector<1x256xi1>, vector<1x256xf32>
    %c38_187 = arith.constant 38 : index
    %1085 = memref.load %arg8[%c38_187] : memref<225xf32, #tpu.memory_space<smem>>
    %1086 = vector.broadcast %1085 : f32 to vector<1x256xf32>
    %1087 = arith.mulf %1086, %1084 : vector<1x256xf32>
    %1088 = arith.addf %1073, %1087 : vector<1x256xf32>
    %c113 = arith.constant 113 : index
    %1089 = memref.load %arg8[%c113] : memref<225xf32, #tpu.memory_space<smem>>
    %1090 = vector.broadcast %1089 : f32 to vector<1x256xf32>
    %1091 = arith.mulf %1090, %1084 : vector<1x256xf32>
    %1092 = arith.addf %1077, %1091 : vector<1x256xf32>
    %c188 = arith.constant 188 : index
    %1093 = memref.load %arg8[%c188] : memref<225xf32, #tpu.memory_space<smem>>
    %1094 = vector.broadcast %1093 : f32 to vector<1x256xf32>
    %1095 = arith.mulf %1094, %1084 : vector<1x256xf32>
    %1096 = arith.addf %1081, %1095 : vector<1x256xf32>
    %c254_i32_188 = arith.constant 254 : i32
    %1097 = tpu.dynamic_rotate %478 by %c254_i32_188 dim 1 : vector<1x256xf32>, i32 -> vector<1x256xf32>
    %cst_189 = arith.constant 0.000000e+00 : f32
    %1098 = vector.broadcast %cst_189 : f32 to vector<1x256xf32>
    %1099 = arith.select %499, %1097, %1098 : vector<1x256xi1>, vector<1x256xf32>
    %c39_190 = arith.constant 39 : index
    %1100 = memref.load %arg8[%c39_190] : memref<225xf32, #tpu.memory_space<smem>>
    %1101 = vector.broadcast %1100 : f32 to vector<1x256xf32>
    %1102 = arith.mulf %1101, %1099 : vector<1x256xf32>
    %1103 = arith.addf %1088, %1102 : vector<1x256xf32>
    %c114 = arith.constant 114 : index
    %1104 = memref.load %arg8[%c114] : memref<225xf32, #tpu.memory_space<smem>>
    %1105 = vector.broadcast %1104 : f32 to vector<1x256xf32>
    %1106 = arith.mulf %1105, %1099 : vector<1x256xf32>
    %1107 = arith.addf %1092, %1106 : vector<1x256xf32>
    %c189 = arith.constant 189 : index
    %1108 = memref.load %arg8[%c189] : memref<225xf32, #tpu.memory_space<smem>>
    %1109 = vector.broadcast %1108 : f32 to vector<1x256xf32>
    %1110 = arith.mulf %1109, %1099 : vector<1x256xf32>
    %1111 = arith.addf %1096, %1110 : vector<1x256xf32>
    %c242_i32_191 = arith.constant 242 : i32
    %1112 = tpu.dynamic_rotate %478 by %c242_i32_191 dim 1 : vector<1x256xf32>, i32 -> vector<1x256xf32>
    %1113 = arith.andi %489, %493 : vector<1x256xi1>
    %cst_192 = arith.constant 0.000000e+00 : f32
    %1114 = vector.broadcast %cst_192 : f32 to vector<1x256xf32>
    %1115 = arith.select %1113, %1112, %1114 : vector<1x256xi1>, vector<1x256xf32>
    %c40_193 = arith.constant 40 : index
    %1116 = memref.load %arg8[%c40_193] : memref<225xf32, #tpu.memory_space<smem>>
    %1117 = vector.broadcast %1116 : f32 to vector<1x256xf32>
    %1118 = arith.mulf %1117, %1115 : vector<1x256xf32>
    %1119 = arith.addf %1103, %1118 : vector<1x256xf32>
    %c115 = arith.constant 115 : index
    %1120 = memref.load %arg8[%c115] : memref<225xf32, #tpu.memory_space<smem>>
    %1121 = vector.broadcast %1120 : f32 to vector<1x256xf32>
    %1122 = arith.mulf %1121, %1115 : vector<1x256xf32>
    %1123 = arith.addf %1107, %1122 : vector<1x256xf32>
    %c190 = arith.constant 190 : index
    %1124 = memref.load %arg8[%c190] : memref<225xf32, #tpu.memory_space<smem>>
    %1125 = vector.broadcast %1124 : f32 to vector<1x256xf32>
    %1126 = arith.mulf %1125, %1115 : vector<1x256xf32>
    %1127 = arith.addf %1111, %1126 : vector<1x256xf32>
    %c241_i32_194 = arith.constant 241 : i32
    %1128 = tpu.dynamic_rotate %478 by %c241_i32_194 dim 1 : vector<1x256xf32>, i32 -> vector<1x256xf32>
    %1129 = arith.andi %489, %495 : vector<1x256xi1>
    %cst_195 = arith.constant 0.000000e+00 : f32
    %1130 = vector.broadcast %cst_195 : f32 to vector<1x256xf32>
    %1131 = arith.select %1129, %1128, %1130 : vector<1x256xi1>, vector<1x256xf32>
    %c41_196 = arith.constant 41 : index
    %1132 = memref.load %arg8[%c41_196] : memref<225xf32, #tpu.memory_space<smem>>
    %1133 = vector.broadcast %1132 : f32 to vector<1x256xf32>
    %1134 = arith.mulf %1133, %1131 : vector<1x256xf32>
    %1135 = arith.addf %1119, %1134 : vector<1x256xf32>
    %c116 = arith.constant 116 : index
    %1136 = memref.load %arg8[%c116] : memref<225xf32, #tpu.memory_space<smem>>
    %1137 = vector.broadcast %1136 : f32 to vector<1x256xf32>
    %1138 = arith.mulf %1137, %1131 : vector<1x256xf32>
    %1139 = arith.addf %1123, %1138 : vector<1x256xf32>
    %c191 = arith.constant 191 : index
    %1140 = memref.load %arg8[%c191] : memref<225xf32, #tpu.memory_space<smem>>
    %1141 = vector.broadcast %1140 : f32 to vector<1x256xf32>
    %1142 = arith.mulf %1141, %1131 : vector<1x256xf32>
    %1143 = arith.addf %1127, %1142 : vector<1x256xf32>
    %c240_i32_197 = arith.constant 240 : i32
    %1144 = tpu.dynamic_rotate %478 by %c240_i32_197 dim 1 : vector<1x256xf32>, i32 -> vector<1x256xf32>
    %cst_198 = arith.constant 0.000000e+00 : f32
    %1145 = vector.broadcast %cst_198 : f32 to vector<1x256xf32>
    %1146 = arith.select %489, %1144, %1145 : vector<1x256xi1>, vector<1x256xf32>
    %c42_199 = arith.constant 42 : index
    %1147 = memref.load %arg8[%c42_199] : memref<225xf32, #tpu.memory_space<smem>>
    %1148 = vector.broadcast %1147 : f32 to vector<1x256xf32>
    %1149 = arith.mulf %1148, %1146 : vector<1x256xf32>
    %1150 = arith.addf %1135, %1149 : vector<1x256xf32>
    %c117 = arith.constant 117 : index
    %1151 = memref.load %arg8[%c117] : memref<225xf32, #tpu.memory_space<smem>>
    %1152 = vector.broadcast %1151 : f32 to vector<1x256xf32>
    %1153 = arith.mulf %1152, %1146 : vector<1x256xf32>
    %1154 = arith.addf %1139, %1153 : vector<1x256xf32>
    %c192 = arith.constant 192 : index
    %1155 = memref.load %arg8[%c192] : memref<225xf32, #tpu.memory_space<smem>>
    %1156 = vector.broadcast %1155 : f32 to vector<1x256xf32>
    %1157 = arith.mulf %1156, %1146 : vector<1x256xf32>
    %1158 = arith.addf %1143, %1157 : vector<1x256xf32>
    %c239_i32_200 = arith.constant 239 : i32
    %1159 = tpu.dynamic_rotate %478 by %c239_i32_200 dim 1 : vector<1x256xf32>, i32 -> vector<1x256xf32>
    %1160 = arith.andi %489, %497 : vector<1x256xi1>
    %cst_201 = arith.constant 0.000000e+00 : f32
    %1161 = vector.broadcast %cst_201 : f32 to vector<1x256xf32>
    %1162 = arith.select %1160, %1159, %1161 : vector<1x256xi1>, vector<1x256xf32>
    %c43_202 = arith.constant 43 : index
    %1163 = memref.load %arg8[%c43_202] : memref<225xf32, #tpu.memory_space<smem>>
    %1164 = vector.broadcast %1163 : f32 to vector<1x256xf32>
    %1165 = arith.mulf %1164, %1162 : vector<1x256xf32>
    %1166 = arith.addf %1150, %1165 : vector<1x256xf32>
    %c118 = arith.constant 118 : index
    %1167 = memref.load %arg8[%c118] : memref<225xf32, #tpu.memory_space<smem>>
    %1168 = vector.broadcast %1167 : f32 to vector<1x256xf32>
    %1169 = arith.mulf %1168, %1162 : vector<1x256xf32>
    %1170 = arith.addf %1154, %1169 : vector<1x256xf32>
    %c193 = arith.constant 193 : index
    %1171 = memref.load %arg8[%c193] : memref<225xf32, #tpu.memory_space<smem>>
    %1172 = vector.broadcast %1171 : f32 to vector<1x256xf32>
    %1173 = arith.mulf %1172, %1162 : vector<1x256xf32>
    %1174 = arith.addf %1158, %1173 : vector<1x256xf32>
    %c238_i32_203 = arith.constant 238 : i32
    %1175 = tpu.dynamic_rotate %478 by %c238_i32_203 dim 1 : vector<1x256xf32>, i32 -> vector<1x256xf32>
    %1176 = arith.andi %489, %499 : vector<1x256xi1>
    %cst_204 = arith.constant 0.000000e+00 : f32
    %1177 = vector.broadcast %cst_204 : f32 to vector<1x256xf32>
    %1178 = arith.select %1176, %1175, %1177 : vector<1x256xi1>, vector<1x256xf32>
    %c44_205 = arith.constant 44 : index
    %1179 = memref.load %arg8[%c44_205] : memref<225xf32, #tpu.memory_space<smem>>
    %1180 = vector.broadcast %1179 : f32 to vector<1x256xf32>
    %1181 = arith.mulf %1180, %1178 : vector<1x256xf32>
    %1182 = arith.addf %1166, %1181 : vector<1x256xf32>
    %c119 = arith.constant 119 : index
    %1183 = memref.load %arg8[%c119] : memref<225xf32, #tpu.memory_space<smem>>
    %1184 = vector.broadcast %1183 : f32 to vector<1x256xf32>
    %1185 = arith.mulf %1184, %1178 : vector<1x256xf32>
    %1186 = arith.addf %1170, %1185 : vector<1x256xf32>
    %c194 = arith.constant 194 : index
    %1187 = memref.load %arg8[%c194] : memref<225xf32, #tpu.memory_space<smem>>
    %1188 = vector.broadcast %1187 : f32 to vector<1x256xf32>
    %1189 = arith.mulf %1188, %1178 : vector<1x256xf32>
    %1190 = arith.addf %1174, %1189 : vector<1x256xf32>
    %c226_i32_206 = arith.constant 226 : i32
    %1191 = tpu.dynamic_rotate %478 by %c226_i32_206 dim 1 : vector<1x256xf32>, i32 -> vector<1x256xf32>
    %1192 = arith.andi %491, %493 : vector<1x256xi1>
    %cst_207 = arith.constant 0.000000e+00 : f32
    %1193 = vector.broadcast %cst_207 : f32 to vector<1x256xf32>
    %1194 = arith.select %1192, %1191, %1193 : vector<1x256xi1>, vector<1x256xf32>
    %c45_208 = arith.constant 45 : index
    %1195 = memref.load %arg8[%c45_208] : memref<225xf32, #tpu.memory_space<smem>>
    %1196 = vector.broadcast %1195 : f32 to vector<1x256xf32>
    %1197 = arith.mulf %1196, %1194 : vector<1x256xf32>
    %1198 = arith.addf %1182, %1197 : vector<1x256xf32>
    %c120 = arith.constant 120 : index
    %1199 = memref.load %arg8[%c120] : memref<225xf32, #tpu.memory_space<smem>>
    %1200 = vector.broadcast %1199 : f32 to vector<1x256xf32>
    %1201 = arith.mulf %1200, %1194 : vector<1x256xf32>
    %1202 = arith.addf %1186, %1201 : vector<1x256xf32>
    %c195 = arith.constant 195 : index
    %1203 = memref.load %arg8[%c195] : memref<225xf32, #tpu.memory_space<smem>>
    %1204 = vector.broadcast %1203 : f32 to vector<1x256xf32>
    %1205 = arith.mulf %1204, %1194 : vector<1x256xf32>
    %1206 = arith.addf %1190, %1205 : vector<1x256xf32>
    %c225_i32_209 = arith.constant 225 : i32
    %1207 = tpu.dynamic_rotate %478 by %c225_i32_209 dim 1 : vector<1x256xf32>, i32 -> vector<1x256xf32>
    %1208 = arith.andi %491, %495 : vector<1x256xi1>
    %cst_210 = arith.constant 0.000000e+00 : f32
    %1209 = vector.broadcast %cst_210 : f32 to vector<1x256xf32>
    %1210 = arith.select %1208, %1207, %1209 : vector<1x256xi1>, vector<1x256xf32>
    %c46_211 = arith.constant 46 : index
    %1211 = memref.load %arg8[%c46_211] : memref<225xf32, #tpu.memory_space<smem>>
    %1212 = vector.broadcast %1211 : f32 to vector<1x256xf32>
    %1213 = arith.mulf %1212, %1210 : vector<1x256xf32>
    %1214 = arith.addf %1198, %1213 : vector<1x256xf32>
    %c121 = arith.constant 121 : index
    %1215 = memref.load %arg8[%c121] : memref<225xf32, #tpu.memory_space<smem>>
    %1216 = vector.broadcast %1215 : f32 to vector<1x256xf32>
    %1217 = arith.mulf %1216, %1210 : vector<1x256xf32>
    %1218 = arith.addf %1202, %1217 : vector<1x256xf32>
    %c196 = arith.constant 196 : index
    %1219 = memref.load %arg8[%c196] : memref<225xf32, #tpu.memory_space<smem>>
    %1220 = vector.broadcast %1219 : f32 to vector<1x256xf32>
    %1221 = arith.mulf %1220, %1210 : vector<1x256xf32>
    %1222 = arith.addf %1206, %1221 : vector<1x256xf32>
    %c224_i32_212 = arith.constant 224 : i32
    %1223 = tpu.dynamic_rotate %478 by %c224_i32_212 dim 1 : vector<1x256xf32>, i32 -> vector<1x256xf32>
    %cst_213 = arith.constant 0.000000e+00 : f32
    %1224 = vector.broadcast %cst_213 : f32 to vector<1x256xf32>
    %1225 = arith.select %491, %1223, %1224 : vector<1x256xi1>, vector<1x256xf32>
    %c47_214 = arith.constant 47 : index
    %1226 = memref.load %arg8[%c47_214] : memref<225xf32, #tpu.memory_space<smem>>
    %1227 = vector.broadcast %1226 : f32 to vector<1x256xf32>
    %1228 = arith.mulf %1227, %1225 : vector<1x256xf32>
    %1229 = arith.addf %1214, %1228 : vector<1x256xf32>
    %c122 = arith.constant 122 : index
    %1230 = memref.load %arg8[%c122] : memref<225xf32, #tpu.memory_space<smem>>
    %1231 = vector.broadcast %1230 : f32 to vector<1x256xf32>
    %1232 = arith.mulf %1231, %1225 : vector<1x256xf32>
    %1233 = arith.addf %1218, %1232 : vector<1x256xf32>
    %c197 = arith.constant 197 : index
    %1234 = memref.load %arg8[%c197] : memref<225xf32, #tpu.memory_space<smem>>
    %1235 = vector.broadcast %1234 : f32 to vector<1x256xf32>
    %1236 = arith.mulf %1235, %1225 : vector<1x256xf32>
    %1237 = arith.addf %1222, %1236 : vector<1x256xf32>
    %c223_i32_215 = arith.constant 223 : i32
    %1238 = tpu.dynamic_rotate %478 by %c223_i32_215 dim 1 : vector<1x256xf32>, i32 -> vector<1x256xf32>
    %1239 = arith.andi %491, %497 : vector<1x256xi1>
    %cst_216 = arith.constant 0.000000e+00 : f32
    %1240 = vector.broadcast %cst_216 : f32 to vector<1x256xf32>
    %1241 = arith.select %1239, %1238, %1240 : vector<1x256xi1>, vector<1x256xf32>
    %c48_217 = arith.constant 48 : index
    %1242 = memref.load %arg8[%c48_217] : memref<225xf32, #tpu.memory_space<smem>>
    %1243 = vector.broadcast %1242 : f32 to vector<1x256xf32>
    %1244 = arith.mulf %1243, %1241 : vector<1x256xf32>
    %1245 = arith.addf %1229, %1244 : vector<1x256xf32>
    %c123 = arith.constant 123 : index
    %1246 = memref.load %arg8[%c123] : memref<225xf32, #tpu.memory_space<smem>>
    %1247 = vector.broadcast %1246 : f32 to vector<1x256xf32>
    %1248 = arith.mulf %1247, %1241 : vector<1x256xf32>
    %1249 = arith.addf %1233, %1248 : vector<1x256xf32>
    %c198 = arith.constant 198 : index
    %1250 = memref.load %arg8[%c198] : memref<225xf32, #tpu.memory_space<smem>>
    %1251 = vector.broadcast %1250 : f32 to vector<1x256xf32>
    %1252 = arith.mulf %1251, %1241 : vector<1x256xf32>
    %1253 = arith.addf %1237, %1252 : vector<1x256xf32>
    %c222_i32_218 = arith.constant 222 : i32
    %1254 = tpu.dynamic_rotate %478 by %c222_i32_218 dim 1 : vector<1x256xf32>, i32 -> vector<1x256xf32>
    %1255 = arith.andi %491, %499 : vector<1x256xi1>
    %cst_219 = arith.constant 0.000000e+00 : f32
    %1256 = vector.broadcast %cst_219 : f32 to vector<1x256xf32>
    %1257 = arith.select %1255, %1254, %1256 : vector<1x256xi1>, vector<1x256xf32>
    %c49_220 = arith.constant 49 : index
    %1258 = memref.load %arg8[%c49_220] : memref<225xf32, #tpu.memory_space<smem>>
    %1259 = vector.broadcast %1258 : f32 to vector<1x256xf32>
    %1260 = arith.mulf %1259, %1257 : vector<1x256xf32>
    %1261 = arith.addf %1245, %1260 : vector<1x256xf32>
    %c124 = arith.constant 124 : index
    %1262 = memref.load %arg8[%c124] : memref<225xf32, #tpu.memory_space<smem>>
    %1263 = vector.broadcast %1262 : f32 to vector<1x256xf32>
    %1264 = arith.mulf %1263, %1257 : vector<1x256xf32>
    %1265 = arith.addf %1249, %1264 : vector<1x256xf32>
    %c199 = arith.constant 199 : index
    %1266 = memref.load %arg8[%c199] : memref<225xf32, #tpu.memory_space<smem>>
    %1267 = vector.broadcast %1266 : f32 to vector<1x256xf32>
    %1268 = arith.mulf %1267, %1257 : vector<1x256xf32>
    %1269 = arith.addf %1253, %1268 : vector<1x256xf32>
    %1270 = arith.addf %876, %1261 : vector<1x256xf32>
    %1271 = arith.addf %880, %1265 : vector<1x256xf32>
    %1272 = arith.addf %884, %1269 : vector<1x256xf32>
    %c34_i32_221 = arith.constant 34 : i32
    %1273 = tpu.dynamic_rotate %483 by %c34_i32_221 dim 1 : vector<1x256xf32>, i32 -> vector<1x256xf32>
    %1274 = arith.andi %485, %493 : vector<1x256xi1>
    %cst_222 = arith.constant 0.000000e+00 : f32
    %1275 = vector.broadcast %cst_222 : f32 to vector<1x256xf32>
    %1276 = arith.select %1274, %1273, %1275 : vector<1x256xi1>, vector<1x256xf32>
    %c50_223 = arith.constant 50 : index
    %1277 = memref.load %arg8[%c50_223] : memref<225xf32, #tpu.memory_space<smem>>
    %1278 = vector.broadcast %1277 : f32 to vector<1x256xf32>
    %1279 = arith.mulf %1278, %1276 : vector<1x256xf32>
    %c125 = arith.constant 125 : index
    %1280 = memref.load %arg8[%c125] : memref<225xf32, #tpu.memory_space<smem>>
    %1281 = vector.broadcast %1280 : f32 to vector<1x256xf32>
    %1282 = arith.mulf %1281, %1276 : vector<1x256xf32>
    %c200 = arith.constant 200 : index
    %1283 = memref.load %arg8[%c200] : memref<225xf32, #tpu.memory_space<smem>>
    %1284 = vector.broadcast %1283 : f32 to vector<1x256xf32>
    %1285 = arith.mulf %1284, %1276 : vector<1x256xf32>
    %c33_i32_224 = arith.constant 33 : i32
    %1286 = tpu.dynamic_rotate %483 by %c33_i32_224 dim 1 : vector<1x256xf32>, i32 -> vector<1x256xf32>
    %1287 = arith.andi %485, %495 : vector<1x256xi1>
    %cst_225 = arith.constant 0.000000e+00 : f32
    %1288 = vector.broadcast %cst_225 : f32 to vector<1x256xf32>
    %1289 = arith.select %1287, %1286, %1288 : vector<1x256xi1>, vector<1x256xf32>
    %c51_226 = arith.constant 51 : index
    %1290 = memref.load %arg8[%c51_226] : memref<225xf32, #tpu.memory_space<smem>>
    %1291 = vector.broadcast %1290 : f32 to vector<1x256xf32>
    %1292 = arith.mulf %1291, %1289 : vector<1x256xf32>
    %1293 = arith.addf %1279, %1292 : vector<1x256xf32>
    %c126 = arith.constant 126 : index
    %1294 = memref.load %arg8[%c126] : memref<225xf32, #tpu.memory_space<smem>>
    %1295 = vector.broadcast %1294 : f32 to vector<1x256xf32>
    %1296 = arith.mulf %1295, %1289 : vector<1x256xf32>
    %1297 = arith.addf %1282, %1296 : vector<1x256xf32>
    %c201 = arith.constant 201 : index
    %1298 = memref.load %arg8[%c201] : memref<225xf32, #tpu.memory_space<smem>>
    %1299 = vector.broadcast %1298 : f32 to vector<1x256xf32>
    %1300 = arith.mulf %1299, %1289 : vector<1x256xf32>
    %1301 = arith.addf %1285, %1300 : vector<1x256xf32>
    %c32_i32_227 = arith.constant 32 : i32
    %1302 = tpu.dynamic_rotate %483 by %c32_i32_227 dim 1 : vector<1x256xf32>, i32 -> vector<1x256xf32>
    %cst_228 = arith.constant 0.000000e+00 : f32
    %1303 = vector.broadcast %cst_228 : f32 to vector<1x256xf32>
    %1304 = arith.select %485, %1302, %1303 : vector<1x256xi1>, vector<1x256xf32>
    %c52_229 = arith.constant 52 : index
    %1305 = memref.load %arg8[%c52_229] : memref<225xf32, #tpu.memory_space<smem>>
    %1306 = vector.broadcast %1305 : f32 to vector<1x256xf32>
    %1307 = arith.mulf %1306, %1304 : vector<1x256xf32>
    %1308 = arith.addf %1293, %1307 : vector<1x256xf32>
    %c127 = arith.constant 127 : index
    %1309 = memref.load %arg8[%c127] : memref<225xf32, #tpu.memory_space<smem>>
    %1310 = vector.broadcast %1309 : f32 to vector<1x256xf32>
    %1311 = arith.mulf %1310, %1304 : vector<1x256xf32>
    %1312 = arith.addf %1297, %1311 : vector<1x256xf32>
    %c202 = arith.constant 202 : index
    %1313 = memref.load %arg8[%c202] : memref<225xf32, #tpu.memory_space<smem>>
    %1314 = vector.broadcast %1313 : f32 to vector<1x256xf32>
    %1315 = arith.mulf %1314, %1304 : vector<1x256xf32>
    %1316 = arith.addf %1301, %1315 : vector<1x256xf32>
    %c31_i32_230 = arith.constant 31 : i32
    %1317 = tpu.dynamic_rotate %483 by %c31_i32_230 dim 1 : vector<1x256xf32>, i32 -> vector<1x256xf32>
    %1318 = arith.andi %485, %497 : vector<1x256xi1>
    %cst_231 = arith.constant 0.000000e+00 : f32
    %1319 = vector.broadcast %cst_231 : f32 to vector<1x256xf32>
    %1320 = arith.select %1318, %1317, %1319 : vector<1x256xi1>, vector<1x256xf32>
    %c53_232 = arith.constant 53 : index
    %1321 = memref.load %arg8[%c53_232] : memref<225xf32, #tpu.memory_space<smem>>
    %1322 = vector.broadcast %1321 : f32 to vector<1x256xf32>
    %1323 = arith.mulf %1322, %1320 : vector<1x256xf32>
    %1324 = arith.addf %1308, %1323 : vector<1x256xf32>
    %c128 = arith.constant 128 : index
    %1325 = memref.load %arg8[%c128] : memref<225xf32, #tpu.memory_space<smem>>
    %1326 = vector.broadcast %1325 : f32 to vector<1x256xf32>
    %1327 = arith.mulf %1326, %1320 : vector<1x256xf32>
    %1328 = arith.addf %1312, %1327 : vector<1x256xf32>
    %c203 = arith.constant 203 : index
    %1329 = memref.load %arg8[%c203] : memref<225xf32, #tpu.memory_space<smem>>
    %1330 = vector.broadcast %1329 : f32 to vector<1x256xf32>
    %1331 = arith.mulf %1330, %1320 : vector<1x256xf32>
    %1332 = arith.addf %1316, %1331 : vector<1x256xf32>
    %c30_i32_233 = arith.constant 30 : i32
    %1333 = tpu.dynamic_rotate %483 by %c30_i32_233 dim 1 : vector<1x256xf32>, i32 -> vector<1x256xf32>
    %1334 = arith.andi %485, %499 : vector<1x256xi1>
    %cst_234 = arith.constant 0.000000e+00 : f32
    %1335 = vector.broadcast %cst_234 : f32 to vector<1x256xf32>
    %1336 = arith.select %1334, %1333, %1335 : vector<1x256xi1>, vector<1x256xf32>
    %c54_235 = arith.constant 54 : index
    %1337 = memref.load %arg8[%c54_235] : memref<225xf32, #tpu.memory_space<smem>>
    %1338 = vector.broadcast %1337 : f32 to vector<1x256xf32>
    %1339 = arith.mulf %1338, %1336 : vector<1x256xf32>
    %1340 = arith.addf %1324, %1339 : vector<1x256xf32>
    %c129 = arith.constant 129 : index
    %1341 = memref.load %arg8[%c129] : memref<225xf32, #tpu.memory_space<smem>>
    %1342 = vector.broadcast %1341 : f32 to vector<1x256xf32>
    %1343 = arith.mulf %1342, %1336 : vector<1x256xf32>
    %1344 = arith.addf %1328, %1343 : vector<1x256xf32>
    %c204 = arith.constant 204 : index
    %1345 = memref.load %arg8[%c204] : memref<225xf32, #tpu.memory_space<smem>>
    %1346 = vector.broadcast %1345 : f32 to vector<1x256xf32>
    %1347 = arith.mulf %1346, %1336 : vector<1x256xf32>
    %1348 = arith.addf %1332, %1347 : vector<1x256xf32>
    %c18_i32_236 = arith.constant 18 : i32
    %1349 = tpu.dynamic_rotate %483 by %c18_i32_236 dim 1 : vector<1x256xf32>, i32 -> vector<1x256xf32>
    %1350 = arith.andi %487, %493 : vector<1x256xi1>
    %cst_237 = arith.constant 0.000000e+00 : f32
    %1351 = vector.broadcast %cst_237 : f32 to vector<1x256xf32>
    %1352 = arith.select %1350, %1349, %1351 : vector<1x256xi1>, vector<1x256xf32>
    %c55_238 = arith.constant 55 : index
    %1353 = memref.load %arg8[%c55_238] : memref<225xf32, #tpu.memory_space<smem>>
    %1354 = vector.broadcast %1353 : f32 to vector<1x256xf32>
    %1355 = arith.mulf %1354, %1352 : vector<1x256xf32>
    %1356 = arith.addf %1340, %1355 : vector<1x256xf32>
    %c130 = arith.constant 130 : index
    %1357 = memref.load %arg8[%c130] : memref<225xf32, #tpu.memory_space<smem>>
    %1358 = vector.broadcast %1357 : f32 to vector<1x256xf32>
    %1359 = arith.mulf %1358, %1352 : vector<1x256xf32>
    %1360 = arith.addf %1344, %1359 : vector<1x256xf32>
    %c205 = arith.constant 205 : index
    %1361 = memref.load %arg8[%c205] : memref<225xf32, #tpu.memory_space<smem>>
    %1362 = vector.broadcast %1361 : f32 to vector<1x256xf32>
    %1363 = arith.mulf %1362, %1352 : vector<1x256xf32>
    %1364 = arith.addf %1348, %1363 : vector<1x256xf32>
    %c17_i32_239 = arith.constant 17 : i32
    %1365 = tpu.dynamic_rotate %483 by %c17_i32_239 dim 1 : vector<1x256xf32>, i32 -> vector<1x256xf32>
    %1366 = arith.andi %487, %495 : vector<1x256xi1>
    %cst_240 = arith.constant 0.000000e+00 : f32
    %1367 = vector.broadcast %cst_240 : f32 to vector<1x256xf32>
    %1368 = arith.select %1366, %1365, %1367 : vector<1x256xi1>, vector<1x256xf32>
    %c56_241 = arith.constant 56 : index
    %1369 = memref.load %arg8[%c56_241] : memref<225xf32, #tpu.memory_space<smem>>
    %1370 = vector.broadcast %1369 : f32 to vector<1x256xf32>
    %1371 = arith.mulf %1370, %1368 : vector<1x256xf32>
    %1372 = arith.addf %1356, %1371 : vector<1x256xf32>
    %c131 = arith.constant 131 : index
    %1373 = memref.load %arg8[%c131] : memref<225xf32, #tpu.memory_space<smem>>
    %1374 = vector.broadcast %1373 : f32 to vector<1x256xf32>
    %1375 = arith.mulf %1374, %1368 : vector<1x256xf32>
    %1376 = arith.addf %1360, %1375 : vector<1x256xf32>
    %c206 = arith.constant 206 : index
    %1377 = memref.load %arg8[%c206] : memref<225xf32, #tpu.memory_space<smem>>
    %1378 = vector.broadcast %1377 : f32 to vector<1x256xf32>
    %1379 = arith.mulf %1378, %1368 : vector<1x256xf32>
    %1380 = arith.addf %1364, %1379 : vector<1x256xf32>
    %c16_i32_242 = arith.constant 16 : i32
    %1381 = tpu.dynamic_rotate %483 by %c16_i32_242 dim 1 : vector<1x256xf32>, i32 -> vector<1x256xf32>
    %cst_243 = arith.constant 0.000000e+00 : f32
    %1382 = vector.broadcast %cst_243 : f32 to vector<1x256xf32>
    %1383 = arith.select %487, %1381, %1382 : vector<1x256xi1>, vector<1x256xf32>
    %c57_244 = arith.constant 57 : index
    %1384 = memref.load %arg8[%c57_244] : memref<225xf32, #tpu.memory_space<smem>>
    %1385 = vector.broadcast %1384 : f32 to vector<1x256xf32>
    %1386 = arith.mulf %1385, %1383 : vector<1x256xf32>
    %1387 = arith.addf %1372, %1386 : vector<1x256xf32>
    %c132 = arith.constant 132 : index
    %1388 = memref.load %arg8[%c132] : memref<225xf32, #tpu.memory_space<smem>>
    %1389 = vector.broadcast %1388 : f32 to vector<1x256xf32>
    %1390 = arith.mulf %1389, %1383 : vector<1x256xf32>
    %1391 = arith.addf %1376, %1390 : vector<1x256xf32>
    %c207 = arith.constant 207 : index
    %1392 = memref.load %arg8[%c207] : memref<225xf32, #tpu.memory_space<smem>>
    %1393 = vector.broadcast %1392 : f32 to vector<1x256xf32>
    %1394 = arith.mulf %1393, %1383 : vector<1x256xf32>
    %1395 = arith.addf %1380, %1394 : vector<1x256xf32>
    %c15_i32_245 = arith.constant 15 : i32
    %1396 = tpu.dynamic_rotate %483 by %c15_i32_245 dim 1 : vector<1x256xf32>, i32 -> vector<1x256xf32>
    %1397 = arith.andi %487, %497 : vector<1x256xi1>
    %cst_246 = arith.constant 0.000000e+00 : f32
    %1398 = vector.broadcast %cst_246 : f32 to vector<1x256xf32>
    %1399 = arith.select %1397, %1396, %1398 : vector<1x256xi1>, vector<1x256xf32>
    %c58_247 = arith.constant 58 : index
    %1400 = memref.load %arg8[%c58_247] : memref<225xf32, #tpu.memory_space<smem>>
    %1401 = vector.broadcast %1400 : f32 to vector<1x256xf32>
    %1402 = arith.mulf %1401, %1399 : vector<1x256xf32>
    %1403 = arith.addf %1387, %1402 : vector<1x256xf32>
    %c133 = arith.constant 133 : index
    %1404 = memref.load %arg8[%c133] : memref<225xf32, #tpu.memory_space<smem>>
    %1405 = vector.broadcast %1404 : f32 to vector<1x256xf32>
    %1406 = arith.mulf %1405, %1399 : vector<1x256xf32>
    %1407 = arith.addf %1391, %1406 : vector<1x256xf32>
    %c208 = arith.constant 208 : index
    %1408 = memref.load %arg8[%c208] : memref<225xf32, #tpu.memory_space<smem>>
    %1409 = vector.broadcast %1408 : f32 to vector<1x256xf32>
    %1410 = arith.mulf %1409, %1399 : vector<1x256xf32>
    %1411 = arith.addf %1395, %1410 : vector<1x256xf32>
    %c14_i32_248 = arith.constant 14 : i32
    %1412 = tpu.dynamic_rotate %483 by %c14_i32_248 dim 1 : vector<1x256xf32>, i32 -> vector<1x256xf32>
    %1413 = arith.andi %487, %499 : vector<1x256xi1>
    %cst_249 = arith.constant 0.000000e+00 : f32
    %1414 = vector.broadcast %cst_249 : f32 to vector<1x256xf32>
    %1415 = arith.select %1413, %1412, %1414 : vector<1x256xi1>, vector<1x256xf32>
    %c59_250 = arith.constant 59 : index
    %1416 = memref.load %arg8[%c59_250] : memref<225xf32, #tpu.memory_space<smem>>
    %1417 = vector.broadcast %1416 : f32 to vector<1x256xf32>
    %1418 = arith.mulf %1417, %1415 : vector<1x256xf32>
    %1419 = arith.addf %1403, %1418 : vector<1x256xf32>
    %c134 = arith.constant 134 : index
    %1420 = memref.load %arg8[%c134] : memref<225xf32, #tpu.memory_space<smem>>
    %1421 = vector.broadcast %1420 : f32 to vector<1x256xf32>
    %1422 = arith.mulf %1421, %1415 : vector<1x256xf32>
    %1423 = arith.addf %1407, %1422 : vector<1x256xf32>
    %c209 = arith.constant 209 : index
    %1424 = memref.load %arg8[%c209] : memref<225xf32, #tpu.memory_space<smem>>
    %1425 = vector.broadcast %1424 : f32 to vector<1x256xf32>
    %1426 = arith.mulf %1425, %1415 : vector<1x256xf32>
    %1427 = arith.addf %1411, %1426 : vector<1x256xf32>
    %c2_i32_251 = arith.constant 2 : i32
    %1428 = tpu.dynamic_rotate %483 by %c2_i32_251 dim 1 : vector<1x256xf32>, i32 -> vector<1x256xf32>
    %cst_252 = arith.constant 0.000000e+00 : f32
    %1429 = vector.broadcast %cst_252 : f32 to vector<1x256xf32>
    %1430 = arith.select %493, %1428, %1429 : vector<1x256xi1>, vector<1x256xf32>
    %c60_253 = arith.constant 60 : index
    %1431 = memref.load %arg8[%c60_253] : memref<225xf32, #tpu.memory_space<smem>>
    %1432 = vector.broadcast %1431 : f32 to vector<1x256xf32>
    %1433 = arith.mulf %1432, %1430 : vector<1x256xf32>
    %1434 = arith.addf %1419, %1433 : vector<1x256xf32>
    %c135 = arith.constant 135 : index
    %1435 = memref.load %arg8[%c135] : memref<225xf32, #tpu.memory_space<smem>>
    %1436 = vector.broadcast %1435 : f32 to vector<1x256xf32>
    %1437 = arith.mulf %1436, %1430 : vector<1x256xf32>
    %1438 = arith.addf %1423, %1437 : vector<1x256xf32>
    %c210 = arith.constant 210 : index
    %1439 = memref.load %arg8[%c210] : memref<225xf32, #tpu.memory_space<smem>>
    %1440 = vector.broadcast %1439 : f32 to vector<1x256xf32>
    %1441 = arith.mulf %1440, %1430 : vector<1x256xf32>
    %1442 = arith.addf %1427, %1441 : vector<1x256xf32>
    %c1_i32_254 = arith.constant 1 : i32
    %1443 = tpu.dynamic_rotate %483 by %c1_i32_254 dim 1 : vector<1x256xf32>, i32 -> vector<1x256xf32>
    %cst_255 = arith.constant 0.000000e+00 : f32
    %1444 = vector.broadcast %cst_255 : f32 to vector<1x256xf32>
    %1445 = arith.select %495, %1443, %1444 : vector<1x256xi1>, vector<1x256xf32>
    %c61_256 = arith.constant 61 : index
    %1446 = memref.load %arg8[%c61_256] : memref<225xf32, #tpu.memory_space<smem>>
    %1447 = vector.broadcast %1446 : f32 to vector<1x256xf32>
    %1448 = arith.mulf %1447, %1445 : vector<1x256xf32>
    %1449 = arith.addf %1434, %1448 : vector<1x256xf32>
    %c136 = arith.constant 136 : index
    %1450 = memref.load %arg8[%c136] : memref<225xf32, #tpu.memory_space<smem>>
    %1451 = vector.broadcast %1450 : f32 to vector<1x256xf32>
    %1452 = arith.mulf %1451, %1445 : vector<1x256xf32>
    %1453 = arith.addf %1438, %1452 : vector<1x256xf32>
    %c211 = arith.constant 211 : index
    %1454 = memref.load %arg8[%c211] : memref<225xf32, #tpu.memory_space<smem>>
    %1455 = vector.broadcast %1454 : f32 to vector<1x256xf32>
    %1456 = arith.mulf %1455, %1445 : vector<1x256xf32>
    %1457 = arith.addf %1442, %1456 : vector<1x256xf32>
    %c62_257 = arith.constant 62 : index
    %1458 = memref.load %arg8[%c62_257] : memref<225xf32, #tpu.memory_space<smem>>
    %1459 = vector.broadcast %1458 : f32 to vector<1x256xf32>
    %1460 = arith.mulf %1459, %483 : vector<1x256xf32>
    %1461 = arith.addf %1449, %1460 : vector<1x256xf32>
    %c137 = arith.constant 137 : index
    %1462 = memref.load %arg8[%c137] : memref<225xf32, #tpu.memory_space<smem>>
    %1463 = vector.broadcast %1462 : f32 to vector<1x256xf32>
    %1464 = arith.mulf %1463, %483 : vector<1x256xf32>
    %1465 = arith.addf %1453, %1464 : vector<1x256xf32>
    %c212 = arith.constant 212 : index
    %1466 = memref.load %arg8[%c212] : memref<225xf32, #tpu.memory_space<smem>>
    %1467 = vector.broadcast %1466 : f32 to vector<1x256xf32>
    %1468 = arith.mulf %1467, %483 : vector<1x256xf32>
    %1469 = arith.addf %1457, %1468 : vector<1x256xf32>
    %c255_i32_258 = arith.constant 255 : i32
    %1470 = tpu.dynamic_rotate %483 by %c255_i32_258 dim 1 : vector<1x256xf32>, i32 -> vector<1x256xf32>
    %cst_259 = arith.constant 0.000000e+00 : f32
    %1471 = vector.broadcast %cst_259 : f32 to vector<1x256xf32>
    %1472 = arith.select %497, %1470, %1471 : vector<1x256xi1>, vector<1x256xf32>
    %c63_260 = arith.constant 63 : index
    %1473 = memref.load %arg8[%c63_260] : memref<225xf32, #tpu.memory_space<smem>>
    %1474 = vector.broadcast %1473 : f32 to vector<1x256xf32>
    %1475 = arith.mulf %1474, %1472 : vector<1x256xf32>
    %1476 = arith.addf %1461, %1475 : vector<1x256xf32>
    %c138 = arith.constant 138 : index
    %1477 = memref.load %arg8[%c138] : memref<225xf32, #tpu.memory_space<smem>>
    %1478 = vector.broadcast %1477 : f32 to vector<1x256xf32>
    %1479 = arith.mulf %1478, %1472 : vector<1x256xf32>
    %1480 = arith.addf %1465, %1479 : vector<1x256xf32>
    %c213 = arith.constant 213 : index
    %1481 = memref.load %arg8[%c213] : memref<225xf32, #tpu.memory_space<smem>>
    %1482 = vector.broadcast %1481 : f32 to vector<1x256xf32>
    %1483 = arith.mulf %1482, %1472 : vector<1x256xf32>
    %1484 = arith.addf %1469, %1483 : vector<1x256xf32>
    %c254_i32_261 = arith.constant 254 : i32
    %1485 = tpu.dynamic_rotate %483 by %c254_i32_261 dim 1 : vector<1x256xf32>, i32 -> vector<1x256xf32>
    %cst_262 = arith.constant 0.000000e+00 : f32
    %1486 = vector.broadcast %cst_262 : f32 to vector<1x256xf32>
    %1487 = arith.select %499, %1485, %1486 : vector<1x256xi1>, vector<1x256xf32>
    %c64_263 = arith.constant 64 : index
    %1488 = memref.load %arg8[%c64_263] : memref<225xf32, #tpu.memory_space<smem>>
    %1489 = vector.broadcast %1488 : f32 to vector<1x256xf32>
    %1490 = arith.mulf %1489, %1487 : vector<1x256xf32>
    %1491 = arith.addf %1476, %1490 : vector<1x256xf32>
    %c139 = arith.constant 139 : index
    %1492 = memref.load %arg8[%c139] : memref<225xf32, #tpu.memory_space<smem>>
    %1493 = vector.broadcast %1492 : f32 to vector<1x256xf32>
    %1494 = arith.mulf %1493, %1487 : vector<1x256xf32>
    %1495 = arith.addf %1480, %1494 : vector<1x256xf32>
    %c214 = arith.constant 214 : index
    %1496 = memref.load %arg8[%c214] : memref<225xf32, #tpu.memory_space<smem>>
    %1497 = vector.broadcast %1496 : f32 to vector<1x256xf32>
    %1498 = arith.mulf %1497, %1487 : vector<1x256xf32>
    %1499 = arith.addf %1484, %1498 : vector<1x256xf32>
    %c242_i32_264 = arith.constant 242 : i32
    %1500 = tpu.dynamic_rotate %483 by %c242_i32_264 dim 1 : vector<1x256xf32>, i32 -> vector<1x256xf32>
    %1501 = arith.andi %489, %493 : vector<1x256xi1>
    %cst_265 = arith.constant 0.000000e+00 : f32
    %1502 = vector.broadcast %cst_265 : f32 to vector<1x256xf32>
    %1503 = arith.select %1501, %1500, %1502 : vector<1x256xi1>, vector<1x256xf32>
    %c65_266 = arith.constant 65 : index
    %1504 = memref.load %arg8[%c65_266] : memref<225xf32, #tpu.memory_space<smem>>
    %1505 = vector.broadcast %1504 : f32 to vector<1x256xf32>
    %1506 = arith.mulf %1505, %1503 : vector<1x256xf32>
    %1507 = arith.addf %1491, %1506 : vector<1x256xf32>
    %c140 = arith.constant 140 : index
    %1508 = memref.load %arg8[%c140] : memref<225xf32, #tpu.memory_space<smem>>
    %1509 = vector.broadcast %1508 : f32 to vector<1x256xf32>
    %1510 = arith.mulf %1509, %1503 : vector<1x256xf32>
    %1511 = arith.addf %1495, %1510 : vector<1x256xf32>
    %c215 = arith.constant 215 : index
    %1512 = memref.load %arg8[%c215] : memref<225xf32, #tpu.memory_space<smem>>
    %1513 = vector.broadcast %1512 : f32 to vector<1x256xf32>
    %1514 = arith.mulf %1513, %1503 : vector<1x256xf32>
    %1515 = arith.addf %1499, %1514 : vector<1x256xf32>
    %c241_i32_267 = arith.constant 241 : i32
    %1516 = tpu.dynamic_rotate %483 by %c241_i32_267 dim 1 : vector<1x256xf32>, i32 -> vector<1x256xf32>
    %1517 = arith.andi %489, %495 : vector<1x256xi1>
    %cst_268 = arith.constant 0.000000e+00 : f32
    %1518 = vector.broadcast %cst_268 : f32 to vector<1x256xf32>
    %1519 = arith.select %1517, %1516, %1518 : vector<1x256xi1>, vector<1x256xf32>
    %c66_269 = arith.constant 66 : index
    %1520 = memref.load %arg8[%c66_269] : memref<225xf32, #tpu.memory_space<smem>>
    %1521 = vector.broadcast %1520 : f32 to vector<1x256xf32>
    %1522 = arith.mulf %1521, %1519 : vector<1x256xf32>
    %1523 = arith.addf %1507, %1522 : vector<1x256xf32>
    %c141 = arith.constant 141 : index
    %1524 = memref.load %arg8[%c141] : memref<225xf32, #tpu.memory_space<smem>>
    %1525 = vector.broadcast %1524 : f32 to vector<1x256xf32>
    %1526 = arith.mulf %1525, %1519 : vector<1x256xf32>
    %1527 = arith.addf %1511, %1526 : vector<1x256xf32>
    %c216 = arith.constant 216 : index
    %1528 = memref.load %arg8[%c216] : memref<225xf32, #tpu.memory_space<smem>>
    %1529 = vector.broadcast %1528 : f32 to vector<1x256xf32>
    %1530 = arith.mulf %1529, %1519 : vector<1x256xf32>
    %1531 = arith.addf %1515, %1530 : vector<1x256xf32>
    %c240_i32_270 = arith.constant 240 : i32
    %1532 = tpu.dynamic_rotate %483 by %c240_i32_270 dim 1 : vector<1x256xf32>, i32 -> vector<1x256xf32>
    %cst_271 = arith.constant 0.000000e+00 : f32
    %1533 = vector.broadcast %cst_271 : f32 to vector<1x256xf32>
    %1534 = arith.select %489, %1532, %1533 : vector<1x256xi1>, vector<1x256xf32>
    %c67_272 = arith.constant 67 : index
    %1535 = memref.load %arg8[%c67_272] : memref<225xf32, #tpu.memory_space<smem>>
    %1536 = vector.broadcast %1535 : f32 to vector<1x256xf32>
    %1537 = arith.mulf %1536, %1534 : vector<1x256xf32>
    %1538 = arith.addf %1523, %1537 : vector<1x256xf32>
    %c142 = arith.constant 142 : index
    %1539 = memref.load %arg8[%c142] : memref<225xf32, #tpu.memory_space<smem>>
    %1540 = vector.broadcast %1539 : f32 to vector<1x256xf32>
    %1541 = arith.mulf %1540, %1534 : vector<1x256xf32>
    %1542 = arith.addf %1527, %1541 : vector<1x256xf32>
    %c217 = arith.constant 217 : index
    %1543 = memref.load %arg8[%c217] : memref<225xf32, #tpu.memory_space<smem>>
    %1544 = vector.broadcast %1543 : f32 to vector<1x256xf32>
    %1545 = arith.mulf %1544, %1534 : vector<1x256xf32>
    %1546 = arith.addf %1531, %1545 : vector<1x256xf32>
    %c239_i32_273 = arith.constant 239 : i32
    %1547 = tpu.dynamic_rotate %483 by %c239_i32_273 dim 1 : vector<1x256xf32>, i32 -> vector<1x256xf32>
    %1548 = arith.andi %489, %497 : vector<1x256xi1>
    %cst_274 = arith.constant 0.000000e+00 : f32
    %1549 = vector.broadcast %cst_274 : f32 to vector<1x256xf32>
    %1550 = arith.select %1548, %1547, %1549 : vector<1x256xi1>, vector<1x256xf32>
    %c68_275 = arith.constant 68 : index
    %1551 = memref.load %arg8[%c68_275] : memref<225xf32, #tpu.memory_space<smem>>
    %1552 = vector.broadcast %1551 : f32 to vector<1x256xf32>
    %1553 = arith.mulf %1552, %1550 : vector<1x256xf32>
    %1554 = arith.addf %1538, %1553 : vector<1x256xf32>
    %c143 = arith.constant 143 : index
    %1555 = memref.load %arg8[%c143] : memref<225xf32, #tpu.memory_space<smem>>
    %1556 = vector.broadcast %1555 : f32 to vector<1x256xf32>
    %1557 = arith.mulf %1556, %1550 : vector<1x256xf32>
    %1558 = arith.addf %1542, %1557 : vector<1x256xf32>
    %c218 = arith.constant 218 : index
    %1559 = memref.load %arg8[%c218] : memref<225xf32, #tpu.memory_space<smem>>
    %1560 = vector.broadcast %1559 : f32 to vector<1x256xf32>
    %1561 = arith.mulf %1560, %1550 : vector<1x256xf32>
    %1562 = arith.addf %1546, %1561 : vector<1x256xf32>
    %c238_i32_276 = arith.constant 238 : i32
    %1563 = tpu.dynamic_rotate %483 by %c238_i32_276 dim 1 : vector<1x256xf32>, i32 -> vector<1x256xf32>
    %1564 = arith.andi %489, %499 : vector<1x256xi1>
    %cst_277 = arith.constant 0.000000e+00 : f32
    %1565 = vector.broadcast %cst_277 : f32 to vector<1x256xf32>
    %1566 = arith.select %1564, %1563, %1565 : vector<1x256xi1>, vector<1x256xf32>
    %c69_278 = arith.constant 69 : index
    %1567 = memref.load %arg8[%c69_278] : memref<225xf32, #tpu.memory_space<smem>>
    %1568 = vector.broadcast %1567 : f32 to vector<1x256xf32>
    %1569 = arith.mulf %1568, %1566 : vector<1x256xf32>
    %1570 = arith.addf %1554, %1569 : vector<1x256xf32>
    %c144 = arith.constant 144 : index
    %1571 = memref.load %arg8[%c144] : memref<225xf32, #tpu.memory_space<smem>>
    %1572 = vector.broadcast %1571 : f32 to vector<1x256xf32>
    %1573 = arith.mulf %1572, %1566 : vector<1x256xf32>
    %1574 = arith.addf %1558, %1573 : vector<1x256xf32>
    %c219 = arith.constant 219 : index
    %1575 = memref.load %arg8[%c219] : memref<225xf32, #tpu.memory_space<smem>>
    %1576 = vector.broadcast %1575 : f32 to vector<1x256xf32>
    %1577 = arith.mulf %1576, %1566 : vector<1x256xf32>
    %1578 = arith.addf %1562, %1577 : vector<1x256xf32>
    %c226_i32_279 = arith.constant 226 : i32
    %1579 = tpu.dynamic_rotate %483 by %c226_i32_279 dim 1 : vector<1x256xf32>, i32 -> vector<1x256xf32>
    %1580 = arith.andi %491, %493 : vector<1x256xi1>
    %cst_280 = arith.constant 0.000000e+00 : f32
    %1581 = vector.broadcast %cst_280 : f32 to vector<1x256xf32>
    %1582 = arith.select %1580, %1579, %1581 : vector<1x256xi1>, vector<1x256xf32>
    %c70_281 = arith.constant 70 : index
    %1583 = memref.load %arg8[%c70_281] : memref<225xf32, #tpu.memory_space<smem>>
    %1584 = vector.broadcast %1583 : f32 to vector<1x256xf32>
    %1585 = arith.mulf %1584, %1582 : vector<1x256xf32>
    %1586 = arith.addf %1570, %1585 : vector<1x256xf32>
    %c145 = arith.constant 145 : index
    %1587 = memref.load %arg8[%c145] : memref<225xf32, #tpu.memory_space<smem>>
    %1588 = vector.broadcast %1587 : f32 to vector<1x256xf32>
    %1589 = arith.mulf %1588, %1582 : vector<1x256xf32>
    %1590 = arith.addf %1574, %1589 : vector<1x256xf32>
    %c220 = arith.constant 220 : index
    %1591 = memref.load %arg8[%c220] : memref<225xf32, #tpu.memory_space<smem>>
    %1592 = vector.broadcast %1591 : f32 to vector<1x256xf32>
    %1593 = arith.mulf %1592, %1582 : vector<1x256xf32>
    %1594 = arith.addf %1578, %1593 : vector<1x256xf32>
    %c225_i32_282 = arith.constant 225 : i32
    %1595 = tpu.dynamic_rotate %483 by %c225_i32_282 dim 1 : vector<1x256xf32>, i32 -> vector<1x256xf32>
    %1596 = arith.andi %491, %495 : vector<1x256xi1>
    %cst_283 = arith.constant 0.000000e+00 : f32
    %1597 = vector.broadcast %cst_283 : f32 to vector<1x256xf32>
    %1598 = arith.select %1596, %1595, %1597 : vector<1x256xi1>, vector<1x256xf32>
    %c71_284 = arith.constant 71 : index
    %1599 = memref.load %arg8[%c71_284] : memref<225xf32, #tpu.memory_space<smem>>
    %1600 = vector.broadcast %1599 : f32 to vector<1x256xf32>
    %1601 = arith.mulf %1600, %1598 : vector<1x256xf32>
    %1602 = arith.addf %1586, %1601 : vector<1x256xf32>
    %c146 = arith.constant 146 : index
    %1603 = memref.load %arg8[%c146] : memref<225xf32, #tpu.memory_space<smem>>
    %1604 = vector.broadcast %1603 : f32 to vector<1x256xf32>
    %1605 = arith.mulf %1604, %1598 : vector<1x256xf32>
    %1606 = arith.addf %1590, %1605 : vector<1x256xf32>
    %c221 = arith.constant 221 : index
    %1607 = memref.load %arg8[%c221] : memref<225xf32, #tpu.memory_space<smem>>
    %1608 = vector.broadcast %1607 : f32 to vector<1x256xf32>
    %1609 = arith.mulf %1608, %1598 : vector<1x256xf32>
    %1610 = arith.addf %1594, %1609 : vector<1x256xf32>
    %c224_i32_285 = arith.constant 224 : i32
    %1611 = tpu.dynamic_rotate %483 by %c224_i32_285 dim 1 : vector<1x256xf32>, i32 -> vector<1x256xf32>
    %cst_286 = arith.constant 0.000000e+00 : f32
    %1612 = vector.broadcast %cst_286 : f32 to vector<1x256xf32>
    %1613 = arith.select %491, %1611, %1612 : vector<1x256xi1>, vector<1x256xf32>
    %c72_287 = arith.constant 72 : index
    %1614 = memref.load %arg8[%c72_287] : memref<225xf32, #tpu.memory_space<smem>>
    %1615 = vector.broadcast %1614 : f32 to vector<1x256xf32>
    %1616 = arith.mulf %1615, %1613 : vector<1x256xf32>
    %1617 = arith.addf %1602, %1616 : vector<1x256xf32>
    %c147 = arith.constant 147 : index
    %1618 = memref.load %arg8[%c147] : memref<225xf32, #tpu.memory_space<smem>>
    %1619 = vector.broadcast %1618 : f32 to vector<1x256xf32>
    %1620 = arith.mulf %1619, %1613 : vector<1x256xf32>
    %1621 = arith.addf %1606, %1620 : vector<1x256xf32>
    %c222 = arith.constant 222 : index
    %1622 = memref.load %arg8[%c222] : memref<225xf32, #tpu.memory_space<smem>>
    %1623 = vector.broadcast %1622 : f32 to vector<1x256xf32>
    %1624 = arith.mulf %1623, %1613 : vector<1x256xf32>
    %1625 = arith.addf %1610, %1624 : vector<1x256xf32>
    %c223_i32_288 = arith.constant 223 : i32
    %1626 = tpu.dynamic_rotate %483 by %c223_i32_288 dim 1 : vector<1x256xf32>, i32 -> vector<1x256xf32>
    %1627 = arith.andi %491, %497 : vector<1x256xi1>
    %cst_289 = arith.constant 0.000000e+00 : f32
    %1628 = vector.broadcast %cst_289 : f32 to vector<1x256xf32>
    %1629 = arith.select %1627, %1626, %1628 : vector<1x256xi1>, vector<1x256xf32>
    %c73_290 = arith.constant 73 : index
    %1630 = memref.load %arg8[%c73_290] : memref<225xf32, #tpu.memory_space<smem>>
    %1631 = vector.broadcast %1630 : f32 to vector<1x256xf32>
    %1632 = arith.mulf %1631, %1629 : vector<1x256xf32>
    %1633 = arith.addf %1617, %1632 : vector<1x256xf32>
    %c148 = arith.constant 148 : index
    %1634 = memref.load %arg8[%c148] : memref<225xf32, #tpu.memory_space<smem>>
    %1635 = vector.broadcast %1634 : f32 to vector<1x256xf32>
    %1636 = arith.mulf %1635, %1629 : vector<1x256xf32>
    %1637 = arith.addf %1621, %1636 : vector<1x256xf32>
    %c223 = arith.constant 223 : index
    %1638 = memref.load %arg8[%c223] : memref<225xf32, #tpu.memory_space<smem>>
    %1639 = vector.broadcast %1638 : f32 to vector<1x256xf32>
    %1640 = arith.mulf %1639, %1629 : vector<1x256xf32>
    %1641 = arith.addf %1625, %1640 : vector<1x256xf32>
    %c222_i32_291 = arith.constant 222 : i32
    %1642 = tpu.dynamic_rotate %483 by %c222_i32_291 dim 1 : vector<1x256xf32>, i32 -> vector<1x256xf32>
    %1643 = arith.andi %491, %499 : vector<1x256xi1>
    %cst_292 = arith.constant 0.000000e+00 : f32
    %1644 = vector.broadcast %cst_292 : f32 to vector<1x256xf32>
    %1645 = arith.select %1643, %1642, %1644 : vector<1x256xi1>, vector<1x256xf32>
    %c74_293 = arith.constant 74 : index
    %1646 = memref.load %arg8[%c74_293] : memref<225xf32, #tpu.memory_space<smem>>
    %1647 = vector.broadcast %1646 : f32 to vector<1x256xf32>
    %1648 = arith.mulf %1647, %1645 : vector<1x256xf32>
    %1649 = arith.addf %1633, %1648 : vector<1x256xf32>
    %c149 = arith.constant 149 : index
    %1650 = memref.load %arg8[%c149] : memref<225xf32, #tpu.memory_space<smem>>
    %1651 = vector.broadcast %1650 : f32 to vector<1x256xf32>
    %1652 = arith.mulf %1651, %1645 : vector<1x256xf32>
    %1653 = arith.addf %1637, %1652 : vector<1x256xf32>
    %c224 = arith.constant 224 : index
    %1654 = memref.load %arg8[%c224] : memref<225xf32, #tpu.memory_space<smem>>
    %1655 = vector.broadcast %1654 : f32 to vector<1x256xf32>
    %1656 = arith.mulf %1655, %1645 : vector<1x256xf32>
    %1657 = arith.addf %1641, %1656 : vector<1x256xf32>
    %1658 = arith.addf %1270, %1649 : vector<1x256xf32>
    %1659 = arith.addf %1271, %1653 : vector<1x256xf32>
    %1660 = arith.addf %1272, %1657 : vector<1x256xf32>
    %c0_294 = arith.constant 0 : index
    %1661 = memref.load %arg9[%c0_294] : memref<3xf32, #tpu.memory_space<smem>>
    %1662 = vector.broadcast %1661 : f32 to vector<1x256xf32>
    %1663 = arith.addf %1658, %1662 : vector<1x256xf32>
    %cst_295 = arith.constant 0.000000e+00 : f32
    %1664 = vector.broadcast %cst_295 : f32 to vector<1x256xf32>
    %1665 = arith.maximumf %1663, %1664 : vector<1x256xf32>
    %c1_296 = arith.constant 1 : index
    %1666 = memref.load %arg9[%c1_296] : memref<3xf32, #tpu.memory_space<smem>>
    %1667 = vector.broadcast %1666 : f32 to vector<1x256xf32>
    %1668 = arith.addf %1659, %1667 : vector<1x256xf32>
    %cst_297 = arith.constant 0.000000e+00 : f32
    %1669 = vector.broadcast %cst_297 : f32 to vector<1x256xf32>
    %1670 = arith.maximumf %1668, %1669 : vector<1x256xf32>
    %c2_298 = arith.constant 2 : index
    %1671 = memref.load %arg9[%c2_298] : memref<3xf32, #tpu.memory_space<smem>>
    %1672 = vector.broadcast %1671 : f32 to vector<1x256xf32>
    %1673 = arith.addf %1660, %1672 : vector<1x256xf32>
    %cst_299 = arith.constant 0.000000e+00 : f32
    %1674 = vector.broadcast %cst_299 : f32 to vector<1x256xf32>
    %1675 = arith.maximumf %1673, %1674 : vector<1x256xf32>
    %c0_300 = arith.constant 0 : index
    %c0_301 = arith.constant 0 : index
    %c0_302 = arith.constant 0 : index
    %1676 = vector.load %arg1[%c0_300, %c0_301, %c0_302] : memref<1x3x256xf32, #tpu.memory_space<vmem>>, vector<1x1x256xf32>
    %1677 = vector.shape_cast %1676 : vector<1x1x256xf32> to vector<1x256xf32>
    %1678 = arith.addf %1677, %1665 : vector<1x256xf32>
    %c0_303 = arith.constant 0 : index
    %c0_304 = arith.constant 0 : index
    %c0_305 = arith.constant 0 : index
    %1679 = vector.load %arg10[%c0_303, %c0_304, %c0_305] : memref<1x3x256xf32, #tpu.memory_space<vmem>>, vector<1x1x256xf32>
    %1680 = vector.shape_cast %1679 : vector<1x1x256xf32> to vector<1x256xf32>
    %1681 = vector.shape_cast %1678 : vector<1x256xf32> to vector<1x1x256xf32>
    tpu.vector_store %arg10[%c0_303, %c0_304, %c0_305], %1681 {strides = array<i32>} : memref<1x3x256xf32, #tpu.memory_space<vmem>>, vector<1x1x256xf32>,
    %c0_306 = arith.constant 0 : index
    %c1_307 = arith.constant 1 : index
    %c0_308 = arith.constant 0 : index
    %1682 = vector.load %arg1[%c0_306, %c1_307, %c0_308] : memref<1x3x256xf32, #tpu.memory_space<vmem>>, vector<1x1x256xf32>
    %1683 = vector.shape_cast %1682 : vector<1x1x256xf32> to vector<1x256xf32>
    %1684 = arith.addf %1683, %1670 : vector<1x256xf32>
    %c0_309 = arith.constant 0 : index
    %c1_310 = arith.constant 1 : index
    %c0_311 = arith.constant 0 : index
    %1685 = vector.load %arg10[%c0_309, %c1_310, %c0_311] : memref<1x3x256xf32, #tpu.memory_space<vmem>>, vector<1x1x256xf32>
    %1686 = vector.shape_cast %1685 : vector<1x1x256xf32> to vector<1x256xf32>
    %1687 = vector.shape_cast %1684 : vector<1x256xf32> to vector<1x1x256xf32>
    tpu.vector_store %arg10[%c0_309, %c1_310, %c0_311], %1687 {strides = array<i32>} : memref<1x3x256xf32, #tpu.memory_space<vmem>>, vector<1x1x256xf32>,
    %c0_312 = arith.constant 0 : index
    %c2_313 = arith.constant 2 : index
    %c0_314 = arith.constant 0 : index
    %1688 = vector.load %arg1[%c0_312, %c2_313, %c0_314] : memref<1x3x256xf32, #tpu.memory_space<vmem>>, vector<1x1x256xf32>
    %1689 = vector.shape_cast %1688 : vector<1x1x256xf32> to vector<1x256xf32>
    %1690 = arith.addf %1689, %1675 : vector<1x256xf32>
    %c0_315 = arith.constant 0 : index
    %c2_316 = arith.constant 2 : index
    %c0_317 = arith.constant 0 : index
    %1691 = vector.load %arg10[%c0_315, %c2_316, %c0_317] : memref<1x3x256xf32, #tpu.memory_space<vmem>>, vector<1x1x256xf32>
    %1692 = vector.shape_cast %1691 : vector<1x1x256xf32> to vector<1x256xf32>
    %1693 = vector.shape_cast %1690 : vector<1x256xf32> to vector<1x1x256xf32>
    tpu.vector_store %arg10[%c0_315, %c2_316, %c0_317], %1693 {strides = array<i32>} : memref<1x3x256xf32, #tpu.memory_space<vmem>>, vector<1x1x256xf32>,
    return
  }
  func.func @transform_0(%arg0: i32) -> (i32, i32, i32) {
    %c0_i32 = arith.constant 0 : i32
    %c0_i32_0 = arith.constant 0 : i32
    %c0_i32_1 = arith.constant 0 : i32
    return %arg0, %c0_i32, %c0_i32_0 : i32, i32, i32
  }
  func.func @transform_1(%arg0: i32) -> (i32, i32) {
    %c0_i32 = arith.constant 0 : i32
    %c0_i32_0 = arith.constant 0 : i32
    %c0_i32_1 = arith.constant 0 : i32
    return %c0_i32, %c0_i32_0 : i32, i32
  }
  func.func @transform_2(%arg0: i32) -> (i32, i32) {
    %c0_i32 = arith.constant 0 : i32
    %c0_i32_0 = arith.constant 0 : i32
    %c0_i32_1 = arith.constant 0 : i32
    return %c0_i32, %c0_i32_0 : i32, i32
  }
  func.func @transform_3(%arg0: i32) -> i32 {
    %c0_i32 = arith.constant 0 : i32
    %c0_i32_0 = arith.constant 0 : i32
    return %c0_i32 : i32
  }
  func.func @transform_4(%arg0: i32) -> i32 {
    %c0_i32 = arith.constant 0 : i32
    %c0_i32_0 = arith.constant 0 : i32
    return %c0_i32 : i32
  }
  func.func @transform_5(%arg0: i32) -> i32 {
    %c0_i32 = arith.constant 0 : i32
    %c0_i32_0 = arith.constant 0 : i32
    return %c0_i32 : i32
  }
  func.func @transform_6(%arg0: i32) -> i32 {
    %c0_i32 = arith.constant 0 : i32
    %c0_i32_0 = arith.constant 0 : i32
    return %c0_i32 : i32
  }
  func.func @transform_7(%arg0: i32) -> i32 {
    %c0_i32 = arith.constant 0 : i32
    %c0_i32_0 = arith.constant 0 : i32
    return %c0_i32 : i32
  }
  func.func @transform_8(%arg0: i32) -> i32 {
    %c0_i32 = arith.constant 0 : i32
    %c0_i32_0 = arith.constant 0 : i32
    return %c0_i32 : i32
  }
  func.func @transform_9(%arg0: i32) -> (i32, i32, i32) {
    %c0_i32 = arith.constant 0 : i32
    %c0_i32_0 = arith.constant 0 : i32
    %c0_i32_1 = arith.constant 0 : i32
    return %arg0, %c0_i32, %c0_i32_0 : i32, i32, i32
  }
}

</mosaic_0001>

<bundles_post_ra>
// kernel: tpu_custom_call.1
= control target key start
LH: loop header
LB: loop body
LE: loop exit
PB: predicated region body
PF: predicated region fallthrough
CT: control target
= control target key end

     0   :  { %s7898_s0 = inlined_call_operand.vmem [shape: f32[2,3,256], index: 0, kind: input, shape index: {}]   ;;  %s7899_s1 = inlined_call_operand.vmem [shape: s32[1,256], index: 1, kind: input, shape index: {}]   ;;  %s7900_s2 = inlined_call_operand.vmem [shape: s32[1,256], index: 2, kind: input, shape index: {}]   ;;  %s7901_s3 = inlined_call_operand.vmem [shape: f32[9], index: 3, kind: input, shape index: {}]   ;;  %s7902_s4 = inlined_call_operand.vmem [shape: f32[3], index: 4, kind: input, shape index: {}]   ;;  %s7903_s5 = inlined_call_operand.vmem [shape: f32[81], index: 5, kind: input, shape index: {}]   ;;  %s7904_s6 = inlined_call_operand.vmem [shape: f32[3], index: 6, kind: input, shape index: {}]   ;;  %s7905_s7 = inlined_call_operand.vmem [shape: f32[225], index: 7, kind: input, shape index: {}]   ;;  %s7906_s8 = inlined_call_operand.vmem [shape: f32[3], index: 8, kind: input, shape index: {}]   ;;  %s7907_s9 = inlined_call_operand.vmem [shape: f32[2,3,256], index: 9, kind: output, shape index: {}]  }
   0x1   :  { %8061 = sst [smem:[#allocation46_spill]] %s7898_s0 }
   0x2   :  { %8062 = sst [smem:[#allocation47_spill]] %s7899_s1 }
   0x3   :  { %8063 = sst [smem:[#allocation48_spill]] %s7900_s2 }
   0x4   :  { %8064 = sst [smem:[#allocation49_spill]] %s7901_s3 }
   0x5   :  { %8065 = sst [smem:[#allocation50_spill]] %s7902_s4 }
   0x6   :  { %8066 = sst [smem:[#allocation51_spill]] %s7903_s5 }
   0x7   :  { %8067 = sst [smem:[#allocation52_spill]] %s7904_s6 }
   0x8   :  { %8068 = sst [smem:[#allocation53_spill]] %s7905_s7 }
   0x9   :  { %8069 = sst [smem:[#allocation54_spill]] %s7906_s8 }
   0xa   :  { %8070 = sst [smem:[#allocation55_spill]] %s7907_s9 }
   0xb   :  { %14 = vsyncpa [#allocation3], 0 }
   0xc   :  { %15 = vsyncpa [#allocation5], 0 }
   0xd   :  { %16 = vsyncpa [#allocation8], 0 }
   0xe   :  { %17 = vsyncpa [#allocation11], 0  ;;  %s4990_s30 = smov 0  }
   0xf LB: > { %8071 = sst [smem:[#allocation16_spill]] %s4907_s30  ;;  %s8072_s4 = sld [smem:[#allocation50_spill]]  ;;  %s4907_s30 = sphi %s4990_s30, %s23_s30  }
  0x10   : > { %s4999_s13 = sadd.s32 4294967295, %s4907_s30   ;;  %p4351_p0 = scmp.ge.s32.totalorder %s4907_s30, 1 }
  0x11   : > { %p248_p1 = scmp.lt.s32.totalorder %s4907_s30, 3  ;;  %p7908_p2 = scmp.eq.s32.totalorder %s4999_s13, 0 }
  0x12   : > { %s8074_s6 = sld [smem:[#allocation52_spill]]  ;;  %s8075_s3 = sld [smem:[#allocation49_spill]] }
  0x13   : > { %p5004_p3 = pnand %p4351_p0, %p248_p1  ;;  %s8077_s5 = sld [smem:[#allocation51_spill]] }
  0x14   : > { %s8078_s7 = sld [smem:[#allocation53_spill]] }
  0x15   : > { %s278_s12 = sshll.u32 %s8072_s4, 4  ;;  %p4722_p4 = pneg %p5004_p3  ;;  %s279_s12 = int_to_ptr.vmem [resolvable:$true] %s278_s12 }
  0x16   : > { %s4795_s28 = scalar_lea.vmem %s279_s12, 16  ;;  %p4803_p10 = scmp.lt.s32.totalorder %s279_s12, %s279_s12 }
  0x17   : > { %p5022_p5 = pnand %p7908_p2, %p4722_p4  ;;  %p4796_p6 = scmp.ne.s32.totalorder %s279_s12, %s4795_s28 }
  0x18   : > { %s300_s17 = sshll.u32 %s8074_s6, 4  ;;  %s267_s20 = sshll.u32 %s8075_s3, 4  ;;  %s5011_s17 = int_to_ptr.vmem [resolvable:$true] %s300_s17  ;;  %s5018_s20 = int_to_ptr.vmem [resolvable:$true] %s267_s20 }
  0x19   : > { %s289_s24 = sshll.u32 %s8077_s5, 4  ;;  %p5036_p7 = pneg %p5022_p5  ;;  %s5029_s24 = int_to_ptr.vmem [resolvable:$true] %s289_s24 }
  0x1a   : > { %s311_s27 = sshll.u32 %s8078_s7, 4  ;;  %p4804_p11 = scmp.lt.s32.totalorder %s4795_s28, %s4795_s28  ;;  %s312_s27 = int_to_ptr.vmem [resolvable:$true] %s311_s27 }
  0x1b   : > { %p4798_p8 = pnand %p5036_p7, %p4796_p6 }
  0x1c   : > { %p4805_p12 = por %p4804_p11, %p4803_p10 }
  0x1d   : > { %p4799_p9 = pneg %p4798_p8 }
  0x1f   : > { %p4806_p13 = pnand %p4805_p12, %p4799_p9 }
  0x21   : > { %4809 = shalt.err (!%p4806_p13)
}
  0x22   : > { %s4909_s10 = smov [#allocation4]   ;;  %s4810_s11 = scalar_lea.vmem %s5011_s17, 16 }
  0x23   : > { %4728 = dma.vmem_to_smem (!%p5022_p5), %s279_s12, 16, %s4909_s10, [#allocation5]  }
  0x24   : > { %p4811_p0 = scmp.ne.s32.totalorder %s5011_s17, %s4810_s11  ;;  %p4818_p6 = scmp.lt.s32.totalorder %s5011_s17, %s5011_s17 }
  0x25   : > { %p4819_p8 = scmp.lt.s32.totalorder %s4810_s11, %s4810_s11 }
  0x26   : > { %p4813_p1 = pnand %p4811_p0, %p5036_p7 }
  0x27   : > { %p4820_p2 = por %p4819_p8, %p4818_p6 }
  0x28   : > { %p4814_p4 = pneg %p4813_p1 }
  0x2a   : > { %p4821_p10 = pnand %p4820_p2, %p4814_p4 }
  0x2c   : > { %4824 = shalt.err (!%p4821_p10)
}
  0x2d   : > { %s4910_s15 = smov [#allocation7]   ;;  %s4825_s12 = scalar_lea.vmem %s5018_s20, 16 }
  0x2e   : > { %4734 = dma.vmem_to_smem (!%p5022_p5), %s5011_s17, 16, %s4910_s15, [#allocation8]  }
  0x2f   : > { %p4826_p9 = scmp.ne.s32.totalorder %s5018_s20, %s4825_s12  ;;  %p4833_p13 = scmp.lt.s32.totalorder %s5018_s20, %s5018_s20 }
  0x30   : > { %p4834_p0 = scmp.lt.s32.totalorder %s4825_s12, %s4825_s12 }
  0x31   : > { %p4828_p11 = pnand %p4826_p9, %p5036_p7 }
  0x32   : > { %p4835_p1 = por %p4834_p0, %p4833_p13 }
  0x33   : > { %p4829_p12 = pneg %p4828_p11 }
  0x35   : > { %p4836_p2 = pnand %p4835_p1, %p4829_p12 }
  0x37   : > { %4839 = shalt.err (!%p4836_p2)
}
  0x38   : > { %s4911_s16 = smov [#allocation2]   ;;  %s4840_s17 = scalar_lea.vmem %s5029_s24, 16 }
  0x39   : > { %4725 = dma.vmem_to_smem (!%p5022_p5), %s5018_s20, 16, %s4911_s16, [#allocation3]  }
  0x3a   : > { %p4841_p4 = scmp.ne.s32.totalorder %s5029_s24, %s4840_s17  ;;  %p4848_p10 = scmp.lt.s32.totalorder %s5029_s24, %s5029_s24 }
  0x3b   : > { %p4849_p9 = scmp.lt.s32.totalorder %s4840_s17, %s4840_s17 }
  0x3c   : > { %p4843_p6 = pnand %p4841_p4, %p5036_p7 }
  0x3d   : > { %p4850_p11 = por %p4849_p9, %p4848_p10 }
  0x3e   : > { %p4844_p8 = pneg %p4843_p6 }
  0x40   : > { %p4851_p12 = pnand %p4850_p11, %p4844_p8 }
  0x42   : > { %4854 = shalt.err (!%p4851_p12)
}
  0x43   : > { %s4912_s18 = smov [#allocation6]   ;;  %s4855_s20 = scalar_lea.vmem %s312_s27, 32 }
  0x44   : > { %4731 = dma.vmem_to_smem (!%p5022_p5), %s5029_s24, 16, %s4912_s18, [#allocation5]  }
  0x45   : > { %p4856_p13 = scmp.ne.s32.totalorder %s312_s27, %s4855_s20  ;;  %p4863_p2 = scmp.lt.s32.totalorder %s312_s27, %s312_s27 }
  0x46   : > { %p4864_p4 = scmp.lt.s32.totalorder %s4855_s20, %s4855_s20 }
  0x47   : > { %p4858_p0 = pnand %p4856_p13, %p5036_p7 }
  0x48   : > { %p4865_p6 = por %p4864_p4, %p4863_p2 }
  0x49   : > { %p4859_p1 = pneg %p4858_p0 }
  0x4b   : > { %p4866_p8 = pnand %p4865_p6, %p4859_p1 }
  0x4d   : > { %4869 = shalt.err (!%p4866_p8)
}
  0x4e   : > { %s4913_s23 = smov [#allocation9]   ;;  %s8080_s8 = sld [smem:[#allocation54_spill]] }
  0x4f   : > { %4737 = dma.vmem_to_smem (!%p5022_p5), %s312_s27, 32, %s4913_s23, [#allocation8]  }
  0x54   : > { %s322_s26 = sshll.u32 %s8080_s8, 4  ;;  %s323_s26 = int_to_ptr.vmem [resolvable:$true] %s322_s26 }
  0x55   : > { %s4870_s28 = scalar_lea.vmem %s323_s26, 16  ;;  %p4878_p12 = scmp.lt.s32.totalorder %s323_s26, %s323_s26 }
  0x56   : > { %p4871_p10 = scmp.ne.s32.totalorder %s323_s26, %s4870_s28  ;;  %p4879_p13 = scmp.lt.s32.totalorder %s4870_s28, %s4870_s28 }
  0x58   : > { %p4873_p9 = pnand %p4871_p10, %p5036_p7  ;;  %p4880_p0 = por %p4879_p13, %p4878_p12 }
  0x5a   : > { %p4874_p11 = pneg %p4873_p9 }
  0x5c   : > { %p4881_p1 = pnand %p4880_p0, %p4874_p11 }
  0x5e   : > { %4884 = shalt.err (!%p4881_p1)
}
  0x5f   : > { %s4914_s10 = smov [#allocation10]   ;;  %343 = sbr.rel (%p5004_p3) target bundleno = 807 (0x327), region = 56 }
  0x60   : > { %4740 = dma.vmem_to_smem (!%p5022_p5), %s323_s26, 16, %s4914_s10, [#allocation11]  }
  0x66   : > { %p8081_p2 = scmp.eq.s32.totalorder %s4999_s13, 0 }
  0x68   : > { %4890 = dma.done.wait (%p8081_p2), [#allocation3], 16   ;;  %p8082_p4 = pmov %p8081_p2 }
  0x69   : > { %p8083_p7 = pmov %p8081_p2 }
  0x6a   : > { %4892 = vsyncadd (%p8082_p4), [#allocation3], 4294967280 }
  0x6b   : > { %4894 = dma.done.wait (%p8083_p7), [#allocation5], 32   ;;  %p8084_p6 = pmov %p8081_p2 }
  0x6c   : > { %p8085_p8 = pmov %p8081_p2 }
  0x6d   : > { %4896 = vsyncadd (%p8084_p6), [#allocation5], 4294967264 }
  0x6e   : > { %4898 = dma.done.wait (%p8085_p8), [#allocation8], 48   ;;  %p8086_p5 = pmov %p8081_p2 }
  0x6f   : > { %p8087_p3 = pmov %p8081_p2 }
  0x70   : > { %4900 = vsyncadd (%p8086_p5), [#allocation8], 4294967248 }
  0x71   : > { %4902 = dma.done.wait (%p8087_p3), [#allocation11], 16   ;;  %p8088_p10 = pmov %p8081_p2 }
  0x73   : > { %4904 = vsyncadd (%p8088_p10), [#allocation11], 4294967280 }
  0x74   : > { %369 = sfence }
  0x75   : > { %p400_p9 = scmp.lt.s32.totalorder %s4999_s13, 1  ;;  %s417_s14 = sld [smem:[#allocation2]]  ;;  %v7930_v3 = vlaneseq  ;;  %v4923_v46 = vmov 1966171168  }
  0x76   : > { %s4372_s21 = sld [smem:[#allocation2 + $0x1]]  ;;  %s4373_s27 = sld [smem:[#allocation2 + $0x2]]  ;;  %v491_v47 = vunpack.c.l.s4 %v4923_v46 }
  0x77   : > { %s8476_s13 = smov (!%p400_p9, %s4999_s13), 1  ;;  %s428_s29 = sld [smem:[#allocation4]]  ;;  %v5120_v11 = vshrl.u32 %v7930_v3, 7  ;;  %v5195_v48 = vand.u32 127, %v7930_v3 }
  0x78   : > { %8089 = sst [smem:[#allocation17_spill]] %s8476_s13  ;;  %s7909_s11 = sshll.u32 %s8476_s13, 3  ;;  %v492_v49 = vunpack.c.0.s8 %v491_v47 }
  0x79   : > { %s8090_s0 = sld [smem:[#allocation46_spill]]  ;;  %s4379_s18 = sld [smem:[#allocation2 + $0x7]]  ;;  %v5123_v15 = vsub.s32 0, %v5120_v11  ;;  %v5128_v17 = vsub.s32 1, %v5120_v11  ;;  %vm8009_vm0 = vcmp.lt.s32.totalorder %v5195_v48, 16  ;;  %vm8007_vm1 = vcmp.lt.s32.totalorder %v5195_v48, 17 }
  0x7a   : > { %s4378_s17 = sld [smem:[#allocation2 + $0x6]]  ;;  %s4380_s19 = sld [smem:[#allocation2 + $0x8]]  ;;  %v5228_v54 = vsub.s32 %v492_v49, %v5120_v11  ;;  %vm8008_vm4 = vcmp.lt.s32.totalorder %v5195_v48, 15  ;;  %vm7979_vm7 = vcmp.lt.s32.totalorder %v5195_v48, 1  ;;  %vm7974_vm8 = vcmp.lt.s32.totalorder %v5195_v48, 127 }
  0x7b   : > { %v418_v2 = vstv %s417_s14  ;;  %s4374_s22 = sld [smem:[#allocation2 + $0x3]]  ;;  %s4375_s20 = sld [smem:[#allocation2 + $0x4]]  ;;  %vm7969_vm10 = vcmp.lt.s32.totalorder %v5195_v48, 113  ;;  %vm7967_vm11 = vcmp.lt.s32.totalorder %v5195_v48, 112  ;;  %vm7963_vm13 = vcmp.lt.s32.totalorder %v5195_v48, 111 }
  0x7c   : > { %v421_v6 = vstv %s4372_s21  ;;  %v425_v7 = vstv %s4373_s27  ;;  %s7922_s23 = smov 16   ;;  %s7924_s24 = smov 17  }
  0x7d   : > { %v429_v12 = vstv %s428_s29  ;;  %s4376_s25 = sld [smem:[#allocation2 + $0x5]]  ;;  %s7920_s26 = smov 15  }
  0x7e   : > { %s4377_s28 = sld [smem:[#allocation4 + $0x1]]  ;;  %s7918_s10 = smov 1  }
  0x7f   : > { %s5114_s16 = scalar_lea.vmem %s8090_s0, %s7909_s11  ;;  %v451_v21 = vstv %s4379_s18  ;;  %s7916_s14 = smov 127  }
  0x80   : > { %8091 = sst [smem:[#allocation18_spill]] %s5114_s16  ;;  %v412_v0 = vld [vmem:[%s5114_s16] ss:$4 sm:$0x3]  ;;  %v448_v18 = vstv %s4378_s17  ;;  %v455_v23 = vstv %s4380_s19  ;;  %s7914_s21 = smov 113  }
  0x81   : > { %v4370_v1 = vld [vmem:[%s5114_s16 + $0x1] ss:$4 sm:$0x3]  ;;  %v4371_v4 = vld [vmem:[%s5114_s16 + $0x2] ss:$4 sm:$0x3]  ;;  %v419_v5 = vmul.f32 %v418_v2, %v412_v0  ;;  %v449_v20 = vmul.f32 %v448_v18, %v412_v0  ;;  %v433_v28 = vstv %s4374_s22  ;;  %v436_v29 = vstv %s4375_s20 }
  0x82   : > { %v422_v8 = vmul.f32 %v4370_v1, %v421_v6  ;;  %v426_v9 = vmul.f32 %v4371_v4, %v425_v7  ;;  %v452_v22 = vmul.f32 %v4370_v1, %v451_v21  ;;  %v456_v25 = vmul.f32 %v4371_v4, %v455_v23  ;;  %s7912_s27 = smov 112   ;;  %s7910_s29 = smov 111  }
  0x83   : > { %v434_v30 = vmul.f32 %v433_v28, %v412_v0  ;;  %v437_v31 = vmul.f32 %v4370_v1, %v436_v29  ;;  %v440_v32 = vstv %s4376_s25  ;;  %s4381_s15 = sld [smem:[#allocation4 + $0x2]]  ;;  %s5197_s12 = sld [smem:[#allocation6 + $0x1]] }
  0x84   : > { %v423_v10 = vadd.f32 %v422_v8, %v419_v5  ;;  %v453_v26 = vadd.f32 %v452_v22, %v449_v20  ;;  %v441_v34 = vmul.f32 %v4371_v4, %v440_v32  ;;  %v444_v36 = vstv %s4377_s28  ;;  %s5199_s17 = sld [smem:[#allocation6 + $0x1c]]  ;;  %s5201_s18 = sld [smem:[#allocation6 + $0x37]] }
  0x85   : > { %v438_v33 = vadd.f32 %v437_v31, %v434_v30  ;;  %s5203_s19 = sld [smem:[#allocation6]]  ;;  %s5205_s22 = sld [smem:[#allocation6 + $0x1b]] }
  0x86   : > { %v427_v13 = vadd.f32 %v426_v9, %v423_v10  ;;  %v457_v27 = vadd.f32 %v456_v25, %v453_v26  ;;  %s8092_s1 = sld [smem:[#allocation47_spill]]  ;;  %s5212_s28 = sld [smem:[#allocation6 + $0x36]] }
  0x87   : > { %v442_v35 = vadd.f32 %v441_v34, %v438_v33  ;;  %s8093_s2 = sld [smem:[#allocation48_spill]]  ;;  %s5231_s20 = sld [smem:[#allocation6 + $0x3]] }
  0x88   : > { %v430_v14 = vadd.f32 %v429_v12, %v427_v13  ;;  %s5241_s11 = sld [smem:[#allocation6 + $0x1e]]  ;;  %s5247_s25 = sld [smem:[#allocation6 + $0x4]] }
  0x89   : > { %v445_v37 = vadd.f32 %v444_v36, %v442_v35  ;;  %v459_v41 = vstv %s4381_s15  ;;  %s5216_s15 = sld [smem:[#allocation6 + $0x2]]  ;;  %v542_v63 = vstv %s5197_s12  ;;  %s5382_s0 = sld [smem:[#allocation6 + $0x25]] }
  0x8a   : > { %v5125_v16 = vmax.f32 %v430_v14, 0.0  ;;  %v460_v42 = vadd.f32 %v459_v41, %v457_v27  ;;  %v546_v0 = vstv %s5199_s17  ;;  %v550_v1 = vstv %s5201_s18  ;;  %s5307_s17 = sld [smem:[#allocation6 + $0x3b]]  ;;  %s5314_s18 = sld [smem:[#allocation6 + $0x6]] }
  0x8b   : > { %v5148_v38 = vmax.f32 %v445_v37, 0.0  ;;  %v507_v4 = vstv %s5203_s19  ;;  %v510_v5 = vstv %s5205_s22  ;;  %s5321_s22 = sld [smem:[#allocation6 + $0x21]]  ;;  %s5388_s3 = sld [smem:[#allocation6 + $0x40]] }
  0x8c   : > { %v470_v19 = vrot.slane %v5125_v16, %v5123_v15  ;;  %v474_v24 = vrot.slane %v5125_v16, %v5128_v17  ;;  %v5170_v43 = vmax.f32 %v460_v42, 0.0  ;;  %v5210_v52 = vld [vmem:[%s8092_s1] sm:$0x3]  ;;  %v513_v10 = vstv %s5212_s28  ;;  %s5327_s28 = sld [smem:[#allocation6 + $0x3c]]  ;;  %s5411_s4 = sld [smem:[#allocation6 + $0x41]] }
  0x8d   : > { %v804_v39 = vrot.slane %v5148_v38, %v5128_v17  ;;  %v800_v40 = vrot.slane %v5148_v38, %v5123_v15  ;;  %v5221_v53 = vld [vmem:[%s8093_s2] sm:$0x3]  ;;  %vm7998_vm2 = vcmp.ge.s32.totalorder %v5210_v52, 1  ;;  %v619_v26 = vstv %s5231_s20  ;;  %s5413_s5 = sld [smem:[#allocation6 + $0xc]]  ;;  %s5418_s6 = sld [smem:[#allocation6 + $0x27]] }
  0x8e   : > { %515 = vrot.lane.b32.xlu1 %v470_v19, %s7922_s23  ;;  %477 = vrot.lane.b32.xlu0 %v470_v19, %s7924_s24  ;;  %v1123_v44 = vrot.slane %v5170_v43, %v5128_v17  ;;  %v1119_v45 = vrot.slane %v5170_v43, %v5123_v15  ;;  %vm8020_vm3 = vcmp.ge.s32.totalorder %v5221_v53, 1  ;;  %vm8014_vm6 = vcmp.lt.s32.totalorder %v5221_v53, 15  ;;  %s5420_s7 = sld [smem:[#allocation6 + $0xd]]  ;;  %s5434_s8 = sld [smem:[#allocation6 + $0x43]] }
  0x8f   : > { %vm5264_vm5 = vmand %vm7998_vm2, %vm8020_vm3  ;;  %v581_v18 = vstv %s5216_s15  ;;  %v623_v31 = vstv %s5241_s11  ;;  %s5329_s11 = sld [smem:[#allocation6 + $0x7]]  ;;  %vm7966_vm12 = vcmp.lt.s32.totalorder %v5210_v52, 15  ;;  %s5456_s30 = sld [smem:[#allocation6 + $0x29]] }
  0x90   : > { %vm5301_vm9 = vmand %vm7998_vm2, %vm8014_vm6  ;;  %s5473_s9 = sld [smem:[#allocation6 + $0x44]]  ;;  %s5475_s13 = sld [smem:[#allocation6 + $0xf]] }
  0x91   : > { %vm5398_vm14 = vmand %vm7966_vm12, %vm8020_vm3  ;;  %s5484_s16 = sld [smem:[#allocation6 + $0x2a]]  ;;  %s5486_s2 = sld [smem:[#allocation6 + $0x45]] }
  0x92   : > { %517 = vrot.lane.b32.xlu1 %v474_v24, %s7922_s23  ;;  %479 = vrot.lane.b32.xlu0 %v474_v24, %s7924_s24  ;;  %vm5465_vm15 = vmand %vm7966_vm12, %vm8014_vm6  ;;  %s5542_s12 = sld [smem:[#allocation6 + $0x46]]  ;;  %s5562_s19 = sld [smem:[#allocation6 + $0x11]] }
  0x93   : > { %s5704_s15 = sld [smem:[#allocation6 + $0x30]]  ;;  %s5706_s20 = sld [smem:[#allocation6 + $0x31]] }
  0x96   : > { %555 = vrot.lane.b32.xlu1 %v474_v24, %s7920_s26  ;;  %553 = vrot.lane.b32.xlu0 %v470_v19, %s7920_s26 }
  0x9a   : > { %594 = vrot.lane.b32.xlu1 %v474_v24, %s7918_s10  ;;  %592 = vrot.lane.b32.xlu0 %v470_v19, %s7918_s10 }
  0x9e   : > { %644 = vrot.lane.b32.xlu1 %v474_v24, %s7916_s14  ;;  %642 = vrot.lane.b32.xlu0 %v470_v19, %s7916_s14 }
  0xa2   : > { %682 = vrot.lane.b32.xlu1 %v474_v24, %s7914_s21  ;;  %680 = vrot.lane.b32.xlu0 %v470_v19, %s7914_s21 }
  0xa6   : > { %721 = vrot.lane.b32.xlu1 %v474_v24, %s7912_s27  ;;  %719 = vrot.lane.b32.xlu0 %v470_v19, %s7912_s27 }
  0xaa   : > { %759 = vrot.lane.b32.xlu1 %v474_v24, %s7910_s29  ;;  %757 = vrot.lane.b32.xlu0 %v470_v19, %s7910_s29 }
  0xae   : > { %809 = vrot.lane.b32.xlu1 %v804_v39, %s7924_s24  ;;  %807 = vrot.lane.b32.xlu0 %v800_v40, %s7924_s24 }
  0xb2   : > { %843 = vrot.lane.b32.xlu1 %v804_v39, %s7922_s23  ;;  %841 = vrot.lane.b32.xlu0 %v800_v40, %s7922_s23 }
  0xb6   : > { %880 = vrot.lane.b32.xlu1 %v804_v39, %s7920_s26  ;;  %878 = vrot.lane.b32.xlu0 %v800_v40, %s7920_s26 }
  0xba   : > { %917 = vrot.lane.b32.xlu1 %v804_v39, %s7918_s10  ;;  %915 = vrot.lane.b32.xlu0 %v800_v40, %s7918_s10 }
  0xbe   : > { %966 = vrot.lane.b32.xlu1 %v804_v39, %s7916_s14  ;;  %964 = vrot.lane.b32.xlu0 %v800_v40, %s7916_s14 }
  0xc2   : > { %1003 = vrot.lane.b32.xlu1 %v804_v39, %s7914_s21  ;;  %1001 = vrot.lane.b32.xlu0 %v800_v40, %s7914_s21 }
  0xc6   : > { %1040 = vrot.lane.b32.xlu1 %v804_v39, %s7912_s27  ;;  %1038 = vrot.lane.b32.xlu0 %v800_v40, %s7912_s27 }
  0xca   : > { %1077 = vrot.lane.b32.xlu1 %v804_v39, %s7910_s29  ;;  %1075 = vrot.lane.b32.xlu0 %v800_v40, %s7910_s29  ;;  %v631_v39 = vstv %s5247_s25  ;;  %s5354_s25 = sld [smem:[#allocation6 + $0x23]] }
  0xce   : > { %1128 = vrot.lane.b32.xlu1 %v1123_v44, %s7924_s24  ;;  %1126 = vrot.lane.b32.xlu0 %v1119_v45, %s7924_s24  ;;  %s5380_s24 = sld [smem:[#allocation6 + $0xa]] }
  0xd2   : > { %1162 = vrot.lane.b32.xlu1 %v1123_v44, %s7922_s23  ;;  %1160 = vrot.lane.b32.xlu0 %v1119_v45, %s7922_s23  ;;  %s5366_s23 = sld [smem:[#allocation6 + $0x24]] }
  0xd6   : > { %1199 = vrot.lane.b32.xlu1 %v1123_v44, %s7920_s26  ;;  %1197 = vrot.lane.b32.xlu0 %v1119_v45, %s7920_s26  ;;  %s5356_s26 = sld [smem:[#allocation6 + $0x3e]] }
  0xda   : > { %1236 = vrot.lane.b32.xlu1 %v1123_v44, %s7918_s10  ;;  %1234 = vrot.lane.b32.xlu0 %v1119_v45, %s7918_s10  ;;  %s5254_s10 = sld [smem:[#allocation6 + $0x3a]] }
  0xde   : > { %1285 = vrot.lane.b32.xlu1 %v1123_v44, %s7916_s14  ;;  %1283 = vrot.lane.b32.xlu0 %v1119_v45, %s7916_s14  ;;  %s5252_s14 = sld [smem:[#allocation6 + $0x1f]] }
  0xe0   : > { %v639_v41 = vstv %s5254_s10  ;;  %s5336_s10 = sld [smem:[#allocation6 + $0x22]] }
  0xe2   : > { %1322 = vrot.lane.b32.xlu1 %v1123_v44, %s7914_s21  ;;  %1320 = vrot.lane.b32.xlu0 %v1119_v45, %s7914_s21  ;;  %s5225_s21 = sld [smem:[#allocation6 + $0x38]] }
  0xe4   : > { %v635_v40 = vstv %s5252_s14  ;;  %s5345_s14 = sld [smem:[#allocation6 + $0x3d]] }
  0xe6   : > { %1359 = vrot.lane.b32.xlu1 %v1123_v44, %s7912_s27  ;;  %1357 = vrot.lane.b32.xlu0 %v1119_v45, %s7912_s27  ;;  %s5223_s27 = sld [smem:[#allocation6 + $0x1d]] }
  0xe8   : > { %v589_v21 = vstv %s5225_s21  ;;  %s5291_s21 = sld [smem:[#allocation6 + $0x5]] }
  0xea   : > { %1396 = vrot.lane.b32.xlu1 %v1123_v44, %s7910_s29  ;;  %1394 = vrot.lane.b32.xlu0 %v1119_v45, %s7910_s29  ;;  %s5243_s29 = sld [smem:[#allocation6 + $0x39]] }
  0xec   : > { %v585_v20 = vstv %s5223_s27  ;;  %s5293_s27 = sld [smem:[#allocation6 + $0x20]] }
  0xf0   : > { %v627_v32 = vstv %s5243_s29  ;;  %s5348_s29 = sld [smem:[#allocation6 + $0x8]] }
 0x100   : > { %v516_v50 = vpop.permute.xlu1 %515  ;;  %v478_v51 = vpop.permute.xlu0 %477 }
 0x104   : > { %v518_v55 = vpop.permute.xlu1 %517  ;;  %v480_v56 = vpop.permute.xlu0 %479 }
 0x105   : > { %v520_v57 = vsel %vm8009_vm0, %v516_v50, %v518_v55  ;;  %v521_v58 = vsel %vm8009_vm0, %v518_v55, %v516_v50  ;;  %v484_v59 = vsel %vm8007_vm1, %v478_v51, %v480_v56  ;;  %v485_v60 = vsel %vm8007_vm1, %v480_v56, %v478_v51 }
 0x106   : > { %v524_v61 = vcombine.low %v521_v58, %v520_v57  ;;  %v489_v62 = vcombine.low %v485_v60, %v484_v59  ;;  %v5340_v57 = vmul.f32 %v631_v39, %v5125_v16  ;;  %v636_v58 = vmul.f32 %v635_v40, %v5125_v16 }
 0x108   : > { %v531_v2 = vrot.slane %v524_v61, %v5228_v54  ;;  %v496_v6 = vrot.slane %v489_v62, %v5228_v54  ;;  %v556_v7 = vpop.permute.xlu1 %555  ;;  %v554_v8 = vpop.permute.xlu0 %553  ;;  %v640_v62 = vmul.f32 %v639_v41, %v5125_v16  ;;  %v754_v41 = vstv %s5345_s14  ;;  %s5430_s14 = sld [smem:[#allocation6 + $0x28]] }
 0x109   : > { %v558_v11 = vsel %vm8008_vm4, %v554_v8, %v556_v7  ;;  %v559_v12 = vsel %vm8008_vm4, %v556_v7, %v554_v8  ;;  %v677_v8 = vstv %s5307_s17  ;;  %s5374_s17 = sld [smem:[#allocation6 + $0x3f]] }
 0x10a   : > { %v538_v13 = vrot.slane %v531_v2, %v5228_v54  ;;  %v503_v14 = vrot.slane %v496_v6, %v5228_v54  ;;  %v563_v19 = vcombine.low %v559_v12, %v558_v11  ;;  %v669_v2 = vstv %s5291_s21  ;;  %s5711_s21 = sld [smem:[#allocation6 + $0x4b]] }
 0x10c   : > { %v5283_v22 = vsel %vm7998_vm2, %v538_v13, 0.0  ;;  %v5287_v23 = vsel %vm5264_vm5, %v503_v14, 0.0  ;;  %v570_v24 = vrot.slane %v563_v19, %v5228_v54  ;;  %v595_v25 = vpop.permute.xlu1 %594  ;;  %v593_v27 = vpop.permute.xlu0 %592  ;;  %v708_v13 = vstv %s5314_s18  ;;  %s5713_s18 = sld [smem:[#allocation6 + $0x4c]] }
 0x10d   : > { %v547_v28 = vmul.f32 %v546_v0, %v5283_v22  ;;  %v551_v29 = vmul.f32 %v550_v1, %v5283_v22  ;;  %v511_v33 = vmul.f32 %v510_v5, %v5287_v23  ;;  %v514_v34 = vmul.f32 %v513_v10, %v5287_v23 }
 0x10e   : > { %v577_v35 = vrot.slane %v570_v24, %v5228_v54  ;;  %v597_v36 = vsel %vm7979_vm7, %v593_v27, %v595_v25  ;;  %v598_v37 = vsel %vm7979_vm7, %v595_v25, %v593_v27  ;;  %v673_v5 = vstv %s5293_s27  ;;  %s5364_s27 = sld [smem:[#allocation6 + $0x9]] }
 0x10f   : > { %v548_v42 = vadd.f32 %v547_v28, %v511_v33  ;;  %v552_v44 = vadd.f32 %v551_v29, %v514_v34  ;;  %v601_v46 = vcombine.low %v598_v37, %v597_v36  ;;  %v712_v24 = vstv %s5321_s22  ;;  %s5403_s22 = sld [smem:[#allocation6 + $0xb]] }
 0x110   : > { %v5325_v45 = vsel %vm5301_vm9, %v577_v35, 0.0  ;;  %v645_v47 = vpop.permute.xlu1 %644  ;;  %v643_v49 = vpop.permute.xlu0 %642  ;;  %v716_v25 = vstv %s5327_s28  ;;  %v746_v29 = vstv %s5329_s11  ;;  %v750_v36 = vstv %s5336_s10  ;;  %s5405_s28 = sld [smem:[#allocation6 + $0x26]]  ;;  %s5734_s10 = sld [smem:[#allocation6 + $0x32]] }
 0x111   : > { %v586_v50 = vmul.f32 %v585_v20, %v5325_v45  ;;  %v590_v51 = vmul.f32 %v589_v21, %v5325_v45  ;;  %v647_v55 = vsel %vm7974_vm8, %v643_v49, %v645_v47  ;;  %v608_v56 = vrot.slane %v601_v46, %v5228_v54  ;;  %s5716_s11 = sld [smem:[#allocation6 + $0x16]] }
 0x112   : > { %v648_v59 = vsel %vm7974_vm8, %v645_v47, %v643_v49  ;;  %v785_v47 = vstv %s5348_s29  ;;  %s5736_s29 = sld [smem:[#allocation6 + $0x4d]] }
 0x113   : > { %v587_v60 = vadd.f32 %v586_v50, %v548_v42  ;;  %v591_v61 = vadd.f32 %v590_v51, %v552_v44  ;;  %v651_v0 = vcombine.low %v647_v55, %v648_v59  ;;  %v615_v1 = vrot.slane %v608_v56, %v5228_v54 }
 0x114   : > { %v683_v6 = vpop.permute.xlu1 %682  ;;  %v681_v7 = vpop.permute.xlu0 %680  ;;  %v789_v55 = vstv %s5354_s25  ;;  %v793_v56 = vstv %s5356_s26  ;;  %s5440_s26 = sld [smem:[#allocation6 + $0x42]]  ;;  %s5454_s25 = sld [smem:[#allocation6 + $0xe]] }
 0x115   : > { %v658_v16 = vrot.slane %v651_v0, %v5228_v54  ;;  %v685_v10 = vsel %vm7969_vm10, %v681_v7, %v683_v6  ;;  %v686_v11 = vsel %vm7969_vm10, %v683_v6, %v681_v7  ;;  %v5370_v12 = vsel %vm8020_vm3, %v615_v1, 0.0 }
 0x116   : > { %v690_v14 = vcombine.low %v685_v10, %v686_v11  ;;  %v624_v19 = vmul.f32 %v623_v31, %v5370_v12  ;;  %v628_v20 = vmul.f32 %v627_v32, %v5370_v12  ;;  %v871_v10 = vstv %s5382_s0  ;;  %s5576_s0 = sld [smem:[#allocation6 + $0x2c]] }
 0x117   : > { %v665_v21 = vrot.slane %v658_v16, %v5228_v54  ;;  %v867_v16 = vstv %s5380_s24  ;;  %s5695_s24 = sld [smem:[#allocation6 + $0x15]] }
 0x118   : > { %v697_v27 = vrot.slane %v690_v14, %v5228_v54  ;;  %v722_v28 = vpop.permute.xlu1 %721  ;;  %v720_v33 = vpop.permute.xlu0 %719  ;;  %v625_v31 = vadd.f32 %v624_v19, %v587_v60  ;;  %v629_v32 = vadd.f32 %v628_v20, %v591_v61  ;;  %v833_v61 = vstv %s5364_s27  ;;  %s5763_s27 = sld [smem:[#allocation6 + $0x17]] }
 0x119   : > { %v5392_v34 = vsel %vm8014_vm6, %v665_v21, 0.0  ;;  %v724_v46 = vsel %vm7967_vm11, %v720_v33, %v722_v28  ;;  %v725_v50 = vsel %vm7967_vm11, %v722_v28, %v720_v33  ;;  %v875_v28 = vstv %s5388_s3  ;;  %s5578_s3 = sld [smem:[#allocation6 + $0x47]] }
 0x11a   : > { %v674_v37 = vmul.f32 %v673_v5, %v5392_v34  ;;  %v678_v39 = vmul.f32 %v677_v8, %v5392_v34  ;;  %v704_v40 = vrot.slane %v697_v27, %v5228_v54  ;;  %v637_v42 = vadd.f32 %v636_v58, %v625_v31 }
 0x11b   : > { %v641_v44 = vadd.f32 %v640_v62, %v629_v32  ;;  %v836_v62 = vstv %s5366_s23  ;;  %v728_v5 = vcombine.low %v724_v46, %v725_v50  ;;  %v839_v8 = vstv %s5374_s17  ;;  %s5591_s23 = sld [smem:[#allocation6 + $0x12]]  ;;  %s5773_s17 = sld [smem:[#allocation6 + $0x33]] }
 0x11c   : > { %v5424_v49 = vsel %vm5398_vm14, %v704_v40, 0.0  ;;  %v760_v51 = vpop.permute.xlu1 %759  ;;  %v758_v58 = vpop.permute.xlu0 %757  ;;  %v675_v59 = vadd.f32 %v674_v37, %v637_v42  ;;  %v904_v33 = vstv %s5403_s22  ;;  %v8100_v40 = vmov 0  ;;  %s5775_s22 = sld [smem:[#allocation6 + $0x4e]] }
 0x11d   : > { %v679_v60 = vadd.f32 %v678_v39, %v641_v44  ;;  %v713_v0 = vmul.f32 %v712_v24, %v5424_v49  ;;  %v717_v1 = vmul.f32 %v716_v25, %v5424_v49  ;;  %v762_v6 = vsel %vm7963_vm13, %v758_v58, %v760_v51 }
 0x11e   : > { %v763_v7 = vsel %vm7963_vm13, %v760_v51, %v758_v58  ;;  %v735_v19 = vrot.slane %v728_v5, %v5228_v54  ;;  %v908_v39 = vstv %s5405_s28  ;;  %v8101_v40 = vsel %vm5465_vm15, 4294967295, %v8100_v40  ;;  %s5778_s28 = sld [smem:[#allocation6 + $0x18]] }
 0x11f   : > { %v714_v11 = vadd.f32 %v713_v0, %v675_v59  ;;  %v718_v14 = vadd.f32 %v717_v1, %v679_v60  ;;  %v767_v20 = vcombine.low %v762_v6, %v763_v7  ;;  %v912_v42 = vstv %s5411_s4  ;;  %s5606_s4 = sld [smem:[#allocation6 + $0x2d]] }
 0x120   : > { %v810_v21 = vpop.permute.xlu1 %809  ;;  %v808_v24 = vpop.permute.xlu0 %807  ;;  %v742_v31 = vrot.slane %v735_v19, %v5228_v54  ;;  %v941_v44 = vstv %s5413_s5  ;;  %v945_v46 = vstv %s5418_s6  ;;  %v953_v50 = vstv %s5420_s7  ;;  %s5495_s7 = sld [smem:[#allocation6 + $0x10]]  ;;  %s5659_s6 = sld [smem:[#allocation6 + $0x13]] }
 0x121   : > { %v811_v25 = vsel %vm8007_vm1, %v808_v24, %v810_v21  ;;  %v812_v27 = vsel %vm8007_vm1, %v810_v21, %v808_v24  ;;  %v774_v32 = vrot.slane %v767_v20, %v5228_v54  ;;  %v957_v1 = vstv %s5430_s14  ;;  %s5637_s5 = sld [smem:[#allocation6 + $0x48]]  ;;  %s5787_s14 = sld [smem:[#allocation6 + $0x19]] }
 0x122   : > { %v815_v37 = vcombine.low %v812_v27, %v811_v25  ;;  %v5479_v51 = vsel %vm7966_vm12, %v742_v31, 0.0  ;;  %v961_v19 = vstv %s5434_s8  ;;  %v5509_v31 = vmul.f32 %v957_v1, %v5148_v38  ;;  %s5540_s8 = sld [smem:[#allocation6 + $0x2b]] }
 0x123   : > { %v781_v58 = vrot.slane %v774_v32, %v5228_v54  ;;  %v751_v5 = vmul.f32 %v750_v36, %v5479_v51  ;;  %v755_v6 = vmul.f32 %v754_v41, %v5479_v51  ;;  %v949_v36 = vstv %s5440_s26  ;;  %s5790_s26 = sld [smem:[#allocation6 + $0x34]] }
 0x124   : > { %v822_v59 = vrot.slane %v815_v37, %v5228_v54  ;;  %v844_v60 = vpop.permute.xlu1 %843  ;;  %v842_v0 = vpop.permute.xlu0 %841  ;;  %v5505_v41 = vmul.f32 %v953_v50, %v5148_v38  ;;  %v5514_v3 = vmul.f32 %v961_v19, %v5148_v38  ;;  %v990_v50 = vstv %s5454_s25  ;;  %s5792_s25 = sld [smem:[#allocation6 + $0x4f]] }
 0x125   : > { %v845_v7 = vsel %vm8009_vm0, %v842_v0, %v844_v60  ;;  %v5499_v20 = vsel %vm5465_vm15, %v781_v58, 0.0  ;;  %v846_v21 = vsel %vm8009_vm0, %v844_v60, %v842_v0  ;;  %v752_v24 = vadd.f32 %v751_v5, %v714_v11 }
 0x126   : > { %v756_v25 = vadd.f32 %v755_v6, %v718_v14  ;;  %v829_v27 = vrot.slane %v822_v59, %v5228_v54  ;;  %v790_v32 = vmul.f32 %v789_v55, %v5499_v20  ;;  %v794_v37 = vmul.f32 %v793_v56, %v5499_v20 }
 0x127   : > { %v849_v58 = vcombine.low %v846_v21, %v845_v7  ;;  %v543_v11 = vmul.f32 %v542_v63, %v5283_v22  ;;  %v508_v14 = vmul.f32 %v507_v4, %v5287_v23  ;;  %v994_v55 = vstv %s5456_s30  ;;  %s5682_s30 = sld [smem:[#allocation6 + $0x14]] }
 0x128   : > { %v881_v60 = vpop.permute.xlu1 %880  ;;  %v879_v0 = vpop.permute.xlu0 %878  ;;  %v5524_v59 = vadd.f32 %v790_v32, %v752_v24  ;;  %v5526_v56 = vadd.f32 %v794_v37, %v756_v25  ;;  %v831_v63 = vsel %vm5264_vm5, %v829_v27, 0.0  ;;  %v998_v22 = vstv %s5473_s9  ;;  %s5661_s9 = sld [smem:[#allocation6 + $0x2e]] }
 0x129   : > { %v856_v1 = vrot.slane %v849_v58, %v5228_v54  ;;  %v882_v38 = vsel %vm8008_vm4, %v879_v0, %v881_v60  ;;  %v883_v4 = vsel %vm8008_vm4, %v881_v60, %v879_v0  ;;  %v1027_v23 = vstv %s5475_s13  ;;  %s5684_s13 = sld [smem:[#allocation6 + $0x2f]] }
 0x12a   : > { %v886_v6 = vcombine.low %v883_v4, %v882_v38  ;;  %v1031_v21 = vstv %s5484_s16  ;;  %v1035_v24 = vstv %s5486_s2  ;;  %v544_v25 = vadd.f32 %v543_v11, %v508_v14  ;;  %s5672_s2 = sld [smem:[#allocation6 + $0x49]]  ;;  %s5693_s16 = sld [smem:[#allocation6 + $0x4a]] }
 0x12b   : > { %v863_v5 = vrot.slane %v856_v1, %v5228_v54  ;;  %v1064_v37 = vstv %s5495_s7  ;;  %v837_v58 = vmul.f32 %v836_v62, %v831_v63  ;;  %v840_v38 = vmul.f32 %v839_v8, %v831_v63  ;;  %s5798_s7 = sld [smem:[#allocation6 + $0x1a]] }
 0x12c   : > { %v918_v7 = vpop.permute.xlu1 %917  ;;  %v916_v19 = vpop.permute.xlu0 %915  ;;  %v893_v0 = vrot.slane %v886_v6, %v5228_v54  ;;  %v834_v62 = vmul.f32 %v833_v61, %v831_v63 }
 0x12d   : > { %v919_v27 = vsel %vm7979_vm7, %v916_v19, %v918_v7  ;;  %v920_v32 = vsel %vm7979_vm7, %v918_v7, %v916_v19  ;;  %v865_v60 = vsel %vm7998_vm2, %v863_v5, 0.0  ;;  %v582_v7 = vmul.f32 %v581_v18, %v5325_v45 }
 0x12e   : > { %v923_v1 = vcombine.low %v920_v32, %v919_v27  ;;  %v868_v11 = vmul.f32 %v867_v16, %v865_v60  ;;  %v872_v14 = vmul.f32 %v871_v10, %v865_v60  ;;  %v876_v4 = vmul.f32 %v875_v28, %v865_v60 }
 0x12f   : > { %v900_v5 = vrot.slane %v893_v0, %v5228_v54  ;;  %v620_v10 = vmul.f32 %v619_v26, %v5370_v12  ;;  %v583_v60 = vadd.f32 %v582_v7, %v544_v25 }
 0x130   : > { %v930_v8 = vrot.slane %v923_v1, %v5228_v54  ;;  %v967_v6 = vpop.permute.xlu1 %966  ;;  %v965_v16 = vpop.permute.xlu0 %964  ;;  %v873_v28 = vadd.f32 %v872_v14, %v837_v58  ;;  %v877_v19 = vadd.f32 %v876_v4, %v840_v38  ;;  %v869_v18 = vadd.f32 %v868_v11, %v834_v62 }
 0x131   : > { %v968_v27 = vsel %vm7974_vm8, %v965_v16, %v967_v6  ;;  %v902_v45 = vsel %vm5301_vm9, %v900_v5, 0.0  ;;  %v969_v26 = vsel %vm7974_vm8, %v967_v6, %v965_v16  ;;  %v1068_v11 = vstv %s5540_s8  ;;  %s5802_s8 = sld [smem:[#allocation6 + $0x35]] }
 0x132   : > { %v937_v61 = vrot.slane %v930_v8, %v5228_v54  ;;  %v905_v12 = vmul.f32 %v904_v33, %v902_v45  ;;  %v909_v63 = vmul.f32 %v908_v39, %v902_v45  ;;  %v913_v32 = vmul.f32 %v912_v42, %v902_v45 }
 0x133   : > { %v972_v58 = vcombine.low %v968_v27, %v969_v26  ;;  %v1072_v14 = vstv %s5542_s12  ;;  %v621_v8 = vadd.f32 %v620_v10, %v583_v60  ;;  %v1109_v26 = vstv %s5578_s3  ;;  %s5804_s12 = sld [smem:[#allocation6 + $0x50]]  ;;  %s7951_s3 = smov 33  }
 0x134   : > { %v939_v0 = vsel %vm8020_vm3, %v937_v61, 0.0  ;;  %v1004_v1 = vpop.permute.xlu1 %1003  ;;  %v1002_v38 = vpop.permute.xlu0 %1001  ;;  %v906_v4 = vadd.f32 %v905_v12, %v869_v18  ;;  %v910_v62 = vadd.f32 %v909_v63, %v873_v28  ;;  %v914_v33 = vadd.f32 %v913_v32, %v877_v19 }
 0x135   : > { %v942_v5 = vmul.f32 %v941_v44, %v939_v0  ;;  %v946_v39 = vmul.f32 %v945_v46, %v939_v0  ;;  %v950_v42 = vmul.f32 %v949_v36, %v939_v0  ;;  %v979_v25 = vrot.slane %v972_v58, %v5228_v54 }
 0x136   : > { %v1005_v7 = vsel %vm7969_vm10, %v1002_v38, %v1004_v1  ;;  %v1006_v16 = vsel %vm7969_vm10, %v1004_v1, %v1002_v38  ;;  %v1101_v44 = vstv %s5562_s19  ;;  %v1105_v61 = vstv %s5576_s0  ;;  %s1434_s19 = sld [smem:[#allocation7]]  ;;  %s7953_s0 = smov 34  }
 0x137   : > { %v943_v6 = vadd.f32 %v942_v5, %v906_v4  ;;  %v947_v46 = vadd.f32 %v946_v39, %v910_v62  ;;  %v951_v28 = vadd.f32 %v950_v42, %v914_v33  ;;  %v986_v36 = vrot.slane %v979_v25, %v5228_v54 }
 0x138   : > { %v1009_v19 = vcombine.low %v1005_v7, %v1006_v16  ;;  %v1041_v27 = vpop.permute.xlu1 %1040  ;;  %v1039_v18 = vpop.permute.xlu0 %1038  ;;  %v1152_v38 = vstv %s5591_s23  ;;  %v633_v4 = vadd.f32 %v5340_v57, %v621_v8  ;;  %v709_v25 = vmul.f32 %v708_v13, %v5424_v49  ;;  %s7947_s23 = smov 32  }
 0x139   : > { %v1042_v45 = vsel %vm7967_vm11, %v1039_v18, %v1041_v27  ;;  %v1043_v10 = vsel %vm7967_vm11, %v1041_v27, %v1039_v18  ;;  %v959_v12 = vadd.f32 %v5509_v31, %v947_v46  ;;  %v963_v63 = vadd.f32 %v5514_v3, %v951_v28 }
 0x13a   : > { %v988_v32 = vsel %vm8014_vm6, %v986_v36, 0.0  ;;  %v1016_v58 = vrot.slane %v1009_v19, %v5228_v54  ;;  %v1046_v1 = vcombine.low %v1042_v45, %v1043_v10  ;;  %v670_v31 = vmul.f32 %v669_v2, %v5392_v34 }
 0x13b   : > { %v995_v60 = vmul.f32 %v994_v55, %v988_v32  ;;  %v999_v0 = vmul.f32 %v998_v22, %v988_v32  ;;  %v955_v3 = vadd.f32 %v5505_v41, %v943_v6  ;;  %v991_v22 = vmul.f32 %v990_v50, %v988_v32 }
 0x13c   : > { %v1023_v62 = vrot.slane %v1016_v58, %v5228_v54  ;;  %v1078_v33 = vpop.permute.xlu1 %1077  ;;  %v1076_v55 = vpop.permute.xlu0 %1075  ;;  %v1053_v42 = vrot.slane %v1046_v1, %v5228_v54  ;;  %v1155_v41 = vstv %s5606_s4  ;;  %v671_v6 = vadd.f32 %v670_v31, %v633_v4  ;;  %s7945_s4 = smov 31  }
 0x13d   : > { %v996_v5 = vadd.f32 %v995_v60, %v959_v12  ;;  %v1000_v39 = vadd.f32 %v999_v0, %v963_v63  ;;  %v1079_v2 = vsel %vm7963_vm13, %v1076_v55, %v1078_v33  ;;  %v1080_v34 = vsel %vm7963_vm13, %v1078_v33, %v1076_v55 }
 0x13e   : > { %v1025_v57 = vsel %vm5398_vm14, %v1023_v62, 0.0  ;;  %v1060_v8 = vrot.slane %v1053_v42, %v5228_v54  ;;  %v747_v16 = vmul.f32 %v746_v29, %v5479_v51  ;;  %v1083_v28 = vcombine.low %v1079_v2, %v1080_v34 }
 0x13f   : > { %v1032_v50 = vmul.f32 %v1031_v21, %v1025_v57  ;;  %v1036_v7 = vmul.f32 %v1035_v24, %v1025_v57  ;;  %v1028_v46 = vmul.f32 %v1027_v23, %v1025_v57  ;;  %v992_v13 = vadd.f32 %v991_v22, %v955_v3 }
 0x140   : > { %v1129_v36 = vpop.permute.xlu1 %1128  ;;  %v1127_v19 = vpop.permute.xlu0 %1126  ;;  %v1062_v24 = vsel %vm7966_vm12, %v1060_v8, 0.0  ;;  %v1090_v23 = vrot.slane %v1083_v28, %v5228_v54  ;;  %v710_v18 = vadd.f32 %v709_v25, %v671_v6  ;;  %v786_v45 = vmul.f32 %v785_v47, %v5499_v20 }
 0x141   : > { %v1033_v49 = vadd.f32 %v1032_v50, %v996_v5  ;;  %v1037_v21 = vadd.f32 %v1036_v7, %v1000_v39  ;;  %v1065_v27 = vmul.f32 %v1064_v37, %v1062_v24  ;;  %v1069_v29 = vmul.f32 %v1068_v11, %v1062_v24 }
 0x142   : > { %v1073_v51 = vmul.f32 %v1072_v14, %v1062_v24  ;;  %v1130_v10 = vsel %vm8007_vm1, %v1127_v19, %v1129_v36  ;;  %v1131_v12 = vsel %vm8007_vm1, %v1129_v36, %v1127_v19  ;;  %v1029_v37 = vadd.f32 %v1028_v46, %v992_v13 }
 0x143   : > { %v1070_v63 = vadd.f32 %v1069_v29, %v1033_v49  ;;  %v1097_v14 = vrot.slane %v1090_v23, %v5228_v54  ;;  %v1158_v47 = vstv %s5637_s5  ;;  %v1134_v20 = vcombine.low %v1131_v12, %v1130_v10  ;;  %s7943_s5 = smov 30  }
 0x144   : > { %v1074_v11 = vadd.f32 %v1073_v51, %v1037_v21  ;;  %v1163_v32 = vpop.permute.xlu1 %1162  ;;  %v1161_v58 = vpop.permute.xlu0 %1160  ;;  %v748_v1 = vadd.f32 %v747_v16, %v710_v18  ;;  %v1066_v4 = vadd.f32 %v1065_v27, %v1029_v37  ;;  %v1186_v39 = vstv %s5659_s6  ;;  %s7949_s6 = smov 18  }
 0x145   : > { %v1164_v60 = vsel %vm8009_vm0, %v1161_v58, %v1163_v32  ;;  %v1165_v0 = vsel %vm8009_vm0, %v1163_v32, %v1161_v58  ;;  %v1099_v31 = vsel %vm5465_vm15, %v1097_v14, 0.0  ;;  %v1141_v22 = vrot.slane %v1134_v20, %v5228_v54 }
 0x146   : > { %v1168_v3 = vcombine.low %v1165_v0, %v1164_v60  ;;  %v1102_v62 = vmul.f32 %v1101_v44, %v1099_v31  ;;  %v1106_v33 = vmul.f32 %v1105_v61, %v1099_v31  ;;  %v1110_v55 = vmul.f32 %v1109_v26, %v1099_v31 }
 0x147   : > { %v787_v5 = vadd.f32 %v786_v45, %v748_v1  ;;  %v1190_v42 = vstv %s5661_s9  ;;  %v1148_v25 = vrot.slane %v1141_v22, %v5228_v54  ;;  %v1194_v50 = vstv %s5672_s2  ;;  %s8102_s9 = smov 17   ;;  %s8103_s2 = smov 16  }
 0x148   : > { %v1175_v57 = vrot.slane %v1168_v3, %v5228_v54  ;;  %v1200_v2 = vpop.permute.xlu1 %1199  ;;  %v1198_v34 = vpop.permute.xlu0 %1197  ;;  %v1103_v44 = vadd.f32 %v1102_v62, %v1066_v4  ;;  %v1107_v61 = vadd.f32 %v1106_v33, %v1070_v63  ;;  %v1111_v26 = vadd.f32 %v1110_v55, %v1074_v11 }
 0x149   : > { %v1201_v8 = vsel %vm8008_vm4, %v1198_v34, %v1200_v2  ;;  %v1202_v6 = vsel %vm8008_vm4, %v1200_v2, %v1198_v34  ;;  %v1150_v36 = vsel %vm5264_vm5, %v1148_v25, 0.0  ;;  %v1223_v49 = vstv %s5682_s30  ;;  %s8104_s30 = smov 15  }
 0x14a   : > { %v1182_v7 = vrot.slane %v1175_v57, %v5228_v54  ;;  %v5724_v16 = vadd.f32 %v1103_v44, %v787_v5  ;;  %v5727_v46 = vadd.f32 %v1107_v61, %v5524_v59  ;;  %v5730_v28 = vadd.f32 %v1111_v26, %v5526_v56 }
 0x14b   : > { %v1156_v19 = vmul.f32 %v1155_v41, %v1150_v36  ;;  %v1227_v59 = vstv %s5684_s13  ;;  %v1159_v24 = vmul.f32 %v1158_v47, %v1150_v36  ;;  %v1205_v51 = vcombine.low %v1202_v6, %v1201_v8  ;;  %s7961_s13 = smov 14  }
 0x14c   : > { %v1184_v13 = vsel %vm7998_vm2, %v1182_v7, 0.0  ;;  %v1237_v21 = vpop.permute.xlu1 %1236  ;;  %v1235_v56 = vpop.permute.xlu0 %1234  ;;  %v1231_v23 = vstv %s5693_s16  ;;  %v1260_v18 = vstv %s5695_s24  ;;  %v1276_v63 = vstv %s5706_s20  ;;  %s7959_s16 = smov 2   ;;  %s8105_s24 = smov 1  }
 0x14d   : > { %v1191_v27 = vmul.f32 %v1190_v42, %v1184_v13  ;;  %v1195_v29 = vmul.f32 %v1194_v50, %v1184_v13  ;;  %v1238_v41 = vsel %vm7979_vm7, %v1235_v56, %v1237_v21  ;;  %v1239_v45 = vsel %vm7979_vm7, %v1237_v21, %v1235_v56  ;;  %s7957_s20 = smov 126  }
 0x14e   : > { %v1212_v37 = vrot.slane %v1205_v51, %v5228_v54  ;;  %v1264_v11 = vstv %s5704_s15  ;;  %v1268_v14 = vstv %s5711_s21  ;;  %v1242_v32 = vcombine.low %v1239_v45, %v1238_v41  ;;  %s8106_s15 = smov 127   ;;  %s7955_s21 = smov 114  }
 0x14f   : > { %v1192_v10 = vadd.f32 %v1191_v27, %v1156_v19  ;;  %v1196_v12 = vadd.f32 %v1195_v29, %v1159_v24  ;;  %v1280_v47 = vstv %s5713_s18  ;;  %v1272_v0 = vstv %s5716_s11  ;;  %s8107_s18 = smov 113   ;;  %s8108_s11 = smov 112  }
 0x150   : > { %v1286_v58 = vpop.permute.xlu1 %1285  ;;  %v1284_v20 = vpop.permute.xlu0 %1283  ;;  %v1219_v60 = vrot.slane %v1212_v37, %v5228_v54  ;;  %v1187_v31 = vmul.f32 %v1186_v39, %v1184_v13  ;;  %v1249_v3 = vrot.slane %v1242_v32, %v5228_v54  ;;  %v1277_v62 = vmul.f32 %v1276_v63, %v5170_v43 }
 0x151   : > { %v1287_v1 = vsel %vm7974_vm8, %v1284_v20, %v1286_v58  ;;  %v1288_v4 = vsel %vm7974_vm8, %v1286_v58, %v1284_v20  ;;  %v1281_v22 = vmul.f32 %v1280_v47, %v5170_v43  ;;  %v1313_v5 = vstv %s5734_s10  ;;  %s8109_s10 = smov 111  }
 0x152   : > { %v1291_v33 = vcombine.low %v1287_v1, %v1288_v4  ;;  %v1221_v55 = vsel %vm5301_vm9, %v1219_v60, 0.0  ;;  %v1317_v42 = vstv %s5736_s29  ;;  %v1153_v57 = vmul.f32 %v1152_v38, %v1150_v36  ;;  %s7941_s29 = smov 110  }
 0x153   : > { %v1228_v2 = vmul.f32 %v1227_v59, %v1221_v55  ;;  %v1232_v34 = vmul.f32 %v1231_v23, %v1221_v55  ;;  %v1256_v39 = vrot.slane %v1249_v3, %v5228_v54  ;;  %v1224_v26 = vmul.f32 %v1223_v49, %v1221_v55 }
 0x154   : > { %v1323_v44 = vpop.permute.xlu1 %1322  ;;  %v1321_v61 = vpop.permute.xlu0 %1320  ;;  %v1298_v25 = vrot.slane %v1291_v33, %v5228_v54  ;;  %v1188_v7 = vadd.f32 %v1187_v31, %v1153_v57  ;;  %v1273_v21 = vmul.f32 %v1272_v0, %v5170_v43  ;;  %v1309_v41 = vstv %s5763_s27  ;;  %s4462_s27 = sld [smem:[#allocation7 + $0x1]] }
 0x155   : > { %v1324_v50 = vsel %vm7969_vm10, %v1321_v61, %v1323_v44  ;;  %v1325_v38 = vsel %vm7969_vm10, %v1323_v44, %v1321_v61  ;;  %v1229_v8 = vadd.f32 %v1228_v2, %v1192_v10  ;;  %v1233_v6 = vadd.f32 %v1232_v34, %v1196_v12 }
 0x156   : > { %v1258_v36 = vsel %vm8020_vm3, %v1256_v39, 0.0  ;;  %v1305_v59 = vrot.slane %v1298_v25, %v5228_v54  ;;  %v1328_v56 = vcombine.low %v1324_v50, %v1325_v38  ;;  %v1225_v29 = vadd.f32 %v1224_v26, %v1188_v7 }
 0x157   : > { %v1261_v19 = vmul.f32 %v1260_v18, %v1258_v36  ;;  %v1265_v13 = vmul.f32 %v1264_v11, %v1258_v36  ;;  %v1269_v49 = vmul.f32 %v1268_v14, %v1258_v36  ;;  %v1350_v14 = vstv %s5773_s17  ;;  %s7939_s17 = smov 98  }
 0x158   : > { %v1360_v24 = vpop.permute.xlu1 %1359  ;;  %v1358_v27 = vpop.permute.xlu0 %1357  ;;  %v1307_v18 = vsel %vm8014_vm6, %v1305_v59, 0.0  ;;  %v1335_v43 = vrot.slane %v1328_v56, %v5228_v54  ;;  %v1354_v32 = vstv %s5775_s22  ;;  %v1346_v4 = vstv %s5778_s28  ;;  %s7937_s22 = smov 97   ;;  %s7935_s28 = smov 96  }
 0x159   : > { %v1266_v51 = vadd.f32 %v1265_v13, %v1229_v8  ;;  %v1270_v23 = vadd.f32 %v1269_v49, %v1233_v6  ;;  %v1314_v45 = vmul.f32 %v1313_v5, %v1307_v18  ;;  %v1318_v10 = vmul.f32 %v1317_v42, %v1307_v18 }
 0x15a   : > { %v1262_v12 = vadd.f32 %v1261_v19, %v1225_v29  ;;  %v1361_v11 = vsel %vm7967_vm11, %v1358_v27, %v1360_v24  ;;  %v1342_v58 = vrot.slane %v1335_v43, %v5228_v54  ;;  %v1362_v47 = vsel %vm7967_vm11, %v1360_v24, %v1358_v27 }
 0x15b   : > { %v1278_v37 = vadd.f32 %v1277_v62, %v1266_v51  ;;  %v1282_v63 = vadd.f32 %v1281_v22, %v1270_v23  ;;  %v1365_v31 = vcombine.low %v1361_v11, %v1362_v47  ;;  %v1310_v3 = vmul.f32 %v1309_v41, %v1307_v18 }
 0x15c   : > { %v1397_v20 = vpop.permute.xlu1 %1396  ;;  %v1395_v60 = vpop.permute.xlu0 %1394  ;;  %v1344_v62 = vsel %vm5398_vm14, %v1342_v58, 0.0  ;;  %v1274_v22 = vadd.f32 %v1273_v21, %v1262_v12  ;;  %v1383_v2 = vstv %s5787_s14  ;;  %v1387_v34 = vstv %s5790_s26  ;;  %s7933_s14 = smov 95   ;;  %s7931_s26 = smov 94  }
 0x15d   : > { %v1315_v0 = vadd.f32 %v1314_v45, %v1278_v37  ;;  %v1319_v1 = vadd.f32 %v1318_v10, %v1282_v63  ;;  %v1398_v33 = vsel %vm7963_vm13, %v1395_v60, %v1397_v20  ;;  %v1399_v55 = vsel %vm7963_vm13, %v1397_v20, %v1395_v60 }
 0x15e   : > { %v1351_v5 = vmul.f32 %v1350_v14, %v1344_v62  ;;  %v1355_v42 = vmul.f32 %v1354_v32, %v1344_v62  ;;  %v1372_v57 = vrot.slane %v1365_v31, %v5228_v54  ;;  %v1391_v39 = vstv %s5792_s25  ;;  %s4463_s25 = sld [smem:[#allocation7 + $0x2]] }
 0x15f   : > { %v1402_v44 = vcombine.low %v1398_v33, %v1399_v55  ;;  %v1347_v61 = vmul.f32 %v1346_v4, %v1344_v62  ;;  %v1420_v38 = vstv %s5798_s7  ;;  %v1311_v8 = vadd.f32 %v1310_v3, %v1274_v22  ;;  %s5976_s7 = sld [smem:[#allocation9 + $0xc]] }
 0x160   : > { %v1352_v26 = vadd.f32 %v1351_v5, %v1315_v0  ;;  %v1356_v25 = vadd.f32 %v1355_v42, %v1319_v1  ;;  %v1379_v50 = vrot.slane %v1372_v57, %v5228_v54  ;;  %v1424_v36 = vstv %s5802_s8  ;;  %s5978_s8 = sld [smem:[#allocation9 + $0x57]] }
 0x161   : > { %v1409_v7 = vrot.slane %v1402_v44, %v5228_v54  ;;  %v1428_v19 = vstv %s5804_s12  ;;  %v1348_v56 = vadd.f32 %v1347_v61, %v1311_v8  ;;  %v1435_v12 = vstv %s1434_s19  ;;  %s5980_s12 = sld [smem:[#allocation9]]  ;;  %s5982_s19 = sld [smem:[#allocation9 + $0xa2]] }
 0x162   : > { %v1381_v6 = vsel %vm7966_vm12, %v1379_v50, 0.0  ;;  %vm7978_vm13 = vcmp.lt.s32.totalorder %v5195_v48, 34  ;;  %vm7997_vm12 = vcmp.lt.s32.totalorder %v5195_v48, 33  ;;  %vm7996_vm11 = vcmp.lt.s32.totalorder %v5195_v48, 32 }
 0x163   : > { %v1384_v13 = vmul.f32 %v1383_v2, %v1381_v6  ;;  %v1388_v49 = vmul.f32 %v1387_v34, %v1381_v6  ;;  %v1392_v59 = vmul.f32 %v1391_v39, %v1381_v6  ;;  %v1416_v21 = vrot.slane %v1409_v7, %v5228_v54  ;;  %v6088_v6 = vld [vmem:[%s8092_s1] sm:$0x3]  ;;  %s6126_s1 = sld [smem:[#allocation9 + $0xa0]] }
 0x164   : > { %v1443_v0 = vstv %s4463_s25  ;;  %s5997_s25 = sld [smem:[#allocation9 + $0x97]]  ;;  %vm7991_vm10 = vcmp.lt.s32.totalorder %v5195_v48, 31  ;;  %vm8010_vm8 = vcmp.ge.s32.totalorder %v6088_v6, 2  ;;  %vm8002_vm7 = vcmp.lt.s32.totalorder %v5195_v48, 30 }
 0x165   : > { %v1389_v24 = vadd.f32 %v1388_v49, %v1352_v26  ;;  %v1393_v27 = vadd.f32 %v1392_v59, %v1356_v25  ;;  %v1418_v29 = vsel %vm5465_vm15, %v1416_v21, 0.0  ;;  %v1385_v51 = vadd.f32 %v1384_v13, %v1348_v56 }
 0x166   : > { %v1421_v23 = vmul.f32 %v1420_v38, %v1418_v29  ;;  %v1425_v18 = vmul.f32 %v1424_v36, %v1418_v29  ;;  %v1429_v41 = vmul.f32 %v1428_v19, %v1418_v29  ;;  %v1917_v5 = vstv %s5976_s7  ;;  %s6056_s7 = sld [smem:[#allocation9 + $0x7]] }
 0x167   : > { %v1921_v42 = vstv %s5978_s8  ;;  %v1489_v57 = vstv %s5980_s12  ;;  %v1925_v34 = vstv %s5982_s19  ;;  %s6058_s8 = sld [smem:[#allocation9 + $0x52]]  ;;  %s6065_s19 = sld [smem:[#allocation9 + $0x9d]] }
 0x168   : > { %v1422_v45 = vadd.f32 %v1421_v23, %v1385_v51  ;;  %v1426_v10 = vadd.f32 %v1425_v18, %v1389_v24  ;;  %v1430_v43 = vadd.f32 %v1429_v41, %v1393_v27  ;;  %s6288_s12 = sld [smem:[#allocation9 + $0xa6]] }
 0x16a   : > { %v1431_v37 = vadd.f32 %v1422_v45, %v5724_v16  ;;  %v5834_v63 = vadd.f32 %v1426_v10, %v5727_v46  ;;  %v5837_v11 = vadd.f32 %v1430_v43, %v5730_v28  ;;  %v1439_v16 = vstv %s4462_s27  ;;  %s5984_s27 = sld [smem:[#allocation9 + $0x4b]] }
 0x16b   : > { %v1533_v19 = vstv %s5997_s25  ;;  %s8171_s25 = smov 34  }
 0x16c   : > { %v1436_v14 = vadd.f32 %v1435_v12, %v1431_v37  ;;  %v1440_v46 = vadd.f32 %v1439_v16, %v5834_v63  ;;  %v1444_v31 = vadd.f32 %v1443_v0, %v5837_v11  ;;  %8123 = sst [smem:[#allocation32_spill]] %s6056_s7 }
 0x16d   : > { %8124 = sst [smem:[#allocation33_spill]] %s6058_s8 }
 0x16e   : > { %v5839_v32 = vmax.f32 %v1436_v14, 0.0  ;;  %v5942_v28 = vmax.f32 %v1440_v46, 0.0  ;;  %v6013_v33 = vmax.f32 %v1444_v31, 0.0  ;;  %8125 = sst [smem:[#allocation34_spill]] %s6065_s19 }
 0x170   : > { %v5843_v58 = vrot.slane %v5839_v32, %v5123_v15  ;;  %v5847_v47 = vrot.slane %v5839_v32, %v5128_v17  ;;  %v5950_v20 = vrot.slane %v5942_v28, %v5123_v15  ;;  %v5954_v60 = vrot.slane %v5942_v28, %v5128_v17  ;;  %8110 = sst [smem:[#allocation19_spill]] %s5984_s27 }
 0x171   : > { %v1492_v2 = vstv %s5984_s27  ;;  %v6047_v39 = vrot.slane %v6013_v33, %v5123_v15  ;;  %v6062_v15 = vrot.slane %v6013_v33, %v5128_v17  ;;  %v6070_v26 = vmul.f32 %v1917_v5, %v5839_v32  ;;  %s6105_s27 = sld [smem:[#allocation9 + $0x54]] }
 0x172   : > { %1463 = vrot.lane.b32.xlu1 %v5847_v47, %s7953_s0  ;;  %1461 = vrot.lane.b32.xlu0 %v5843_v58, %s7953_s0  ;;  %v6073_v25 = vmul.f32 %v1921_v42, %v5839_v32  ;;  %v6119_v24 = vmul.f32 %v1925_v34, %v5839_v32  ;;  %v1762_v5 = vstv %s6065_s19  ;;  %s6187_s19 = sld [smem:[#allocation9 + $0x5a]] }
 0x176   : > { %1499 = vrot.lane.b32.xlu1 %v5847_v47, %s7951_s3  ;;  %1497 = vrot.lane.b32.xlu0 %v5843_v58, %s7951_s3 }
 0x17a   : > { %1538 = vrot.lane.b32.xlu1 %v5847_v47, %s7947_s23  ;;  %1536 = vrot.lane.b32.xlu0 %v5843_v58, %s7947_s23 }
 0x17e   : > { %1576 = vrot.lane.b32.xlu1 %v5847_v47, %s7945_s4  ;;  %1574 = vrot.lane.b32.xlu0 %v5843_v58, %s7945_s4 }
 0x182   : > { %1615 = vrot.lane.b32.xlu1 %v5847_v47, %s7943_s5  ;;  %1613 = vrot.lane.b32.xlu0 %v5843_v58, %s7943_s5 }
 0x186   : > { %1654 = vrot.lane.b32.xlu1 %v5847_v47, %s7949_s6  ;;  %1652 = vrot.lane.b32.xlu0 %v5843_v58, %s7949_s6 }
 0x18a   : > { %1693 = vrot.lane.b32.xlu1 %v5847_v47, %s8102_s9  ;;  %1691 = vrot.lane.b32.xlu0 %v5843_v58, %s8102_s9 }
 0x18e   : > { %1730 = vrot.lane.b32.xlu1 %v5847_v47, %s8103_s2  ;;  %1728 = vrot.lane.b32.xlu0 %v5843_v58, %s8103_s2 }
 0x192   : > { %1767 = vrot.lane.b32.xlu1 %v5847_v47, %s8104_s30  ;;  %1765 = vrot.lane.b32.xlu0 %v5843_v58, %s8104_s30 }
 0x196   : > { %1804 = vrot.lane.b32.xlu1 %v5847_v47, %s7961_s13  ;;  %1802 = vrot.lane.b32.xlu0 %v5843_v58, %s7961_s13  ;;  %s6033_s13 = sld [smem:[#allocation9 + $0x6]] }
 0x19a   : > { %1843 = vrot.lane.b32.xlu1 %v5847_v47, %s7959_s16  ;;  %1841 = vrot.lane.b32.xlu0 %v5843_v58, %s7959_s16  ;;  %s6031_s16 = sld [smem:[#allocation9 + $0x9b]] }
 0x19c   : > { %v1717_v16 = vstv %s6033_s13  ;;  %s6482_s13 = sld [smem:[#allocation9 + $0x5f]] }
 0x19e   : > { %1881 = vrot.lane.b32.xlu1 %v5847_v47, %s8105_s24  ;;  %1879 = vrot.lane.b32.xlu0 %v5843_v58, %s8105_s24 }
 0x1a0   : > { %8121 = sst [smem:[#allocation30_spill]] %s6031_s16 }
 0x1a2   : > { %1930 = vrot.lane.b32.xlu1 %v5847_v47, %s8106_s15  ;;  %1928 = vrot.lane.b32.xlu0 %v5843_v58, %s8106_s15  ;;  %s6114_s15 = sld [smem:[#allocation9 + $0x9f]] }
 0x1a6   : > { %1967 = vrot.lane.b32.xlu1 %v5847_v47, %s7957_s20  ;;  %1965 = vrot.lane.b32.xlu0 %v5843_v58, %s7957_s20  ;;  %s6025_s20 = sld [smem:[#allocation9 + $0x50]] }
 0x1aa   : > { %2005 = vrot.lane.b32.xlu1 %v5847_v47, %s7955_s21  ;;  %2003 = vrot.lane.b32.xlu0 %v5843_v58, %s7955_s21  ;;  %s6023_s21 = sld [smem:[#allocation9 + $0x5]] }
 0x1ac   : > { %8120 = sst [smem:[#allocation29_spill]] %s6025_s20  ;;  %v1684_v14 = vstv %s6025_s20  ;;  %s6159_s20 = sld [smem:[#allocation9 + $0xa3]] }
 0x1ae   : > { %2044 = vrot.lane.b32.xlu1 %v5847_v47, %s8107_s18  ;;  %2042 = vrot.lane.b32.xlu0 %v5843_v58, %s8107_s18  ;;  %s6083_s18 = sld [smem:[#allocation9 + $0x9e]] }
 0x1b0   : > { %8119 = sst [smem:[#allocation28_spill]] %s6023_s21  ;;  %v1680_v11 = vstv %s6023_s21  ;;  %s6167_s21 = sld [smem:[#allocation9 + $0xe]] }
 0x1b2   : > { %2081 = vrot.lane.b32.xlu1 %v5847_v47, %s8108_s11  ;;  %2079 = vrot.lane.b32.xlu0 %v5843_v58, %s8108_s11  ;;  %s6067_s11 = sld [smem:[#allocation9 + $0x8]]  ;;  %8129 = sst [smem:[#allocation36_spill]] %s6159_s20 }
 0x1b3   : > { %s6272_s20 = sld [smem:[#allocation9 + $0x5b]] }
 0x1b4   : > { %8126 = sst [smem:[#allocation35_spill]] %s6083_s18  ;;  %s6197_s18 = sld [smem:[#allocation9 + $0x10]] }
 0x1b6   : > { %2118 = vrot.lane.b32.xlu1 %v5847_v47, %s8109_s10  ;;  %2116 = vrot.lane.b32.xlu0 %v5843_v58, %s8109_s10  ;;  %s6040_s10 = sld [smem:[#allocation9 + $0x51]]  ;;  %8130 = sst [smem:[#allocation37_spill]] %s6167_s21 }
 0x1b7   : > { %s6382_s21 = sld [smem:[#allocation9 + $0xa7]] }
 0x1ba   : > { %2155 = vrot.lane.b32.xlu1 %v5847_v47, %s7941_s29  ;;  %2153 = vrot.lane.b32.xlu0 %v5843_v58, %s7941_s29  ;;  %s6003_s29 = sld [smem:[#allocation9 + $0x98]] }
 0x1bc   : > { %v1721_v0 = vstv %s6040_s10  ;;  %s6400_s10 = sld [smem:[#allocation9 + $0x12]] }
 0x1be   : > { %2194 = vrot.lane.b32.xlu1 %v5847_v47, %s7939_s17  ;;  %2192 = vrot.lane.b32.xlu0 %v5843_v58, %s7939_s17  ;;  %s6001_s17 = sld [smem:[#allocation9 + $0x4d]] }
 0x1c0   : > { %8114 = sst [smem:[#allocation23_spill]] %s6003_s29  ;;  %v1571_v56 = vstv %s6003_s29  ;;  %s6133_s29 = sld [smem:[#allocation9 + $0x56]] }
 0x1c2   : > { %2233 = vrot.lane.b32.xlu1 %v5847_v47, %s7937_s22  ;;  %2231 = vrot.lane.b32.xlu0 %v5843_v58, %s7937_s22  ;;  %s5999_s22 = sld [smem:[#allocation9 + $0x2]] }
 0x1c4   : > { %v1567_v21 = vstv %s6001_s17  ;;  %s8163_s17 = smov 112  }
 0x1c6   : > { %2272 = vrot.lane.b32.xlu1 %v5847_v47, %s7935_s28  ;;  %2270 = vrot.lane.b32.xlu0 %v5843_v58, %s7935_s28  ;;  %s5990_s28 = sld [smem:[#allocation9 + $0x4c]] }
 0x1c8   : > { %v1563_v59 = vstv %s5999_s22  ;;  %s6346_s22 = sld [smem:[#allocation9 + $0x11]] }
 0x1ca   : > { %2310 = vrot.lane.b32.xlu1 %v5847_v47, %s7933_s14  ;;  %2308 = vrot.lane.b32.xlu0 %v5843_v58, %s7933_s14  ;;  %s5988_s14 = sld [smem:[#allocation9 + $0x1]] }
 0x1cc   : > { %8113 = sst [smem:[#allocation22_spill]] %s5990_s28  ;;  %v1529_v38 = vstv %s5990_s28  ;;  %s8127_s28 = sld [smem:[#allocation48_spill]] }
 0x1ce   : > { %2349 = vrot.lane.b32.xlu1 %v5847_v47, %s7931_s26  ;;  %2347 = vrot.lane.b32.xlu0 %v5843_v58, %s7931_s26  ;;  %s5986_s26 = sld [smem:[#allocation9 + $0x96]]  ;;  %v1688_v47 = vstv %s6031_s16  ;;  %s6169_s16 = sld [smem:[#allocation9 + $0x59]] }
 0x1d0   : > { %8112 = sst [smem:[#allocation21_spill]] %s5988_s14  ;;  %v1525_v61 = vstv %s5988_s14 }
 0x1d1   : > { %s6124_s14 = sld [smem:[#allocation9 + $0x55]] }
 0x1d2   : > { %2399 = vrot.lane.b32.xlu1 %v5954_v60, %s7953_s0  ;;  %2397 = vrot.lane.b32.xlu0 %v5950_v20, %s7953_s0  ;;  %s6021_s0 = sld [smem:[#allocation9 + $0x9a]]  ;;  %v6094_v36 = vld [vmem:[%s8127_s28] sm:$0x3] }
 0x1d3   : > { %s6116_s28 = sld [smem:[#allocation9 + $0xa]]  ;;  %vm8016_vm2 = vcmp.lt.s32.totalorder %v6094_v36, 14 }
 0x1d4   : > { %8111 = sst [smem:[#allocation20_spill]] %s5986_s26  ;;  %v1495_v44 = vstv %s5986_s26  ;;  %s6103_s26 = sld [smem:[#allocation9 + $0x9]] }
 0x1d5   : > { %8131 = sst [smem:[#allocation38_spill]] %s6169_s16  ;;  %s8159_s16 = smov 113  }
 0x1d6   : > { %2433 = vrot.lane.b32.xlu1 %v5954_v60, %s7951_s3  ;;  %2431 = vrot.lane.b32.xlu0 %v5950_v20, %s7951_s3  ;;  %s6019_s3 = sld [smem:[#allocation9 + $0x4f]] }
 0x1d8   : > { %8118 = sst [smem:[#allocation27_spill]] %s6021_s0  ;;  %v1649_v43 = vstv %s6021_s0  ;;  %s6145_s0 = sld [smem:[#allocation9 + $0xa1]] }
 0x1da   : > { %2470 = vrot.lane.b32.xlu1 %v5954_v60, %s7947_s23  ;;  %2468 = vrot.lane.b32.xlu0 %v5950_v20, %s7947_s23  ;;  %s6009_s23 = sld [smem:[#allocation9 + $0x99]] }
 0x1dc   : > { %8117 = sst [smem:[#allocation26_spill]] %s6019_s3  ;;  %v1645_v10 = vstv %s6019_s3  ;;  %s6147_s3 = sld [smem:[#allocation9 + $0xd]] }
 0x1de   : > { %2507 = vrot.lane.b32.xlu1 %v5954_v60, %s7945_s4  ;;  %2505 = vrot.lane.b32.xlu0 %v5950_v20, %s7945_s4  ;;  %s6007_s4 = sld [smem:[#allocation9 + $0x4e]] }
 0x1e0   : > { %8115 = sst [smem:[#allocation24_spill]] %s6009_s23  ;;  %v1610_v23 = vstv %s6009_s23 }
 0x1e1   : > { %s6157_s23 = sld [smem:[#allocation9 + $0x58]] }
 0x1e2   : > { %2544 = vrot.lane.b32.xlu1 %v5954_v60, %s7943_s5  ;;  %2542 = vrot.lane.b32.xlu0 %v5950_v20, %s7943_s5  ;;  %s6005_s5 = sld [smem:[#allocation9 + $0x3]] }
 0x1e4   : > { %v1464_v1 = vpop.permute.xlu1 %1463  ;;  %v1462_v4 = vpop.permute.xlu0 %1461  ;;  %v1606_v51 = vstv %s6007_s4  ;;  %s8178_s4 = smov 33  }
 0x1e5   : > { %v1466_v50 = vsel %vm7978_vm13, %v1462_v4, %v1464_v1  ;;  %v1467_v17 = vsel %vm7978_vm13, %v1464_v1, %v1462_v4  ;;  %vm8023_vm13 = vcmp.ge.s32.totalorder %v6094_v36, 2  ;;  %v1754_v4 = vstv %s6056_s7  ;;  %s6179_s7 = sld [smem:[#allocation9 + $0xf]] }
 0x1e6   : > { %2581 = vrot.lane.b32.xlu1 %v5954_v60, %s7949_s6  ;;  %2579 = vrot.lane.b32.xlu0 %v5950_v20, %s7949_s6  ;;  %s6011_s6 = sld [smem:[#allocation9 + $0x4]]  ;;  %v1471_v27 = vcombine.low %v1467_v17, %v1466_v50 }
 0x1e8   : > { %v1500_v3 = vpop.permute.xlu1 %1499  ;;  %v1498_v62 = vpop.permute.xlu0 %1497  ;;  %v1602_v29 = vstv %s6005_s5  ;;  %v1478_v46 = vrot.slane %v1471_v27, %v5228_v54  ;;  %s8153_s5 = smov 114  }
 0x1e9   : > { %v1502_v13 = vsel %vm7997_vm12, %v1498_v62, %v1500_v3  ;;  %v1503_v49 = vsel %vm7997_vm12, %v1500_v3, %v1498_v62  ;;  %vm6217_vm12 = vmand %vm8010_vm8, %vm8020_vm3 }
 0x1ea   : > { %2618 = vrot.lane.b32.xlu1 %v5954_v60, %s8102_s9  ;;  %2616 = vrot.lane.b32.xlu0 %v5950_v20, %s8102_s9  ;;  %s6042_s9 = sld [smem:[#allocation9 + $0x9c]]  ;;  %v1507_v18 = vcombine.low %v1503_v49, %v1502_v13  ;;  %v1485_v49 = vrot.slane %v1478_v46, %v5228_v54 }
 0x1ec   : > { %8116 = sst [smem:[#allocation25_spill]] %s6011_s6  ;;  %v6027_v55 = vpop.permute.xlu1 %1538  ;;  %v6029_v22 = vpop.permute.xlu0 %1536  ;;  %v1641_v45 = vstv %s6011_s6  ;;  %s8128_s6 = smov 14   ;;  %v1514_v31 = vrot.slane %v1507_v18, %v5228_v54 }
 0x1ed   : > { %v1541_v37 = vsel %vm7996_vm11, %v6029_v22, %v6027_v55  ;;  %v1542_v63 = vsel %vm7996_vm11, %v6027_v55, %v6029_v22  ;;  %v1758_v22 = vstv %s6058_s8  ;;  %s6189_s8 = sld [smem:[#allocation9 + $0xa5]]  ;;  %vm6203_vm11 = vmand %vm8010_vm8, %vm8023_vm13 }
 0x1ee   : > { %2655 = vrot.lane.b32.xlu1 %v5954_v60, %s8103_s2  ;;  %2653 = vrot.lane.b32.xlu0 %v5950_v20, %s8103_s2  ;;  %s6081_s2 = sld [smem:[#allocation9 + $0x53]]  ;;  %v1545_v3 = vcombine.low %v1542_v63, %v1541_v37  ;;  %v1487_v13 = vsel %vm6203_vm11, %v1485_v49, 0.0 }
 0x1ef   : > { %v1493_v50 = vmul.f32 %v1492_v2, %v1487_v13  ;;  %v1496_v17 = vmul.f32 %v1495_v44, %v1487_v13 }
 0x1f0   : > { %8122 = sst [smem:[#allocation31_spill]] %s6042_s9  ;;  %v1577_v7 = vpop.permute.xlu1 %1576  ;;  %v1575_v8 = vpop.permute.xlu0 %1574  ;;  %v1725_v1 = vstv %s6042_s9  ;;  %s8133_s9 = smov 2  }
 0x1f1   : > { %v1579_v32 = vsel %vm7991_vm10, %v1575_v8, %v1577_v7  ;;  %v1580_v58 = vsel %vm7991_vm10, %v1577_v7, %v1575_v8  ;;  %vm8000_vm10 = vcmp.lt.s32.totalorder %v5195_v48, 18 }
 0x1f2   : > { %2692 = vrot.lane.b32.xlu1 %v5954_v60, %s8104_s30  ;;  %2690 = vrot.lane.b32.xlu0 %v5950_v20, %s8104_s30  ;;  %s6131_s30 = sld [smem:[#allocation9 + $0xb]]  ;;  %v1584_v42 = vcombine.low %v1580_v58, %v1579_v32  ;;  %v1521_v32 = vrot.slane %v1514_v31, %v5228_v54  ;;  %v1552_v58 = vrot.slane %v1545_v3, %v5228_v54 }
 0x1f4   : > { %v1616_v41 = vpop.permute.xlu1 %1615  ;;  %v1614_v12 = vpop.permute.xlu0 %1613  ;;  %v1591_v3 = vrot.slane %v1584_v42, %v5228_v54 }
 0x1f5   : > { %v1618_v46 = vsel %vm8002_vm7, %v1614_v12, %v1616_v41  ;;  %v1619_v37 = vsel %vm8002_vm7, %v1616_v41, %v1614_v12  ;;  %vm8013_vm7 = vcmp.lt.s32.totalorder %v5195_v48, 14 }
 0x1f6   : > { %2729 = vrot.lane.b32.xlu1 %v5954_v60, %s8128_s6  ;;  %2727 = vrot.lane.b32.xlu0 %v5950_v20, %s8128_s6  ;;  %s6174_s6 = sld [smem:[#allocation9 + $0xa4]]  ;;  %v1623_v34 = vcombine.low %v1619_v37, %v1618_v46  ;;  %v1598_v42 = vrot.slane %v1591_v3, %v5228_v54 }
 0x1f8   : > { %v1655_v62 = vpop.permute.xlu1 %1654  ;;  %v1653_v55 = vpop.permute.xlu0 %1652 }
 0x1f9   : > { %v1657_v12 = vsel %vm8000_vm10, %v1653_v55, %v1655_v62  ;;  %v1658_v7 = vsel %vm8000_vm10, %v1655_v62, %v1653_v55  ;;  %v1523_v62 = vsel %vm6217_vm12, %v1521_v32, 0.0  ;;  %v1559_v55 = vrot.slane %v1552_v58, %v5228_v54  ;;  %vm6254_vm10 = vmand %vm8010_vm8, %vm8014_vm6 }
 0x1fa   : > { %2766 = vrot.lane.b32.xlu1 %v5954_v60, %s8133_s9  ;;  %2764 = vrot.lane.b32.xlu0 %v5950_v20, %s8133_s9  ;;  %v1662_v8 = vcombine.low %v1658_v7, %v1657_v12  ;;  %v1630_v12 = vrot.slane %v1623_v34, %v5228_v54  ;;  %s6427_s9 = sld [smem:[#allocation9 + $0x5d]] }
 0x1fb   : > { %v1561_v7 = vsel %vm8010_vm8, %v1559_v55, 0.0 }
 0x1fc   : > { %8132 = sst [smem:[#allocation39_spill]] %s6174_s6  ;;  %v1694_v18 = vpop.permute.xlu1 %1693  ;;  %v1692_v27 = vpop.permute.xlu0 %1691  ;;  %v1669_v55 = vrot.slane %v1662_v8, %v5228_v54  ;;  %s8146_s6 = smov 126   ;;  %v1637_v8 = vrot.slane %v1630_v12, %v5228_v54 }
 0x1fd   : > { %v1695_v41 = vsel %vm8007_vm1, %v1692_v27, %v1694_v18  ;;  %v1696_v49 = vsel %vm8007_vm1, %v1694_v18, %v1692_v27  ;;  %v1490_v27 = vmul.f32 %v1489_v57, %v1487_v13  ;;  %v1526_v18 = vmul.f32 %v1525_v61, %v1523_v62 }
 0x1fe   : > { %2803 = vrot.lane.b32.xlu1 %v5954_v60, %s8105_s24  ;;  %2801 = vrot.lane.b32.xlu0 %v5950_v20, %s8105_s24  ;;  %s8141_s24 = smov 127   ;;  %v1699_v58 = vcombine.low %v1696_v49, %v1695_v41  ;;  %vm8012_vm1 = vcmp.lt.s32.totalorder %v5195_v48, 2  ;;  %v1600_v41 = vsel %vm6254_vm10, %v1598_v42, 0.0  ;;  %v1564_v13 = vmul.f32 %v1563_v59, %v1561_v7 }
 0x1ff   : > { %v1527_v44 = vadd.f32 %v1526_v18, %v1490_v27  ;;  %v1676_v12 = vrot.slane %v1669_v55, %v5228_v54 }
 0x200   : > { %v1731_v37 = vpop.permute.xlu1 %1730  ;;  %v1729_v46 = vpop.permute.xlu0 %1728 }
 0x201   : > { %v1732_v3 = vsel %vm8009_vm0, %v1729_v46, %v1731_v37  ;;  %v1733_v57 = vsel %vm8009_vm0, %v1731_v37, %v1729_v46  ;;  %v1530_v37 = vmul.f32 %v1529_v38, %v1523_v62  ;;  %v1534_v46 = vmul.f32 %v1533_v19, %v1523_v62 }
 0x202   : > { %2852 = vrot.lane.b32.xlu1 %v5954_v60, %s8141_s24  ;;  %2850 = vrot.lane.b32.xlu0 %v5950_v20, %s8141_s24  ;;  %v1736_v42 = vcombine.low %v1733_v57, %v1732_v3  ;;  %v1568_v38 = vmul.f32 %v1567_v21, %v1561_v7  ;;  %v1572_v19 = vmul.f32 %v1571_v56, %v1561_v7  ;;  %vm8150_vm0 = vcmp.ge.s32.totalorder %v5210_v52, 1 }
 0x203   : > { %v1603_v62 = vmul.f32 %v1602_v29, %v1600_v41  ;;  %v1706_v3 = vrot.slane %v1699_v58, %v5228_v54  ;;  %v1531_v7 = vadd.f32 %v1530_v37, %v1493_v50  ;;  %v1535_v57 = vadd.f32 %v1534_v46, %v1496_v17 }
 0x204   : > { %v1768_v61 = vpop.permute.xlu1 %1767  ;;  %v1766_v34 = vpop.permute.xlu0 %1765  ;;  %v1565_v55 = vadd.f32 %v1564_v13, %v1527_v44 }
 0x205   : > { %v1769_v49 = vsel %vm8008_vm4, %v1766_v34, %v1768_v61  ;;  %v1770_v2 = vsel %vm8008_vm4, %v1768_v61, %v1766_v34  ;;  %vm6315_vm4 = vmand %vm8010_vm8, %vm8016_vm2  ;;  %v1607_v61 = vmul.f32 %v1606_v51, %v1600_v41  ;;  %v1611_v34 = vmul.f32 %v1610_v23, %v1600_v41 }
 0x206   : > { %2889 = vrot.lane.b32.xlu1 %v5954_v60, %s8146_s6  ;;  %2887 = vrot.lane.b32.xlu0 %v5950_v20, %s8146_s6  ;;  %v1773_v21 = vcombine.low %v1770_v2, %v1769_v49  ;;  %vm6333_vm8 = vmand %vm8150_vm0, %vm8023_vm13  ;;  %v1639_v50 = vsel %vm6315_vm4, %v1637_v8, 0.0  ;;  %v1743_v51 = vrot.slane %v1736_v42, %v5228_v54  ;;  %v2072_v23 = vstv %s6272_s20  ;;  %s8209_s6 = sld [smem:[#allocation38_spill]]  ;;  %s8224_s20 = smov 15  }
 0x207   : > { %v1569_v17 = vadd.f32 %v1568_v38, %v1531_v7  ;;  %v1573_v41 = vadd.f32 %v1572_v19, %v1535_v57  ;;  %v1713_v37 = vrot.slane %v1706_v3, %v5228_v54  ;;  %v1604_v44 = vadd.f32 %v1603_v62, %v1565_v55 }
 0x208   : > { %v1805_v27 = vpop.permute.xlu1 %1804  ;;  %v1803_v18 = vpop.permute.xlu0 %1802  ;;  %v1678_v13 = vsel %vm6333_vm8, %v1676_v12, 0.0  ;;  %v1780_v8 = vrot.slane %v1773_v21, %v5228_v54  ;;  %v2076_v42 = vstv %s6288_s12  ;;  %v1642_v19 = vmul.f32 %v1641_v45, %v1639_v50  ;;  %s6708_s12 = sld [smem:[#allocation9 + $0xae]] }
 0x209   : > { %v1807_v56 = vsel %vm8013_vm7, %v1803_v18, %v1805_v27  ;;  %v1808_v29 = vsel %vm8013_vm7, %v1805_v27, %v1803_v18  ;;  %v1608_v27 = vadd.f32 %v1607_v61, %v1569_v17  ;;  %v1612_v38 = vadd.f32 %v1611_v34, %v1573_v41 }
 0x20a   : > { %2926 = vrot.lane.b32.xlu1 %v5954_v60, %s8153_s5  ;;  %2924 = vrot.lane.b32.xlu0 %v5950_v20, %s8153_s5  ;;  %v1812_v46 = vcombine.low %v1808_v29, %v1807_v56  ;;  %v1646_v3 = vmul.f32 %v1645_v10, %v1639_v50  ;;  %s6358_s5 = sld [smem:[#allocation9 + $0x5c]]  ;;  %v1650_v62 = vmul.f32 %v1649_v43, %v1639_v50  ;;  %vm8018_vm0 = vcmp.lt.s32.totalorder %v5195_v48, 126 }
 0x20b   : > { %v1750_v18 = vrot.slane %v1743_v51, %v5228_v54  ;;  %v1681_v45 = vmul.f32 %v1680_v11, %v1678_v13  ;;  %v1685_v10 = vmul.f32 %v1684_v14, %v1678_v13  ;;  %v1715_v43 = vsel %vm5264_vm5, %v1713_v37, 0.0 }
 0x20c   : > { %v1844_v49 = vpop.permute.xlu1 %1843  ;;  %v1842_v2 = vpop.permute.xlu0 %1841  ;;  %v1819_v56 = vrot.slane %v1812_v46, %v5228_v54  ;;  %v1787_v57 = vrot.slane %v1780_v8, %v5228_v54  ;;  %v1643_v14 = vadd.f32 %v1642_v19, %v1604_v44  ;;  %v1647_v55 = vadd.f32 %v1646_v3, %v1608_v27 }
 0x20d   : > { %v1846_v12 = vsel %vm8012_vm1, %v1842_v2, %v1844_v49  ;;  %v1847_v21 = vsel %vm8012_vm1, %v1844_v49, %v1842_v2  ;;  %vm8161_vm1 = vcmp.lt.s32.totalorder %v5195_v48, 1  ;;  %v1689_v50 = vmul.f32 %v1688_v47, %v1678_v13 }
 0x20e   : > { %2963 = vrot.lane.b32.xlu1 %v5954_v60, %s8159_s16  ;;  %2961 = vrot.lane.b32.xlu0 %v5950_v20, %s8159_s16  ;;  %v1850_v61 = vcombine.low %v1847_v21, %v1846_v12  ;;  %vm8162_vm7 = vmmov %vm8161_vm1  ;;  %v1718_v17 = vmul.f32 %v1717_v16, %v1715_v43  ;;  %v1722_v41 = vmul.f32 %v1721_v0, %v1715_v43  ;;  %v2105_v44 = vstv %s6346_s22  ;;  %s8198_s16 = sld [smem:[#allocation37_spill]]  ;;  %s6728_s22 = sld [smem:[#allocation9 + $0x19]] }
 0x20f   : > { %v1651_v47 = vadd.f32 %v1650_v62, %v1612_v38  ;;  %v1682_v49 = vadd.f32 %v1681_v45, %v1643_v14  ;;  %v1826_v2 = vrot.slane %v1819_v56, %v5228_v54  ;;  %v1686_v13 = vadd.f32 %v1685_v10, %v1647_v55 }
 0x210   : > { %v1882_v29 = vpop.permute.xlu1 %1881  ;;  %v1880_v7 = vpop.permute.xlu0 %1879  ;;  %v1857_v46 = vrot.slane %v1850_v61, %v5228_v54  ;;  %v1726_v8 = vmul.f32 %v1725_v1, %v1715_v43  ;;  %v1789_v27 = vsel %vm5301_vm9, %v1787_v57, 0.0  ;;  %v2109_v1 = vstv %s6358_s5  ;;  %s8238_s5 = smov 2  }
 0x211   : > { %v1883_v34 = vsel %vm8161_vm1, %v1880_v7, %v1882_v29  ;;  %v1884_v11 = vsel %vm8162_vm7, %v1882_v29, %v1880_v7  ;;  %vm8165_vm1 = vcmp.ge.s32.totalorder %v5210_v52, 1  ;;  %vm8017_vm7 = vcmp.lt.s32.totalorder %v5195_v48, 114 }
 0x212   : > { %v1887_v51 = vcombine.low %v1884_v11, %v1883_v34  ;;  %3000 = vrot.lane.b32.xlu1 %v5954_v60, %s8163_s17  ;;  %v1752_v37 = vsel %vm8165_vm1, %v1750_v18, 0.0  ;;  %2998 = vrot.lane.b32.xlu0 %v5950_v20, %s8163_s17  ;;  %vm6410_vm6 = vmand %vm8165_vm1, %vm8016_vm2  ;;  %v1690_v3 = vadd.f32 %v1689_v50, %v1651_v47  ;;  %v1719_v12 = vadd.f32 %v1718_v17, %v1682_v49  ;;  %s8172_s17 = sld [smem:[#allocation35_spill]] }
 0x213   : > { %v1755_v62 = vmul.f32 %v1754_v4, %v1752_v37  ;;  %v1759_v18 = vmul.f32 %v1758_v22, %v1752_v37  ;;  %v1723_v21 = vadd.f32 %v1722_v41, %v1686_v13  ;;  %v1763_v45 = vmul.f32 %v1762_v5, %v1752_v37 }
 0x214   : > { %v1931_v16 = vpop.permute.xlu1 %1930  ;;  %v1929_v0 = vpop.permute.xlu0 %1928  ;;  %v1894_v19 = vrot.slane %v1887_v51, %v5228_v54  ;;  %v1864_v10 = vrot.slane %v1857_v46, %v5228_v54  ;;  %v8173_v4 = vstv %s6067_s11  ;;  %v1828_v43 = vsel %vm6410_vm6, %v1826_v2, 0.0  ;;  %s6441_s11 = sld [smem:[#allocation9 + $0xa8]] }
 0x215   : > { %v1792_v22 = vmul.f32 %v8173_v4, %v1789_v27  ;;  %vm8174_vm1 = vcmp.lt.s32.totalorder %v5195_v48, 127  ;;  %v1727_v57 = vadd.f32 %v1726_v8, %v1690_v3  ;;  %v8176_v61 = vstv %s6081_s2  ;;  %s6457_s2 = sld [smem:[#allocation9 + $0x13]] }
 0x216   : > { %3310 = vrot.lane.b32.xlu1 %v6062_v15, %s8171_s25  ;;  %3308 = vrot.lane.b32.xlu0 %v6047_v39, %s8171_s25  ;;  %v1932_v56 = vsel %vm8174_vm1, %v1929_v0, %v1931_v16  ;;  %vm8175_vm2 = vmmov %vm8174_vm1  ;;  %v1796_v34 = vmul.f32 %v8176_v61, %v1789_v27  ;;  %v1901_v11 = vrot.slane %v1894_v19, %v5228_v54  ;;  %v2113_v14 = vstv %s6382_s21  ;;  %s6498_s25 = sld [smem:[#allocation9 + $0x60]]  ;;  %s6735_s21 = sld [smem:[#allocation9 + $0x64]] }
 0x217   : > { %v1933_v5 = vsel %vm8175_vm2, %v1931_v16, %v1929_v0  ;;  %v1756_v55 = vadd.f32 %v1755_v62, %v1719_v12  ;;  %v1760_v50 = vadd.f32 %v1759_v18, %v1723_v21  ;;  %v8179_v37 = vstv %s6103_s26  ;;  %s6462_s26 = sld [smem:[#allocation9 + $0x5e]] }
 0x218   : > { %v1968_v29 = vpop.permute.xlu1 %1967  ;;  %v1966_v7 = vpop.permute.xlu0 %1965  ;;  %v8177_v51 = vstv %s8172_s17  ;;  %v1831_v46 = vmul.f32 %v8179_v37, %v1828_v43  ;;  %v1866_v47 = vsel %vm8023_vm13, %v1864_v10, 0.0  ;;  %v1936_v49 = vcombine.low %v1932_v56, %v1933_v5  ;;  %s6468_s17 = sld [smem:[#allocation9 + $0xa9]] }
 0x219   : > { %v1800_v17 = vmul.f32 %v8177_v51, %v1789_v27  ;;  %v1970_v41 = vsel %vm8018_vm0, %v1966_v7, %v1968_v29  ;;  %v1971_v2 = vsel %vm8018_vm0, %v1968_v29, %v1966_v7  ;;  %v1764_v16 = vadd.f32 %v1763_v45, %v1727_v57 }
 0x21a   : > { %3344 = vrot.lane.b32.xlu1 %v6062_v15, %s8178_s4  ;;  %3342 = vrot.lane.b32.xlu0 %v6047_v39, %s8178_s4  ;;  %v1793_v0 = vadd.f32 %v1792_v22, %v1756_v55  ;;  %v8180_v13 = vstv %s6105_s27  ;;  %v2142_v3 = vstv %s6400_s10  ;;  %v1797_v62 = vadd.f32 %v1796_v34, %v1760_v50  ;;  %s8184_s27 = smov 32   ;;  %s6500_s4 = sld [smem:[#allocation9 + $0xab]] }
 0x21b   : > { %v1835_v8 = vmul.f32 %v8180_v13, %v1828_v43  ;;  %v8181_v18 = vstv %s6114_s15  ;;  %v1903_v21 = vsel %vm8020_vm3, %v1901_v11, 0.0  ;;  %v1974_v10 = vcombine.low %v1970_v41, %v1971_v2  ;;  %s6480_s15 = sld [smem:[#allocation9 + $0x14]]  ;;  %s8246_s10 = smov 1  }
 0x21c   : > { %v2006_v27 = vpop.permute.xlu1 %2005  ;;  %v2004_v19 = vpop.permute.xlu0 %2003  ;;  %v1839_v12 = vmul.f32 %v8181_v18, %v1828_v43  ;;  %v8182_v4 = vstv %s6116_s28  ;;  %v8183_v22 = vstv %s6124_s14  ;;  %v1801_v43 = vadd.f32 %v1800_v17, %v1764_v16  ;;  %s6488_s28 = sld [smem:[#allocation9 + $0xaa]]  ;;  %s6490_s14 = sld [smem:[#allocation9 + $0x15]] }
 0x21d   : > { %v1869_v45 = vmul.f32 %v8182_v4, %v1866_v47  ;;  %v1873_v56 = vmul.f32 %v8183_v22, %v1866_v47  ;;  %v2008_v5 = vsel %vm8017_vm7, %v2004_v19, %v2006_v27  ;;  %v2009_v29 = vsel %vm8017_vm7, %v2006_v27, %v2004_v19 }
 0x21e   : > { %3381 = vrot.lane.b32.xlu1 %v6062_v15, %s8184_s27  ;;  %v1832_v7 = vadd.f32 %v1831_v46, %v1793_v0  ;;  %v1943_v57 = vrot.slane %v1936_v49, %v5228_v54  ;;  %3379 = vrot.lane.b32.xlu0 %v6047_v39, %s8184_s27  ;;  %v2146_v61 = vstv %s6427_s9  ;;  %v1836_v34 = vadd.f32 %v1835_v8, %v1797_v62  ;;  %s8194_s27 = smov 30   ;;  %s6763_s9 = sld [smem:[#allocation9 + $0xaf]] }
 0x21f   : > { %v8185_v11 = vstv %s6126_s1  ;;  %v8186_v50 = vstv %s6131_s30  ;;  %v8187_v41 = vstv %s6133_s29  ;;  %v1840_v49 = vadd.f32 %v1839_v12, %v1801_v43  ;;  %s8190_s1 = smov 31   ;;  %s6518_s30 = sld [smem:[#allocation9 + $0x16]] }
 0x220   : > { %v1877_v55 = vmul.f32 %v8185_v11, %v1866_v47  ;;  %v1906_v51 = vmul.f32 %v8186_v50, %v1903_v21  ;;  %v1910_v17 = vmul.f32 %v8187_v41, %v1903_v21  ;;  %v2045_v37 = vpop.permute.xlu1 %2044  ;;  %v2043_v46 = vpop.permute.xlu0 %2042  ;;  %v1981_v2 = vrot.slane %v1974_v10, %v5228_v54  ;;  %s6528_s29 = sld [smem:[#allocation9 + $0xac]] }
 0x221   : > { %v2013_v16 = vcombine.low %v2008_v5, %v2009_v29  ;;  %v2150_v0 = vstv %s6441_s11  ;;  %v1870_v13 = vadd.f32 %v1869_v45, %v1832_v7  ;;  %v1874_v47 = vadd.f32 %v1873_v56, %v1836_v34  ;;  %s6770_s11 = sld [smem:[#allocation9 + $0x1a]] }
 0x222   : > { %vm8188_vm2 = vcmp.lt.s32.totalorder %v5195_v48, 113  ;;  %3418 = vrot.lane.b32.xlu1 %v6062_v15, %s8190_s1  ;;  %vm8022_vm7 = vcmp.lt.s32.totalorder %v5195_v48, 110  ;;  %v8191_v19 = vstv %s6145_s0  ;;  %v1950_v18 = vrot.slane %v1943_v57, %v5228_v54  ;;  %3416 = vrot.lane.b32.xlu0 %v6047_v39, %s8190_s1  ;;  %s6520_s0 = sld [smem:[#allocation9 + $0x61]]  ;;  %s8196_s1 = sld [smem:[#allocation36_spill]] }
 0x223   : > { %v2046_v8 = vsel %vm8188_vm2, %v2043_v46, %v2045_v37  ;;  %vm8189_vm1 = vmmov %vm8188_vm2  ;;  %v1914_v62 = vmul.f32 %v8191_v19, %v1903_v21  ;;  %v2181_v10 = vstv %s6457_s2  ;;  %v1878_v4 = vadd.f32 %v1877_v55, %v1840_v49  ;;  %s6772_s2 = sld [smem:[#allocation9 + $0x65]] }
 0x224   : > { %v2047_v27 = vsel %vm8189_vm1, %v2045_v37, %v2043_v46  ;;  %v1907_v45 = vadd.f32 %v1906_v51, %v1870_v13  ;;  %v1911_v22 = vadd.f32 %v1910_v17, %v1874_v47  ;;  %v2082_v56 = vpop.permute.xlu1 %2081  ;;  %v2080_v5 = vpop.permute.xlu0 %2079  ;;  %v2185_v29 = vstv %s6462_s26  ;;  %s6785_s26 = sld [smem:[#allocation9 + $0xb0]] }
 0x225   : > { %v2050_v12 = vcombine.low %v2046_v8, %v2047_v27  ;;  %v1988_v21 = vrot.slane %v1981_v2, %v5228_v54  ;;  %v2020_v43 = vrot.slane %v2013_v16, %v5228_v54  ;;  %vm8192_vm2 = vcmp.lt.s32.totalorder %v5195_v48, 112 }
 0x226   : > { %v2083_v7 = vsel %vm8192_vm2, %v2080_v5, %v2082_v56  ;;  %vm8193_vm1 = vmmov %vm8192_vm2  ;;  %3455 = vrot.lane.b32.xlu1 %v6062_v15, %s8194_s27  ;;  %v2189_v34 = vstv %s6468_s17  ;;  %v2220_v11 = vstv %s6480_s15  ;;  %v2224_v55 = vstv %s6482_s13  ;;  %s6802_s17 = sld [smem:[#allocation9 + $0x1b]]  ;;  %s6814_s15 = sld [smem:[#allocation9 + $0x66]] }
 0x227   : > { %v2084_v57 = vsel %vm8193_vm1, %v2082_v56, %v2080_v5  ;;  %v1915_v50 = vadd.f32 %v1914_v62, %v1878_v4  ;;  %vm8195_vm2 = vcmp.lt.s32.totalorder %v5221_v53, 15  ;;  %v2057_v41 = vrot.slane %v2050_v12, %v5228_v54  ;;  %3453 = vrot.lane.b32.xlu0 %v6047_v39, %s8194_s27  ;;  %s8205_s27 = smov 18   ;;  %s6816_s13 = sld [smem:[#allocation9 + $0xb1]] }
 0x228   : > { %v1952_v51 = vsel %vm8195_vm2, %v1950_v18, 0.0  ;;  %v2087_v17 = vcombine.low %v2083_v7, %v2084_v57  ;;  %v2119_v37 = vpop.permute.xlu1 %2118  ;;  %v2117_v46 = vpop.permute.xlu0 %2116  ;;  %v2228_v49 = vstv %s6488_s28  ;;  %v2259_v2 = vstv %s6490_s14  ;;  %s8262_s28 = smov 114   ;;  %s6840_s14 = sld [smem:[#allocation9 + $0x1c]] }
 0x229   : > { %v2263_v16 = vstv %s6498_s25  ;;  %v2267_v13 = vstv %s6500_s4  ;;  %v1919_v47 = vadd.f32 %v6070_v26, %v1907_v45  ;;  %v1923_v8 = vadd.f32 %v6073_v25, %v1911_v22  ;;  %s6847_s25 = sld [smem:[#allocation9 + $0x67]]  ;;  %s6849_s4 = sld [smem:[#allocation9 + $0xb2]] }
 0x22a   : > { %vm8197_vm1 = vcmp.lt.s32.totalorder %v6094_v36, 14  ;;  %v2027_v19 = vrot.slane %v2020_v43, %v5228_v54  ;;  %v8199_v62 = vstv %s6147_s3  ;;  %v8200_v12 = vstv %s6157_s23  ;;  %3492 = vrot.lane.b32.xlu1 %v6062_v15, %s8205_s27  ;;  %s6575_s3 = sld [smem:[#allocation9 + $0x17]]  ;;  %s6577_s23 = sld [smem:[#allocation9 + $0x62]] }
 0x22b   : > { %v1990_v27 = vsel %vm8197_vm1, %v1988_v21, 0.0  ;;  %v1955_v18 = vmul.f32 %v8199_v62, %v1952_v51  ;;  %v1959_v4 = vmul.f32 %v8200_v12, %v1952_v51  ;;  %vm8201_vm2 = vcmp.lt.s32.totalorder %v5210_v52, 15  ;;  %3490 = vrot.lane.b32.xlu0 %v6047_v39, %s8205_s27  ;;  %s6866_s27 = sld [smem:[#allocation9 + $0xb3]] }
 0x22c   : > { %vm6558_vm3 = vmand %vm8201_vm2, %vm8023_vm13  ;;  %v2094_v26 = vrot.slane %v2087_v17, %v5228_v54  ;;  %vm8204_vm0 = vcmp.lt.s32.totalorder %v5195_v48, 111  ;;  %v1927_v45 = vadd.f32 %v6119_v24, %v1915_v50  ;;  %v8206_v22 = vstv %s8196_s1  ;;  %v2156_v62 = vpop.permute.xlu1 %2155  ;;  %v2154_v24 = vpop.permute.xlu0 %2153  ;;  %s8210_s1 = sld [smem:[#allocation39_spill]] }
 0x22d   : > { %v2120_v25 = vsel %vm8204_vm0, %v2117_v46, %v2119_v37  ;;  %v1963_v5 = vmul.f32 %v8206_v22, %v1952_v51  ;;  %v2064_v21 = vrot.slane %v2057_v41, %v5228_v54  ;;  %vm8207_vm1 = vmmov %vm8204_vm0  ;;  %v8208_v7 = vstv %s8198_s16  ;;  %s8211_s16 = smov 17  }
 0x22e   : > { %v2121_v43 = vsel %vm8207_vm1, %v2119_v37, %v2117_v46  ;;  %v1993_v57 = vmul.f32 %v8208_v7, %v1990_v27  ;;  %vm8024_vm0 = vcmp.lt.s32.totalorder %v5195_v48, 97  ;;  %v2029_v41 = vsel %vm6558_vm3, %v2027_v19, 0.0  ;;  %3529 = vrot.lane.b32.xlu1 %v6062_v15, %s8211_s16 }
 0x22f   : > { %v2124_v17 = vcombine.low %v2120_v25, %v2121_v43  ;;  %v2158_v37 = vsel %vm8022_vm7, %v2154_v24, %v2156_v62  ;;  %v2159_v46 = vsel %vm8022_vm7, %v2156_v62, %v2154_v24  ;;  %v1956_v25 = vadd.f32 %v1955_v18, %v1919_v47  ;;  %3527 = vrot.lane.b32.xlu0 %v6047_v39, %s8211_s16  ;;  %s8269_s16 = smov 111  }
 0x230   : > { %v1960_v22 = vadd.f32 %v1959_v4, %v1923_v8  ;;  %v2101_v43 = vrot.slane %v2094_v26, %v5228_v54  ;;  %v1964_v19 = vadd.f32 %v1963_v5, %v1927_v45  ;;  %v8212_v51 = vstv %s8209_s6  ;;  %v2195_v5 = vpop.permute.xlu1 %2194  ;;  %s6609_s6 = sld [smem:[#allocation9 + $0xad]] }
 0x231   : > { %v2131_v7 = vrot.slane %v2124_v17, %v5228_v54  ;;  %v1997_v50 = vmul.f32 %v8212_v51, %v1990_v27  ;;  %v2066_v62 = vsel %vm5398_vm14, %v2064_v21, 0.0  ;;  %v2163_v24 = vcombine.low %v2158_v37, %v2159_v46  ;;  %v2193_v51 = vpop.permute.xlu0 %2192 }
 0x232   : > { %v1994_v47 = vadd.f32 %v1993_v57, %v1956_v25  ;;  %v8213_v8 = vstv %s8210_s1  ;;  %v8214_v4 = vstv %s6179_s7  ;;  %v8215_v17 = vstv %s6187_s19  ;;  %s8220_s7 = smov 16   ;;  %s6689_s19 = sld [smem:[#allocation9 + $0x63]] }
 0x233   : > { %v2001_v18 = vmul.f32 %v8213_v8, %v1990_v27  ;;  %v2032_v26 = vmul.f32 %v8214_v4, %v2029_v41  ;;  %v2036_v45 = vmul.f32 %v8215_v17, %v2029_v41  ;;  %v2138_v21 = vrot.slane %v2131_v7, %v5228_v54  ;;  %3566 = vrot.lane.b32.xlu1 %v6062_v15, %s8220_s7  ;;  %s6875_s1 = sld [smem:[#allocation9 + $0xb4]] }
 0x234   : > { %v2170_v37 = vrot.slane %v2163_v24, %v5228_v54  ;;  %vm8216_vm7 = vcmp.lt.s32.totalorder %v5195_v48, 98  ;;  %v8218_v46 = vstv %s6189_s8  ;;  %v8219_v8 = vstv %s6197_s18  ;;  %3564 = vrot.lane.b32.xlu0 %v6047_v39, %s8220_s7  ;;  %s8231_s18 = smov 14   ;;  %s6687_s8 = sld [smem:[#allocation9 + $0x18]] }
 0x235   : > { %v2197_v57 = vsel %vm8216_vm7, %v2193_v51, %v2195_v5  ;;  %vm8217_vm1 = vmmov %vm8216_vm7  ;;  %v2040_v25 = vmul.f32 %v8218_v46, %v2029_v41  ;;  %v2069_v4 = vmul.f32 %v8219_v8, %v2066_v62  ;;  %v2103_v17 = vsel %vm8201_vm2, %v2101_v43, 0.0  ;;  %s6911_s7 = sld [smem:[#allocation9 + $0x1f]] }
 0x236   : > { %v2198_v27 = vsel %vm8217_vm1, %v2195_v5, %v2193_v51  ;;  %v1998_v7 = vadd.f32 %v1997_v50, %v1960_v22  ;;  %v2177_v24 = vrot.slane %v2170_v37, %v5228_v54  ;;  %v2336_v41 = vstv %s6575_s3  ;;  %v2234_v22 = vpop.permute.xlu1 %2233  ;;  %v2232_v37 = vpop.permute.xlu0 %2231  ;;  %s6871_s3 = sld [smem:[#allocation9 + $0x1e]] }
 0x237   : > { %v2202_v12 = vcombine.low %v2197_v57, %v2198_v27  ;;  %v2002_v51 = vadd.f32 %v2001_v18, %v1964_v19  ;;  %v2033_v43 = vadd.f32 %v2032_v26, %v1994_v47  ;;  %v2073_v57 = vmul.f32 %v2072_v23, %v2066_v62  ;;  %3603 = vrot.lane.b32.xlu1 %v6062_v15, %s8224_s20 }
 0x238   : > { %vm8221_vm7 = vcmp.lt.s32.totalorder %v6094_v36, 14  ;;  %v8222_v27 = vmov 0  ;;  %v2037_v46 = vadd.f32 %v2036_v45, %v1998_v7  ;;  %v2077_v8 = vmul.f32 %v2076_v42, %v2066_v62  ;;  %3601 = vrot.lane.b32.xlu0 %v6047_v39, %s8224_s20  ;;  %s6913_s20 = sld [smem:[#allocation9 + $0x6a]] }
 0x239   : > { %vm6637_vm1 = vmand %vm8201_vm2, %vm8221_vm7  ;;  %v2209_v50 = vrot.slane %v2202_v12, %v5228_v54  ;;  %v2106_v19 = vmul.f32 %v2105_v44, %v2103_v17  ;;  %v2140_v23 = vsel %vm5465_vm15, %v2138_v21, 0.0  ;;  %v2041_v47 = vadd.f32 %v2040_v25, %v2002_v51 }
 0x23a   : > { %v8223_v27 = vsel %vm6637_vm1, 4294967295, %v8222_v27  ;;  %v2070_v18 = vadd.f32 %v2069_v4, %v2033_v43  ;;  %v2110_v26 = vmul.f32 %v2109_v1, %v2103_v17  ;;  %v2114_v5 = vmul.f32 %v2113_v14, %v2103_v17  ;;  %v2273_v25 = vpop.permute.xlu1 %2272  ;;  %v2271_v4 = vpop.permute.xlu0 %2270 }
 0x23b   : > { %v2179_v42 = vsel %vm6637_vm1, %v2177_v24, 0.0  ;;  %v2216_v44 = vrot.slane %v2209_v50, %v5228_v54  ;;  %v2236_v12 = vsel %vm8024_vm0, %v2232_v37, %v2234_v22  ;;  %v2237_v1 = vsel %vm8024_vm0, %v2234_v22, %v2232_v37  ;;  %3640 = vrot.lane.b32.xlu1 %v6062_v15, %s8231_s18 }
 0x23c   : > { %v2074_v14 = vadd.f32 %v2073_v57, %v2037_v46  ;;  %v2143_v62 = vmul.f32 %v2142_v3, %v2140_v23  ;;  %v2147_v45 = vmul.f32 %v2146_v61, %v2140_v23  ;;  %vm8225_vm2 = vcmp.ge.s32.totalorder %v6094_v36, 2  ;;  %3638 = vrot.lane.b32.xlu0 %v6047_v39, %s8231_s18  ;;  %s6917_s18 = sld [smem:[#allocation9 + $0xb5]] }
 0x23d   : > { %vm8226_vm7 = vcmp.lt.s32.totalorder %v6088_v6, 14  ;;  %v8227_v21 = vmov 0  ;;  %v2344_v17 = vstv %s6609_s6  ;;  %v2078_v7 = vadd.f32 %v2077_v8, %v2041_v47  ;;  %s8272_s6 = smov 112  }
 0x23e   : > { %vm6672_vm13 = vmand %vm8226_vm7, %vm8225_vm2  ;;  %v2107_v24 = vadd.f32 %v2106_v19, %v2070_v18  ;;  %v2151_v51 = vmul.f32 %v2150_v0, %v2140_v23  ;;  %v2241_v3 = vcombine.low %v2236_v12, %v2237_v1  ;;  %v2111_v43 = vadd.f32 %v2110_v26, %v2074_v14  ;;  %v2311_v23 = vpop.permute.xlu1 %2310  ;;  %v2309_v47 = vpop.permute.xlu0 %2308 }
 0x23f   : > { %v8228_v21 = vsel %vm6672_vm13, 4294967295, %v8227_v21  ;;  %v2182_v61 = vmul.f32 %v2181_v10, %v2179_v42  ;;  %vm8229_vm0 = vcmp.lt.s32.totalorder %v5195_v48, 96  ;;  %v2115_v22 = vadd.f32 %v2114_v5, %v2078_v7  ;;  %3677 = vrot.lane.b32.xlu1 %v6062_v15, %s8238_s5 }
 0x240   : > { %v2275_v57 = vsel %vm8229_vm0, %v2271_v4, %v2273_v25  ;;  %vm8230_vm7 = vmmov %vm8229_vm0  ;;  %v2186_v0 = vmul.f32 %v2185_v29, %v2179_v42  ;;  %v2218_v37 = vsel %vm6672_vm13, %v2216_v44, 0.0  ;;  %v2248_v10 = vrot.slane %v2241_v3, %v5228_v54  ;;  %3675 = vrot.lane.b32.xlu0 %v6047_v39, %s8238_s5  ;;  %s6932_s5 = sld [smem:[#allocation9 + $0xb6]] }
 0x241   : > { %v2276_v50 = vsel %vm8230_vm7, %v2273_v25, %v2271_v4  ;;  %v2144_v46 = vadd.f32 %v2143_v62, %v2107_v24  ;;  %v2148_v8 = vadd.f32 %v2147_v45, %v2111_v43  ;;  %v2190_v19 = vmul.f32 %v2189_v34, %v2179_v42 }
 0x242   : > { %vm8232_vm0 = vcmp.ge.s32.totalorder %v5221_v53, 1  ;;  %vm8233_vm2 = vcmp.lt.s32.totalorder %v6088_v6, 14  ;;  %v8234_v29 = vmov 0  ;;  %v2279_v5 = vcombine.low %v2275_v57, %v2276_v50 }
 0x243   : > { %vm6704_vm7 = vmand %vm8233_vm2, %vm8232_vm0  ;;  %v2152_v18 = vadd.f32 %v2151_v51, %v2115_v22  ;;  %v2255_v26 = vrot.slane %v2248_v10, %v5228_v54  ;;  %vm8236_vm13 = vcmp.lt.s32.totalorder %v5195_v48, 95  ;;  %v2183_v44 = vadd.f32 %v2182_v61, %v2144_v46  ;;  %3714 = vrot.lane.b32.xlu1 %v6062_v15, %s8246_s10 }
 0x244   : > { %v8235_v29 = vsel %vm6704_vm7, 4294967295, %v8234_v29  ;;  %v2313_v34 = vsel %vm8236_vm13, %v2309_v47, %v2311_v23  ;;  %vm8237_vm1 = vmmov %vm8236_vm13  ;;  %v2221_v12 = vmul.f32 %v2220_v11, %v2218_v37  ;;  %v2286_v1 = vrot.slane %v2279_v5, %v5228_v54  ;;  %3712 = vrot.lane.b32.xlu0 %v6047_v39, %s8246_s10  ;;  %s6940_s10 = sld [smem:[#allocation9 + $0xb7]] }
 0x245   : > { %v2314_v42 = vsel %vm8237_vm1, %v2311_v23, %v2309_v47  ;;  %v2187_v62 = vadd.f32 %v2186_v0, %v2148_v8  ;;  %v2225_v45 = vmul.f32 %v2224_v55, %v2218_v37  ;;  %v2229_v25 = vmul.f32 %v2228_v49, %v2218_v37  ;;  %v2350_v55 = vpop.permute.xlu1 %2349  ;;  %v2348_v49 = vpop.permute.xlu0 %2347  ;;  %vm8241_vm0 = vmmov %vm8233_vm2 }
 0x246   : > { %v2318_v14 = vcombine.low %v2313_v34, %v2314_v42  ;;  %v2257_v4 = vsel %vm6704_vm7, %v2255_v26, 0.0  ;;  %v2191_v11 = vadd.f32 %v2190_v19, %v2152_v18  ;;  %v2293_v51 = vrot.slane %v2286_v1, %v5228_v54  ;;  %vm8243_vm7 = vmmov %vm8241_vm0 }
 0x247   : > { %v2260_v7 = vmul.f32 %v2259_v2, %v2257_v4  ;;  %v2264_v24 = vmul.f32 %v2263_v16, %v2257_v4  ;;  %v2268_v3 = vmul.f32 %v2267_v13, %v2257_v4  ;;  %vm8239_vm13 = vcmp.lt.s32.totalorder %v5195_v48, 94  ;;  %3763 = vrot.lane.b32.xlu1 %v6062_v15, %s8141_s24 }
 0x248   : > { %v2325_v43 = vrot.slane %v2318_v14, %v5228_v54  ;;  %v2352_v61 = vsel %vm8239_vm13, %v2348_v49, %v2350_v55  ;;  %vm8240_vm1 = vmmov %vm8239_vm13  ;;  %v2222_v16 = vadd.f32 %v2221_v12, %v2183_v44  ;;  %v2295_v57 = vsel %vm8241_vm0, %v2293_v51, 0.0  ;;  %3761 = vrot.lane.b32.xlu0 %v6047_v39, %s8141_s24  ;;  %s8259_s24 = smov 126  }
 0x249   : > { %v2353_v2 = vsel %vm8240_vm1, %v2350_v55, %v2348_v49  ;;  %vm8242_vm2 = vcmp.lt.s32.totalorder %v5221_v53, 15  ;;  %v2375_v50 = vstv %s6687_s8  ;;  %v2379_v22 = vstv %s6689_s19  ;;  %v2400_v34 = vpop.permute.xlu1 %2399  ;;  %v2398_v42 = vpop.permute.xlu0 %2397  ;;  %vm8252_vm13 = vmmov %vm8241_vm0  ;;  %s8273_s8 = smov 110   ;;  %s6922_s19 = sld [smem:[#allocation9 + $0x20]] }
 0x24a   : > { %vm6750_vm15 = vmand %vm8243_vm7, %vm8242_vm2  ;;  %v2226_v0 = vadd.f32 %v2225_v45, %v2187_v62  ;;  %v2230_v37 = vadd.f32 %v2229_v25, %v2191_v11  ;;  %v8247_v10 = vstv %s6518_s30  ;;  %v2332_v8 = vrot.slane %v2325_v43, %v5228_v54  ;;  %s6854_s30 = sld [smem:[#allocation9 + $0x1d]] }
 0x24b   : > { %v2298_v46 = vmul.f32 %v8247_v10, %v2295_v57  ;;  %v8248_v19 = vstv %s6520_s0  ;;  %v8249_v23 = vstv %s6528_s29  ;;  %v2383_v18 = vstv %s6708_s12  ;;  %3800 = vrot.lane.b32.xlu1 %v6062_v15, %s8259_s24  ;;  %s8265_s0 = smov 113   ;;  %s6864_s29 = sld [smem:[#allocation9 + $0x68]] }
 0x24c   : > { %v2302_v5 = vmul.f32 %v8248_v19, %v2295_v57  ;;  %v2306_v47 = vmul.f32 %v8249_v23, %v2295_v57  ;;  %v2357_v26 = vcombine.low %v2352_v61, %v2353_v2  ;;  %v2261_v44 = vadd.f32 %v2260_v7, %v2222_v16  ;;  %3798 = vrot.lane.b32.xlu0 %v6047_v39, %s8259_s24  ;;  %s6930_s12 = sld [smem:[#allocation9 + $0x6b]]  ;;  %s6982_s24 = sld [smem:[#allocation9 + $0x6d]] }
 0x24d   : > { %v2265_v12 = vadd.f32 %v2264_v24, %v2226_v0  ;;  %v2269_v1 = vadd.f32 %v2268_v3, %v2230_v37  ;;  %v2334_v14 = vsel %vm6750_vm15, %v2332_v8, 0.0  ;;  %v8250_v45 = vstv %s6577_s23  ;;  %v2434_v61 = vpop.permute.xlu1 %2433  ;;  %v2432_v2 = vpop.permute.xlu0 %2431  ;;  %s6873_s23 = sld [smem:[#allocation9 + $0x69]] }
 0x24e   : > { %v2337_v62 = vmul.f32 %v2336_v41, %v2334_v14  ;;  %v2341_v25 = vmul.f32 %v8250_v45, %v2334_v14  ;;  %v2345_v4 = vmul.f32 %v2344_v17, %v2334_v14  ;;  %v2364_v11 = vrot.slane %v2357_v26, %v5228_v54 }
 0x24f   : > { %v2299_v7 = vadd.f32 %v2298_v46, %v2261_v44  ;;  %vm8251_vm7 = vcmp.lt.s32.totalorder %v6094_v36, 14  ;;  %v2423_v41 = vstv %s6728_s22  ;;  %vm8255_vm0 = vcmp.lt.s32.totalorder %v5195_v48, 34  ;;  %3837 = vrot.lane.b32.xlu1 %v6062_v15, %s8262_s28  ;;  %s6936_s22 = sld [smem:[#allocation9 + $0x21]] }
 0x250   : > { %vm6791_vm1 = vmand %vm8252_vm13, %vm8251_vm7  ;;  %v2401_v17 = vsel %vm8255_vm0, %v2398_v42, %v2400_v34  ;;  %v2303_v55 = vadd.f32 %v2302_v5, %v2265_v12  ;;  %v2307_v49 = vadd.f32 %v2306_v47, %v2269_v1  ;;  %v2371_v3 = vrot.slane %v2364_v11, %v5228_v54  ;;  %3835 = vrot.lane.b32.xlu0 %v6047_v39, %s8262_s28  ;;  %s6995_s28 = sld [smem:[#allocation9 + $0x6e]] }
 0x251   : > { %vm8256_vm2 = vmmov %vm8255_vm0  ;;  %v2426_v43 = vstv %s6735_s21  ;;  %v2338_v16 = vadd.f32 %v2337_v62, %v2299_v7  ;;  %vm8257_vm7 = vcmp.lt.s32.totalorder %v5195_v48, 33  ;;  %v2461_v44 = vstv %s6772_s2  ;;  %v2471_v1 = vpop.permute.xlu1 %2470  ;;  %v2469_v14 = vpop.permute.xlu0 %2468  ;;  %s6938_s21 = sld [smem:[#allocation9 + $0x6c]]  ;;  %s8280_s2 = smov 98  }
 0x252   : > { %v2402_v51 = vsel %vm8256_vm2, %v2400_v34, %v2398_v42  ;;  %v2435_v0 = vsel %vm8257_vm7, %v2432_v2, %v2434_v61  ;;  %vm8258_vm13 = vmmov %vm8257_vm7  ;;  %v2342_v10 = vadd.f32 %v2341_v25, %v2303_v55  ;;  %v2346_v46 = vadd.f32 %v2345_v4, %v2307_v49 }
 0x253   : > { %v2405_v57 = vcombine.low %v2402_v51, %v2401_v17  ;;  %v2436_v37 = vsel %vm8258_vm13, %v2434_v61, %v2432_v2  ;;  %v2373_v8 = vsel %vm6791_vm1, %v2371_v3, 0.0  ;;  %v2429_v34 = vstv %s6763_s9  ;;  %3874 = vrot.lane.b32.xlu1 %v6062_v15, %s8265_s0  ;;  %s6953_s9 = sld [smem:[#allocation9 + $0x25]] }
 0x254   : > { %v2439_v19 = vcombine.low %v2436_v37, %v2435_v0  ;;  %v2376_v5 = vmul.f32 %v2375_v50, %v2373_v8  ;;  %v2380_v23 = vmul.f32 %v2379_v22, %v2373_v8  ;;  %v2384_v47 = vmul.f32 %v2383_v18, %v2373_v8  ;;  %3872 = vrot.lane.b32.xlu0 %v6047_v39, %s8265_s0  ;;  %s7013_s0 = sld [smem:[#allocation9 + $0xba]] }
 0x255   : > { %v2412_v26 = vrot.slane %v2405_v57, %v5228_v54  ;;  %v2457_v42 = vstv %s6770_s11  ;;  %v2465_v18 = vstv %s6785_s26  ;;  %vm8260_vm0 = vcmp.lt.s32.totalorder %v5195_v48, 32  ;;  %v2508_v2 = vpop.permute.xlu1 %2507  ;;  %s6955_s11 = sld [smem:[#allocation9 + $0x70]]  ;;  %s6973_s26 = sld [smem:[#allocation9 + $0xbb]] }
 0x256   : > { %v2446_v12 = vrot.slane %v2439_v19, %v5228_v54  ;;  %v6825_v62 = vadd.f32 %v2376_v5, %v2338_v16  ;;  %v6827_v45 = vadd.f32 %v2380_v23, %v2342_v10  ;;  %v6829_v50 = vadd.f32 %v2384_v47, %v2346_v46  ;;  %vm8261_vm2 = vmmov %vm8260_vm0  ;;  %v2506_v16 = vpop.permute.xlu0 %2505 }
 0x257   : > { %v2419_v22 = vrot.slane %v2412_v26, %v5228_v54  ;;  %v2472_v4 = vsel %vm8260_vm0, %v2469_v14, %v2471_v1  ;;  %v2473_v11 = vsel %vm8261_vm2, %v2471_v1, %v2469_v14  ;;  %v2494_v17 = vstv %s6802_s17  ;;  %3037 = vrot.lane.b32.xlu1 %v5954_v60, %s8269_s16  ;;  %s6980_s17 = sld [smem:[#allocation9 + $0x22]] }
 0x258   : > { %v2453_v25 = vrot.slane %v2446_v12, %v5228_v54  ;;  %v2476_v51 = vcombine.low %v2473_v11, %v2472_v4  ;;  %v2498_v46 = vstv %s6814_s15  ;;  %v2502_v8 = vstv %s6816_s13  ;;  %3035 = vrot.lane.b32.xlu0 %v5950_v20, %s8269_s16  ;;  %s6986_s15 = sld [smem:[#allocation9 + $0xb8]]  ;;  %s6990_s13 = sld [smem:[#allocation9 + $0x23]] }
 0x259   : > { %v2421_v7 = vsel %vm6203_vm11, %v2419_v22, 0.0  ;;  %vm8263_vm7 = vcmp.lt.s32.totalorder %v5195_v48, 31  ;;  %vm8266_vm0 = vcmp.ge.s32.totalorder %v6088_v6, 2  ;;  %vm8267_vm2 = vcmp.lt.s32.totalorder %v5195_v48, 30 }
 0x25a   : > { %v2424_v55 = vmul.f32 %v2423_v41, %v2421_v7  ;;  %v2427_v49 = vmul.f32 %v2426_v43, %v2421_v7  ;;  %v2430_v3 = vmul.f32 %v2429_v34, %v2421_v7  ;;  %v2455_v61 = vsel %vm6217_vm12, %v2453_v25, 0.0  ;;  %vm8264_vm13 = vmmov %vm8263_vm7  ;;  %v2545_v34 = vpop.permute.xlu1 %2544 }
 0x25b   : > { %v2458_v57 = vmul.f32 %v2457_v42, %v2455_v61  ;;  %v2462_v0 = vmul.f32 %v2461_v44, %v2455_v61  ;;  %v2466_v37 = vmul.f32 %v2465_v18, %v2455_v61  ;;  %v2483_v10 = vrot.slane %v2476_v51, %v5228_v54  ;;  %v2543_v42 = vpop.permute.xlu0 %2542  ;;  %3911 = vrot.lane.b32.xlu1 %v6062_v15, %s8272_s6 }
 0x25c   : > { %v2509_v19 = vsel %vm8263_vm7, %v2506_v16, %v2508_v2  ;;  %v2510_v41 = vsel %vm8264_vm13, %v2508_v2, %v2506_v16  ;;  %v2546_v12 = vsel %vm8267_vm2, %v2543_v42, %v2545_v34  ;;  %vm8268_vm7 = vmmov %vm8267_vm2  ;;  %v2531_v4 = vstv %s6840_s14  ;;  %3909 = vrot.lane.b32.xlu0 %v6047_v39, %s8272_s6  ;;  %s6997_s14 = sld [smem:[#allocation9 + $0xb9]]  ;;  %s7073_s6 = sld [smem:[#allocation9 + $0xbd]] }
 0x25d   : > { %v2459_v43 = vadd.f32 %v2458_v57, %v2424_v55  ;;  %v2463_v5 = vadd.f32 %v2462_v0, %v2427_v49  ;;  %v2467_v23 = vadd.f32 %v2466_v37, %v2430_v3  ;;  %v2490_v47 = vrot.slane %v2483_v10, %v5228_v54 }
 0x25e   : > { %v2513_v26 = vcombine.low %v2510_v41, %v2509_v19  ;;  %v2547_v1 = vsel %vm8268_vm7, %v2545_v34, %v2543_v42  ;;  %v2535_v11 = vstv %s6847_s25  ;;  %v2539_v7 = vstv %s6849_s4  ;;  %v2582_v61 = vpop.permute.xlu1 %2581  ;;  %s7003_s25 = sld [smem:[#allocation9 + $0x24]]  ;;  %s7005_s4 = sld [smem:[#allocation9 + $0x6f]] }
 0x25f   : > { %v2492_v44 = vsel %vm8266_vm0, %v2490_v47, 0.0  ;;  %v2550_v51 = vcombine.low %v2547_v1, %v2546_v12  ;;  %v2580_v2 = vpop.permute.xlu0 %2579  ;;  %v2568_v16 = vstv %s6854_s30  ;;  %vm8270_vm13 = vcmp.lt.s32.totalorder %v5195_v48, 18  ;;  %3074 = vrot.lane.b32.xlu1 %v5954_v60, %s8273_s8  ;;  %s8284_s30 = smov 97  }
 0x260   : > { %v2495_v14 = vmul.f32 %v2494_v17, %v2492_v44  ;;  %v2499_v22 = vmul.f32 %v2498_v46, %v2492_v44  ;;  %v2503_v18 = vmul.f32 %v2502_v8, %v2492_v44  ;;  %v2520_v25 = vrot.slane %v2513_v26, %v5228_v54  ;;  %vm8271_vm0 = vmmov %vm8270_vm13  ;;  %3072 = vrot.lane.b32.xlu0 %v5950_v20, %s8273_s8 }
 0x261   : > { %v2557_v57 = vrot.slane %v2550_v51, %v5228_v54  ;;  %v2583_v0 = vsel %vm8270_vm13, %v2580_v2, %v2582_v61  ;;  %v2584_v37 = vsel %vm8271_vm0, %v2582_v61, %v2580_v2  ;;  %v2572_v46 = vstv %s6864_s29  ;;  %s7031_s29 = sld [smem:[#allocation9 + $0x26]] }
 0x262   : > { %v2496_v55 = vadd.f32 %v2495_v14, %v2459_v43  ;;  %v2500_v49 = vadd.f32 %v2499_v22, %v2463_v5  ;;  %v2504_v17 = vadd.f32 %v2503_v18, %v2467_v23  ;;  %v2527_v3 = vrot.slane %v2520_v25, %v5228_v54  ;;  %v2619_v44 = vpop.permute.xlu1 %2618 }
 0x263   : > { %v2576_v8 = vstv %s6866_s27  ;;  %v2587_v19 = vcombine.low %v2584_v37, %v2583_v0  ;;  %v2564_v23 = vrot.slane %v2557_v57, %v5228_v54  ;;  %v2605_v47 = vstv %s6871_s3  ;;  %v2617_v12 = vpop.permute.xlu0 %2616  ;;  %3948 = vrot.lane.b32.xlu1 %v6062_v15, %s8269_s16  ;;  %s7033_s27 = sld [smem:[#allocation9 + $0x71]]  ;;  %s7053_s3 = sld [smem:[#allocation9 + $0xbc]] }
 0x264   : > { %v2529_v10 = vsel %vm6254_vm10, %v2527_v3, 0.0  ;;  %v2609_v26 = vstv %s6873_s23  ;;  %v2613_v34 = vstv %s6875_s1  ;;  %vm8274_vm2 = vcmp.lt.s32.totalorder %v5195_v48, 17  ;;  %3946 = vrot.lane.b32.xlu0 %v6047_v39, %s8269_s16  ;;  %s7055_s23 = sld [smem:[#allocation9 + $0x27]]  ;;  %s8291_s1 = smov 96  }
 0x265   : > { %v2532_v41 = vmul.f32 %v2531_v4, %v2529_v10  ;;  %v2536_v43 = vmul.f32 %v2535_v11, %v2529_v10  ;;  %v2540_v5 = vmul.f32 %v2539_v7, %v2529_v10  ;;  %v2594_v42 = vrot.slane %v2587_v19, %v5228_v54  ;;  %vm8275_vm7 = vmmov %vm8274_vm2  ;;  %s7066_s16 = sld [smem:[#allocation9 + $0x72]] }
 0x266   : > { %v2566_v18 = vsel %vm6315_vm4, %v2564_v23, 0.0  ;;  %v2620_v51 = vsel %vm8274_vm2, %v2617_v12, %v2619_v44  ;;  %v2656_v2 = vpop.permute.xlu1 %2655  ;;  %vm8276_vm13 = vcmp.lt.s32.totalorder %v5195_v48, 16  ;;  %v2642_v23 = vstv %s6911_s7  ;;  %s7078_s7 = sld [smem:[#allocation9 + $0x28]] }
 0x267   : > { %v2533_v1 = vadd.f32 %v2532_v41, %v2496_v55  ;;  %v2537_v14 = vadd.f32 %v2536_v43, %v2500_v49  ;;  %v2541_v22 = vadd.f32 %v2540_v5, %v2504_v17  ;;  %v2569_v25 = vmul.f32 %v2568_v16, %v2566_v18  ;;  %v2654_v16 = vpop.permute.xlu0 %2653  ;;  %vm8277_vm0 = vmmov %vm8276_vm13  ;;  %3111 = vrot.lane.b32.xlu1 %v5954_v60, %s8280_s2 }
 0x268   : > { %v2573_v4 = vmul.f32 %v2572_v46, %v2566_v18  ;;  %v2577_v11 = vmul.f32 %v2576_v8, %v2566_v18  ;;  %v2601_v7 = vrot.slane %v2594_v42, %v5228_v54  ;;  %v2621_v55 = vsel %vm8275_vm7, %v2619_v44, %v2617_v12  ;;  %3109 = vrot.lane.b32.xlu0 %v5950_v20, %s8280_s2 }
 0x269   : > { %v2570_v49 = vadd.f32 %v2569_v25, %v2533_v1  ;;  %v2624_v10 = vcombine.low %v2621_v55, %v2620_v51  ;;  %v2657_v46 = vsel %vm8276_vm13, %v2654_v16, %v2656_v2  ;;  %v2658_v8 = vsel %vm8277_vm0, %v2656_v2, %v2654_v16 }
 0x26a   : > { %v2574_v17 = vadd.f32 %v2573_v4, %v2537_v14  ;;  %v2578_v3 = vadd.f32 %v2577_v11, %v2541_v22  ;;  %v2603_v61 = vsel %vm6333_vm8, %v2601_v7, 0.0  ;;  %v2650_v44 = vstv %s6917_s18  ;;  %s7089_s18 = sld [smem:[#allocation9 + $0xbe]] }
 0x26b   : > { %v2606_v57 = vmul.f32 %v2605_v47, %v2603_v61  ;;  %v2610_v0 = vmul.f32 %v2609_v26, %v2603_v61  ;;  %v2614_v37 = vmul.f32 %v2613_v34, %v2603_v61  ;;  %v2631_v5 = vrot.slane %v2624_v10, %v5228_v54  ;;  %v2693_v34 = vpop.permute.xlu1 %2692  ;;  %v2691_v42 = vpop.permute.xlu0 %2690  ;;  %3985 = vrot.lane.b32.xlu1 %v6062_v15, %s8273_s8 }
 0x26c   : > { %v2646_v47 = vstv %s6913_s20  ;;  %v2661_v26 = vcombine.low %v2658_v8, %v2657_v46  ;;  %vm8278_vm2 = vcmp.lt.s32.totalorder %v5195_v48, 15  ;;  %v2679_v4 = vstv %s6922_s19  ;;  %3983 = vrot.lane.b32.xlu0 %v6047_v39, %s8273_s8  ;;  %s7080_s20 = sld [smem:[#allocation9 + $0x73]]  ;;  %s7097_s8 = sld [smem:[#allocation9 + $0x29]] }
 0x26d   : > { %v2607_v19 = vadd.f32 %v2606_v57, %v2570_v49  ;;  %v2611_v41 = vadd.f32 %v2610_v0, %v2574_v17  ;;  %v2615_v43 = vadd.f32 %v2614_v37, %v2578_v3  ;;  %v2638_v12 = vrot.slane %v2631_v5, %v5228_v54  ;;  %vm8279_vm7 = vmmov %vm8278_vm2  ;;  %s7099_s19 = sld [smem:[#allocation9 + $0x74]] }
 0x26e   : > { %v2694_v1 = vsel %vm8278_vm2, %v2691_v42, %v2693_v34  ;;  %v2695_v14 = vsel %vm8279_vm7, %v2693_v34, %v2691_v42  ;;  %v2668_v22 = vrot.slane %v2661_v26, %v5228_v54  ;;  %v2683_v11 = vstv %s6930_s12  ;;  %s8298_s12 = smov 95  }
 0x26f   : > { %v2698_v18 = vcombine.low %v2695_v14, %v2694_v1  ;;  %v2640_v25 = vsel %vm5264_vm5, %v2638_v12, 0.0  ;;  %v2687_v7 = vstv %s6932_s5  ;;  %v2730_v3 = vpop.permute.xlu1 %2729  ;;  %v2716_v61 = vstv %s6936_s22  ;;  %v2728_v0 = vpop.permute.xlu0 %2727  ;;  %3148 = vrot.lane.b32.xlu1 %v5954_v60, %s8284_s30  ;;  %s7109_s5 = sld [smem:[#allocation9 + $0xbf]]  ;;  %s7121_s22 = sld [smem:[#allocation9 + $0x2a]] }
 0x270   : > { %v2643_v51 = vmul.f32 %v2642_v23, %v2640_v25  ;;  %v2647_v55 = vmul.f32 %v2646_v47, %v2640_v25  ;;  %v2651_v49 = vmul.f32 %v2650_v44, %v2640_v25  ;;  %v2675_v17 = vrot.slane %v2668_v22, %v5228_v54  ;;  %3146 = vrot.lane.b32.xlu0 %v5950_v20, %s8284_s30 }
 0x271   : > { %v2720_v2 = vstv %s6938_s21  ;;  %v2724_v16 = vstv %s6940_s10  ;;  %v2705_v57 = vrot.slane %v2698_v18, %v5228_v54  ;;  %vm8281_vm13 = vcmp.ge.s32.totalorder %v5210_v52, 1  ;;  %s7138_s21 = sld [smem:[#allocation9 + $0x75]]  ;;  %s7140_s10 = sld [smem:[#allocation9 + $0xc0]] }
 0x272   : > { %v2644_v37 = vadd.f32 %v2643_v51, %v2607_v19  ;;  %v2648_v10 = vadd.f32 %v2647_v55, %v2611_v41  ;;  %v2652_v46 = vadd.f32 %v2651_v49, %v2615_v43  ;;  %v2677_v8 = vsel %vm8281_vm13, %v2675_v17, 0.0 }
 0x273   : > { %v2680_v5 = vmul.f32 %v2679_v4, %v2677_v8  ;;  %v2684_v23 = vmul.f32 %v2683_v11, %v2677_v8  ;;  %v2688_v47 = vmul.f32 %v2687_v7, %v2677_v8  ;;  %v2712_v26 = vrot.slane %v2705_v57, %v5228_v54  ;;  %v2767_v43 = vpop.permute.xlu1 %2766  ;;  %v2765_v22 = vpop.permute.xlu0 %2764  ;;  %4022 = vrot.lane.b32.xlu1 %v6062_v15, %s8280_s2 }
 0x274   : > { %vm8282_vm0 = vcmp.lt.s32.totalorder %v5195_v48, 14  ;;  %v2839_v34 = vstv %s6953_s9  ;;  %v2843_v42 = vstv %s6955_s11  ;;  %vm8285_vm7 = vcmp.lt.s32.totalorder %v5195_v48, 2  ;;  %4020 = vrot.lane.b32.xlu0 %v6047_v39, %s8280_s2  ;;  %s8305_s9 = smov 94   ;;  %s7155_s11 = sld [smem:[#allocation9 + $0x32]] }
 0x275   : > { %v2731_v19 = vsel %vm8282_vm0, %v2728_v0, %v2730_v3  ;;  %vm8283_vm2 = vmmov %vm8282_vm0  ;;  %v2681_v44 = vadd.f32 %v2680_v5, %v2644_v37  ;;  %v2685_v12 = vadd.f32 %v2684_v23, %v2648_v10  ;;  %v2689_v1 = vadd.f32 %v2688_v47, %v2652_v46  ;;  %s7157_s2 = sld [smem:[#allocation9 + $0x7d]] }
 0x276   : > { %v2732_v41 = vsel %vm8283_vm2, %v2730_v3, %v2728_v0  ;;  %v2714_v14 = vsel %vm5301_vm9, %v2712_v26, 0.0  ;;  %v2768_v7 = vsel %vm8285_vm7, %v2765_v22, %v2767_v43  ;;  %vm8286_vm13 = vmmov %vm8285_vm7  ;;  %v7022_v55 = vmul.f32 %v2839_v34, %v5942_v28 }
 0x277   : > { %v2717_v18 = vmul.f32 %v2716_v61, %v2714_v14  ;;  %v2721_v25 = vmul.f32 %v2720_v2, %v2714_v14  ;;  %v2725_v4 = vmul.f32 %v2724_v16, %v2714_v14  ;;  %v2735_v11 = vcombine.low %v2732_v41, %v2731_v19  ;;  %v2804_v16 = vpop.permute.xlu1 %2803  ;;  %v2802_v10 = vpop.permute.xlu0 %2801  ;;  %3185 = vrot.lane.b32.xlu1 %v5954_v60, %s8291_s1 }
 0x278   : > { %v2769_v51 = vsel %vm8286_vm13, %v2767_v43, %v2765_v22  ;;  %v2847_v49 = vstv %s6973_s26  ;;  %v2753_v57 = vstv %s6980_s17  ;;  %v2757_v0 = vstv %s6982_s24  ;;  %3183 = vrot.lane.b32.xlu0 %v5950_v20, %s8291_s1  ;;  %s7160_s26 = sld [smem:[#allocation9 + $0xc8]]  ;;  %s7163_s17 = sld [smem:[#allocation9 + $0x33]] }
 0x279   : > { %v2718_v17 = vadd.f32 %v2717_v18, %v2681_v44  ;;  %v2722_v3 = vadd.f32 %v2721_v25, %v2685_v12  ;;  %v2726_v61 = vadd.f32 %v2725_v4, %v2689_v1  ;;  %v2742_v2 = vrot.slane %v2735_v11, %v5228_v54  ;;  %s7165_s24 = sld [smem:[#allocation9 + $0x7e]] }
 0x27a   : > { %v2772_v37 = vcombine.low %v2769_v51, %v2768_v7  ;;  %v7029_v46 = vmul.f32 %v2843_v42, %v5942_v28  ;;  %v2761_v8 = vstv %s6986_s15  ;;  %vm8287_vm0 = vcmp.lt.s32.totalorder %v5195_v48, 1  ;;  %s7174_s15 = sld [smem:[#allocation9 + $0xc9]] }
 0x27b   : > { %v2749_v5 = vrot.slane %v2742_v2, %v5228_v54  ;;  %v2805_v23 = vsel %vm8287_vm0, %v2802_v10, %v2804_v16  ;;  %vm8288_vm2 = vmmov %vm8287_vm0  ;;  %v2790_v26 = vstv %s6990_s13  ;;  %v2794_v19 = vstv %s6995_s28  ;;  %v2853_v1 = vpop.permute.xlu1 %2852  ;;  %v2851_v4 = vpop.permute.xlu0 %2850  ;;  %4059 = vrot.lane.b32.xlu1 %v6062_v15, %s8284_s30  ;;  %s7182_s13 = sld [smem:[#allocation9 + $0x34]]  ;;  %s7197_s28 = sld [smem:[#allocation9 + $0x7f]] }
 0x27c   : > { %v2806_v47 = vsel %vm8288_vm2, %v2804_v16, %v2802_v10  ;;  %v2779_v41 = vrot.slane %v2772_v37, %v5228_v54  ;;  %v2798_v42 = vstv %s6997_s14  ;;  %v2827_v44 = vstv %s7003_s25  ;;  %4057 = vrot.lane.b32.xlu0 %v6047_v39, %s8284_s30  ;;  %s7199_s14 = sld [smem:[#allocation9 + $0xca]]  ;;  %s7219_s25 = sld [smem:[#allocation9 + $0x35]] }
 0x27d   : > { %v2809_v43 = vcombine.low %v2806_v47, %v2805_v23  ;;  %v2751_v34 = vsel %vm6410_vm6, %v2749_v5, 0.0  ;;  %v2831_v12 = vstv %s7005_s4  ;;  %v2835_v11 = vstv %s7013_s0  ;;  %s7224_s4 = sld [smem:[#allocation9 + $0x80]]  ;;  %s7226_s30 = sld [smem:[#allocation9 + $0xcb]] }
 0x27e   : > { %v2754_v14 = vmul.f32 %v2753_v57, %v2751_v34  ;;  %v2758_v22 = vmul.f32 %v2757_v0, %v2751_v34  ;;  %v2762_v18 = vmul.f32 %v2761_v8, %v2751_v34  ;;  %v2786_v25 = vrot.slane %v2779_v41, %v5228_v54  ;;  %s7231_s0 = sld [smem:[#allocation9 + $0x36]] }
 0x27f   : > { %v2816_v7 = vrot.slane %v2809_v43, %v5228_v54  ;;  %vm8289_vm7 = vcmp.lt.s32.totalorder %v5195_v48, 127  ;;  %vm8292_vm0 = vcmp.ge.s32.totalorder %v6094_v36, 2  ;;  %v2890_v47 = vpop.permute.xlu1 %2889  ;;  %v2848_v41 = vmul.f32 %v2847_v49, %v5942_v28  ;;  %3222 = vrot.lane.b32.xlu1 %v5954_v60, %s8298_s12 }
 0x280   : > { %v2854_v51 = vsel %vm8289_vm7, %v2851_v4, %v2853_v1  ;;  %vm8290_vm13 = vmmov %vm8289_vm7  ;;  %v2755_v16 = vadd.f32 %v2754_v14, %v2718_v17  ;;  %v2759_v57 = vadd.f32 %v2758_v22, %v2722_v3  ;;  %v2763_v0 = vadd.f32 %v2762_v18, %v2726_v61  ;;  %v2888_v61 = vpop.permute.xlu0 %2887  ;;  %3220 = vrot.lane.b32.xlu0 %v5950_v20, %s8298_s12 }
 0x281   : > { %v2855_v2 = vsel %vm8290_vm13, %v2853_v1, %v2851_v4  ;;  %v2788_v37 = vsel %vm8292_vm0, %v2786_v25, 0.0  ;;  %v2823_v23 = vrot.slane %v2816_v7, %v5228_v54  ;;  %v2876_v43 = vstv %s7031_s29  ;;  %s7239_s29 = sld [smem:[#allocation9 + $0x81]] }
 0x282   : > { %v2791_v10 = vmul.f32 %v2790_v26, %v2788_v37  ;;  %v2795_v8 = vmul.f32 %v2794_v19, %v2788_v37  ;;  %v2799_v5 = vmul.f32 %v2798_v42, %v2788_v37  ;;  %v2880_v17 = vstv %s7033_s27  ;;  %s7241_s27 = sld [smem:[#allocation9 + $0xcc]] }
 0x283   : > { %v2858_v3 = vcombine.low %v2854_v51, %v2855_v2  ;;  %vm8293_vm2 = vcmp.ge.s32.totalorder %v5221_v53, 1  ;;  %v2884_v22 = vstv %s7053_s3  ;;  %v2913_v18 = vstv %s7055_s23  ;;  %v2927_v7 = vpop.permute.xlu1 %2926  ;;  %4096 = vrot.lane.b32.xlu1 %v6062_v15, %s8291_s1  ;;  %s7265_s3 = sld [smem:[#allocation9 + $0x3e]]  ;;  %s7267_s23 = sld [smem:[#allocation9 + $0x89]] }
 0x284   : > { %v2792_v26 = vadd.f32 %v2791_v10, %v2755_v16  ;;  %v2796_v19 = vadd.f32 %v2795_v8, %v2759_v57  ;;  %v2800_v34 = vadd.f32 %v2799_v5, %v2763_v0  ;;  %v2825_v42 = vsel %vm8293_vm2, %v2823_v23, 0.0  ;;  %v2925_v2 = vpop.permute.xlu0 %2924  ;;  %4094 = vrot.lane.b32.xlu0 %v6047_v39, %s8291_s1  ;;  %s7270_s1 = sld [smem:[#allocation9 + $0x37]] }
 0x285   : > { %v2828_v28 = vmul.f32 %v2827_v44, %v2825_v42  ;;  %v2832_v49 = vmul.f32 %v2831_v12, %v2825_v42  ;;  %v2836_v1 = vmul.f32 %v2835_v11, %v2825_v42  ;;  %v2865_v14 = vrot.slane %v2858_v3, %v5228_v54 }
 0x286   : > { %vm8294_vm7 = vcmp.lt.s32.totalorder %v5195_v48, 126  ;;  %v2917_v16 = vstv %s7066_s16  ;;  %vm8296_vm0 = vcmp.lt.s32.totalorder %v5195_v48, 114  ;;  %v2950_v42 = vstv %s7078_s7  ;;  %s7272_s16 = sld [smem:[#allocation9 + $0x82]]  ;;  %s7277_s7 = sld [smem:[#allocation9 + $0x38]] }
 0x287   : > { %v2891_v25 = vsel %vm8294_vm7, %v2888_v61, %v2890_v47  ;;  %vm8295_vm13 = vmmov %vm8294_vm7  ;;  %v2829_v44 = vadd.f32 %v2828_v28, %v2792_v26  ;;  %v2833_v12 = vadd.f32 %v2832_v49, %v2796_v19  ;;  %v2837_v11 = vadd.f32 %v2836_v1, %v2800_v34  ;;  %v2964_v19 = vpop.permute.xlu1 %2963  ;;  %3259 = vrot.lane.b32.xlu1 %v5954_v60, %s8305_s9 }
 0x288   : > { %v2892_v4 = vsel %vm8295_vm13, %v2890_v47, %v2888_v61  ;;  %v2872_v51 = vrot.slane %v2865_v14, %v5228_v54  ;;  %v2928_v0 = vsel %vm8296_vm0, %v2925_v2, %v2927_v7  ;;  %vm8297_vm2 = vmmov %vm8296_vm0  ;;  %vm8299_vm7 = vcmp.lt.s32.totalorder %v5221_v53, 15  ;;  %3257 = vrot.lane.b32.xlu0 %v5950_v20, %s8305_s9 }
 0x289   : > { %v2895_v57 = vcombine.low %v2891_v25, %v2892_v4  ;;  %v2929_v37 = vsel %vm8297_vm2, %v2927_v7, %v2925_v2  ;;  %v2841_v10 = vadd.f32 %v7022_v55, %v2829_v44  ;;  %v2845_v8 = vadd.f32 %v7029_v46, %v2833_v12 }
 0x28a   : > { %v2849_v5 = vadd.f32 %v2848_v41, %v2837_v11  ;;  %v2874_v23 = vsel %vm8299_vm7, %v2872_v51, 0.0  ;;  %v2921_v34 = vstv %s7073_s6  ;;  %v2954_v55 = vstv %s7080_s20  ;;  %v2962_v41 = vpop.permute.xlu0 %2961  ;;  %s7274_s6 = sld [smem:[#allocation9 + $0xcd]]  ;;  %s7281_s20 = sld [smem:[#allocation9 + $0x83]] }
 0x28b   : > { %v2877_v47 = vmul.f32 %v2876_v43, %v2874_v23  ;;  %v2881_v3 = vmul.f32 %v2880_v17, %v2874_v23  ;;  %v2885_v61 = vmul.f32 %v2884_v22, %v2874_v23  ;;  %v2902_v26 = vrot.slane %v2895_v57, %v5228_v54  ;;  %v3001_v11 = vpop.permute.xlu1 %3000  ;;  %4133 = vrot.lane.b32.xlu1 %v6062_v15, %s8298_s12 }
 0x28c   : > { %v2932_v46 = vcombine.low %v2928_v0, %v2929_v37  ;;  %v2958_v17 = vstv %s7089_s18  ;;  %vm8300_vm13 = vcmp.lt.s32.totalorder %v5195_v48, 113  ;;  %vm8302_vm2 = vcmp.lt.s32.totalorder %v6094_v36, 14  ;;  %4131 = vrot.lane.b32.xlu0 %v6047_v39, %s8298_s12  ;;  %s7283_s18 = sld [smem:[#allocation9 + $0xce]]  ;;  %s7293_s12 = sld [smem:[#allocation9 + $0xcf]] }
 0x28d   : > { %v2878_v28 = vadd.f32 %v2877_v47, %v2841_v10  ;;  %v2882_v49 = vadd.f32 %v2881_v3, %v2845_v8  ;;  %v2886_v1 = vadd.f32 %v2885_v61, %v2849_v5  ;;  %v2909_v43 = vrot.slane %v2902_v26, %v5228_v54  ;;  %vm8301_vm0 = vmmov %vm8300_vm13 }
 0x28e   : > { %v2939_v14 = vrot.slane %v2932_v46, %v5228_v54  ;;  %v2965_v22 = vsel %vm8300_vm13, %v2962_v41, %v2964_v19  ;;  %v2966_v25 = vsel %vm8301_vm0, %v2964_v19, %v2962_v41  ;;  %v2987_v7 = vstv %s7097_s8  ;;  %v2999_v37 = vpop.permute.xlu0 %2998  ;;  %s7285_s8 = sld [smem:[#allocation9 + $0x39]] }
 0x28f   : > { %v2911_v4 = vsel %vm8302_vm2, %v2909_v43, 0.0  ;;  %v2991_v44 = vstv %s7099_s19  ;;  %v2969_v12 = vcombine.low %v2965_v22, %v2966_v25  ;;  %v2995_v10 = vstv %s7109_s5  ;;  %v3311_v46 = vpop.permute.xlu1 %3310  ;;  %4170 = vrot.lane.b32.xlu1 %v6062_v15, %s8305_s9  ;;  %s7291_s19 = sld [smem:[#allocation9 + $0x84]]  ;;  %s7295_s5 = sld [smem:[#allocation9 + $0x3a]] }
 0x290   : > { %v2914_v51 = vmul.f32 %v2913_v18, %v2911_v4  ;;  %v2918_v2 = vmul.f32 %v2917_v16, %v2911_v4  ;;  %v2922_v57 = vmul.f32 %v2921_v34, %v2911_v4  ;;  %v2946_v0 = vrot.slane %v2939_v14, %v5228_v54  ;;  %4168 = vrot.lane.b32.xlu0 %v6047_v39, %s8305_s9  ;;  %s7315_s9 = sld [smem:[#allocation9 + $0x86]] }
 0x291   : > { %v2976_v8 = vrot.slane %v2969_v12, %v5228_v54  ;;  %vm8303_vm7 = vcmp.lt.s32.totalorder %v5195_v48, 112  ;;  %v3024_v60 = vstv %s7121_s22  ;;  %v3028_v22 = vstv %s7138_s21  ;;  %s7302_s22 = sld [smem:[#allocation9 + $0x85]]  ;;  %s7304_s21 = sld [smem:[#allocation9 + $0xd0]] }
 0x292   : > { %v3002_v5 = vsel %vm8303_vm7, %v2999_v37, %v3001_v11  ;;  %vm8304_vm13 = vmmov %vm8303_vm7  ;;  %v2915_v47 = vadd.f32 %v2914_v51, %v2878_v28  ;;  %v2919_v18 = vadd.f32 %v2918_v2, %v2882_v49  ;;  %v2923_v16 = vadd.f32 %v2922_v57, %v2886_v1  ;;  %v3309_v28 = vpop.permute.xlu0 %3308 }
 0x293   : > { %v3003_v23 = vsel %vm8304_vm13, %v3001_v11, %v2999_v37  ;;  %v2948_v3 = vsel %vm6558_vm3, %v2946_v0, 0.0  ;;  %v2983_v34 = vrot.slane %v2976_v8, %v5228_v54  ;;  %v3032_v25 = vstv %s7140_s10  ;;  %s7308_s10 = sld [smem:[#allocation9 + $0x3b]] }
 0x294   : > { %v2951_v61 = vmul.f32 %v2950_v42, %v2948_v3  ;;  %v2955_v26 = vmul.f32 %v2954_v55, %v2948_v3  ;;  %v2959_v19 = vmul.f32 %v2958_v17, %v2948_v3  ;;  %v3006_v41 = vcombine.low %v3002_v5, %v3003_v23 }
 0x295   : > { %v2985_v42 = vsel %vm5398_vm14, %v2983_v34, 0.0  ;;  %vm8306_vm0 = vcmp.lt.s32.totalorder %v5195_v48, 34  ;;  %vm8308_vm7 = vcmp.lt.s32.totalorder %v5195_v48, 33  ;;  %v3334_v5 = vstv %s7155_s11  ;;  %s7324_s11 = sld [smem:[#allocation9 + $0xd1]] }
 0x296   : > { %v2952_v20 = vadd.f32 %v2951_v61, %v2915_v47  ;;  %v2956_v49 = vadd.f32 %v2955_v26, %v2919_v18  ;;  %v2960_v1 = vadd.f32 %v2959_v19, %v2923_v16  ;;  %v2988_v55 = vmul.f32 %v2987_v7, %v2985_v42  ;;  %vm8307_vm2 = vmmov %vm8306_vm0  ;;  %v3345_v7 = vpop.permute.xlu1 %3344  ;;  %v3343_v57 = vpop.permute.xlu0 %3342 }
 0x297   : > { %v2992_v43 = vmul.f32 %v2991_v44, %v2985_v42  ;;  %v2996_v17 = vmul.f32 %v2995_v10, %v2985_v42  ;;  %v3013_v14 = vrot.slane %v3006_v41, %v5228_v54  ;;  %v3312_v4 = vsel %vm8306_vm0, %v3309_v28, %v3311_v46  ;;  %vm8309_vm13 = vmmov %vm8308_vm7 }
 0x298   : > { %v3313_v12 = vsel %vm8307_vm2, %v3311_v46, %v3309_v28  ;;  %v2989_v44 = vadd.f32 %v2988_v55, %v2952_v20  ;;  %v3346_v37 = vsel %vm8308_vm7, %v3343_v57, %v3345_v7  ;;  %v3347_v10 = vsel %vm8309_vm13, %v3345_v7, %v3343_v57 }
 0x299   : > { %v2993_v11 = vadd.f32 %v2992_v43, %v2956_v49  ;;  %v2997_v51 = vadd.f32 %v2996_v17, %v2960_v1  ;;  %v3020_v2 = vrot.slane %v3013_v14, %v5228_v54  ;;  %v3316_v0 = vcombine.low %v3313_v12, %v3312_v4 }
 0x29a   : > { %vm8310_vm0 = vcmp.lt.s32.totalorder %v5210_v52, 15  ;;  %v3337_v23 = vstv %s7157_s2  ;;  %v3350_v47 = vcombine.low %v3347_v10, %v3346_v37  ;;  %v3382_v15 = vpop.permute.xlu1 %3381  ;;  %v3340_v26 = vstv %s7160_s26  ;;  %v3380_v41 = vpop.permute.xlu0 %3379  ;;  %s7347_s2 = sld [smem:[#allocation9 + $0x3c]]  ;;  %s7350_s26 = sld [smem:[#allocation9 + $0x87]] }
 0x29b   : > { %v3022_v8 = vsel %vm8310_vm0, %v3020_v2, 0.0  ;;  %v3323_v61 = vrot.slane %v3316_v0, %v5228_v54  ;;  %v3368_v19 = vstv %s7163_s17  ;;  %v3372_v34 = vstv %s7165_s24  ;;  %s7352_s17 = sld [smem:[#allocation9 + $0xd2]]  ;;  %s7357_s24 = sld [smem:[#allocation9 + $0x3d]] }
 0x29c   : > { %v3025_v18 = vmul.f32 %v3024_v60, %v3022_v8  ;;  %v3029_v16 = vmul.f32 %v3028_v22, %v3022_v8  ;;  %v3033_v3 = vmul.f32 %v3032_v25, %v3022_v8  ;;  %v3357_v46 = vrot.slane %v3350_v47, %v5228_v54 }
 0x29d   : > { %v3330_v60 = vrot.slane %v3323_v61, %v5228_v54  ;;  %v3376_v49 = vstv %s7174_s15  ;;  %vm8311_vm2 = vcmp.lt.s32.totalorder %v5195_v48, 32  ;;  %v3405_v17 = vstv %s7182_s13  ;;  %s7360_s15 = sld [smem:[#allocation9 + $0x88]]  ;;  %s7362_s13 = sld [smem:[#allocation9 + $0xd3]] }
 0x29e   : > { %v7206_v28 = vadd.f32 %v3025_v18, %v2989_v44  ;;  %v7208_v39 = vadd.f32 %v3029_v16, %v2993_v11  ;;  %v7210_v20 = vadd.f32 %v3033_v3, %v2997_v51  ;;  %v3364_v1 = vrot.slane %v3357_v46, %v5228_v54  ;;  %vm8312_vm7 = vmmov %vm8311_vm2  ;;  %v3419_v22 = vpop.permute.xlu1 %3418  ;;  %v3417_v44 = vpop.permute.xlu0 %3416 }
 0x29f   : > { %v3383_v42 = vsel %vm8311_vm2, %v3380_v41, %v3382_v15  ;;  %v3384_v55 = vsel %vm8312_vm7, %v3382_v15, %v3380_v41  ;;  %v3332_v43 = vsel %vm6203_vm11, %v3330_v60, 0.0  ;;  %v3409_v57 = vstv %s7197_s28  ;;  %s7373_s28 = sld [smem:[#allocation9 + $0xd4]] }
 0x2a0   : > { %v3387_v14 = vcombine.low %v3384_v55, %v3383_v42  ;;  %v3335_v25 = vmul.f32 %v3334_v5, %v3332_v43  ;;  %v3338_v4 = vmul.f32 %v3337_v23, %v3332_v43  ;;  %v3341_v12 = vmul.f32 %v3340_v26, %v3332_v43 }
 0x2a1   : > { %v3366_v7 = vsel %vm6217_vm12, %v3364_v1, 0.0  ;;  %v3413_v0 = vstv %s7199_s14  ;;  %vm8313_vm11 = vcmp.lt.s32.totalorder %v5195_v48, 31  ;;  %vm8315_vm12 = vcmp.ge.s32.totalorder %v6088_v6, 2  ;;  %s7380_s14 = sld [smem:[#allocation9 + $0x3f]] }
 0x2a2   : > { %v3369_v11 = vmul.f32 %v3368_v19, %v3366_v7  ;;  %v3373_v51 = vmul.f32 %v3372_v34, %v3366_v7  ;;  %v3377_v63 = vmul.f32 %v3376_v49, %v3366_v7  ;;  %v3394_v2 = vrot.slane %v3387_v14, %v5228_v54  ;;  %vm8314_vm13 = vmmov %vm8313_vm11  ;;  %v3456_v47 = vpop.permute.xlu1 %3455  ;;  %v3454_v16 = vpop.permute.xlu0 %3453 }
 0x2a3   : > { %v3420_v37 = vsel %vm8313_vm11, %v3417_v44, %v3419_v22  ;;  %v3421_v10 = vsel %vm8314_vm13, %v3419_v22, %v3417_v44  ;;  %vm8316_vm0 = vcmp.lt.s32.totalorder %v5195_v48, 30  ;;  %v3442_v41 = vstv %s7219_s25  ;;  %s7382_s25 = sld [smem:[#allocation9 + $0x8a]] }
 0x2a4   : > { %v3370_v31 = vadd.f32 %v3369_v11, %v3335_v25  ;;  %v3374_v8 = vadd.f32 %v3373_v51, %v3338_v4  ;;  %v3378_v5 = vadd.f32 %v3377_v63, %v3341_v12  ;;  %v3401_v23 = vrot.slane %v3394_v2, %v5228_v54  ;;  %vm8317_vm2 = vmmov %vm8316_vm0 }
 0x2a5   : > { %v3424_v18 = vcombine.low %v3421_v10, %v3420_v37  ;;  %v3457_v61 = vsel %vm8316_vm0, %v3454_v16, %v3456_v47  ;;  %v3458_v15 = vsel %vm8317_vm2, %v3456_v47, %v3454_v16  ;;  %v3446_v60 = vstv %s7224_s4  ;;  %s7388_s4 = sld [smem:[#allocation9 + $0xd5]] }
 0x2a6   : > { %v3403_v3 = vsel %vm8315_vm12, %v3401_v23, 0.0  ;;  %v3450_v49 = vstv %s7226_s30  ;;  %v3461_v1 = vcombine.low %v3458_v15, %v3457_v61  ;;  %v3493_v42 = vpop.permute.xlu1 %3492  ;;  %v3491_v25 = vpop.permute.xlu0 %3490  ;;  %v3479_v4 = vstv %s7231_s0  ;;  %s7392_s30 = sld [smem:[#allocation9 + $0x40]]  ;;  %s7395_s0 = sld [smem:[#allocation9 + $0x8b]] }
 0x2a7   : > { %v3406_v26 = vmul.f32 %v3405_v17, %v3403_v3  ;;  %v3410_v19 = vmul.f32 %v3409_v57, %v3403_v3  ;;  %v3414_v34 = vmul.f32 %v3413_v0, %v3403_v3  ;;  %v3431_v46 = vrot.slane %v3424_v18, %v5228_v54 }
 0x2a8   : > { %v3468_v17 = vrot.slane %v3461_v1, %v5228_v54  ;;  %vm8318_vm7 = vcmp.lt.s32.totalorder %v5195_v48, 18  ;;  %v3483_v11 = vstv %s7239_s29  ;;  %v3487_v51 = vstv %s7241_s27  ;;  %s7397_s29 = sld [smem:[#allocation9 + $0xd6]]  ;;  %s7403_s27 = sld [smem:[#allocation9 + $0x41]] }
 0x2a9   : > { %v3407_v55 = vadd.f32 %v3406_v26, %v3370_v31  ;;  %v3411_v43 = vadd.f32 %v3410_v19, %v3374_v8  ;;  %v3415_v14 = vadd.f32 %v3414_v34, %v3378_v5  ;;  %v3438_v22 = vrot.slane %v3431_v46, %v5228_v54  ;;  %vm8319_vm11 = vmmov %vm8318_vm7 }
 0x2aa   : > { %v3494_v12 = vsel %vm8318_vm7, %v3491_v25, %v3493_v42  ;;  %v3495_v7 = vsel %vm8319_vm11, %v3493_v42, %v3491_v25  ;;  %v3475_v37 = vrot.slane %v3468_v17, %v5228_v54  ;;  %v3530_v10 = vpop.permute.xlu1 %3529  ;;  %v3528_v31 = vpop.permute.xlu0 %3527  ;;  %v3516_v42 = vstv %s7270_s1  ;;  %s7405_s1 = sld [smem:[#allocation9 + $0x8c]] }
 0x2ab   : > { %v3440_v44 = vsel %vm6254_vm10, %v3438_v22, 0.0  ;;  %v3498_v63 = vcombine.low %v3495_v7, %v3494_v12  ;;  %vm8320_vm10 = vcmp.lt.s32.totalorder %v5195_v48, 17  ;;  %v3754_v22 = vstv %s7267_s23  ;;  %8333 = sst [smem:[#allocation21_spill]] %s7388_s4  ;;  %s7449_s23 = sld [smem:[#allocation9 + $0x44]] }
 0x2ac   : > { %v3443_v2 = vmul.f32 %v3442_v41, %v3440_v44  ;;  %v3447_v57 = vmul.f32 %v3446_v60, %v3440_v44  ;;  %v3451_v0 = vmul.f32 %v3450_v49, %v3440_v44  ;;  %v3477_v47 = vsel %vm6315_vm4, %v3475_v37, 0.0  ;;  %vm8321_vm13 = vmmov %vm8320_vm10  ;;  %8334 = sst [smem:[#allocation19_spill]] %s7392_s30 }
 0x2ad   : > { %v3505_v32 = vrot.slane %v3498_v63, %v5228_v54  ;;  %v3480_v18 = vmul.f32 %v3479_v4, %v3477_v47  ;;  %v3484_v16 = vmul.f32 %v3483_v11, %v3477_v47  ;;  %v3488_v3 = vmul.f32 %v3487_v51, %v3477_v47  ;;  %8335 = sst [smem:[#allocation20_spill]] %s7395_s0 }
 0x2ae   : > { %v3444_v8 = vadd.f32 %v3443_v2, %v3407_v55  ;;  %v3448_v5 = vadd.f32 %v3447_v57, %v3411_v43  ;;  %v3452_v23 = vadd.f32 %v3451_v0, %v3415_v14  ;;  %v3531_v61 = vsel %vm8320_vm10, %v3528_v31, %v3530_v10  ;;  %v3567_v26 = vpop.permute.xlu1 %3566  ;;  %v3565_v46 = vpop.permute.xlu0 %3564  ;;  %8336 = sst [smem:[#allocation22_spill]] %s7397_s29 }
 0x2af   : > { %v3532_v15 = vsel %vm8321_vm13, %v3530_v10, %v3528_v31  ;;  %v3512_v41 = vrot.slane %v3505_v32, %v5228_v54  ;;  %vm8322_vm4 = vcmp.lt.s32.totalorder %v5195_v48, 16  ;;  %v3750_v14 = vstv %s7265_s3  ;;  %s7445_s3 = sld [smem:[#allocation9 + $0x77]] }
 0x2b0   : > { %v3481_v59 = vadd.f32 %v3480_v18, %v3444_v8  ;;  %v3485_v19 = vadd.f32 %v3484_v16, %v3448_v5  ;;  %v3489_v34 = vadd.f32 %v3488_v3, %v3452_v23  ;;  %v3535_v60 = vcombine.low %v3532_v15, %v3531_v61  ;;  %vm8323_vm12 = vmmov %vm8322_vm4  ;;  %8337 = sst [smem:[#allocation23_spill]] %s7405_s1 }
 0x2b1   : > { %v3568_v49 = vsel %vm8322_vm4, %v3565_v46, %v3567_v26  ;;  %v3569_v1 = vsel %vm8323_vm12, %v3567_v26, %v3565_v46  ;;  %v3520_v25 = vstv %s7272_s16  ;;  %v3524_v4 = vstv %s7274_s6  ;;  %s7411_s16 = sld [smem:[#allocation9 + $0xd7]]  ;;  %s7413_s6 = sld [smem:[#allocation9 + $0x42]] }
 0x2b2   : > { %v3542_v55 = vrot.slane %v3535_v60, %v5228_v54  ;;  %v3604_v43 = vpop.permute.xlu1 %3603  ;;  %v3553_v17 = vstv %s7277_s7  ;;  %v3572_v12 = vcombine.low %v3569_v1, %v3568_v49  ;;  %v3602_v7 = vpop.permute.xlu0 %3601  ;;  %v3514_v44 = vsel %vm6333_vm8, %v3512_v41, 0.0  ;;  %s7419_s7 = sld [smem:[#allocation9 + $0x8d]]  ;;  %8349 = sst [smem:[#allocation33_spill]] %s7449_s23 }
 0x2b3   : > { %vm8324_vm0 = vcmp.lt.s32.totalorder %v5195_v48, 15  ;;  %v3557_v2 = vstv %s7281_s20  ;;  %v3561_v57 = vstv %s7283_s18  ;;  %v3590_v10 = vstv %s7285_s8  ;;  %s7421_s20 = sld [smem:[#allocation9 + $0xd8]]  ;;  %s7424_s18 = sld [smem:[#allocation9 + $0x2b]] }
 0x2b4   : > { %v3549_v11 = vrot.slane %v3542_v55, %v5228_v54  ;;  %v3605_v51 = vsel %vm8324_vm0, %v3602_v7, %v3604_v43  ;;  %vm8325_vm2 = vmmov %vm8324_vm0  ;;  %v3579_v0 = vrot.slane %v3572_v12, %v5228_v54  ;;  %v3594_v32 = vstv %s7291_s19  ;;  %s7426_s8 = sld [smem:[#allocation9 + $0x76]]  ;;  %s7428_s19 = sld [smem:[#allocation9 + $0xc1]] }
 0x2b5   : > { %v3606_v63 = vsel %vm8325_vm2, %v3604_v43, %v3602_v7  ;;  %v3598_v31 = vstv %s7293_s12  ;;  %v3517_v5 = vmul.f32 %v3516_v42, %v3514_v44  ;;  %v3521_v23 = vmul.f32 %v3520_v25, %v3514_v44  ;;  %s7430_s12 = sld [smem:[#allocation9 + $0x43]] }
 0x2b6   : > { %v3609_v37 = vcombine.low %v3606_v63, %v3605_v51  ;;  %v3551_v58 = vsel %vm5264_vm5, %v3549_v11, 0.0  ;;  %v3641_v8 = vpop.permute.xlu1 %3640  ;;  %v3586_v47 = vrot.slane %v3579_v0, %v5228_v54  ;;  %v3627_v18 = vstv %s7295_s5  ;;  %v3639_v16 = vpop.permute.xlu0 %3638  ;;  %s7438_s5 = sld [smem:[#allocation9 + $0x8e]]  ;;  %s7562_s23 = sld [smem:[#allocation9 + $0x93]] }
 0x2b7   : > { %v3525_v3 = vmul.f32 %v3524_v4, %v3514_v44  ;;  %vm8326_vm8 = vcmp.lt.s32.totalorder %v5195_v48, 14  ;;  %v3554_v26 = vmul.f32 %v3553_v17, %v3551_v58  ;;  %vm8328_vm7 = vcmp.ge.s32.totalorder %v5210_v52, 1 }
 0x2b8   : > { %v3616_v61 = vrot.slane %v3609_v37, %v5228_v54  ;;  %v3642_v9 = vsel %vm8326_vm8, %v3639_v16, %v3641_v8  ;;  %vm8327_vm5 = vmmov %vm8326_vm8  ;;  %v3588_v46 = vsel %vm8328_vm7, %v3586_v47, 0.0  ;;  %v3631_v41 = vstv %s7302_s22  ;;  %8340 = sst [smem:[#allocation24_spill]] %s7419_s7  ;;  %s7440_s22 = sld [smem:[#allocation9 + $0xd9]] }
 0x2b9   : > { %v3643_v15 = vsel %vm8327_vm5, %v3641_v8, %v3639_v16  ;;  %v3635_v60 = vstv %s7304_s21  ;;  %v3558_v49 = vmul.f32 %v3557_v2, %v3551_v58  ;;  %v3562_v1 = vmul.f32 %v3561_v57, %v3551_v58  ;;  %8341 = sst [smem:[#allocation25_spill]] %s7421_s20  ;;  %s7443_s21 = sld [smem:[#allocation9 + $0x2c]] }
 0x2ba   : > { %v3623_v42 = vrot.slane %v3616_v61, %v5228_v54  ;;  %v3664_v55 = vstv %s7308_s10  ;;  %v3678_v43 = vpop.permute.xlu1 %3677  ;;  %v3518_v25 = vadd.f32 %v3517_v5, %v3481_v59  ;;  %v3591_v4 = vmul.f32 %v3590_v10, %v3588_v46  ;;  %v3676_v17 = vpop.permute.xlu0 %3675  ;;  %8342 = sst [smem:[#allocation26_spill]] %s7424_s18 }
 0x2bb   : > { %v3668_v12 = vstv %s7315_s9  ;;  %v3646_v7 = vcombine.low %v3643_v15, %v3642_v9  ;;  %v3522_v44 = vadd.f32 %v3521_v23, %v3485_v19  ;;  %v3526_v11 = vadd.f32 %v3525_v3, %v3489_v34  ;;  %8343 = sst [smem:[#allocation27_spill]] %s7426_s8  ;;  %s7447_s10 = sld [smem:[#allocation9 + $0xc2]] }
 0x2bc   : > { %v3625_v51 = vsel %vm5301_vm9, %v3623_v42, 0.0  ;;  %v3672_v63 = vstv %s7324_s11  ;;  %v3555_v2 = vadd.f32 %v3554_v26, %v3518_v25  ;;  %v3595_v57 = vmul.f32 %v3594_v32, %v3588_v46  ;;  %8344 = sst [smem:[#allocation28_spill]] %s7428_s19  ;;  %s7457_s9 = sld [smem:[#allocation9 + $0x8f]] }
 0x2bd   : > { %v3599_v0 = vmul.f32 %v3598_v31, %v3588_v46  ;;  %v3653_v59 = vrot.slane %v3646_v7, %v5228_v54  ;;  %v3559_v37 = vadd.f32 %v3558_v49, %v3522_v44  ;;  %v3563_v58 = vadd.f32 %v3562_v1, %v3526_v11  ;;  %8345 = sst [smem:[#allocation29_spill]] %s7430_s12  ;;  %s7459_s11 = sld [smem:[#allocation9 + $0xda]] }
 0x2be   : > { %vm8329_vm11 = vcmp.lt.s32.totalorder %v5195_v48, 2  ;;  %v3715_v34 = vpop.permute.xlu1 %3714  ;;  %v3592_v10 = vadd.f32 %v3591_v4, %v3555_v2  ;;  %v3628_v8 = vmul.f32 %v3627_v18, %v3625_v51  ;;  %v3632_v5 = vmul.f32 %v3631_v41, %v3625_v51  ;;  %v3713_v31 = vpop.permute.xlu0 %3712  ;;  %8346 = sst [smem:[#allocation30_spill]] %s7438_s5 }
 0x2bf   : > { %v3679_v19 = vsel %vm8329_vm11, %v3676_v17, %v3678_v43  ;;  %vm8330_vm10 = vmmov %vm8329_vm11  ;;  %v3660_v32 = vrot.slane %v3653_v59, %v5228_v54  ;;  %v3636_v23 = vmul.f32 %v3635_v60, %v3625_v51  ;;  %vm8331_vm9 = vcmp.lt.s32.totalorder %v5195_v48, 1  ;;  %8347 = sst [smem:[#allocation31_spill]] %s7440_s22 }
 0x2c0   : > { %v3680_v30 = vsel %vm8330_vm10, %v3678_v43, %v3676_v17  ;;  %v3716_v16 = vsel %vm8331_vm9, %v3713_v31, %v3715_v34  ;;  %vm8332_vm13 = vmmov %vm8331_vm9  ;;  %v3596_v61 = vadd.f32 %v3595_v57, %v3559_v37  ;;  %v3600_v9 = vadd.f32 %v3599_v0, %v3563_v58  ;;  %8348 = sst [smem:[#allocation32_spill]] %s7443_s21  ;;  %s7553_s21 = sld [smem:[#allocation9 + $0x7b]] }
 0x2c1   : > { %v3683_v47 = vcombine.low %v3680_v30, %v3679_v19  ;;  %v3717_v3 = vsel %vm8332_vm13, %v3715_v34, %v3713_v31  ;;  %v3662_v18 = vsel %vm6410_vm6, %v3660_v32, 0.0  ;;  %v3701_v1 = vstv %s7347_s2  ;;  %s7463_s2 = sld [smem:[#allocation9 + $0x2d]]  ;;  %8368 = sst [smem:[#allocation44_spill]] %s7562_s23 }
 0x2c2   : > { %v3720_v15 = vcombine.low %v3717_v3, %v3716_v16  ;;  %v3665_v26 = vmul.f32 %v3664_v55, %v3662_v18  ;;  %v3669_v46 = vmul.f32 %v3668_v12, %v3662_v18  ;;  %v3673_v41 = vmul.f32 %v3672_v63, %v3662_v18  ;;  %v7378_v49 = vpop.permute.xlu1 %3763  ;;  %v7390_v55 = vpop.permute.xlu0 %3761  ;;  %8350 = sst [smem:[#allocation34_spill]] %s7457_s9  ;;  %s7560_s9 = sld [smem:[#allocation9 + $0x48]] }
 0x2c3   : > { %v3690_v60 = vrot.slane %v3683_v47, %v5228_v54  ;;  %v3705_v42 = vstv %s7350_s26  ;;  %v3709_v43 = vstv %s7352_s17  ;;  %v3629_v25 = vadd.f32 %v3628_v8, %v3592_v10  ;;  %s7465_s26 = sld [smem:[#allocation9 + $0x78]]  ;;  %s7469_s17 = sld [smem:[#allocation9 + $0xc3]] }
 0x2c4   : > { %v3727_v38 = vrot.slane %v3720_v15, %v5228_v54  ;;  %v3633_v4 = vadd.f32 %v3632_v5, %v3596_v61  ;;  %v3637_v12 = vadd.f32 %v3636_v23, %v3600_v9  ;;  %v3738_v17 = vstv %s7357_s24  ;;  %s7471_s24 = sld [smem:[#allocation9 + $0x45]] }
 0x2c5   : > { %v3697_v7 = vrot.slane %v3690_v60, %v5228_v54  ;;  %v3742_v44 = vstv %s7360_s15  ;;  %v3746_v11 = vstv %s7362_s13  ;;  %v3666_v63 = vadd.f32 %v3665_v26, %v3629_v25  ;;  %s7475_s15 = sld [smem:[#allocation9 + $0x90]]  ;;  %s7477_s13 = sld [smem:[#allocation9 + $0xdb]] }
 0x2c6   : > { %v3734_v51 = vrot.slane %v3727_v38, %v5228_v54  ;;  %v3670_v2 = vadd.f32 %v3669_v46, %v3633_v4  ;;  %v3674_v57 = vadd.f32 %v3673_v41, %v3637_v12  ;;  %vm8338_vm6 = vcmp.ge.s32.totalorder %v6094_v36, 2  ;;  %v7409_v59 = vpop.permute.xlu1 %3800  ;;  %v7417_v34 = vpop.permute.xlu0 %3798 }
 0x2c7   : > { %v3699_v0 = vsel %vm8338_vm6, %v3697_v7, 0.0  ;;  %vm8339_vm4 = vcmp.ge.s32.totalorder %v5221_v53, 1  ;;  %v3758_v32 = vstv %s7373_s28  ;;  %v3751_v16 = vmul.f32 %v3750_v14, %v6013_v33  ;;  %8351 = sst [smem:[#allocation35_spill]] %s7463_s2  ;;  %s7483_s28 = sld [smem:[#allocation9 + $0x2e]] }
 0x2c8   : > { %v3702_v37 = vmul.f32 %v3701_v1, %v3699_v0  ;;  %v3706_v58 = vmul.f32 %v3705_v42, %v3699_v0  ;;  %v3710_v19 = vmul.f32 %v3709_v43, %v3699_v0  ;;  %v3736_v30 = vsel %vm8339_vm4, %v3734_v51, 0.0  ;;  %s7570_s2 = sld [smem:[#allocation9 + $0x31]] }
 0x2c9   : > { %v3739_v10 = vmul.f32 %v3738_v17, %v3736_v30  ;;  %v3743_v8 = vmul.f32 %v3742_v44, %v3736_v30  ;;  %v3747_v5 = vmul.f32 %v3746_v11, %v3736_v30  ;;  %v3755_v3 = vmul.f32 %v3754_v22, %v6013_v33  ;;  %8352 = sst [smem:[#allocation36_spill]] %s7465_s26  ;;  %s7568_s26 = sld [smem:[#allocation9 + $0xde]] }
 0x2ca   : > { %v3703_v31 = vadd.f32 %v3702_v37, %v3666_v63  ;;  %v3707_v23 = vadd.f32 %v3706_v58, %v3670_v2  ;;  %v3711_v47 = vadd.f32 %v3710_v19, %v3674_v57  ;;  %v3838_v61 = vpop.permute.xlu1 %3837  ;;  %v3759_v26 = vmul.f32 %v3758_v32, %v6013_v33  ;;  %v3836_v46 = vpop.permute.xlu0 %3835  ;;  %8353 = sst [smem:[#allocation37_spill]] %s7469_s17  ;;  %s7485_s17 = sld [smem:[#allocation9 + $0x79]] }
 0x2cb   : > { %8354 = sst [smem:[#allocation38_spill]] %s7471_s24  ;;  %v3787_v1 = vstv %s7380_s14  ;;  %v3791_v42 = vstv %s7382_s25  ;;  %v3795_v43 = vstv %s7388_s4  ;;  %v3824_v38 = vstv %s7392_s30  ;;  %s7509_s30 = sld [smem:[#allocation9 + $0x91]] }
 0x2cc   : > { %v3740_v9 = vadd.f32 %v3739_v10, %v3703_v31  ;;  %v3744_v18 = vadd.f32 %v3743_v8, %v3707_v23  ;;  %v3748_v15 = vadd.f32 %v3747_v5, %v3711_v47  ;;  %v3828_v25 = vstv %s7395_s0  ;;  %s7501_s0 = sld [smem:[#allocation9 + $0x46]]  ;;  %s7511_s4 = sld [smem:[#allocation9 + $0xdc]] }
 0x2cd   : > { %v3832_v4 = vstv %s7397_s29  ;;  %vm8355_vm12 = vcmp.lt.s32.totalorder %v5195_v48, 127  ;;  %v3861_v17 = vstv %s7403_s27  ;;  %v3865_v44 = vstv %s7405_s1  ;;  %s7499_s29 = sld [smem:[#allocation9 + $0xc4]]  ;;  %s7517_s1 = sld [smem:[#allocation9 + $0x2f]] }
 0x2ce   : > { %v7451_v14 = vadd.f32 %v3751_v16, %v3740_v9  ;;  %v7453_v22 = vadd.f32 %v3755_v3, %v3744_v18  ;;  %v7455_v41 = vadd.f32 %v3759_v26, %v3748_v15  ;;  %v7461_v33 = vpop.permute.xlu1 %3874  ;;  %v7467_v60 = vpop.permute.xlu0 %3872  ;;  %v3765_v12 = vsel %vm8355_vm12, %v7390_v55, %v7378_v49  ;;  %vm8356_vm0 = vmmov %vm8355_vm12  ;;  %s7576_s24 = sld [smem:[#allocation9 + $0x7c]]  ;;  %s8403_s14 = sld [smem:[#allocation32_spill]] }
 0x2cf   : > { %v3766_v7 = vsel %vm8356_vm0, %v7378_v49, %v7390_v55  ;;  %v3869_v51 = vstv %s7411_s16  ;;  %v3898_v63 = vstv %s7413_s6  ;;  %v3902_v2 = vstv %s7419_s7  ;;  %s7548_s7 = sld [smem:[#allocation9 + $0x30]]  ;;  %8369 = sst [smem:[#allocation45_spill]] %s7568_s26 }
 0x2d0   : > { %v3906_v57 = vstv %s7421_s20  ;;  %v3061_v49 = vstv %s7424_s18  ;;  %v3065_v55 = vstv %s7426_s8  ;;  %v3069_v37 = vstv %s7428_s19  ;;  %s7528_s19 = sld [smem:[#allocation9 + $0x7a]]  ;;  %s7538_s8 = sld [smem:[#allocation9 + $0x47]] }
 0x2d1   : > { %8358 = sst [smem:[#allocation40_spill]] %s7509_s30  ;;  %v3935_v58 = vstv %s7430_s12  ;;  %v3769_v19 = vcombine.low %v3765_v12, %v3766_v7  ;;  %vm8360_vm2 = vcmp.lt.s32.totalorder %v5195_v48, 126  ;;  %v3939_v8 = vstv %s7438_s5  ;;  %s7530_s12 = sld [smem:[#allocation9 + $0xc5]] }
 0x2d2   : > { %v7497_v11 = vpop.permute.xlu1 %3037  ;;  %8357 = sst [smem:[#allocation39_spill]] %s7501_s0  ;;  %v7507_v0 = vpop.permute.xlu0 %3035  ;;  %v3802_v30 = vsel %vm8360_vm2, %v7417_v34, %v7409_v59  ;;  %vm8361_vm8 = vmmov %vm8360_vm2  ;;  %vm8363_vm5 = vcmp.lt.s32.totalorder %v5195_v48, 114  ;;  %v3943_v23 = vstv %s7440_s22  ;;  %s7540_s18 = sld [smem:[#allocation9 + $0x92]]  ;;  %vm8370_vm11 = vcmp.lt.s32.totalorder %v5195_v48, 113 }
 0x2d3   : > { %8359 = sst [smem:[#allocation41_spill]] %s7511_s4  ;;  %v3803_v10 = vsel %vm8361_vm8, %v7409_v59, %v7417_v34  ;;  %v3839_v5 = vsel %vm8363_vm5, %v3836_v46, %v3838_v61  ;;  %vm8364_vm7 = vmmov %vm8363_vm5  ;;  %s8366_s5 = sld [smem:[#allocation37_spill]]  ;;  %v3876_v18 = vsel %vm8370_vm11, %v7467_v60, %v7461_v33  ;;  %vm8372_vm9 = vcmp.lt.s32.totalorder %v5195_v48, 111 }
 0x2d4   : > { %v3840_v32 = vsel %vm8364_vm7, %v3838_v61, %v3836_v46  ;;  %s7546_s20 = sld [smem:[#allocation9 + $0xdd]]  ;;  %v3806_v61 = vcombine.low %v3802_v30, %v3803_v10  ;;  %s7555_s22 = sld [smem:[#allocation9 + $0xc6]]  ;;  %v3776_v46 = vrot.slane %v3769_v19, %v5228_v54  ;;  %vm8371_vm10 = vmmov %vm8370_vm11  ;;  %vm8374_vm6 = vcmp.lt.s32.totalorder %v5195_v48, 112 }
 0x2d5   : > { %v3843_v12 = vcombine.low %v3839_v5, %v3840_v32  ;;  %v3877_v15 = vsel %vm8371_vm10, %v7461_v33, %v7467_v60  ;;  %s7588_s30 = sld [smem:[#allocation9 + $0xc7]]  ;;  %s7590_s4 = sld [smem:[#allocation9 + $0x49]]  ;;  %v3039_v33 = vsel %vm8372_vm9, %v7507_v0, %v7497_v11  ;;  %vm8373_vm13 = vmmov %vm8372_vm9  ;;  %vm8376_vm12 = vcmp.lt.s32.totalorder %v5221_v53, 15 }
 0x2d6   : > { %v3912_v31 = vpop.permute.xlu1 %3911  ;;  %v3910_v59 = vpop.permute.xlu0 %3909  ;;  %v3813_v10 = vrot.slane %v3806_v61, %v5228_v54  ;;  %v3783_v7 = vrot.slane %v3776_v46, %v5228_v54  ;;  %v3040_v60 = vsel %vm8373_vm13, %v7497_v11, %v7507_v0  ;;  %vm8375_vm4 = vmmov %vm8374_vm6  ;;  %s7611_s0 = sld [smem:[#allocation9 + $0x94]]  ;;  %v3283_v0 = vstv %s7570_s2  ;;  %s8405_s25 = sld [smem:[#allocation33_spill]] }
 0x2d7   : > { %8362 = sst [smem:[#allocation42_spill]] %s7530_s12  ;;  %v3850_v61 = vrot.slane %v3843_v12, %v5228_v54  ;;  %v3880_v12 = vcombine.low %v3876_v18, %v3877_v15  ;;  %v3913_v9 = vsel %vm8374_vm6, %v3910_v59, %v3912_v31  ;;  %v3914_v32 = vsel %vm8375_vm4, %v3912_v31, %v3910_v59  ;;  %s7613_s12 = sld [smem:[#allocation9 + $0xdf]]  ;;  %vm8384_vm5 = vmmov %vm8372_vm9 }
 0x2d8   : > { %8365 = sst [smem:[#allocation43_spill]] %s7540_s18  ;;  %v3820_v11 = vrot.slane %v3813_v10, %v5228_v54  ;;  %v3785_v46 = vsel %vm8376_vm12, %v3783_v7, 0.0  ;;  %v3043_v59 = vcombine.low %v3039_v33, %v3040_v60  ;;  %v3917_v26 = vcombine.low %v3913_v9, %v3914_v32  ;;  %vm8385_vm7 = vmmov %vm8384_vm5  ;;  %s8408_s27 = sld [smem:[#allocation34_spill]] }
 0x2d9   : > { %v3857_v31 = vrot.slane %v3850_v61, %v5228_v54  ;;  %v3887_v18 = vrot.slane %v3880_v12, %v5228_v54  ;;  %vm8378_vm0 = vcmp.lt.s32.totalorder %v5195_v48, 110  ;;  %v3287_v61 = vstv %s7576_s24  ;;  %s8420_s18 = sld [smem:[#allocation38_spill]]  ;;  %s8461_s2 = sld [smem:[#allocation45_spill]] }
 0x2da   : > { %8367 = sst [smem:[#allocation37_spill]] %s7546_s20  ;;  %v3075_v30 = vpop.permute.xlu1 %3074  ;;  %v3073_v19 = vpop.permute.xlu0 %3072  ;;  %vm8379_vm2 = vmmov %vm8378_vm0  ;;  %v3788_v33 = vmul.f32 %v3787_v1, %v3785_v46  ;;  %vm8381_vm8 = vcmp.lt.s32.totalorder %v6094_v36, 14  ;;  %v3792_v12 = vmul.f32 %v3791_v42, %v3785_v46  ;;  %v3796_v10 = vmul.f32 %v3795_v43, %v3785_v46  ;;  %s8414_s20 = sld [smem:[#allocation36_spill]] }
 0x2db   : > { %v3076_v15 = vsel %vm8378_vm0, %v3073_v19, %v3075_v30  ;;  %v3077_v53 = vsel %vm8379_vm2, %v3075_v30, %v3073_v19  ;;  %v3822_v9 = vsel %vm8381_vm8, %v3820_v11, 0.0  ;;  %v3291_v32 = vstv %s7588_s30  ;;  %vm8389_vm10 = vmmov %vm8378_vm0  ;;  %s8460_s30 = sld [smem:[#allocation44_spill]] }
 0x2dc   : > { %v3859_v30 = vsel %vm6558_vm3, %v3857_v31, 0.0  ;;  %v3050_v19 = vrot.slane %v3043_v59, %v5228_v54  ;;  %v3924_v1 = vrot.slane %v3917_v26, %v5228_v54  ;;  %v3080_v36 = vcombine.low %v3076_v15, %v3077_v53  ;;  %vm8390_vm9 = vmmov %vm8378_vm0 }
 0x2dd   : > { %v3825_v42 = vmul.f32 %v3824_v38, %v3822_v9  ;;  %v3894_v43 = vrot.slane %v3887_v18, %v5228_v54  ;;  %v4161_v56 = vstv %s7611_s0  ;;  %v4165_v16 = vstv %s7613_s12  ;;  %s8470_s0 = sld [smem:[#allocation17_spill]] }
 0x2de   : > { %v3949_v5 = vpop.permute.xlu1 %3948  ;;  %v3947_v3 = vpop.permute.xlu0 %3946  ;;  %v3789_v31 = vadd.f32 %v3788_v33, %v7451_v14  ;;  %v3829_v59 = vmul.f32 %v3828_v25, %v3822_v9  ;;  %v3833_v26 = vmul.f32 %v3832_v4, %v3822_v9  ;;  %v3862_v15 = vmul.f32 %v3861_v17, %v3859_v30 }
 0x2df   : > { %v3950_v11 = vsel %vm8384_vm5, %v3947_v3, %v3949_v5  ;;  %v3951_v60 = vsel %vm8385_vm7, %v3949_v5, %v3947_v3  ;;  %v3057_v53 = vrot.slane %v3050_v19, %v5228_v54  ;;  %vm8387_vm3 = vcmp.lt.s32.totalorder %v5195_v48, 98 }
 0x2e0   : > { %v3954_v3 = vcombine.low %v3950_v11, %v3951_v60  ;;  %vm8388_vm11 = vmmov %vm8387_vm3  ;;  %v3793_v18 = vadd.f32 %v3792_v12, %v7453_v22  ;;  %v3797_v14 = vadd.f32 %v3796_v10, %v7455_v41  ;;  %v3931_v25 = vrot.slane %v3924_v1, %v5228_v54 }
 0x2e1   : > { %v3087_v4 = vrot.slane %v3080_v36, %v5228_v54  ;;  %v3826_v33 = vadd.f32 %v3825_v42, %v3789_v31  ;;  %v3896_v9 = vsel %vm5398_vm14, %v3894_v43, 0.0  ;;  %v3870_v35 = vmul.f32 %v3869_v51, %v3859_v30  ;;  %vm8411_vm8 = vmmov %vm8387_vm3 }
 0x2e2   : > { %v3112_v34 = vpop.permute.xlu1 %3111  ;;  %v3110_v7 = vpop.permute.xlu0 %3109  ;;  %v3830_v41 = vadd.f32 %v3829_v59, %v3793_v18  ;;  %v3834_v10 = vadd.f32 %v3833_v26, %v3797_v14  ;;  %vm8396_vm14 = vnez %v8101_v40  ;;  %v3961_v36 = vrot.slane %v3954_v3, %v5228_v54  ;;  %vm8412_vm5 = vmmov %vm8387_vm3 }
 0x2e3   : > { %v3113_v38 = vsel %vm8387_vm3, %v3110_v7, %v3112_v34  ;;  %v3114_v5 = vsel %vm8388_vm11, %v3112_v34, %v3110_v7  ;;  %v3866_v7 = vmul.f32 %v3865_v44, %v3859_v30  ;;  %v3863_v19 = vadd.f32 %v3862_v15, %v3826_v33  ;;  %s8471_s12 = sshll.u32 %s8470_s0, 3 }
 0x2e4   : > { %v3117_v12 = vcombine.low %v3113_v38, %v3114_v5  ;;  %v3059_v1 = vsel %vm8396_vm14, %v3057_v53, 0.0  ;;  %vm8397_vm13 = vcmp.lt.s32.totalorder %v5210_v52, 15  ;;  %v3094_v44 = vrot.slane %v3087_v4, %v5228_v54 }
 0x2e5   : > { %v3933_v11 = vsel %vm8397_vm13, %v3931_v25, 0.0  ;;  %v3907_v31 = vmul.f32 %v3906_v57, %v3896_v9  ;;  %vm8399_vm6 = vcmp.lt.s32.totalorder %v5195_v48, 97  ;;  %v3062_v52 = vmul.f32 %v3061_v49, %v3059_v1 }
 0x2e6   : > { %v3986_v47 = vpop.permute.xlu1 %3985  ;;  %v3984_v46 = vpop.permute.xlu0 %3983  ;;  %vm8400_vm4 = vmmov %vm8399_vm6  ;;  %v3070_v26 = vmul.f32 %v3069_v37, %v3059_v1  ;;  %v3124_v15 = vrot.slane %v3117_v12, %v5228_v54  ;;  %v3871_v53 = vadd.f32 %v3870_v35, %v3834_v10  ;;  %v3936_v57 = vmul.f32 %v3935_v58, %v3933_v11 }
 0x2e7   : > { %v3987_v60 = vsel %vm8389_vm10, %v3984_v46, %v3986_v47  ;;  %v3988_v34 = vsel %vm8390_vm9, %v3986_v47, %v3984_v46  ;;  %v3899_v47 = vmul.f32 %v3898_v63, %v3896_v9  ;;  %v3903_v46 = vmul.f32 %v3902_v2, %v3896_v9  ;;  %vm8423_vm3 = vmmov %vm8400_vm4 }
 0x2e8   : > { %v3991_v42 = vcombine.low %v3987_v60, %v3988_v34  ;;  %v3066_v63 = vmul.f32 %v3065_v55, %v3059_v1  ;;  %v3867_v2 = vadd.f32 %v3866_v7, %v3830_v41  ;;  %v3968_v3 = vrot.slane %v3961_v36, %v5228_v54  ;;  %vm8424_vm11 = vmmov %vm8423_vm3 }
 0x2e9   : > { %v3900_v38 = vadd.f32 %v3899_v47, %v3863_v19  ;;  %vm8404_vm12 = vnez %v8223_v27  ;;  %v3908_v37 = vadd.f32 %v3907_v31, %v3871_v53  ;;  %v3940_v25 = vmul.f32 %v3939_v8, %v3933_v11 }
 0x2ea   : > { %v3149_v17 = vpop.permute.xlu1 %3148  ;;  %v3147_v22 = vpop.permute.xlu0 %3146  ;;  %v3096_v5 = vsel %vm8404_vm12, %v3094_v44, 0.0  ;;  %v3998_v49 = vrot.slane %v3991_v42, %v5228_v54  ;;  %v3904_v14 = vadd.f32 %v3903_v46, %v3867_v2  ;;  %v3944_v4 = vmul.f32 %v3943_v23, %v3933_v11 }
 0x2eb   : > { %v3150_v51 = vsel %vm8399_vm6, %v3147_v22, %v3149_v17  ;;  %v3151_v30 = vsel %vm8400_vm4, %v3149_v17, %v3147_v22  ;;  %v3063_v58 = vadd.f32 %v3062_v52, %v7206_v28  ;;  %v3067_v33 = vadd.f32 %v3066_v63, %v7208_v39 }
 0x2ec   : > { %v3154_v18 = vcombine.low %v3150_v51, %v3151_v30  ;;  %v3071_v9 = vadd.f32 %v3070_v26, %v7210_v20  ;;  %v3131_v60 = vrot.slane %v3124_v15, %v5228_v54  ;;  %v3937_v34 = vadd.f32 %v3936_v57, %v3900_v38 }
 0x2ed   : > { %v8406_v22 = vstv %s8403_s14  ;;  %v8407_v10 = vstv %s7445_s3  ;;  %v3970_v8 = vsel %vm8396_vm14, %v3968_v3, 0.0  ;;  %v4005_v23 = vrot.slane %v3998_v49, %v5228_v54  ;;  %s8413_s3 = sld [smem:[#allocation35_spill]] }
 0x2ee   : > { %v4023_v43 = vpop.permute.xlu1 %4022  ;;  %v4021_v59 = vpop.permute.xlu0 %4020  ;;  %v3099_v41 = vmul.f32 %v8406_v22, %v3096_v5  ;;  %v3103_v7 = vmul.f32 %v8407_v10, %v3096_v5  ;;  %v3161_v28 = vrot.slane %v3154_v18, %v5228_v54  ;;  %vm8409_vm0 = vcmp.lt.s32.totalorder %v5195_v48, 96 }
 0x2ef   : > { %vm8410_vm2 = vmmov %vm8409_vm0  ;;  %v3941_v19 = vadd.f32 %v3940_v25, %v3904_v14  ;;  %v3945_v35 = vadd.f32 %v3944_v4, %v3908_v37  ;;  %v4024_v1 = vsel %vm8411_vm8, %v4021_v59, %v4023_v43  ;;  %v4025_v40 = vsel %vm8412_vm5, %v4023_v43, %v4021_v59 }
 0x2f0   : > { %v8415_v47 = vstv %s7447_s10  ;;  %v8416_v44 = vstv %s8405_s25  ;;  %vm8417_vm7 = vnez %v8228_v21  ;;  %v3100_v51 = vadd.f32 %v3099_v41, %v3063_v58  ;;  %vm8435_vm6 = vmmov %vm8409_vm0  ;;  %s7838_s10 = sld [smem:[#allocation9 + $0x95]] }
 0x2f1   : > { %v3107_v11 = vmul.f32 %v8415_v47, %v3096_v5  ;;  %v3973_v42 = vmul.f32 %v8416_v44, %v3970_v8  ;;  %v3133_v46 = vsel %vm8417_vm7, %v3131_v60, 0.0  ;;  %v3104_v30 = vadd.f32 %v3103_v7, %v3067_v33  ;;  %vm8440_vm4 = vmmov %vm8409_vm0 }
 0x2f2   : > { %v3186_v55 = vpop.permute.xlu1 %3185  ;;  %v3184_v17 = vpop.permute.xlu0 %3183  ;;  %v8418_v52 = vstv %s8408_s27  ;;  %v8419_v26 = vstv %s7459_s11  ;;  %v4007_v43 = vsel %vm8404_vm12, %v4005_v23, 0.0  ;;  %v3168_v59 = vrot.slane %v3161_v28, %v5228_v54  ;;  %s7846_s11 = sld [smem:[#allocation9 + $0xe0]] }
 0x2f3   : > { %v3187_v39 = vsel %vm8409_vm0, %v3184_v17, %v3186_v55  ;;  %v3188_v20 = vsel %vm8410_vm2, %v3186_v55, %v3184_v17  ;;  %v3977_v63 = vmul.f32 %v8418_v52, %v3970_v8  ;;  %v3981_v15 = vmul.f32 %v8419_v26, %v3970_v8 }
 0x2f4   : > { %v3191_v31 = vcombine.low %v3187_v39, %v3188_v20  ;;  %v4028_v2 = vcombine.low %v4024_v1, %v4025_v40  ;;  %v8421_v3 = vstv %s8413_s3  ;;  %v8422_v5 = vstv %s8414_s20 }
 0x2f5   : > { %v3136_v38 = vmul.f32 %v8421_v3, %v3133_v46  ;;  %v3140_v49 = vmul.f32 %v8422_v5, %v3133_v46  ;;  %v3108_v27 = vadd.f32 %v3107_v11, %v3071_v9  ;;  %v3974_v37 = vadd.f32 %v3973_v42, %v3937_v34 }
 0x2f6   : > { %v4060_v12 = vpop.permute.xlu1 %4059  ;;  %v4058_v36 = vpop.permute.xlu0 %4057  ;;  %v3198_v53 = vrot.slane %v3191_v31, %v5228_v54  ;;  %v8425_v25 = vstv %s8366_s5  ;;  %v3978_v58 = vadd.f32 %v3977_v63, %v3941_v19  ;;  %v8426_v33 = vstv %s8420_s18  ;;  %s8437_s5 = sld [smem:[#allocation42_spill]] }
 0x2f7   : > { %v4061_v18 = vsel %vm8423_vm3, %v4058_v36, %v4060_v12  ;;  %v4062_v55 = vsel %vm8424_vm11, %v4060_v12, %v4058_v36  ;;  %v3144_v4 = vmul.f32 %v8425_v25, %v3133_v46  ;;  %v4010_v60 = vmul.f32 %v8426_v33, %v4007_v43 }
 0x2f8   : > { %v3205_v17 = vrot.slane %v3198_v53, %v5228_v54  ;;  %vm8427_vm10 = vcmp.lt.s32.totalorder %v5195_v48, 95  ;;  %vm8429_vm14 = vnez %v8235_v29  ;;  %v4035_v34 = vrot.slane %v4028_v2, %v5228_v54 }
 0x2f9   : > { %vm8428_vm9 = vmmov %vm8427_vm10  ;;  %v3170_v9 = vsel %vm8429_vm14, %v3168_v59, 0.0  ;;  %v4065_v10 = vcombine.low %v4061_v18, %v4062_v55  ;;  %v3982_v23 = vadd.f32 %v3981_v15, %v3945_v35  ;;  %v3137_v28 = vadd.f32 %v3136_v38, %v3100_v51 }
 0x2fa   : > { %v3223_v57 = vpop.permute.xlu1 %3222  ;;  %v3221_v14 = vpop.permute.xlu0 %3220  ;;  %v3141_v39 = vadd.f32 %v3140_v49, %v3104_v30  ;;  %v8430_v20 = vstv %s7475_s15  ;;  %v3145_v1 = vadd.f32 %v3144_v4, %v3108_v27  ;;  %v8431_v40 = vstv %s7477_s13  ;;  %vm8449_vm2 = vmmov %vm8428_vm9  ;;  %s8472_s13 = sld [smem:[#allocation55_spill]] }
 0x2fb   : > { %v3224_v22 = vsel %vm8427_vm10, %v3221_v14, %v3223_v57  ;;  %v3225_v41 = vsel %vm8428_vm9, %v3223_v57, %v3221_v14  ;;  %v4014_v12 = vmul.f32 %v8430_v20, %v4007_v43  ;;  %v4018_v36 = vmul.f32 %v8431_v40, %v4007_v43  ;;  %vm8450_vm8 = vmmov %vm8449_vm2 }
 0x2fc   : > { %v3228_v7 = vcombine.low %v3224_v22, %v3225_v41  ;;  %vm8432_vm13 = vcmp.lt.s32.totalorder %v6088_v6, 14  ;;  %v7775_v44 = vadd.f32 %v4010_v60, %v3974_v37  ;;  %v8433_v42 = vstv %s7483_s28 }
 0x2fd   : > { %v3207_v47 = vsel %vm8432_vm13, %v3205_v17, 0.0  ;;  %v3173_v46 = vmul.f32 %v8433_v42, %v3170_v9  ;;  %v8434_v35 = vstv %s7485_s17  ;;  %v8436_v30 = vstv %s7499_s29  ;;  %s8444_s29 = sld [smem:[#allocation39_spill]]  ;;  %vm8458_vm5 = vmmov %vm8432_vm13  ;;  %s4688_s17 = sld [smem:[#allocation10 + $0x1]] }
 0x2fe   : > { %v4097_v8 = vpop.permute.xlu1 %4096  ;;  %v4095_v19 = vpop.permute.xlu0 %4094  ;;  %v3235_v11 = vrot.slane %v3228_v7, %v5228_v54  ;;  %v3177_v31 = vmul.f32 %v8434_v35, %v3170_v9  ;;  %v3181_v52 = vmul.f32 %v8436_v30, %v3170_v9  ;;  %v4042_v63 = vrot.slane %v4035_v34, %v5228_v54 }
 0x2ff   : > { %v4098_v51 = vsel %vm8435_vm6, %v4095_v19, %v4097_v8  ;;  %v4072_v26 = vrot.slane %v4065_v10, %v5228_v54  ;;  %v7788_v59 = vadd.f32 %v4014_v12, %v3978_v58  ;;  %v8438_v2 = vstv %s7517_s1  ;;  %s8446_s1 = sld [smem:[#allocation40_spill]] }
 0x300   : > { %v3242_v15 = vrot.slane %v3235_v11, %v5228_v54  ;;  %v3210_v53 = vmul.f32 %v8438_v2, %v3207_v47  ;;  %v8439_v57 = vstv %s7528_s19  ;;  %v4099_v38 = vsel %vm8440_vm4, %v4097_v8, %v4095_v19  ;;  %s8454_s19 = sld [smem:[#allocation43_spill]]  ;;  %s409_s28 = scalar_lea.vmem %s8472_s13, %s8471_s12 }
 0x301   : > { %v3214_v3 = vmul.f32 %v8439_v57, %v3207_v47  ;;  %v4102_v18 = vcombine.low %v4098_v51, %v4099_v38  ;;  %vm8441_vm12 = vcmp.lt.s32.totalorder %v5195_v48, 94  ;;  %v3174_v27 = vadd.f32 %v3173_v46, %v3137_v28 }
 0x302   : > { %v3260_v43 = vpop.permute.xlu1 %3259  ;;  %v3258_v5 = vpop.permute.xlu0 %3257  ;;  %v3244_v49 = vsel %vm6750_vm15, %v3242_v15, 0.0  ;;  %vm8442_vm0 = vmmov %vm8441_vm12  ;;  %v3178_v37 = vadd.f32 %v3177_v31, %v3141_v39  ;;  %v8443_v25 = vstv %s8437_s5  ;;  %v3182_v58 = vadd.f32 %v3181_v52, %v3145_v1 }
 0x303   : > { %v3261_v55 = vsel %vm8441_vm12, %v3258_v5, %v3260_v43  ;;  %v3262_v14 = vsel %vm8442_vm0, %v3260_v43, %v3258_v5  ;;  %v3218_v4 = vmul.f32 %v8443_v25, %v3207_v47  ;;  %v4044_v33 = vsel %vm8417_vm7, %v4042_v63, 0.0  ;;  %vm8459_vm7 = vmmov %vm8442_vm0 }
 0x304   : > { %v3265_v17 = vcombine.low %v3261_v55, %v3262_v14  ;;  %v4079_v60 = vrot.slane %v4072_v26, %v5228_v54  ;;  %v4109_v22 = vrot.slane %v4102_v18, %v5228_v54  ;;  %v8445_v9 = vstv %s7548_s7  ;;  %s8452_s7 = sld [smem:[#allocation41_spill]]  ;;  %vm8464_vm3 = vmmov %vm8442_vm0 }
 0x305   : > { %v3247_v34 = vmul.f32 %v8445_v9, %v3244_v49  ;;  %v8447_v10 = vstv %s7553_s21  ;;  %v8448_v8 = vstv %s7555_s22  ;;  %v3211_v12 = vadd.f32 %v3210_v53, %v3174_v27  ;;  %s8455_s22 = sld [smem:[#allocation37_spill]]  ;;  %s7836_s21 = sld [smem:[#allocation9 + $0x4a]] }
 0x306   : > { %v4134_v41 = vpop.permute.xlu1 %4133  ;;  %v3251_v7 = vmul.f32 %v8447_v10, %v3244_v49  ;;  %v3255_v28 = vmul.f32 %v8448_v8, %v3244_v49  ;;  %v3272_v39 = vrot.slane %v3265_v17, %v5228_v54  ;;  %v4132_v20 = vpop.permute.xlu0 %4131  ;;  %v3215_v19 = vadd.f32 %v3214_v3, %v3178_v37 }
 0x307   : > { %v4135_v21 = vsel %vm8449_vm2, %v4132_v20, %v4134_v41  ;;  %v4136_v1 = vsel %vm8450_vm8, %v4134_v41, %v4132_v20  ;;  %v3219_v40 = vadd.f32 %v3218_v4, %v3182_v58  ;;  %v4116_v47 = vrot.slane %v4109_v22, %v5228_v54 }
 0x308   : > { %v3279_v11 = vrot.slane %v3272_v39, %v5228_v54  ;;  %v4139_v42 = vcombine.low %v4135_v21, %v4136_v1  ;;  %v4019_v46 = vadd.f32 %v4018_v36, %v3982_v23  ;;  %v8451_v35 = vstv %s8444_s29 }
 0x309   : > { %v4047_v31 = vmul.f32 %v8451_v35, %v4044_v33  ;;  %v8453_v51 = vstv %s8446_s1  ;;  %v4081_v52 = vsel %vm8429_vm14, %v4079_v60, 0.0  ;;  %v3248_v26 = vadd.f32 %v3247_v34, %v3211_v12 }
 0x30a   : > { %v4051_v30 = vmul.f32 %v8453_v51, %v4044_v33  ;;  %v4171_v63 = vpop.permute.xlu1 %4170  ;;  %v3252_v15 = vadd.f32 %v3251_v7, %v3215_v19  ;;  %v3256_v43 = vadd.f32 %v3255_v28, %v3219_v40  ;;  %v3281_v2 = vsel %vm6791_vm1, %v3279_v11, 0.0  ;;  %v4169_v53 = vpop.permute.xlu0 %4168 }
 0x30b   : > { %v3284_v57 = vmul.f32 %v3283_v0, %v3281_v2  ;;  %v3288_v23 = vmul.f32 %v3287_v61, %v3281_v2  ;;  %v3292_v36 = vmul.f32 %v3291_v32, %v3281_v2  ;;  %v4146_v3 = vrot.slane %v4139_v42, %v5228_v54 }
 0x30c   : > { %v8456_v29 = vstv %s8452_s7  ;;  %v8457_v5 = vstv %s7538_s8  ;;  %v4118_v18 = vsel %vm8458_vm5, %v4116_v47, 0.0  ;;  %v4172_v0 = vsel %vm8459_vm7, %v4169_v53, %v4171_v63  ;;  %s7870_s8 = sld [smem:[#allocation10]] }
 0x30d   : > { %v4055_v38 = vmul.f32 %v8456_v29, %v4044_v33  ;;  %v4084_v49 = vmul.f32 %v8457_v5, %v4081_v52  ;;  %v3285_v61 = vadd.f32 %v3284_v57, %v3248_v26  ;;  %v3289_v32 = vadd.f32 %v3288_v23, %v3252_v15 }
 0x30e   : > { %v3293_v55 = vadd.f32 %v3292_v36, %v3256_v43  ;;  %v4153_v14 = vrot.slane %v4146_v3, %v5228_v54  ;;  %v4048_v27 = vadd.f32 %v4047_v31, %v7775_v44  ;;  %v8462_v37 = vstv %s8454_s19 }
 0x30f   : > { %v4088_v25 = vmul.f32 %v8462_v37, %v4081_v52  ;;  %v8463_v4 = vstv %s8455_s22  ;;  %v4173_v17 = vsel %vm8464_vm3, %v4171_v63, %v4169_v53  ;;  %v3294_v58 = vadd.f32 %v3285_v61, %v6825_v62 }
 0x310   : > { %v4092_v6 = vmul.f32 %v8463_v4, %v4081_v52  ;;  %v3295_v33 = vadd.f32 %v3289_v32, %v6827_v45  ;;  %v3296_v60 = vadd.f32 %v3293_v55, %v6829_v50  ;;  %v4155_v22 = vsel %vm6750_vm15, %v4153_v14, 0.0 }
 0x311   : > { %v4052_v44 = vadd.f32 %v4051_v30, %v7788_v59  ;;  %v8465_v41 = vstv %s7560_s9  ;;  %v8466_v34 = vstv %s8460_s30  ;;  %v4176_v10 = vcombine.low %v4172_v0, %v4173_v17  ;;  %s4689_s9 = sld [smem:[#allocation10 + $0x2]] }
 0x312   : > { %v4121_v9 = vmul.f32 %v8465_v41, %v4118_v18  ;;  %v4125_v48 = vmul.f32 %v8466_v34, %v4118_v18  ;;  %v4056_v7 = vadd.f32 %v4055_v38, %v4019_v46  ;;  %v4085_v62 = vadd.f32 %v4084_v49, %v4048_v27 }
 0x313   : > { %v8467_v8 = vstv %s8461_s2  ;;  %v4089_v50 = vadd.f32 %v4088_v25, %v4052_v44  ;;  %v8468_v13 = vstv %s7590_s4  ;;  %v4162_v39 = vmul.f32 %v4161_v56, %v4155_v22  ;;  %s8469_s4 = sld [smem:[#allocation18_spill]] }
 0x314   : > { %v4129_v45 = vmul.f32 %v8467_v8, %v4118_v18  ;;  %v4158_v28 = vmul.f32 %v8468_v13, %v4155_v22  ;;  %v4183_v59 = vrot.slane %v4176_v10, %v5228_v54  ;;  %v4093_v20 = vadd.f32 %v4092_v6, %v4056_v7 }
 0x315   : > { %v4166_v12 = vmul.f32 %v4165_v16, %v4155_v22  ;;  %v4194_v19 = vstv %s7836_s21  ;;  %v4198_v21 = vstv %s7838_s10  ;;  %v4122_v1 = vadd.f32 %v4121_v9, %v4085_v62 }
 0x316   : > { %v4126_v40 = vadd.f32 %v4125_v48, %v4089_v50  ;;  %v4202_v47 = vstv %s7846_s11  ;;  %v4190_v11 = vrot.slane %v4183_v59, %v5228_v54  ;;  %v4130_v42 = vadd.f32 %v4129_v45, %v4093_v20 }
 0x317   : > { %v4159_v46 = vadd.f32 %v4158_v28, %v4122_v1  ;;  %v4209_v15 = vstv %s7870_s8  ;;  %v4213_v43 = vstv %s4688_s17  ;;  %v4217_v54 = vstv %s4689_s9 }
 0x318   : > { %v4163_v35 = vadd.f32 %v4162_v39, %v4126_v40  ;;  %v4192_v56 = vsel %vm6791_vm1, %v4190_v11, 0.0  ;;  %v4167_v31 = vadd.f32 %v4166_v12, %v4130_v42  ;;  %v8473_v18 = vlaneseq }
 0x319   : > { %v4195_v51 = vmul.f32 %v4194_v19, %v4192_v56  ;;  %v4199_v30 = vmul.f32 %v4198_v21, %v4192_v56  ;;  %v4203_v16 = vmul.f32 %v4202_v47, %v4192_v56  ;;  %v4690_v3 = vld [vmem:[%s8469_s4 + $0x1] ss:$4 sm:$0x3]  ;;  %v4692_v29 = vld [vmem:[%s8469_s4 + $0x2] ss:$4 sm:$0x3] }
 0x31a   : > { %vm4223_vm15 = vcmp.lt.s32.totalorder %v8473_v18, 256  ;;  %v4794_v0 = vld [vmem:[%s8469_s4] ss:$4 sm:$0x3] }
 0x31b   : > { %v4196_v52 = vadd.f32 %v4195_v51, %v4159_v46  ;;  %v4200_v63 = vadd.f32 %v4199_v30, %v4163_v35  ;;  %v4204_v26 = vadd.f32 %v4203_v16, %v4167_v31 }
 0x31d   : > { %v4205_v2 = vadd.f32 %v4196_v52, %v3294_v58  ;;  %v4206_v53 = vadd.f32 %v4200_v63, %v3295_v33  ;;  %v4207_v57 = vadd.f32 %v4204_v26, %v3296_v60 }
 0x31f   : > { %v4210_v23 = vadd.f32 %v4209_v15, %v4205_v2  ;;  %v4214_v24 = vadd.f32 %v4213_v43, %v4206_v53  ;;  %v4218_v36 = vadd.f32 %v4217_v54, %v4207_v57 }
 0x321   : > { %v4211_v38 = vmax.f32 %v4210_v23, 0.0  ;;  %v4215_v5 = vmax.f32 %v4214_v24, 0.0  ;;  %v4219_v49 = vmax.f32 %v4218_v36, 0.0 }
 0x323   : > { %v4220_v61 = vadd.f32 %v4794_v0, %v4211_v38  ;;  %v4227_v32 = vadd.f32 %v4690_v3, %v4215_v5  ;;  %v4231_v55 = vadd.f32 %v4692_v29, %v4219_v49 }
 0x325   : > { %4225 = vst.msk [vmem:[%s409_s28] ss:$4 sm:$0x3] %vm4223_vm15, %v4220_v61  ;;  %4691 = vst.msk [vmem:[%s409_s28 + $0x1] ss:$4 sm:$0x3] %vm4223_vm15, %v4227_v32 }
 0x326   : > { %4693 = vst.msk [vmem:[%s409_s28 + $0x2] ss:$4 sm:$0x3] %vm4223_vm15, %v4231_v55 }
 0x327 PF: > { %s8474_s23 = sld [smem:[#allocation16_spill]] }
 0x32d   : > { %s23_s30 = sadd.s32 1, %s8474_s23  }
 0x32e   : > { %p20_p11 = scmp.ge.s32.totalorder %s23_s30, 4  }
 0x330   :  { %22 = sbr.rel (!%p20_p11) target bundleno = 15 (0xf), region = 115 }
 0x337   :  { %4255 = vsyncpa [#allocation3], 1 }
 0x338   :  { %4257 = vsyncpa [#allocation3 + $0x1], 1 }
 0x339   :  { %4258 = vsyncpa [#allocation5], 1 }
 0x33a   :  { %4259 = vsyncpa [#allocation8], 1 }
 0x33b   :  { %4260 = vsyncpa [#allocation11], 1 }

</bundles_post_ra>
